<compile_context>
chip_gen: v5e
topology: v5e:2x2
jax: 0.10.0
libtpu: 0.0.40
codegen_flags: <defaults>
</compile_context>

<pallas_src>
import jax
import jax.numpy as jnp
from jax.experimental import pallas as pl
from jax.experimental.pallas import tpu as pltpu

CP = 128   # lane-padded channel width used for every conv layer
NP = 128   # lane-padded class count for the FC matmul / store


# ---------------------------------------------------------------------------
# Fused conv stack: halo-pad -> conv1+ReLU -> 2x2 maxpool -> conv2+ReLU ->
# conv3+ReLU.  One batch element per grid step; everything stays in VMEM.
# Conv weights arrive pre-padded and flattened to (9*CP, CP) so each conv is a
# single im2col matmul on the MXU (K = 9*128).
# ---------------------------------------------------------------------------
def fused_convs(x_nhwc, params):
    B, H, W, _ = x_nhwc.shape
    Hp, Wp = H // 2, W // 2

    def kernel(x_ref, w1_ref, b1_ref, w2_ref, b2_ref, w3_ref, b3_ref,
               o_ref, pad1, pad2):

        def conv3x3(pad_ref, h, w, w_ref, b_ref):
            # im2col: fold the 9 taps into the contraction dim.  Each patch is
            # exactly 128 lanes wide, so the lane-concat is just vreg tiling.
            patches = [pad_ref[kh:kh + h, kw:kw + w, :].reshape(h * w, CP)
                       for kh in range(3) for kw in range(3)]
            lhs = jnp.concatenate(patches, axis=1)              # (h*w, 9*CP)
            y = jnp.dot(lhs, w_ref[...],
                        preferred_element_type=jnp.float32)     # (h*w, CP)
            return jnp.maximum(y + b_ref[...], 0.0)             # bias + ReLU

        # ---- conv_block1: conv + ReLU + fused 2x2 maxpool ----
        pad1[...] = jnp.zeros_like(pad1)       # zero halo in VMEM (cheap, safe
        pad1[1:H + 1, 1:W + 1, :] = x_ref[0]   # per-step; scratch is per-core)
        y1 = conv3x3(pad1, H, W, w1_ref, b1_ref).reshape(H, W, CP)
        y1 = jnp.max(y1.reshape(H, Wp, 2, CP), axis=2)          # pool over W
        y1 = jnp.max(y1.reshape(Hp, 2, Wp, CP), axis=1)         # pool over H

        # ---- conv_block2 ----
        pad2[...] = jnp.zeros_like(pad2)
        pad2[1:Hp + 1, 1:Wp + 1, :] = y1
        y2 = conv3x3(pad2, Hp, Wp, w2_ref, b2_ref)

        # ---- conv_block3 (reuse pad2; its zero border is still intact) ----
        pad2[1:Hp + 1, 1:Wp + 1, :] = y2.reshape(Hp, Wp, CP)
        y3 = conv3x3(pad2, Hp, Wp, w3_ref, b3_ref)              # (Hp*Wp, CP)

        o_ref[0] = y3                                           # lane-dense store

    wspec = pl.BlockSpec((9 * CP, CP), lambda b: (0, 0))        # resident weights
    bspec = pl.BlockSpec((1, CP), lambda b: (0, 0))
    return pl.pallas_call(
        kernel,
        out_shape=jax.ShapeDtypeStruct((B, Hp * Wp, CP), jnp.float32),
        grid_spec=pltpu.PrefetchScalarGridSpec(
            num_scalar_prefetch=0,
            grid=(B,),
            in_specs=[pl.BlockSpec((1, H, W, CP), lambda b: (b, 0, 0, 0)),
                      wspec, bspec, wspec, bspec, wspec, bspec],
            out_specs=pl.BlockSpec((1, Hp * Wp, CP), lambda b: (b, 0, 0)),
            scratch_shapes=[pltpu.VMEM((H + 2, W + 2, CP), jnp.float32),
                            pltpu.VMEM((Hp + 2, Wp + 2, CP), jnp.float32)]),
        compiler_params=pltpu.CompilerParams(
            dimension_semantics=("parallel",)),   # one image per TC on v7x
    )(x_nhwc, params["w1"], params["b1"], params["w2"], params["b2"],
      params["w3"], params["b3"])


# ---------------------------------------------------------------------------
# Fully connected layer: (B, Hp*Wp*CP) @ (Hp*Wp*CP, NP) + bias, all operands
# explicitly in VMEM, lane-dense padded N (classes sliced out by the caller).
# One call for the whole batch so the 4 MB weight streams through the MXU once.
# ---------------------------------------------------------------------------
def fc_kernel(x_ref, w_ref, b_ref, o_ref):
    o_ref[...] = (jnp.dot(x_ref[...], w_ref[...],
                          preferred_element_type=jnp.float32) + b_ref[...])


def fc(x, w, b):
    B = x.shape[0]
    vmem = pl.BlockSpec(memory_space=pltpu.MemorySpace.VMEM)
    return pl.pallas_call(
        fc_kernel,
        out_shape=jax.ShapeDtypeStruct((B, NP), jnp.float32),
        in_specs=[vmem, vmem, vmem],
        out_specs=vmem,
    )(x, w, b)


# ---------------------------------------------------------------------------
# Forward pass (thin XLA glue only at the boundaries: NCHW->NHWC + channel
# zero-pad of the input, a free row-major collapse, and the final class slice).
# ---------------------------------------------------------------------------
def solveig_forward(x_nchw, params, num_classes=10):
    B, C, H, W = x_nchw.shape
    x = jnp.transpose(x_nchw, (0, 2, 3, 1))                    # NCHW -> NHWC
    x = jnp.pad(x, ((0, 0), (0, 0), (0, 0), (0, CP - C)))      # lane-pad Cin
    y3 = fused_convs(x, params)                                # (B, Hp*Wp, CP)
    feat = y3.reshape(B, y3.shape[1] * CP)                     # free collapse
    logits_p = fc(feat, params["wf"], params["bf"])            # (B, NP)
    return logits_p[:, :num_classes]


# ---------------------------------------------------------------------------
# Parameter preparation (done ONCE, outside the hot path): pad channels to 128,
# flatten conv weights to the im2col K layout, permute FC weight rows from the
# PyTorch NCHW-flatten order to the kernel's NHWC(padded) order.
# ---------------------------------------------------------------------------
def prepare_params(p, pooled_hw, num_classes):
    Hp, Wp = pooled_hw

    def pad_conv(w):
        kh, kw, cin, cout = w.shape
        wp = jnp.zeros((kh, kw, CP, CP), jnp.float32).at[:, :, :cin, :cout].set(w)
        return wp.reshape(kh * kw * CP, CP)      # K index = tap*CP + cin

    def pad_bias(b):
        return jnp.zeros((1, CP), jnp.float32).at[0, :b.shape[0]].set(b)

    c3 = p["w3"].shape[-1]
    wf = p["wf"].reshape(c3, Hp, Wp, num_classes)       # rows were (c, h, w)
    wf = jnp.transpose(wf, (1, 2, 0, 3))                # -> (h, w, c, n)
    wf_p = (jnp.zeros((Hp, Wp, CP, NP), jnp.float32)
            .at[:, :, :c3, :num_classes].set(wf)
            .reshape(Hp * Wp * CP, NP))
    bf_p = jnp.zeros((1, NP), jnp.float32).at[0, :num_classes].set(p["bf"])
    return {
        "w1": pad_conv(p["w1"]), "b1": pad_bias(p["b1"]),
        "w2": pad_conv(p["w2"]), "b2": pad_bias(p["b2"]),
        "w3": pad_conv(p["w3"]), "b3": pad_bias(p["b3"]),
        "wf": wf_p, "bf": bf_p,
    }


# ---------------------------------------------------------------------------
# Pure-JAX reference (lax conv / reduce_window) on the unpadded parameters.
# ---------------------------------------------------------------------------
def reference_forward(x_nchw, params):
    def conv(x, w, b):
        y = jax.lax.conv_general_dilated(
            x, w, window_strides=(1, 1), padding=((1, 1), (1, 1)),
            dimension_numbers=("NCHW", "HWIO", "NCHW"))
        return jax.nn.relu(y + b[None, :, None, None])

    y = conv(x_nchw, params["w1"], params["b1"])
    y = jax.lax.reduce_window(y, -jnp.inf, jax.lax.max,
                              (1, 1, 2, 2), (1, 1, 2, 2), "VALID")
    y = conv(y, params["w2"], params["b2"])
    y = conv(y, params["w3"], params["b3"])
    y = y.reshape(y.shape[0], -1)                       # NCHW flatten (c, h, w)
    return y @ params["wf"] + params["bf"]


def init_params(key, in_channels, num_classes, fc_in):
    ks = jax.random.split(key, 8)
    s = 0.05
    return {
        "w1": s * jax.random.normal(ks[0], (3, 3, in_channels, 25), jnp.float32),
        "b1": s * jax.random.normal(ks[1], (25,), jnp.float32),
        "w2": s * jax.random.normal(ks[2], (3, 3, 25, 50), jnp.float32),
        "b2": s * jax.random.normal(ks[3], (50,), jnp.float32),
        "w3": s * jax.random.normal(ks[4], (3, 3, 50, 100), jnp.float32),
        "b3": s * jax.random.normal(ks[5], (100,), jnp.float32),
        # fc weight rows indexed in channel-major (C, H, W) flatten order,
        # matching torch.flatten on NCHW.
        "wf": s * jax.random.normal(ks[6], (fc_in, num_classes), jnp.float32),
        "bf": s * jax.random.normal(ks[7], (num_classes,), jnp.float32),
    }


if __name__ == "__main__":
    B, C, H, W = 2, 4, 16, 16          # image_shape = (4, 16, 16)
    num_classes = 10
    fc_in = 100 * (H // 2) * (W // 2)  # conv3 channels * pooled spatial

    key = jax.random.PRNGKey(0)
    k_x, k_p = jax.random.split(key)
    x = jax.random.normal(k_x, (B, C, H, W), jnp.float32)
    raw_params = init_params(k_p, C, num_classes, fc_in)
    params = prepare_params(raw_params, pooled_hw=(H // 2, W // 2),
                            num_classes=num_classes)

    fwd = jax.jit(solveig_forward)
    logits = jax.block_until_ready(fwd(x, params))

    ref = reference_forward(x, raw_params)
    assert logits.shape == (B, num_classes), logits.shape
    assert jnp.allclose(logits, ref, rtol=1e-3, atol=1e-3), (
        float(jnp.max(jnp.abs(logits - ref))))

    print("KERNEL_OK")
</pallas_src>

<mosaic_0001>
module attributes {stable_mosaic.version = 11 : i64} {
  func.func @kernel(%arg0: i32, %arg1: memref<1x16x16x128xf32, #tpu.memory_space<vmem>>, %arg2: memref<1152x128xf32, #tpu.memory_space<vmem>>, %arg3: memref<1x128xf32, #tpu.memory_space<vmem>>, %arg4: memref<1152x128xf32, #tpu.memory_space<vmem>>, %arg5: memref<1x128xf32, #tpu.memory_space<vmem>>, %arg6: memref<1152x128xf32, #tpu.memory_space<vmem>>, %arg7: memref<1x128xf32, #tpu.memory_space<vmem>>, %arg8: memref<1x64x128xf32, #tpu.memory_space<vmem>>, %arg9: memref<18x18x128xf32, #tpu.memory_space<vmem>>, %arg10: memref<10x10x128xf32, #tpu.memory_space<vmem>>) attributes {dimension_semantics = [#tpu.dimension_semantics<parallel>], iteration_bounds = array<i64: 2>, scalar_prefetch = 0 : i64, scratch_operands = 2 : i64, tpu.core_type = #tpu.core_type<tc>, window_params = [{transform_indices = @transform_0, window_bounds = array<i64: 1, 16, 16, 128>}, {pipeline_mode = #tpu.pipeline_mode<synchronous>, transform_indices = @transform_1, window_bounds = array<i64: 1152, 128>}, {pipeline_mode = #tpu.pipeline_mode<synchronous>, transform_indices = @transform_2, window_bounds = array<i64: 1, 128>}, {pipeline_mode = #tpu.pipeline_mode<synchronous>, transform_indices = @transform_3, window_bounds = array<i64: 1152, 128>}, {pipeline_mode = #tpu.pipeline_mode<synchronous>, transform_indices = @transform_4, window_bounds = array<i64: 1, 128>}, {pipeline_mode = #tpu.pipeline_mode<synchronous>, transform_indices = @transform_5, window_bounds = array<i64: 1152, 128>}, {pipeline_mode = #tpu.pipeline_mode<synchronous>, transform_indices = @transform_6, window_bounds = array<i64: 1, 128>}, {transform_indices = @transform_7, window_bounds = array<i64: 1, 64, 128>}]} {
    %cst = arith.constant 0.000000e+00 : f32
    %0 = vector.broadcast %cst : f32 to vector<18x18x128xf32>
    %c0 = arith.constant 0 : index
    %c0_0 = arith.constant 0 : index
    %c0_1 = arith.constant 0 : index
    %1 = vector.load %arg9[%c0, %c0_0, %c0_1] : memref<18x18x128xf32, #tpu.memory_space<vmem>>, vector<18x18x128xf32>
    tpu.vector_store %arg9[%c0, %c0_0, %c0_1], %0 {strides = array<i32>} : memref<18x18x128xf32, #tpu.memory_space<vmem>>, vector<18x18x128xf32>,
    %c0_2 = arith.constant 0 : index
    %c0_3 = arith.constant 0 : index
    %c0_4 = arith.constant 0 : index
    %c0_5 = arith.constant 0 : index
    %2 = vector.load %arg1[%c0_2, %c0_3, %c0_4, %c0_5] : memref<1x16x16x128xf32, #tpu.memory_space<vmem>>, vector<1x16x16x128xf32>
    %3 = vector.shape_cast %2 : vector<1x16x16x128xf32> to vector<16x16x128xf32>
    %c1 = arith.constant 1 : index
    %c1_6 = arith.constant 1 : index
    %c0_7 = arith.constant 0 : index
    %4 = vector.load %arg9[%c1, %c1_6, %c0_7] : memref<18x18x128xf32, #tpu.memory_space<vmem>>, vector<16x16x128xf32>
    tpu.vector_store %arg9[%c1, %c1_6, %c0_7], %3 {strides = array<i32>} : memref<18x18x128xf32, #tpu.memory_space<vmem>>, vector<16x16x128xf32>,
    %c0_8 = arith.constant 0 : index
    %c0_9 = arith.constant 0 : index
    %c0_10 = arith.constant 0 : index
    %5 = vector.load %arg9[%c0_8, %c0_9, %c0_10] : memref<18x18x128xf32, #tpu.memory_space<vmem>>, vector<16x16x128xf32>
    %6 = vector.shape_cast %5 : vector<16x16x128xf32> to vector<256x128xf32>
    %c0_11 = arith.constant 0 : index
    %c1_12 = arith.constant 1 : index
    %c0_13 = arith.constant 0 : index
    %7 = vector.load %arg9[%c0_11, %c1_12, %c0_13] : memref<18x18x128xf32, #tpu.memory_space<vmem>>, vector<16x16x128xf32>
    %8 = vector.shape_cast %7 : vector<16x16x128xf32> to vector<256x128xf32>
    %c0_14 = arith.constant 0 : index
    %c2 = arith.constant 2 : index
    %c0_15 = arith.constant 0 : index
    %9 = vector.load %arg9[%c0_14, %c2, %c0_15] : memref<18x18x128xf32, #tpu.memory_space<vmem>>, vector<16x16x128xf32>
    %10 = vector.shape_cast %9 : vector<16x16x128xf32> to vector<256x128xf32>
    %c1_16 = arith.constant 1 : index
    %c0_17 = arith.constant 0 : index
    %c0_18 = arith.constant 0 : index
    %11 = vector.load %arg9[%c1_16, %c0_17, %c0_18] : memref<18x18x128xf32, #tpu.memory_space<vmem>>, vector<16x16x128xf32>
    %12 = vector.shape_cast %11 : vector<16x16x128xf32> to vector<256x128xf32>
    %c1_19 = arith.constant 1 : index
    %c1_20 = arith.constant 1 : index
    %c0_21 = arith.constant 0 : index
    %13 = vector.load %arg9[%c1_19, %c1_20, %c0_21] : memref<18x18x128xf32, #tpu.memory_space<vmem>>, vector<16x16x128xf32>
    %14 = vector.shape_cast %13 : vector<16x16x128xf32> to vector<256x128xf32>
    %c1_22 = arith.constant 1 : index
    %c2_23 = arith.constant 2 : index
    %c0_24 = arith.constant 0 : index
    %15 = vector.load %arg9[%c1_22, %c2_23, %c0_24] : memref<18x18x128xf32, #tpu.memory_space<vmem>>, vector<16x16x128xf32>
    %16 = vector.shape_cast %15 : vector<16x16x128xf32> to vector<256x128xf32>
    %c2_25 = arith.constant 2 : index
    %c0_26 = arith.constant 0 : index
    %c0_27 = arith.constant 0 : index
    %17 = vector.load %arg9[%c2_25, %c0_26, %c0_27] : memref<18x18x128xf32, #tpu.memory_space<vmem>>, vector<16x16x128xf32>
    %18 = vector.shape_cast %17 : vector<16x16x128xf32> to vector<256x128xf32>
    %c2_28 = arith.constant 2 : index
    %c1_29 = arith.constant 1 : index
    %c0_30 = arith.constant 0 : index
    %19 = vector.load %arg9[%c2_28, %c1_29, %c0_30] : memref<18x18x128xf32, #tpu.memory_space<vmem>>, vector<16x16x128xf32>
    %20 = vector.shape_cast %19 : vector<16x16x128xf32> to vector<256x128xf32>
    %c2_31 = arith.constant 2 : index
    %c2_32 = arith.constant 2 : index
    %c0_33 = arith.constant 0 : index
    %21 = vector.load %arg9[%c2_31, %c2_32, %c0_33] : memref<18x18x128xf32, #tpu.memory_space<vmem>>, vector<16x16x128xf32>
    %22 = vector.shape_cast %21 : vector<16x16x128xf32> to vector<256x128xf32>
    %23 = tpu.concatenate %6, %8, %10, %12, %14, %16, %18, %20, %22 in 1 : vector<256x128xf32>, vector<256x128xf32>, vector<256x128xf32>, vector<256x128xf32>, vector<256x128xf32>, vector<256x128xf32>, vector<256x128xf32>, vector<256x128xf32>, vector<256x128xf32> -> vector<256x1152xf32>
    %c0_34 = arith.constant 0 : index
    %c0_35 = arith.constant 0 : index
    %24 = vector.load %arg2[%c0_34, %c0_35] : memref<1152x128xf32, #tpu.memory_space<vmem>>, vector<1152x128xf32>
    %cst_36 = arith.constant dense<0.000000e+00> : vector<256x128xf32>
    %25 = tpu.matmul %23, %24, %cst_36 {dimension_numbers = #tpu.dot_dimension_numbers<[1], [0], [0], [1], [0, 0, 1, 1], [], []>} : vector<256x1152xf32>, vector<1152x128xf32>, vector<256x128xf32> -> vector<256x128xf32>
    %c0_37 = arith.constant 0 : index
    %c0_38 = arith.constant 0 : index
    %26 = vector.load %arg3[%c0_37, %c0_38] : memref<1x128xf32, #tpu.memory_space<vmem>>, vector<1x128xf32>
    %27 = vector.broadcast %26 : vector<1x128xf32> to vector<256x128xf32>
    %28 = arith.addf %25, %27 : vector<256x128xf32>
    %cst_39 = arith.constant 0.000000e+00 : f32
    %29 = vector.broadcast %cst_39 : f32 to vector<256x128xf32>
    %30 = arith.maximumf %28, %29 : vector<256x128xf32>
    %31 = vector.shape_cast %30 : vector<256x128xf32> to vector<16x16x128xf32>
    %32 = vector.shape_cast %31 : vector<16x16x128xf32> to vector<16x8x2x128xf32>
    %cst_40 = arith.constant dense<0xFF800000> : vector<16x8x128xf32>
    %33 = vector.multi_reduction <maximumf>, %32, %cst_40 [2] : vector<16x8x2x128xf32> to vector<16x8x128xf32>
    %34 = vector.shape_cast %33 : vector<16x8x128xf32> to vector<8x2x8x128xf32>
    %cst_41 = arith.constant dense<0xFF800000> : vector<8x8x128xf32>
    %35 = vector.multi_reduction <maximumf>, %34, %cst_41 [1] : vector<8x2x8x128xf32> to vector<8x8x128xf32>
    %cst_42 = arith.constant 0.000000e+00 : f32
    %36 = vector.broadcast %cst_42 : f32 to vector<10x10x128xf32>
    %c0_43 = arith.constant 0 : index
    %c0_44 = arith.constant 0 : index
    %c0_45 = arith.constant 0 : index
    %37 = vector.load %arg10[%c0_43, %c0_44, %c0_45] : memref<10x10x128xf32, #tpu.memory_space<vmem>>, vector<10x10x128xf32>
    tpu.vector_store %arg10[%c0_43, %c0_44, %c0_45], %36 {strides = array<i32>} : memref<10x10x128xf32, #tpu.memory_space<vmem>>, vector<10x10x128xf32>,
    %c1_46 = arith.constant 1 : index
    %c1_47 = arith.constant 1 : index
    %c0_48 = arith.constant 0 : index
    %38 = vector.load %arg10[%c1_46, %c1_47, %c0_48] : memref<10x10x128xf32, #tpu.memory_space<vmem>>, vector<8x8x128xf32>
    tpu.vector_store %arg10[%c1_46, %c1_47, %c0_48], %35 {strides = array<i32>} : memref<10x10x128xf32, #tpu.memory_space<vmem>>, vector<8x8x128xf32>,
    %c0_49 = arith.constant 0 : index
    %c0_50 = arith.constant 0 : index
    %c0_51 = arith.constant 0 : index
    %39 = vector.load %arg10[%c0_49, %c0_50, %c0_51] : memref<10x10x128xf32, #tpu.memory_space<vmem>>, vector<8x8x128xf32>
    %40 = vector.shape_cast %39 : vector<8x8x128xf32> to vector<64x128xf32>
    %c0_52 = arith.constant 0 : index
    %c1_53 = arith.constant 1 : index
    %c0_54 = arith.constant 0 : index
    %41 = vector.load %arg10[%c0_52, %c1_53, %c0_54] : memref<10x10x128xf32, #tpu.memory_space<vmem>>, vector<8x8x128xf32>
    %42 = vector.shape_cast %41 : vector<8x8x128xf32> to vector<64x128xf32>
    %c0_55 = arith.constant 0 : index
    %c2_56 = arith.constant 2 : index
    %c0_57 = arith.constant 0 : index
    %43 = vector.load %arg10[%c0_55, %c2_56, %c0_57] : memref<10x10x128xf32, #tpu.memory_space<vmem>>, vector<8x8x128xf32>
    %44 = vector.shape_cast %43 : vector<8x8x128xf32> to vector<64x128xf32>
    %c1_58 = arith.constant 1 : index
    %c0_59 = arith.constant 0 : index
    %c0_60 = arith.constant 0 : index
    %45 = vector.load %arg10[%c1_58, %c0_59, %c0_60] : memref<10x10x128xf32, #tpu.memory_space<vmem>>, vector<8x8x128xf32>
    %46 = vector.shape_cast %45 : vector<8x8x128xf32> to vector<64x128xf32>
    %c1_61 = arith.constant 1 : index
    %c1_62 = arith.constant 1 : index
    %c0_63 = arith.constant 0 : index
    %47 = vector.load %arg10[%c1_61, %c1_62, %c0_63] : memref<10x10x128xf32, #tpu.memory_space<vmem>>, vector<8x8x128xf32>
    %48 = vector.shape_cast %47 : vector<8x8x128xf32> to vector<64x128xf32>
    %c1_64 = arith.constant 1 : index
    %c2_65 = arith.constant 2 : index
    %c0_66 = arith.constant 0 : index
    %49 = vector.load %arg10[%c1_64, %c2_65, %c0_66] : memref<10x10x128xf32, #tpu.memory_space<vmem>>, vector<8x8x128xf32>
    %50 = vector.shape_cast %49 : vector<8x8x128xf32> to vector<64x128xf32>
    %c2_67 = arith.constant 2 : index
    %c0_68 = arith.constant 0 : index
    %c0_69 = arith.constant 0 : index
    %51 = vector.load %arg10[%c2_67, %c0_68, %c0_69] : memref<10x10x128xf32, #tpu.memory_space<vmem>>, vector<8x8x128xf32>
    %52 = vector.shape_cast %51 : vector<8x8x128xf32> to vector<64x128xf32>
    %c2_70 = arith.constant 2 : index
    %c1_71 = arith.constant 1 : index
    %c0_72 = arith.constant 0 : index
    %53 = vector.load %arg10[%c2_70, %c1_71, %c0_72] : memref<10x10x128xf32, #tpu.memory_space<vmem>>, vector<8x8x128xf32>
    %54 = vector.shape_cast %53 : vector<8x8x128xf32> to vector<64x128xf32>
    %c2_73 = arith.constant 2 : index
    %c2_74 = arith.constant 2 : index
    %c0_75 = arith.constant 0 : index
    %55 = vector.load %arg10[%c2_73, %c2_74, %c0_75] : memref<10x10x128xf32, #tpu.memory_space<vmem>>, vector<8x8x128xf32>
    %56 = vector.shape_cast %55 : vector<8x8x128xf32> to vector<64x128xf32>
    %57 = tpu.concatenate %40, %42, %44, %46, %48, %50, %52, %54, %56 in 1 : vector<64x128xf32>, vector<64x128xf32>, vector<64x128xf32>, vector<64x128xf32>, vector<64x128xf32>, vector<64x128xf32>, vector<64x128xf32>, vector<64x128xf32>, vector<64x128xf32> -> vector<64x1152xf32>
    %c0_76 = arith.constant 0 : index
    %c0_77 = arith.constant 0 : index
    %58 = vector.load %arg4[%c0_76, %c0_77] : memref<1152x128xf32, #tpu.memory_space<vmem>>, vector<1152x128xf32>
    %cst_78 = arith.constant dense<0.000000e+00> : vector<64x128xf32>
    %59 = tpu.matmul %57, %58, %cst_78 {dimension_numbers = #tpu.dot_dimension_numbers<[1], [0], [0], [1], [0, 0, 1, 1], [], []>} : vector<64x1152xf32>, vector<1152x128xf32>, vector<64x128xf32> -> vector<64x128xf32>
    %c0_79 = arith.constant 0 : index
    %c0_80 = arith.constant 0 : index
    %60 = vector.load %arg5[%c0_79, %c0_80] : memref<1x128xf32, #tpu.memory_space<vmem>>, vector<1x128xf32>
    %61 = vector.broadcast %60 : vector<1x128xf32> to vector<64x128xf32>
    %62 = arith.addf %59, %61 : vector<64x128xf32>
    %cst_81 = arith.constant 0.000000e+00 : f32
    %63 = vector.broadcast %cst_81 : f32 to vector<64x128xf32>
    %64 = arith.maximumf %62, %63 : vector<64x128xf32>
    %65 = vector.shape_cast %64 : vector<64x128xf32> to vector<8x8x128xf32>
    %c1_82 = arith.constant 1 : index
    %c1_83 = arith.constant 1 : index
    %c0_84 = arith.constant 0 : index
    %66 = vector.load %arg10[%c1_82, %c1_83, %c0_84] : memref<10x10x128xf32, #tpu.memory_space<vmem>>, vector<8x8x128xf32>
    tpu.vector_store %arg10[%c1_82, %c1_83, %c0_84], %65 {strides = array<i32>} : memref<10x10x128xf32, #tpu.memory_space<vmem>>, vector<8x8x128xf32>,
    %c0_85 = arith.constant 0 : index
    %c0_86 = arith.constant 0 : index
    %c0_87 = arith.constant 0 : index
    %67 = vector.load %arg10[%c0_85, %c0_86, %c0_87] : memref<10x10x128xf32, #tpu.memory_space<vmem>>, vector<8x8x128xf32>
    %68 = vector.shape_cast %67 : vector<8x8x128xf32> to vector<64x128xf32>
    %c0_88 = arith.constant 0 : index
    %c1_89 = arith.constant 1 : index
    %c0_90 = arith.constant 0 : index
    %69 = vector.load %arg10[%c0_88, %c1_89, %c0_90] : memref<10x10x128xf32, #tpu.memory_space<vmem>>, vector<8x8x128xf32>
    %70 = vector.shape_cast %69 : vector<8x8x128xf32> to vector<64x128xf32>
    %c0_91 = arith.constant 0 : index
    %c2_92 = arith.constant 2 : index
    %c0_93 = arith.constant 0 : index
    %71 = vector.load %arg10[%c0_91, %c2_92, %c0_93] : memref<10x10x128xf32, #tpu.memory_space<vmem>>, vector<8x8x128xf32>
    %72 = vector.shape_cast %71 : vector<8x8x128xf32> to vector<64x128xf32>
    %c1_94 = arith.constant 1 : index
    %c0_95 = arith.constant 0 : index
    %c0_96 = arith.constant 0 : index
    %73 = vector.load %arg10[%c1_94, %c0_95, %c0_96] : memref<10x10x128xf32, #tpu.memory_space<vmem>>, vector<8x8x128xf32>
    %74 = vector.shape_cast %73 : vector<8x8x128xf32> to vector<64x128xf32>
    %c1_97 = arith.constant 1 : index
    %c1_98 = arith.constant 1 : index
    %c0_99 = arith.constant 0 : index
    %75 = vector.load %arg10[%c1_97, %c1_98, %c0_99] : memref<10x10x128xf32, #tpu.memory_space<vmem>>, vector<8x8x128xf32>
    %76 = vector.shape_cast %75 : vector<8x8x128xf32> to vector<64x128xf32>
    %c1_100 = arith.constant 1 : index
    %c2_101 = arith.constant 2 : index
    %c0_102 = arith.constant 0 : index
    %77 = vector.load %arg10[%c1_100, %c2_101, %c0_102] : memref<10x10x128xf32, #tpu.memory_space<vmem>>, vector<8x8x128xf32>
    %78 = vector.shape_cast %77 : vector<8x8x128xf32> to vector<64x128xf32>
    %c2_103 = arith.constant 2 : index
    %c0_104 = arith.constant 0 : index
    %c0_105 = arith.constant 0 : index
    %79 = vector.load %arg10[%c2_103, %c0_104, %c0_105] : memref<10x10x128xf32, #tpu.memory_space<vmem>>, vector<8x8x128xf32>
    %80 = vector.shape_cast %79 : vector<8x8x128xf32> to vector<64x128xf32>
    %c2_106 = arith.constant 2 : index
    %c1_107 = arith.constant 1 : index
    %c0_108 = arith.constant 0 : index
    %81 = vector.load %arg10[%c2_106, %c1_107, %c0_108] : memref<10x10x128xf32, #tpu.memory_space<vmem>>, vector<8x8x128xf32>
    %82 = vector.shape_cast %81 : vector<8x8x128xf32> to vector<64x128xf32>
    %c2_109 = arith.constant 2 : index
    %c2_110 = arith.constant 2 : index
    %c0_111 = arith.constant 0 : index
    %83 = vector.load %arg10[%c2_109, %c2_110, %c0_111] : memref<10x10x128xf32, #tpu.memory_space<vmem>>, vector<8x8x128xf32>
    %84 = vector.shape_cast %83 : vector<8x8x128xf32> to vector<64x128xf32>
    %85 = tpu.concatenate %68, %70, %72, %74, %76, %78, %80, %82, %84 in 1 : vector<64x128xf32>, vector<64x128xf32>, vector<64x128xf32>, vector<64x128xf32>, vector<64x128xf32>, vector<64x128xf32>, vector<64x128xf32>, vector<64x128xf32>, vector<64x128xf32> -> vector<64x1152xf32>
    %c0_112 = arith.constant 0 : index
    %c0_113 = arith.constant 0 : index
    %86 = vector.load %arg6[%c0_112, %c0_113] : memref<1152x128xf32, #tpu.memory_space<vmem>>, vector<1152x128xf32>
    %cst_114 = arith.constant dense<0.000000e+00> : vector<64x128xf32>
    %87 = tpu.matmul %85, %86, %cst_114 {dimension_numbers = #tpu.dot_dimension_numbers<[1], [0], [0], [1], [0, 0, 1, 1], [], []>} : vector<64x1152xf32>, vector<1152x128xf32>, vector<64x128xf32> -> vector<64x128xf32>
    %c0_115 = arith.constant 0 : index
    %c0_116 = arith.constant 0 : index
    %88 = vector.load %arg7[%c0_115, %c0_116] : memref<1x128xf32, #tpu.memory_space<vmem>>, vector<1x128xf32>
    %89 = vector.broadcast %88 : vector<1x128xf32> to vector<64x128xf32>
    %90 = arith.addf %87, %89 : vector<64x128xf32>
    %cst_117 = arith.constant 0.000000e+00 : f32
    %91 = vector.broadcast %cst_117 : f32 to vector<64x128xf32>
    %92 = arith.maximumf %90, %91 : vector<64x128xf32>
    %c0_118 = arith.constant 0 : index
    %c0_119 = arith.constant 0 : index
    %c0_120 = arith.constant 0 : index
    %93 = vector.load %arg8[%c0_118, %c0_119, %c0_120] : memref<1x64x128xf32, #tpu.memory_space<vmem>>, vector<1x64x128xf32>
    %94 = vector.shape_cast %93 : vector<1x64x128xf32> to vector<64x128xf32>
    %95 = vector.shape_cast %92 : vector<64x128xf32> to vector<1x64x128xf32>
    tpu.vector_store %arg8[%c0_118, %c0_119, %c0_120], %95 {strides = array<i32>} : memref<1x64x128xf32, #tpu.memory_space<vmem>>, vector<1x64x128xf32>,
    return
  }
  func.func @transform_0(%arg0: i32) -> (i32, i32, i32, i32) {
    %c0_i32 = arith.constant 0 : i32
    %c0_i32_0 = arith.constant 0 : i32
    %c0_i32_1 = arith.constant 0 : i32
    %c0_i32_2 = arith.constant 0 : i32
    return %arg0, %c0_i32, %c0_i32_0, %c0_i32_1 : i32, i32, i32, i32
  }
  func.func @transform_1(%arg0: i32) -> (i32, i32) {
    %c0_i32 = arith.constant 0 : i32
    %c0_i32_0 = arith.constant 0 : i32
    %c0_i32_1 = arith.constant 0 : i32
    return %c0_i32, %c0_i32_0 : i32, i32
  }
  func.func @transform_2(%arg0: i32) -> (i32, i32) {
    %c0_i32 = arith.constant 0 : i32
    %c0_i32_0 = arith.constant 0 : i32
    %c0_i32_1 = arith.constant 0 : i32
    return %c0_i32, %c0_i32_0 : i32, i32
  }
  func.func @transform_3(%arg0: i32) -> (i32, i32) {
    %c0_i32 = arith.constant 0 : i32
    %c0_i32_0 = arith.constant 0 : i32
    %c0_i32_1 = arith.constant 0 : i32
    return %c0_i32, %c0_i32_0 : i32, i32
  }
  func.func @transform_4(%arg0: i32) -> (i32, i32) {
    %c0_i32 = arith.constant 0 : i32
    %c0_i32_0 = arith.constant 0 : i32
    %c0_i32_1 = arith.constant 0 : i32
    return %c0_i32, %c0_i32_0 : i32, i32
  }
  func.func @transform_5(%arg0: i32) -> (i32, i32) {
    %c0_i32 = arith.constant 0 : i32
    %c0_i32_0 = arith.constant 0 : i32
    %c0_i32_1 = arith.constant 0 : i32
    return %c0_i32, %c0_i32_0 : i32, i32
  }
  func.func @transform_6(%arg0: i32) -> (i32, i32) {
    %c0_i32 = arith.constant 0 : i32
    %c0_i32_0 = arith.constant 0 : i32
    %c0_i32_1 = arith.constant 0 : i32
    return %c0_i32, %c0_i32_0 : i32, i32
  }
  func.func @transform_7(%arg0: i32) -> (i32, i32, i32) {
    %c0_i32 = arith.constant 0 : i32
    %c0_i32_0 = arith.constant 0 : i32
    %c0_i32_1 = arith.constant 0 : i32
    return %arg0, %c0_i32, %c0_i32_0 : i32, i32, i32
  }
}

module attributes {stable_mosaic.version = 11 : i64} {
  func.func @fc_kernel(%arg0: memref<2x8192xf32, #tpu.memory_space<vmem>>, %arg1: memref<8192x128xf32, #tpu.memory_space<vmem>>, %arg2: memref<1x128xf32, #tpu.memory_space<vmem>>, %arg3: memref<2x128xf32, #tpu.memory_space<vmem>>) attributes {dimension_semantics = [], scalar_prefetch = 0 : i64, scratch_operands = 0 : i64, tpu.core_type = #tpu.core_type<tc>} {
    %c0 = arith.constant 0 : index
    %c0_0 = arith.constant 0 : index
    %0 = vector.load %arg0[%c0, %c0_0] : memref<2x8192xf32, #tpu.memory_space<vmem>>, vector<2x8192xf32>
    %c0_1 = arith.constant 0 : index
    %c0_2 = arith.constant 0 : index
    %1 = vector.load %arg1[%c0_1, %c0_2] : memref<8192x128xf32, #tpu.memory_space<vmem>>, vector<8192x128xf32>
    %cst = arith.constant dense<0.000000e+00> : vector<2x128xf32>
    %2 = tpu.matmul %0, %1, %cst {dimension_numbers = #tpu.dot_dimension_numbers<[1], [0], [0], [1], [0, 0, 1, 1], [], []>} : vector<2x8192xf32>, vector<8192x128xf32>, vector<2x128xf32> -> vector<2x128xf32>
    %c0_3 = arith.constant 0 : index
    %c0_4 = arith.constant 0 : index
    %3 = vector.load %arg2[%c0_3, %c0_4] : memref<1x128xf32, #tpu.memory_space<vmem>>, vector<1x128xf32>
    %4 = vector.broadcast %3 : vector<1x128xf32> to vector<2x128xf32>
    %5 = arith.addf %2, %4 : vector<2x128xf32>
    %c0_5 = arith.constant 0 : index
    %c0_6 = arith.constant 0 : index
    %6 = vector.load %arg3[%c0_5, %c0_6] : memref<2x128xf32, #tpu.memory_space<vmem>>, vector<2x128xf32>
    tpu.vector_store %arg3[%c0_5, %c0_6], %5 {strides = array<i32>} : memref<2x128xf32, #tpu.memory_space<vmem>>, vector<2x128xf32>,
    return
  }
}

</mosaic_0001>

<bundles_post_ra>
// kernel: solveig_forward.3
= control target key start
LH: loop header
LB: loop body
LE: loop exit
PB: predicated region body
PF: predicated region fallthrough
CT: control target
= control target key end

     0   :  { %8 = vsyncpa [#allocation3], 0  ;;  %s2733_s0 = inlined_call_operand.vmem [shape: f32[2,8192], index: 0, kind: input, shape index: {}]   ;;  %s2734_s1 = inlined_call_operand.hbm [shape: f32[8192,128], index: 1, kind: input, shape index: {}]   ;;  %s2735_s2 = inlined_call_operand.hbm [shape: f32[1,128], index: 2, kind: input, shape index: {}]   ;;  %s2736_s3 = inlined_call_operand.hbm [shape: f32[2,128], index: 3, kind: output, shape index: {}]  }
   0x1   :  { %9 = vsyncpa [#allocation6], 0 }
   0x2   :  { %10 = vsyncpa [#allocation4], 0  ;;  %s17_s14 = sshll.u32 %s2734_s1, 4  ;;  %s2633_s15 = smov [#allocation2]   ;;  %s18_s14 = int_to_ptr.hbm [resolvable:$true] %s17_s14 }
   0x3   :  { %s19_s16 = sshll.u32 %s2633_s15, 4  ;;  %s31_s19 = sshll.u32 %s2735_s2, 4  ;;  %s20_s16 = int_to_ptr.vmem [resolvable:$true] %s19_s16  ;;  %s32_s19 = int_to_ptr.hbm [resolvable:$true] %s31_s19 }
   0x4   :  { %s2634_s20 = smov 128   ;;  %s2635_s21 = smov 8  }
   0x5   :  { %25 = dma.hbm_to_vmem [thread:$0]  %s18_s14, 131072, %s20_s16, [#allocation3], %s2634_s20, %s2634_s20, %s2635_s21  }
   0x6   :  { %s2636_s22 = smov [#allocation5]  }
   0x7   :  { %s33_s23 = sshll.u32 %s2636_s22, 4  ;;  %s34_s23 = int_to_ptr.vmem [resolvable:$true] %s33_s23 }
   0x8   :  { %36 = dma.hbm_to_vmem [thread:$0]  %s32_s19, 16, %s34_s23, [#allocation6]  }
   0x9   :  { %2627 = dma.done.wait [#allocation3], 131072  }
   0xa   :  { %2628 = vsyncadd [#allocation3], 4294836224 }
   0xb   :  { %2629 = dma.done.wait [#allocation6], 16  }
   0xc   :  { %2630 = vsyncadd [#allocation6], 4294967280  ;;  %v76_v0 = vld [vmem:[#allocation2 + $0x78] sm:$0xff]  ;;  %v75_v2 = vld [vmem:[#allocation2 + $0x70] sm:$0xff]  ;;  %s2538_s28 = sshll.u32 %s2736_s3, 4  ;;  %s2539_s28 = int_to_ptr.hbm [resolvable:$true] %s2538_s28 }
   0xd   :  { %v108_v1 = vld [vmem:[#allocation2 + $0x178] sm:$0xff]  ;;  %1250 = vmatpush.msra.mxu0 %v76_v0  ;;  %v107_v4 = vld [vmem:[#allocation2 + $0x170] sm:$0xff]  ;;  %v74_v6 = vld [vmem:[#allocation2 + $0x68] sm:$0xff] }
   0xe   :  { %1290 = vmatpush.msra.mxu2 %v108_v1  ;;  %v92_v3 = vld [vmem:[#allocation2 + $0xf8] sm:$0xff]  ;;  %v91_v7 = vld [vmem:[#allocation2 + $0xf0] sm:$0xff]  ;;  %v106_v8 = vld [vmem:[#allocation2 + $0x168] sm:$0xff] }
   0xf   :  { %v124_v5 = vld [vmem:[#allocation2 + $0x1f8] sm:$0xff]  ;;  %1270 = vmatpush.msra.mxu1 %v92_v3  ;;  %1251 = vmatpush.msra.mxu0 %v75_v2  ;;  %v123_v9 = vld [vmem:[#allocation2 + $0x1f0] sm:$0xff]  ;;  %v90_v10 = vld [vmem:[#allocation2 + $0xe8] sm:$0xff] }
  0x10   :  { %1310 = vmatpush.msra.mxu3 %v124_v5  ;;  %1291 = vmatpush.msra.mxu2 %v107_v4  ;;  %v73_v11 = vld [vmem:[#allocation2 + $0x60] sm:$0xff]  ;;  %v122_v13 = vld [vmem:[#allocation2 + $0x1e8] sm:$0xff]  ;;  %v72_v16 = vld [vmem:[#allocation2 + $0x58] sm:$0xff] }
  0x11   :  { %1271 = vmatpush.msra.mxu1 %v91_v7  ;;  %v105_v12 = vld [vmem:[#allocation2 + $0x160] sm:$0xff]  ;;  %1252 = vmatpush.msra.mxu0 %v74_v6  ;;  %v104_v17 = vld [vmem:[#allocation2 + $0x158] sm:$0xff]  ;;  %v71_v20 = vld [vmem:[#allocation2 + $0x50] sm:$0xff] }
  0x12   :  { %1311 = vmatpush.msra.mxu3 %v123_v9  ;;  %1292 = vmatpush.msra.mxu2 %v106_v8  ;;  %v89_v14 = vld [vmem:[#allocation2 + $0xe0] sm:$0xff]  ;;  %v88_v18 = vld [vmem:[#allocation2 + $0xd8] sm:$0xff]  ;;  %v103_v21 = vld [vmem:[#allocation2 + $0x150] sm:$0xff] }
  0x13   :  { %v121_v15 = vld [vmem:[#allocation2 + $0x1e0] sm:$0xff]  ;;  %1272 = vmatpush.msra.mxu1 %v90_v10  ;;  %1253 = vmatpush.msra.mxu0 %v73_v11  ;;  %v120_v19 = vld [vmem:[#allocation2 + $0x1d8] sm:$0xff]  ;;  %v87_v22 = vld [vmem:[#allocation2 + $0xd0] sm:$0xff] }
  0x14   :  { %1312 = vmatpush.msra.mxu3 %v122_v13  ;;  %1293 = vmatpush.msra.mxu2 %v105_v12  ;;  %v119_v23 = vld [vmem:[#allocation2 + $0x1d0] sm:$0xff]  ;;  %v70_v24 = vld [vmem:[#allocation2 + $0x48] sm:$0xff]  ;;  %v69_v28 = vld [vmem:[#allocation2 + $0x40] sm:$0xff] }
  0x15   :  { %1273 = vmatpush.msra.mxu1 %v89_v14  ;;  %1254 = vmatpush.msra.mxu0 %v72_v16  ;;  %v102_v25 = vld [vmem:[#allocation2 + $0x148] sm:$0xff]  ;;  %v101_v29 = vld [vmem:[#allocation2 + $0x140] sm:$0xff]  ;;  %v68_v32 = vld [vmem:[#allocation2 + $0x38] sm:$0xff] }
  0x16   :  { %1313 = vmatpush.msra.mxu3 %v121_v15  ;;  %1294 = vmatpush.msra.mxu2 %v104_v17  ;;  %v86_v26 = vld [vmem:[#allocation2 + $0xc8] sm:$0xff]  ;;  %v85_v30 = vld [vmem:[#allocation2 + $0xc0] sm:$0xff]  ;;  %v100_v33 = vld [vmem:[#allocation2 + $0x138] sm:$0xff] }
  0x17   :  { %1274 = vmatpush.msra.mxu1 %v88_v18  ;;  %1255 = vmatpush.msra.mxu0 %v71_v20  ;;  %v118_v27 = vld [vmem:[#allocation2 + $0x1c8] sm:$0xff]  ;;  %v117_v31 = vld [vmem:[#allocation2 + $0x1c0] sm:$0xff]  ;;  %v84_v34 = vld [vmem:[#allocation2 + $0xb8] sm:$0xff] }
  0x18   :  { %1314 = vmatpush.msra.mxu3 %v120_v19  ;;  %1295 = vmatpush.msra.mxu2 %v103_v21  ;;  %v116_v35 = vld [vmem:[#allocation2 + $0x1b8] sm:$0xff]  ;;  %v67_v36 = vld [vmem:[#allocation2 + $0x30] sm:$0xff]  ;;  %v66_v40 = vld [vmem:[#allocation2 + $0x28] sm:$0xff] }
  0x19   :  { %1275 = vmatpush.msra.mxu1 %v87_v22  ;;  %1256 = vmatpush.msra.mxu0 %v70_v24  ;;  %v99_v37 = vld [vmem:[#allocation2 + $0x130] sm:$0xff]  ;;  %v98_v41 = vld [vmem:[#allocation2 + $0x128] sm:$0xff]  ;;  %v65_v44 = vld [vmem:[#allocation2 + $0x20] sm:$0xff] }
  0x1a   :  { %1315 = vmatpush.msra.mxu3 %v119_v23  ;;  %1296 = vmatpush.msra.mxu2 %v102_v25  ;;  %v83_v38 = vld [vmem:[#allocation2 + $0xb0] sm:$0xff]  ;;  %v82_v42 = vld [vmem:[#allocation2 + $0xa8] sm:$0xff]  ;;  %v97_v45 = vld [vmem:[#allocation2 + $0x120] sm:$0xff] }
  0x1b   :  { %1276 = vmatpush.msra.mxu1 %v86_v26  ;;  %1257 = vmatpush.msra.mxu0 %v69_v28  ;;  %v115_v39 = vld [vmem:[#allocation2 + $0x1b0] sm:$0xff]  ;;  %v114_v43 = vld [vmem:[#allocation2 + $0x1a8] sm:$0xff]  ;;  %v81_v46 = vld [vmem:[#allocation2 + $0xa0] sm:$0xff] }
  0x1c   :  { %1316 = vmatpush.msra.mxu3 %v118_v27  ;;  %1297 = vmatpush.msra.mxu2 %v101_v29  ;;  %v113_v47 = vld [vmem:[#allocation2 + $0x1a0] sm:$0xff]  ;;  %v64_v48 = vld [vmem:[#allocation2 + $0x18] sm:$0xff]  ;;  %v63_v52 = vld [vmem:[#allocation2 + $0x10] sm:$0xff] }
  0x1d   :  { %1277 = vmatpush.msra.mxu1 %v85_v30  ;;  %1258 = vmatpush.msra.mxu0 %v68_v32  ;;  %v96_v49 = vld [vmem:[#allocation2 + $0x118] sm:$0xff]  ;;  %v95_v53 = vld [vmem:[#allocation2 + $0x110] sm:$0xff]  ;;  %v62_v56 = vld [vmem:[#allocation2 + $0x8] sm:$0xff] }
  0x1e   :  { %1317 = vmatpush.msra.mxu3 %v117_v31  ;;  %1298 = vmatpush.msra.mxu2 %v100_v33  ;;  %v80_v50 = vld [vmem:[#allocation2 + $0x98] sm:$0xff]  ;;  %v79_v54 = vld [vmem:[#allocation2 + $0x90] sm:$0xff]  ;;  %v94_v57 = vld [vmem:[#allocation2 + $0x108] sm:$0xff] }
  0x1f   :  { %1278 = vmatpush.msra.mxu1 %v84_v34  ;;  %1259 = vmatpush.msra.mxu0 %v67_v36  ;;  %v112_v51 = vld [vmem:[#allocation2 + $0x198] sm:$0xff]  ;;  %v111_v55 = vld [vmem:[#allocation2 + $0x190] sm:$0xff]  ;;  %v78_v58 = vld [vmem:[#allocation2 + $0x88] sm:$0xff] }
  0x20   :  { %1318 = vmatpush.msra.mxu3 %v116_v35  ;;  %1299 = vmatpush.msra.mxu2 %v99_v37  ;;  %v110_v59 = vld [vmem:[#allocation2 + $0x188] sm:$0xff]  ;;  %v61_v60 = vld [vmem:[#allocation2] sm:$0xff]  ;;  %v140_v62 = vld [vmem:[#allocation2 + $0x278] sm:$0xff] }
  0x21   :  { %1279 = vmatpush.msra.mxu1 %v83_v38  ;;  %1260 = vmatpush.msra.mxu0 %v66_v40  ;;  %v93_v61 = vld [vmem:[#allocation2 + $0x100] sm:$0xff]  ;;  %v172_v63 = vld [vmem:[#allocation2 + $0x378] sm:$0xff]  ;;  %v139_v2 = vld [vmem:[#allocation2 + $0x270] sm:$0xff] }
  0x22   :  { %1319 = vmatpush.msra.mxu3 %v115_v39  ;;  %1300 = vmatpush.msra.mxu2 %v98_v41  ;;  %v77_v0 = vld [vmem:[#allocation2 + $0x80] sm:$0xff]  ;;  %v156_v3 = vld [vmem:[#allocation2 + $0x2f8] sm:$0xff]  ;;  %v171_v4 = vld [vmem:[#allocation2 + $0x370] sm:$0xff] }
  0x23   :  { %1280 = vmatpush.msra.mxu1 %v82_v42  ;;  %1261 = vmatpush.msra.mxu0 %v65_v44  ;;  %v109_v1 = vld [vmem:[#allocation2 + $0x180] sm:$0xff]  ;;  %v188_v5 = vld [vmem:[#allocation2 + $0x3f8] sm:$0xff]  ;;  %v138_v6 = vld [vmem:[#allocation2 + $0x268] sm:$0xff] }
  0x24   :  { %1320 = vmatpush.msra.mxu3 %v114_v43  ;;  %1301 = vmatpush.msra.mxu2 %v97_v45  ;;  %v155_v7 = vld [vmem:[#allocation2 + $0x2f0] sm:$0xff]  ;;  %v170_v8 = vld [vmem:[#allocation2 + $0x368] sm:$0xff]  ;;  %v137_v10 = vld [vmem:[#allocation2 + $0x260] sm:$0xff] }
  0x25   :  { %1281 = vmatpush.msra.mxu1 %v81_v46  ;;  %1262 = vmatpush.msra.mxu0 %v64_v48  ;;  %v187_v9 = vld [vmem:[#allocation2 + $0x3f0] sm:$0xff]  ;;  %v154_v11 = vld [vmem:[#allocation2 + $0x2e8] sm:$0xff]  ;;  %v169_v12 = vld [vmem:[#allocation2 + $0x360] sm:$0xff] }
  0x26   :  { %1321 = vmatpush.msra.mxu3 %v113_v47  ;;  %1302 = vmatpush.msra.mxu2 %v96_v49  ;;  %v186_v13 = vld [vmem:[#allocation2 + $0x3e8] sm:$0xff]  ;;  %v136_v14 = vld [vmem:[#allocation2 + $0x258] sm:$0xff]  ;;  %v153_v15 = vld [vmem:[#allocation2 + $0x2e0] sm:$0xff] }
  0x27   :  { %1282 = vmatpush.msra.mxu1 %v80_v50  ;;  %1263 = vmatpush.msra.mxu0 %v63_v52  ;;  %v168_v16 = vld [vmem:[#allocation2 + $0x358] sm:$0xff]  ;;  %v185_v17 = vld [vmem:[#allocation2 + $0x3e0] sm:$0xff]  ;;  %v135_v18 = vld [vmem:[#allocation2 + $0x250] sm:$0xff] }
  0x28   :  { %1322 = vmatpush.msra.mxu3 %v112_v51  ;;  %1303 = vmatpush.msra.mxu2 %v95_v53  ;;  %v152_v19 = vld [vmem:[#allocation2 + $0x2d8] sm:$0xff]  ;;  %v167_v20 = vld [vmem:[#allocation2 + $0x350] sm:$0xff]  ;;  %v134_v22 = vld [vmem:[#allocation2 + $0x248] sm:$0xff] }
  0x29   :  { %1283 = vmatpush.msra.mxu1 %v79_v54  ;;  %1264 = vmatpush.msra.mxu0 %v62_v56  ;;  %v184_v21 = vld [vmem:[#allocation2 + $0x3d8] sm:$0xff]  ;;  %v151_v23 = vld [vmem:[#allocation2 + $0x2d0] sm:$0xff]  ;;  %v166_v24 = vld [vmem:[#allocation2 + $0x348] sm:$0xff] }
  0x2a   :  { %1323 = vmatpush.msra.mxu3 %v111_v55  ;;  %1304 = vmatpush.msra.mxu2 %v94_v57  ;;  %v183_v25 = vld [vmem:[#allocation2 + $0x3d0] sm:$0xff]  ;;  %v45_v26 = vld [vmem:[%s2733_s0] sm:$0xff]  ;;  %v133_v27 = vld [vmem:[#allocation2 + $0x240] sm:$0xff] }
  0x2b   :  { %1284 = vmatpush.msra.mxu1 %v78_v58  ;;  %1265 = vmatpush.msra.mxu0 %v61_v60  ;;  %v150_v28 = vld [vmem:[#allocation2 + $0x2c8] sm:$0xff]  ;;  %1105 = vst [vmem:[#allocation1] ss:$4 sm:$0xff] %v45_v26  ;;  %v165_v29 = vld [vmem:[#allocation2 + $0x340] sm:$0xff]  ;;  %v132_v31 = vld [vmem:[#allocation2 + $0x238] sm:$0xff] }
  0x2c   :  { %1324 = vmatpush.msra.mxu3 %v110_v59  ;;  %1305 = vmatpush.msra.mxu2 %v93_v61  ;;  %v182_v30 = vld [vmem:[#allocation2 + $0x3c8] sm:$0xff]  ;;  %v149_v32 = vld [vmem:[#allocation2 + $0x2c0] sm:$0xff]  ;;  %v164_v33 = vld [vmem:[#allocation2 + $0x338] sm:$0xff] }
  0x2d   :  { %1330 = vmatpush.msrb.mxu0 %v140_v62  ;;  %1285 = vmatpush.msra.mxu1 %v77_v0  ;;  %v181_v34 = vld [vmem:[#allocation2 + $0x3c0] sm:$0xff]  ;;  %v131_v35 = vld [vmem:[#allocation2 + $0x230] sm:$0xff]  ;;  %v148_v36 = vld [vmem:[#allocation2 + $0x2b8] sm:$0xff] }
  0x2e   :  { %1370 = vmatpush.msrb.mxu2 %v172_v63  ;;  %1325 = vmatpush.msra.mxu3 %v109_v1  ;;  %v163_v37 = vld [vmem:[#allocation2 + $0x330] sm:$0xff]  ;;  %v180_v38 = vld [vmem:[#allocation2 + $0x3b8] sm:$0xff]  ;;  %v130_v39 = vld [vmem:[#allocation2 + $0x228] sm:$0xff] }
  0x2f   :  { %1331 = vmatpush.msrb.mxu0 %v139_v2  ;;  %1350 = vmatpush.msrb.mxu1 %v156_v3  ;;  %v147_v40 = vld [vmem:[#allocation2 + $0x2b0] sm:$0xff]  ;;  %v162_v41 = vld [vmem:[#allocation2 + $0x328] sm:$0xff]  ;;  %v46_v43 = vld [vmem:[%s2733_s0 + $0x8] sm:$0xff] }
  0x30   :  { %1371 = vmatpush.msrb.mxu2 %v171_v4  ;;  %1390 = vmatpush.msrb.mxu3 %v188_v5  ;;  %v179_v42 = vld [vmem:[#allocation2 + $0x3b0] sm:$0xff]  ;;  %v129_v44 = vld [vmem:[#allocation2 + $0x220] sm:$0xff]  ;;  %v146_v45 = vld [vmem:[#allocation2 + $0x2a8] sm:$0xff]  ;;  %1107 = vst [vmem:[#allocation1 + $0x20] ss:$4 sm:$0xff] %v46_v43 }
  0x31   :  { %1332 = vmatpush.msrb.mxu0 %v138_v6  ;;  %1351 = vmatpush.msrb.mxu1 %v155_v7  ;;  %v47_v46 = vld [vmem:[%s2733_s0 + $0x10] sm:$0xff]  ;;  %v161_v47 = vld [vmem:[#allocation2 + $0x320] sm:$0xff]  ;;  %v128_v53 = vld [vmem:[#allocation2 + $0x218] sm:$0xff] }
  0x32   :  { %1372 = vmatpush.msrb.mxu2 %v170_v8  ;;  %1391 = vmatpush.msrb.mxu3 %v187_v9  ;;  %v1108_v48 = vld.sshfl [vmem:[#allocation1] sm:$0xff pattern:$0x73625140]  ;;  %v1110_v49 = vld.sshfl [vmem:[#allocation1 + $0x10] sm:$0xff pattern:$0x73625140] }
  0x33   :  { %1333 = vmatpush.msrb.mxu0 %v137_v10  ;;  %1352 = vmatpush.msrb.mxu1 %v154_v11  ;;  %v2673_v50 = vld.sshfl [vmem:[#allocation1 + $0x8] sm:$0xff pattern:$0x73625140]  ;;  %v2675_v51 = vld.sshfl [vmem:[#allocation1 + $0x18] sm:$0xff pattern:$0x73625140] }
  0x34   :  { %1373 = vmatpush.msrb.mxu2 %v169_v12  ;;  %1392 = vmatpush.msrb.mxu3 %v186_v13  ;;  %v178_v52 = vld [vmem:[#allocation2 + $0x3a8] sm:$0xff]  ;;  %v145_v54 = vld [vmem:[#allocation2 + $0x2a0] sm:$0xff]  ;;  %1116 = vst [vmem:[#allocation1] ss:$4 sm:$0xff] %v47_v46  ;;  %v160_v55 = vld [vmem:[#allocation2 + $0x318] sm:$0xff] }
  0x35   :  { %1334 = vmatpush.msrb.mxu0 %v136_v14  ;;  %1353 = vmatpush.msrb.mxu1 %v153_v15  ;;  %v177_v56 = vld [vmem:[#allocation2 + $0x3a0] sm:$0xff]  ;;  %v127_v57 = vld [vmem:[#allocation2 + $0x210] sm:$0xff]  ;;  %v144_v58 = vld [vmem:[#allocation2 + $0x298] sm:$0xff] }
  0x36   :  { %1374 = vmatpush.msrb.mxu2 %v168_v16  ;;  %1393 = vmatpush.msrb.mxu3 %v185_v17  ;;  %v159_v59 = vld [vmem:[#allocation2 + $0x310] sm:$0xff]  ;;  %v176_v60 = vld [vmem:[#allocation2 + $0x398] sm:$0xff]  ;;  %v126_v61 = vld [vmem:[#allocation2 + $0x208] sm:$0xff] }
  0x37   :  { %1335 = vmatpush.msrb.mxu0 %v135_v18  ;;  %1354 = vmatpush.msrb.mxu1 %v152_v19  ;;  %v143_v62 = vld [vmem:[#allocation2 + $0x290] sm:$0xff]  ;;  %v2680_v0 = vld.sshfl [vmem:[#allocation1 + $0x30] sm:$0xff pattern:$0x73625140]  ;;  %v125_v6 = vld [vmem:[#allocation2 + $0x200] sm:$0xff] }
  0x38   :  { %1375 = vmatpush.msrb.mxu2 %v167_v20  ;;  %1394 = vmatpush.msrb.mxu3 %v184_v21  ;;  %v48_v63 = vld [vmem:[%s2733_s0 + $0x18] sm:$0xff]  ;;  %v2682_v1 = vld.sshfl [vmem:[#allocation1 + $0x20] sm:$0xff pattern:$0x73625140]  ;;  %v158_v4 = vld [vmem:[#allocation2 + $0x308] sm:$0xff] }
  0x39   :  { %1336 = vmatpush.msrb.mxu0 %v134_v22  ;;  %1355 = vmatpush.msrb.mxu1 %v151_v23  ;;  %v2684_v2 = vld.sshfl [vmem:[#allocation1 + $0x38] sm:$0xff pattern:$0x73625140]  ;;  %v2686_v3 = vld.sshfl [vmem:[#allocation1 + $0x28] sm:$0xff pattern:$0x73625140] }
  0x3a   :  { %1376 = vmatpush.msrb.mxu2 %v166_v24  ;;  %1395 = vmatpush.msrb.mxu3 %v183_v25  ;;  %v175_v5 = vld [vmem:[#allocation2 + $0x390] sm:$0xff]  ;;  %1117 = vst [vmem:[#allocation1 + $0x20] ss:$4 sm:$0xff] %v48_v63  ;;  %v142_v7 = vld [vmem:[#allocation2 + $0x288] sm:$0xff]  ;;  %v157_v8 = vld [vmem:[#allocation2 + $0x300] sm:$0xff] }
  0x3b   :  { %1337 = vmatpush.msrb.mxu0 %v133_v27  ;;  %1356 = vmatpush.msrb.mxu1 %v150_v28  ;;  %v174_v9 = vld [vmem:[#allocation2 + $0x388] sm:$0xff]  ;;  %v204_v10 = vld [vmem:[#allocation2 + $0x478] sm:$0xff]  ;;  %v141_v12 = vld [vmem:[#allocation2 + $0x280] sm:$0xff] }
  0x3c   :  { %1377 = vmatpush.msrb.mxu2 %v165_v29  ;;  %1396 = vmatpush.msrb.mxu3 %v182_v30  ;;  %v236_v11 = vld [vmem:[#allocation2 + $0x578] sm:$0xff]  ;;  %v173_v13 = vld [vmem:[#allocation2 + $0x380] sm:$0xff]  ;;  %v203_v14 = vld [vmem:[#allocation2 + $0x470] sm:$0xff] }
  0x3d   :  { %1338 = vmatpush.msrb.mxu0 %v132_v31  ;;  %1357 = vmatpush.msrb.mxu1 %v149_v32  ;;  %v220_v15 = vld [vmem:[#allocation2 + $0x4f8] sm:$0xff]  ;;  %v235_v16 = vld [vmem:[#allocation2 + $0x570] sm:$0xff]  ;;  %v202_v18 = vld [vmem:[#allocation2 + $0x468] sm:$0xff] }
  0x3e   :  { %1378 = vmatpush.msrb.mxu2 %v164_v33  ;;  %1397 = vmatpush.msrb.mxu3 %v181_v34  ;;  %v252_v17 = vld [vmem:[#allocation2 + $0x5f8] sm:$0xff]  ;;  %v219_v19 = vld [vmem:[#allocation2 + $0x4f0] sm:$0xff]  ;;  %v234_v20 = vld [vmem:[#allocation2 + $0x568] sm:$0xff] }
  0x3f   :  { %1339 = vmatpush.msrb.mxu0 %v131_v35  ;;  %1358 = vmatpush.msrb.mxu1 %v148_v36  ;;  %v251_v21 = vld [vmem:[#allocation2 + $0x5f0] sm:$0xff]  ;;  %v201_v22 = vld [vmem:[#allocation2 + $0x460] sm:$0xff]  ;;  %v218_v23 = vld [vmem:[#allocation2 + $0x4e8] sm:$0xff] }
  0x40   :  { %1379 = vmatpush.msrb.mxu2 %v163_v37  ;;  %1398 = vmatpush.msrb.mxu3 %v180_v38  ;;  %v233_v24 = vld [vmem:[#allocation2 + $0x560] sm:$0xff]  ;;  %v250_v25 = vld [vmem:[#allocation2 + $0x5e8] sm:$0xff]  ;;  %v200_v26 = vld [vmem:[#allocation2 + $0x458] sm:$0xff] }
  0x41   :  { %1340 = vmatpush.msrb.mxu0 %v130_v39  ;;  %1359 = vmatpush.msrb.mxu1 %v147_v40  ;;  %v217_v27 = vld [vmem:[#allocation2 + $0x4e0] sm:$0xff]  ;;  %v232_v28 = vld [vmem:[#allocation2 + $0x558] sm:$0xff]  ;;  %v199_v30 = vld [vmem:[#allocation2 + $0x450] sm:$0xff] }
  0x42   :  { %1380 = vmatpush.msrb.mxu2 %v162_v41  ;;  %1399 = vmatpush.msrb.mxu3 %v179_v42  ;;  %v249_v29 = vld [vmem:[#allocation2 + $0x5e0] sm:$0xff]  ;;  %v216_v31 = vld [vmem:[#allocation2 + $0x4d8] sm:$0xff]  ;;  %v231_v32 = vld [vmem:[#allocation2 + $0x550] sm:$0xff] }
  0x43   :  { %1341 = vmatpush.msrb.mxu0 %v129_v44  ;;  %1360 = vmatpush.msrb.mxu1 %v146_v45  ;;  %v248_v33 = vld [vmem:[#allocation2 + $0x5d8] sm:$0xff]  ;;  %v198_v34 = vld [vmem:[#allocation2 + $0x448] sm:$0xff]  ;;  %v215_v35 = vld [vmem:[#allocation2 + $0x4d0] sm:$0xff] }
  0x44   :  { %1381 = vmatpush.msrb.mxu2 %v161_v47  ;;  %1400 = vmatpush.msrb.mxu3 %v178_v52  ;;  %v230_v36 = vld [vmem:[#allocation2 + $0x548] sm:$0xff]  ;;  %v247_v37 = vld [vmem:[#allocation2 + $0x5d0] sm:$0xff]  ;;  %v197_v38 = vld [vmem:[#allocation2 + $0x440] sm:$0xff] }
  0x45   :  { %1342 = vmatpush.msrb.mxu0 %v128_v53  ;;  %1361 = vmatpush.msrb.mxu1 %v145_v54  ;;  %v214_v39 = vld [vmem:[#allocation2 + $0x4c8] sm:$0xff]  ;;  %v229_v40 = vld [vmem:[#allocation2 + $0x540] sm:$0xff]  ;;  %v196_v42 = vld [vmem:[#allocation2 + $0x438] sm:$0xff] }
  0x46   :  { %1382 = vmatpush.msrb.mxu2 %v160_v55  ;;  %1401 = vmatpush.msrb.mxu3 %v177_v56  ;;  %v246_v41 = vld [vmem:[#allocation2 + $0x5c8] sm:$0xff]  ;;  %v213_v43 = vld [vmem:[#allocation2 + $0x4c0] sm:$0xff]  ;;  %v228_v44 = vld [vmem:[#allocation2 + $0x538] sm:$0xff] }
  0x47   :  { %1343 = vmatpush.msrb.mxu0 %v127_v57  ;;  %1362 = vmatpush.msrb.mxu1 %v144_v58  ;;  %v245_v45 = vld [vmem:[#allocation2 + $0x5c0] sm:$0xff]  ;;  %v195_v46 = vld [vmem:[#allocation2 + $0x430] sm:$0xff]  ;;  %v212_v47 = vld [vmem:[#allocation2 + $0x4b8] sm:$0xff] }
  0x48   :  { %1383 = vmatpush.msrb.mxu2 %v159_v59  ;;  %1402 = vmatpush.msrb.mxu3 %v176_v60  ;;  %v226_v52 = vld [vmem:[#allocation2 + $0x528] sm:$0xff]  ;;  %v243_v53 = vld [vmem:[#allocation2 + $0x5b0] sm:$0xff]  ;;  %v193_v54 = vld [vmem:[#allocation2 + $0x420] sm:$0xff] }
  0x49   :  { %1344 = vmatpush.msrb.mxu0 %v126_v61  ;;  %1363 = vmatpush.msrb.mxu1 %v143_v62  ;;  %v210_v55 = vld [vmem:[#allocation2 + $0x4a8] sm:$0xff]  ;;  %v225_v56 = vld [vmem:[#allocation2 + $0x520] sm:$0xff]  ;;  %v192_v58 = vld [vmem:[#allocation2 + $0x418] sm:$0xff] }
  0x4a   :  { %1384 = vmatpush.msrb.mxu2 %v158_v4  ;;  %1403 = vmatpush.msrb.mxu3 %v175_v5  ;;  %v242_v57 = vld [vmem:[#allocation2 + $0x5a8] sm:$0xff]  ;;  %v209_v59 = vld [vmem:[#allocation2 + $0x4a0] sm:$0xff]  ;;  %v224_v60 = vld [vmem:[#allocation2 + $0x518] sm:$0xff] }
  0x4b   :  { %1345 = vmatpush.msrb.mxu0 %v125_v6  ;;  %1364 = vmatpush.msrb.mxu1 %v142_v7  ;;  %v241_v61 = vld [vmem:[#allocation2 + $0x5a0] sm:$0xff]  ;;  %v191_v62 = vld [vmem:[#allocation2 + $0x410] sm:$0xff]  ;;  %v208_v63 = vld [vmem:[#allocation2 + $0x498] sm:$0xff] }
  0x4c   :  { %1385 = vmatpush.msrb.mxu2 %v157_v8  ;;  %1404 = vmatpush.msrb.mxu3 %v174_v9  ;;  %v222_v4 = vld [vmem:[#allocation2 + $0x508] sm:$0xff]  ;;  %v239_v5 = vld [vmem:[#allocation2 + $0x590] sm:$0xff]  ;;  %v189_v6 = vld [vmem:[#allocation2 + $0x400] sm:$0xff] }
  0x4d   :  { %1266 = vmatmul.f32.vlgmr.msra.gmra.mxu0 %v1108_v48  ;;  %1306 = vmatmul.f32.vlgmr.msra.gmra.mxu2 %v1110_v49  ;;  %v227_v48 = vld [vmem:[#allocation2 + $0x530] sm:$0xff]  ;;  %v244_v49 = vld [vmem:[#allocation2 + $0x5b8] sm:$0xff]  ;;  %v206_v7 = vld [vmem:[#allocation2 + $0x488] sm:$0xff] }
  0x4e   :  { %1410 = vmatpush.msra.mxu0 %v204_v10  ;;  %1450 = vmatpush.msra.mxu2 %v236_v11  ;;  %v221_v8 = vld [vmem:[#allocation2 + $0x500] sm:$0xff]  ;;  %v238_v9 = vld [vmem:[#allocation2 + $0x588] sm:$0xff]  ;;  %v1118_v10 = vld.sshfl [vmem:[#allocation1] sm:$0xff pattern:$0x73625140] }
  0x4f   :  { %1365 = vmatpush.msrb.mxu1 %v141_v12  ;;  %1405 = vmatpush.msrb.mxu3 %v173_v13  ;;  %v1120_v11 = vld.sshfl [vmem:[#allocation1 + $0x10] sm:$0xff pattern:$0x73625140]  ;;  %v268_v12 = vld [vmem:[#allocation2 + $0x678] sm:$0xff] }
  0x50   :  { %1286 = vmatmul.f32.vlgmr.msra.gmra.mxu1 %v2673_v50  ;;  %1326 = vmatmul.f32.vlgmr.msra.gmra.mxu3 %v2675_v51  ;;  %v194_v50 = vld [vmem:[#allocation2 + $0x428] sm:$0xff]  ;;  %v211_v51 = vld [vmem:[#allocation2 + $0x4b0] sm:$0xff]  ;;  %v300_v13 = vld [vmem:[#allocation2 + $0x778] sm:$0xff] }
  0x51   :  { %1411 = vmatpush.msra.mxu0 %v203_v14  ;;  %1430 = vmatpush.msra.mxu1 %v220_v15  ;;  %v205_v14 = vld [vmem:[#allocation2 + $0x480] sm:$0xff] }
  0x52   :  { %1451 = vmatpush.msra.mxu2 %v235_v16  ;;  %1470 = vmatpush.msra.mxu3 %v252_v17  ;;  %v237_v15 = vld [vmem:[#allocation2 + $0x580] sm:$0xff]  ;;  %v1121_v17 = vld.sshfl [vmem:[#allocation1 + $0x18] sm:$0xff pattern:$0x73625140] }
  0x53   :  { %1412 = vmatpush.msra.mxu0 %v202_v18  ;;  %1431 = vmatpush.msra.mxu1 %v219_v19  ;;  %v1119_v16 = vld.sshfl [vmem:[#allocation1 + $0x8] sm:$0xff pattern:$0x73625140]  ;;  %v267_v18 = vld [vmem:[#allocation2 + $0x670] sm:$0xff]  ;;  %v284_v19 = vld [vmem:[#allocation2 + $0x6f8] sm:$0xff] }
  0x54   :  { %1452 = vmatpush.msra.mxu2 %v234_v20  ;;  %1471 = vmatpush.msra.mxu3 %v251_v21  ;;  %v299_v20 = vld [vmem:[#allocation2 + $0x770] sm:$0xff]  ;;  %v316_v21 = vld [vmem:[#allocation2 + $0x7f8] sm:$0xff] }
  0x55   :  { %1413 = vmatpush.msra.mxu0 %v201_v22  ;;  %1432 = vmatpush.msra.mxu1 %v218_v23  ;;  %v266_v22 = vld [vmem:[#allocation2 + $0x668] sm:$0xff]  ;;  %v283_v23 = vld [vmem:[#allocation2 + $0x6f0] sm:$0xff] }
  0x56   :  { %1453 = vmatpush.msra.mxu2 %v233_v24  ;;  %1472 = vmatpush.msra.mxu3 %v250_v25  ;;  %v298_v24 = vld [vmem:[#allocation2 + $0x768] sm:$0xff]  ;;  %v315_v25 = vld [vmem:[#allocation2 + $0x7f0] sm:$0xff] }
  0x57   :  { %1386 = vmatmul.f32.vlgmr.msrb.gmra.mxu2 %v2680_v0  ;;  %1414 = vmatpush.msra.mxu0 %v200_v26  ;;  %v223_v0 = vld [vmem:[#allocation2 + $0x510] sm:$0xff]  ;;  %v265_v26 = vld [vmem:[#allocation2 + $0x660] sm:$0xff] }
  0x58   :  { %1433 = vmatpush.msra.mxu1 %v217_v27  ;;  %1454 = vmatpush.msra.mxu2 %v232_v28  ;;  %v282_v27 = vld [vmem:[#allocation2 + $0x6e8] sm:$0xff]  ;;  %v297_v28 = vld [vmem:[#allocation2 + $0x760] sm:$0xff] }
  0x59   :  { %1473 = vmatpush.msra.mxu3 %v249_v29  ;;  %1346 = vmatmul.f32.vlgmr.msrb.gmra.mxu0 %v2682_v1  ;;  %v240_v1 = vld [vmem:[#allocation2 + $0x598] sm:$0xff]  ;;  %v314_v29 = vld [vmem:[#allocation2 + $0x7e8] sm:$0xff] }
  0x5a   :  { %1406 = vmatmul.f32.vlgmr.msrb.gmra.mxu3 %v2684_v2  ;;  %1415 = vmatpush.msra.mxu0 %v199_v30  ;;  %v190_v2 = vld [vmem:[#allocation2 + $0x408] sm:$0xff]  ;;  %v264_v30 = vld [vmem:[#allocation2 + $0x658] sm:$0xff] }
  0x5b   :  { %1434 = vmatpush.msra.mxu1 %v216_v31  ;;  %1455 = vmatpush.msra.mxu2 %v231_v32  ;;  %v281_v31 = vld [vmem:[#allocation2 + $0x6e0] sm:$0xff]  ;;  %v296_v32 = vld [vmem:[#allocation2 + $0x758] sm:$0xff] }
  0x5c   :  { %1474 = vmatpush.msra.mxu3 %v248_v33  ;;  %1366 = vmatmul.f32.vlgmr.msrb.gmra.mxu1 %v2686_v3  ;;  %v207_v3 = vld [vmem:[#allocation2 + $0x490] sm:$0xff]  ;;  %v313_v33 = vld [vmem:[#allocation2 + $0x7e0] sm:$0xff] }
  0x5d   :  { %1416 = vmatpush.msra.mxu0 %v198_v34  ;;  %1435 = vmatpush.msra.mxu1 %v215_v35  ;;  %v263_v34 = vld [vmem:[#allocation2 + $0x650] sm:$0xff]  ;;  %v280_v35 = vld [vmem:[#allocation2 + $0x6d8] sm:$0xff] }
  0x5e   :  { %1456 = vmatpush.msra.mxu2 %v230_v36  ;;  %1475 = vmatpush.msra.mxu3 %v247_v37  ;;  %v295_v36 = vld [vmem:[#allocation2 + $0x750] sm:$0xff]  ;;  %v312_v37 = vld [vmem:[#allocation2 + $0x7d8] sm:$0xff] }
  0x5f   :  { %1417 = vmatpush.msra.mxu0 %v197_v38  ;;  %1436 = vmatpush.msra.mxu1 %v214_v39  ;;  %v262_v38 = vld [vmem:[#allocation2 + $0x648] sm:$0xff]  ;;  %v279_v39 = vld [vmem:[#allocation2 + $0x6d0] sm:$0xff] }
  0x60   :  { %1457 = vmatpush.msra.mxu2 %v229_v40  ;;  %1476 = vmatpush.msra.mxu3 %v246_v41  ;;  %v294_v40 = vld [vmem:[#allocation2 + $0x748] sm:$0xff]  ;;  %v311_v41 = vld [vmem:[#allocation2 + $0x7d0] sm:$0xff] }
  0x61   :  { %1418 = vmatpush.msra.mxu0 %v196_v42  ;;  %1437 = vmatpush.msra.mxu1 %v213_v43  ;;  %v261_v42 = vld [vmem:[#allocation2 + $0x640] sm:$0xff]  ;;  %v278_v43 = vld [vmem:[#allocation2 + $0x6c8] sm:$0xff] }
  0x62   :  { %1458 = vmatpush.msra.mxu2 %v228_v44  ;;  %1477 = vmatpush.msra.mxu3 %v245_v45  ;;  %v293_v44 = vld [vmem:[#allocation2 + $0x740] sm:$0xff]  ;;  %v310_v45 = vld [vmem:[#allocation2 + $0x7c8] sm:$0xff] }
  0x63   :  { %1419 = vmatpush.msra.mxu0 %v195_v46  ;;  %1438 = vmatpush.msra.mxu1 %v212_v47  ;;  %v260_v46 = vld [vmem:[#allocation2 + $0x638] sm:$0xff]  ;;  %v277_v47 = vld [vmem:[#allocation2 + $0x6c0] sm:$0xff] }
  0x64   :  { %1459 = vmatpush.msra.mxu2 %v227_v48  ;;  %1478 = vmatpush.msra.mxu3 %v244_v49  ;;  %v292_v48 = vld [vmem:[#allocation2 + $0x738] sm:$0xff]  ;;  %v309_v49 = vld [vmem:[#allocation2 + $0x7c0] sm:$0xff] }
  0x65   :  { %1420 = vmatpush.msra.mxu0 %v194_v50  ;;  %1439 = vmatpush.msra.mxu1 %v211_v51  ;;  %v259_v50 = vld [vmem:[#allocation2 + $0x630] sm:$0xff]  ;;  %v276_v51 = vld [vmem:[#allocation2 + $0x6b8] sm:$0xff] }
  0x66   :  { %1460 = vmatpush.msra.mxu2 %v226_v52  ;;  %1479 = vmatpush.msra.mxu3 %v243_v53  ;;  %v291_v52 = vld [vmem:[#allocation2 + $0x730] sm:$0xff]  ;;  %v308_v53 = vld [vmem:[#allocation2 + $0x7b8] sm:$0xff] }
  0x67   :  { %1421 = vmatpush.msra.mxu0 %v193_v54  ;;  %1440 = vmatpush.msra.mxu1 %v210_v55  ;;  %v258_v54 = vld [vmem:[#allocation2 + $0x628] sm:$0xff]  ;;  %v275_v55 = vld [vmem:[#allocation2 + $0x6b0] sm:$0xff] }
  0x68   :  { %1461 = vmatpush.msra.mxu2 %v225_v56  ;;  %1480 = vmatpush.msra.mxu3 %v242_v57  ;;  %v290_v56 = vld [vmem:[#allocation2 + $0x728] sm:$0xff]  ;;  %v307_v57 = vld [vmem:[#allocation2 + $0x7b0] sm:$0xff] }
  0x69   :  { %1422 = vmatpush.msra.mxu0 %v192_v58  ;;  %1441 = vmatpush.msra.mxu1 %v209_v59  ;;  %v257_v58 = vld [vmem:[#allocation2 + $0x620] sm:$0xff]  ;;  %v274_v59 = vld [vmem:[#allocation2 + $0x6a8] sm:$0xff] }
  0x6a   :  { %1462 = vmatpush.msra.mxu2 %v224_v60  ;;  %1481 = vmatpush.msra.mxu3 %v241_v61  ;;  %v289_v60 = vld [vmem:[#allocation2 + $0x720] sm:$0xff]  ;;  %v306_v61 = vld [vmem:[#allocation2 + $0x7a8] sm:$0xff] }
  0x6b   :  { %1423 = vmatpush.msra.mxu0 %v191_v62  ;;  %1442 = vmatpush.msra.mxu1 %v208_v63  ;;  %v256_v62 = vld [vmem:[#allocation2 + $0x618] sm:$0xff]  ;;  %v273_v63 = vld [vmem:[#allocation2 + $0x6a0] sm:$0xff] }
  0x6c   :  { %1463 = vmatpush.msra.mxu2 %v223_v0  ;;  %1482 = vmatpush.msra.mxu3 %v240_v1  ;;  %v288_v0 = vld [vmem:[#allocation2 + $0x718] sm:$0xff]  ;;  %v305_v1 = vld [vmem:[#allocation2 + $0x7a0] sm:$0xff] }
  0x6d   :  { %1424 = vmatpush.msra.mxu0 %v190_v2  ;;  %1443 = vmatpush.msra.mxu1 %v207_v3  ;;  %v255_v2 = vld [vmem:[#allocation2 + $0x610] sm:$0xff]  ;;  %v272_v3 = vld [vmem:[#allocation2 + $0x698] sm:$0xff] }
  0x6e   :  { %1464 = vmatpush.msra.mxu2 %v222_v4  ;;  %1483 = vmatpush.msra.mxu3 %v239_v5  ;;  %v287_v4 = vld [vmem:[#allocation2 + $0x710] sm:$0xff]  ;;  %v304_v5 = vld [vmem:[#allocation2 + $0x798] sm:$0xff] }
  0x6f   :  { %1425 = vmatpush.msra.mxu0 %v189_v6  ;;  %1444 = vmatpush.msra.mxu1 %v206_v7  ;;  %v254_v6 = vld [vmem:[#allocation2 + $0x608] sm:$0xff]  ;;  %v271_v7 = vld [vmem:[#allocation2 + $0x690] sm:$0xff] }
  0x70   :  { %1465 = vmatpush.msra.mxu2 %v221_v8  ;;  %1484 = vmatpush.msra.mxu3 %v238_v9  ;;  %v49_v8 = vld [vmem:[%s2733_s0 + $0x20] sm:$0xff]  ;;  %v286_v9 = vld [vmem:[#allocation2 + $0x708] sm:$0xff] }
  0x71   :  { %1426 = vmatmul.f32.vlgmr.msra.gmra.mxu0 %v1118_v10  ;;  %1466 = vmatmul.f32.vlgmr.msra.gmra.mxu2 %v1120_v11  ;;  %v303_v10 = vld [vmem:[#allocation2 + $0x790] sm:$0xff]  ;;  %1126 = vst [vmem:[#allocation1] ss:$4 sm:$0xff] %v49_v8  ;;  %v253_v11 = vld [vmem:[#allocation2 + $0x600] sm:$0xff]  ;;  %v336_v8 = vld [vmem:[#allocation2 + $0x898] sm:$0xff] }
  0x72   :  { %1490 = vmatpush.msrb.mxu0 %v268_v12  ;;  %1530 = vmatpush.msrb.mxu2 %v300_v13  ;;  %v270_v12 = vld [vmem:[#allocation2 + $0x688] sm:$0xff]  ;;  %v285_v13 = vld [vmem:[#allocation2 + $0x700] sm:$0xff] }
  0x73   :  { %1445 = vmatpush.msra.mxu1 %v205_v14  ;;  %1485 = vmatpush.msra.mxu3 %v237_v15  ;;  %v302_v14 = vld [vmem:[#allocation2 + $0x788] sm:$0xff]  ;;  %v1122_v15 = vld.sshfl [vmem:[#allocation1 + $0x20] sm:$0xff pattern:$0x73625140] }
  0x74   :  { %1446 = vmatmul.f32.vlgmr.msra.gmra.mxu1 %v1119_v16  ;;  %1486 = vmatmul.f32.vlgmr.msra.gmra.mxu3 %v1121_v17  ;;  %v1124_v16 = vld.sshfl [vmem:[#allocation1 + $0x30] sm:$0xff pattern:$0x73625140]  ;;  %v332_v17 = vld [vmem:[#allocation2 + $0x878] sm:$0xff] }
  0x75   :  { %1491 = vmatpush.msrb.mxu0 %v267_v18  ;;  %1510 = vmatpush.msrb.mxu1 %v284_v19  ;;  %v364_v18 = vld [vmem:[#allocation2 + $0x978] sm:$0xff]  ;;  %v269_v19 = vld [vmem:[#allocation2 + $0x680] sm:$0xff] }
  0x76   :  { %1531 = vmatpush.msrb.mxu2 %v299_v20  ;;  %1550 = vmatpush.msrb.mxu3 %v316_v21  ;;  %v301_v20 = vld [vmem:[#allocation2 + $0x780] sm:$0xff] }
  0x77   :  { %1492 = vmatpush.msrb.mxu0 %v266_v22  ;;  %1511 = vmatpush.msrb.mxu1 %v283_v23  ;;  %v1123_v21 = vld.sshfl [vmem:[#allocation1 + $0x28] sm:$0xff pattern:$0x73625140]  ;;  %v1125_v22 = vld.sshfl [vmem:[#allocation1 + $0x38] sm:$0xff pattern:$0x73625140] }
  0x78   :  { %1532 = vmatpush.msrb.mxu2 %v298_v24  ;;  %1551 = vmatpush.msrb.mxu3 %v315_v25  ;;  %v331_v23 = vld [vmem:[#allocation2 + $0x870] sm:$0xff]  ;;  %v348_v24 = vld [vmem:[#allocation2 + $0x8f8] sm:$0xff] }
  0x79   :  { %1493 = vmatpush.msrb.mxu0 %v265_v26  ;;  %1512 = vmatpush.msrb.mxu1 %v282_v27  ;;  %v363_v25 = vld [vmem:[#allocation2 + $0x970] sm:$0xff]  ;;  %v380_v26 = vld [vmem:[#allocation2 + $0x9f8] sm:$0xff]  ;;  %v330_v27 = vld [vmem:[#allocation2 + $0x868] sm:$0xff] }
  0x7a   :  { %1533 = vmatpush.msrb.mxu2 %v297_v28  ;;  %1552 = vmatpush.msrb.mxu3 %v314_v29  ;;  %v347_v28 = vld [vmem:[#allocation2 + $0x8f0] sm:$0xff]  ;;  %v362_v29 = vld [vmem:[#allocation2 + $0x968] sm:$0xff] }
  0x7b   :  { %1494 = vmatpush.msrb.mxu0 %v264_v30  ;;  %1513 = vmatpush.msrb.mxu1 %v281_v31  ;;  %v379_v30 = vld [vmem:[#allocation2 + $0x9f0] sm:$0xff]  ;;  %v329_v31 = vld [vmem:[#allocation2 + $0x860] sm:$0xff] }
  0x7c   :  { %1534 = vmatpush.msrb.mxu2 %v296_v32  ;;  %1553 = vmatpush.msrb.mxu3 %v313_v33  ;;  %v346_v32 = vld [vmem:[#allocation2 + $0x8e8] sm:$0xff]  ;;  %v361_v33 = vld [vmem:[#allocation2 + $0x960] sm:$0xff] }
  0x7d   :  { %1495 = vmatpush.msrb.mxu0 %v263_v34  ;;  %1514 = vmatpush.msrb.mxu1 %v280_v35  ;;  %v378_v34 = vld [vmem:[#allocation2 + $0x9e8] sm:$0xff]  ;;  %v328_v35 = vld [vmem:[#allocation2 + $0x858] sm:$0xff] }
  0x7e   :  { %1535 = vmatpush.msrb.mxu2 %v295_v36  ;;  %1554 = vmatpush.msrb.mxu3 %v312_v37  ;;  %v345_v36 = vld [vmem:[#allocation2 + $0x8e0] sm:$0xff]  ;;  %v360_v37 = vld [vmem:[#allocation2 + $0x958] sm:$0xff] }
  0x7f   :  { %1496 = vmatpush.msrb.mxu0 %v262_v38  ;;  %1515 = vmatpush.msrb.mxu1 %v279_v39  ;;  %v377_v38 = vld [vmem:[#allocation2 + $0x9e0] sm:$0xff]  ;;  %v327_v39 = vld [vmem:[#allocation2 + $0x850] sm:$0xff] }
  0x80   :  { %1536 = vmatpush.msrb.mxu2 %v294_v40  ;;  %1555 = vmatpush.msrb.mxu3 %v311_v41  ;;  %v344_v40 = vld [vmem:[#allocation2 + $0x8d8] sm:$0xff]  ;;  %v359_v41 = vld [vmem:[#allocation2 + $0x950] sm:$0xff] }
  0x81   :  { %1497 = vmatpush.msrb.mxu0 %v261_v42  ;;  %1516 = vmatpush.msrb.mxu1 %v278_v43  ;;  %v376_v42 = vld [vmem:[#allocation2 + $0x9d8] sm:$0xff]  ;;  %v326_v43 = vld [vmem:[#allocation2 + $0x848] sm:$0xff] }
  0x82   :  { %1537 = vmatpush.msrb.mxu2 %v293_v44  ;;  %1556 = vmatpush.msrb.mxu3 %v310_v45  ;;  %v343_v44 = vld [vmem:[#allocation2 + $0x8d0] sm:$0xff]  ;;  %v358_v45 = vld [vmem:[#allocation2 + $0x948] sm:$0xff] }
  0x83   :  { %1498 = vmatpush.msrb.mxu0 %v260_v46  ;;  %1517 = vmatpush.msrb.mxu1 %v277_v47  ;;  %v375_v46 = vld [vmem:[#allocation2 + $0x9d0] sm:$0xff]  ;;  %v325_v47 = vld [vmem:[#allocation2 + $0x840] sm:$0xff] }
  0x84   :  { %1538 = vmatpush.msrb.mxu2 %v292_v48  ;;  %1557 = vmatpush.msrb.mxu3 %v309_v49  ;;  %v342_v48 = vld [vmem:[#allocation2 + $0x8c8] sm:$0xff]  ;;  %v357_v49 = vld [vmem:[#allocation2 + $0x940] sm:$0xff] }
  0x85   :  { %1499 = vmatpush.msrb.mxu0 %v259_v50  ;;  %1518 = vmatpush.msrb.mxu1 %v276_v51  ;;  %v374_v50 = vld [vmem:[#allocation2 + $0x9c8] sm:$0xff]  ;;  %v324_v51 = vld [vmem:[#allocation2 + $0x838] sm:$0xff] }
  0x86   :  { %1539 = vmatpush.msrb.mxu2 %v291_v52  ;;  %1558 = vmatpush.msrb.mxu3 %v308_v53  ;;  %v341_v52 = vld [vmem:[#allocation2 + $0x8c0] sm:$0xff]  ;;  %v356_v53 = vld [vmem:[#allocation2 + $0x938] sm:$0xff] }
  0x87   :  { %1500 = vmatpush.msrb.mxu0 %v258_v54  ;;  %1519 = vmatpush.msrb.mxu1 %v275_v55  ;;  %v373_v54 = vld [vmem:[#allocation2 + $0x9c0] sm:$0xff]  ;;  %v323_v55 = vld [vmem:[#allocation2 + $0x830] sm:$0xff] }
  0x88   :  { %1540 = vmatpush.msrb.mxu2 %v290_v56  ;;  %1559 = vmatpush.msrb.mxu3 %v307_v57  ;;  %v340_v56 = vld [vmem:[#allocation2 + $0x8b8] sm:$0xff]  ;;  %v355_v57 = vld [vmem:[#allocation2 + $0x930] sm:$0xff] }
  0x89   :  { %1501 = vmatpush.msrb.mxu0 %v257_v58  ;;  %1520 = vmatpush.msrb.mxu1 %v274_v59  ;;  %v372_v58 = vld [vmem:[#allocation2 + $0x9b8] sm:$0xff]  ;;  %v322_v59 = vld [vmem:[#allocation2 + $0x828] sm:$0xff] }
  0x8a   :  { %1541 = vmatpush.msrb.mxu2 %v289_v60  ;;  %1560 = vmatpush.msrb.mxu3 %v306_v61  ;;  %v339_v60 = vld [vmem:[#allocation2 + $0x8b0] sm:$0xff]  ;;  %v354_v61 = vld [vmem:[#allocation2 + $0x928] sm:$0xff] }
  0x8b   :  { %1502 = vmatpush.msrb.mxu0 %v256_v62  ;;  %1521 = vmatpush.msrb.mxu1 %v273_v63  ;;  %v371_v62 = vld [vmem:[#allocation2 + $0x9b0] sm:$0xff]  ;;  %v321_v63 = vld [vmem:[#allocation2 + $0x820] sm:$0xff] }
  0x8c   :  { %1542 = vmatpush.msrb.mxu2 %v288_v0  ;;  %1561 = vmatpush.msrb.mxu3 %v305_v1  ;;  %v338_v0 = vld [vmem:[#allocation2 + $0x8a8] sm:$0xff]  ;;  %v353_v1 = vld [vmem:[#allocation2 + $0x920] sm:$0xff] }
  0x8d   :  { %1503 = vmatpush.msrb.mxu0 %v255_v2  ;;  %1522 = vmatpush.msrb.mxu1 %v272_v3  ;;  %v370_v2 = vld [vmem:[#allocation2 + $0x9a8] sm:$0xff]  ;;  %v320_v3 = vld [vmem:[#allocation2 + $0x818] sm:$0xff] }
  0x8e   :  { %1543 = vmatpush.msrb.mxu2 %v287_v4  ;;  %1562 = vmatpush.msrb.mxu3 %v304_v5  ;;  %v337_v4 = vld [vmem:[#allocation2 + $0x8a0] sm:$0xff]  ;;  %v352_v5 = vld [vmem:[#allocation2 + $0x918] sm:$0xff] }
  0x8f   :  { %1504 = vmatpush.msrb.mxu0 %v254_v6  ;;  %1523 = vmatpush.msrb.mxu1 %v271_v7  ;;  %v369_v6 = vld [vmem:[#allocation2 + $0x9a0] sm:$0xff]  ;;  %v319_v7 = vld [vmem:[#allocation2 + $0x810] sm:$0xff] }
  0x90   :  { %1544 = vmatpush.msrb.mxu2 %v286_v9  ;;  %1563 = vmatpush.msrb.mxu3 %v303_v10  ;;  %v351_v9 = vld [vmem:[#allocation2 + $0x910] sm:$0xff]  ;;  %v368_v10 = vld [vmem:[#allocation2 + $0x998] sm:$0xff] }
  0x91   :  { %1505 = vmatpush.msrb.mxu0 %v253_v11  ;;  %1524 = vmatpush.msrb.mxu1 %v270_v12  ;;  %v318_v11 = vld [vmem:[#allocation2 + $0x808] sm:$0xff]  ;;  %v335_v12 = vld [vmem:[#allocation2 + $0x890] sm:$0xff] }
  0x92   :  { %1545 = vmatpush.msrb.mxu2 %v285_v13  ;;  %1564 = vmatpush.msrb.mxu3 %v302_v14  ;;  %v50_v13 = vld [vmem:[%s2733_s0 + $0x28] sm:$0xff]  ;;  %v350_v14 = vld [vmem:[#allocation2 + $0x908] sm:$0xff] }
  0x93   :  { %1506 = vmatmul.f32.vlgmr.msrb.gmra.mxu0 %v1122_v15  ;;  %1546 = vmatmul.f32.vlgmr.msrb.gmra.mxu2 %v1124_v16  ;;  %v367_v15 = vld [vmem:[#allocation2 + $0x990] sm:$0xff]  ;;  %1127 = vst [vmem:[#allocation1 + $0x20] ss:$4 sm:$0xff] %v50_v13  ;;  %v317_v16 = vld [vmem:[#allocation2 + $0x800] sm:$0xff]  ;;  %v400_v13 = vld [vmem:[#allocation2 + $0xa98] sm:$0xff] }
  0x94   :  { %1570 = vmatpush.msra.mxu0 %v332_v17  ;;  %1610 = vmatpush.msra.mxu2 %v364_v18  ;;  %v334_v17 = vld [vmem:[#allocation2 + $0x888] sm:$0xff]  ;;  %v349_v18 = vld [vmem:[#allocation2 + $0x900] sm:$0xff] }
  0x95   :  { %1525 = vmatpush.msrb.mxu1 %v269_v19  ;;  %1565 = vmatpush.msrb.mxu3 %v301_v20  ;;  %v366_v19 = vld [vmem:[#allocation2 + $0x988] sm:$0xff]  ;;  %v1128_v20 = vld.sshfl [vmem:[#allocation1] sm:$0xff pattern:$0x73625140] }
  0x96   :  { %1526 = vmatmul.f32.vlgmr.msrb.gmra.mxu1 %v1123_v21  ;;  %1566 = vmatmul.f32.vlgmr.msrb.gmra.mxu3 %v1125_v22  ;;  %v1130_v21 = vld.sshfl [vmem:[#allocation1 + $0x10] sm:$0xff pattern:$0x73625140]  ;;  %v396_v22 = vld [vmem:[#allocation2 + $0xa78] sm:$0xff] }
  0x97   :  { %1571 = vmatpush.msra.mxu0 %v331_v23  ;;  %1590 = vmatpush.msra.mxu1 %v348_v24  ;;  %v428_v23 = vld [vmem:[#allocation2 + $0xb78] sm:$0xff]  ;;  %v333_v24 = vld [vmem:[#allocation2 + $0x880] sm:$0xff] }
  0x98   :  { %1611 = vmatpush.msra.mxu2 %v363_v25  ;;  %1630 = vmatpush.msra.mxu3 %v380_v26  ;;  %v365_v25 = vld [vmem:[#allocation2 + $0x980] sm:$0xff] }
  0x99   :  { %1572 = vmatpush.msra.mxu0 %v330_v27  ;;  %1591 = vmatpush.msra.mxu1 %v347_v28  ;;  %v1129_v26 = vld.sshfl [vmem:[#allocation1 + $0x8] sm:$0xff pattern:$0x73625140]  ;;  %v1131_v27 = vld.sshfl [vmem:[#allocation1 + $0x18] sm:$0xff pattern:$0x73625140] }
  0x9a   :  { %1612 = vmatpush.msra.mxu2 %v362_v29  ;;  %1631 = vmatpush.msra.mxu3 %v379_v30  ;;  %v395_v28 = vld [vmem:[#allocation2 + $0xa70] sm:$0xff]  ;;  %v412_v29 = vld [vmem:[#allocation2 + $0xaf8] sm:$0xff] }
  0x9b   :  { %1573 = vmatpush.msra.mxu0 %v329_v31  ;;  %1592 = vmatpush.msra.mxu1 %v346_v32  ;;  %v427_v30 = vld [vmem:[#allocation2 + $0xb70] sm:$0xff]  ;;  %v444_v31 = vld [vmem:[#allocation2 + $0xbf8] sm:$0xff]  ;;  %v394_v32 = vld [vmem:[#allocation2 + $0xa68] sm:$0xff] }
  0x9c   :  { %1613 = vmatpush.msra.mxu2 %v361_v33  ;;  %1632 = vmatpush.msra.mxu3 %v378_v34  ;;  %v411_v33 = vld [vmem:[#allocation2 + $0xaf0] sm:$0xff]  ;;  %v426_v34 = vld [vmem:[#allocation2 + $0xb68] sm:$0xff] }
  0x9d   :  { %1574 = vmatpush.msra.mxu0 %v328_v35  ;;  %1593 = vmatpush.msra.mxu1 %v345_v36  ;;  %v443_v35 = vld [vmem:[#allocation2 + $0xbf0] sm:$0xff]  ;;  %v393_v36 = vld [vmem:[#allocation2 + $0xa60] sm:$0xff] }
  0x9e   :  { %1614 = vmatpush.msra.mxu2 %v360_v37  ;;  %1633 = vmatpush.msra.mxu3 %v377_v38  ;;  %v410_v37 = vld [vmem:[#allocation2 + $0xae8] sm:$0xff]  ;;  %v425_v38 = vld [vmem:[#allocation2 + $0xb60] sm:$0xff] }
  0x9f   :  { %1575 = vmatpush.msra.mxu0 %v327_v39  ;;  %1594 = vmatpush.msra.mxu1 %v344_v40  ;;  %v442_v39 = vld [vmem:[#allocation2 + $0xbe8] sm:$0xff]  ;;  %v392_v40 = vld [vmem:[#allocation2 + $0xa58] sm:$0xff] }
  0xa0   :  { %1615 = vmatpush.msra.mxu2 %v359_v41  ;;  %1634 = vmatpush.msra.mxu3 %v376_v42  ;;  %v409_v41 = vld [vmem:[#allocation2 + $0xae0] sm:$0xff]  ;;  %v424_v42 = vld [vmem:[#allocation2 + $0xb58] sm:$0xff] }
  0xa1   :  { %1576 = vmatpush.msra.mxu0 %v326_v43  ;;  %1595 = vmatpush.msra.mxu1 %v343_v44  ;;  %v441_v43 = vld [vmem:[#allocation2 + $0xbe0] sm:$0xff]  ;;  %v391_v44 = vld [vmem:[#allocation2 + $0xa50] sm:$0xff] }
  0xa2   :  { %1616 = vmatpush.msra.mxu2 %v358_v45  ;;  %1635 = vmatpush.msra.mxu3 %v375_v46  ;;  %v408_v45 = vld [vmem:[#allocation2 + $0xad8] sm:$0xff]  ;;  %v423_v46 = vld [vmem:[#allocation2 + $0xb50] sm:$0xff] }
  0xa3   :  { %1577 = vmatpush.msra.mxu0 %v325_v47  ;;  %1596 = vmatpush.msra.mxu1 %v342_v48  ;;  %v440_v47 = vld [vmem:[#allocation2 + $0xbd8] sm:$0xff]  ;;  %v390_v48 = vld [vmem:[#allocation2 + $0xa48] sm:$0xff] }
  0xa4   :  { %1617 = vmatpush.msra.mxu2 %v357_v49  ;;  %1636 = vmatpush.msra.mxu3 %v374_v50  ;;  %v407_v49 = vld [vmem:[#allocation2 + $0xad0] sm:$0xff]  ;;  %v422_v50 = vld [vmem:[#allocation2 + $0xb48] sm:$0xff] }
  0xa5   :  { %1578 = vmatpush.msra.mxu0 %v324_v51  ;;  %1597 = vmatpush.msra.mxu1 %v341_v52  ;;  %v439_v51 = vld [vmem:[#allocation2 + $0xbd0] sm:$0xff]  ;;  %v389_v52 = vld [vmem:[#allocation2 + $0xa40] sm:$0xff] }
  0xa6   :  { %1618 = vmatpush.msra.mxu2 %v356_v53  ;;  %1637 = vmatpush.msra.mxu3 %v373_v54  ;;  %v406_v53 = vld [vmem:[#allocation2 + $0xac8] sm:$0xff]  ;;  %v421_v54 = vld [vmem:[#allocation2 + $0xb40] sm:$0xff] }
  0xa7   :  { %1579 = vmatpush.msra.mxu0 %v323_v55  ;;  %1598 = vmatpush.msra.mxu1 %v340_v56  ;;  %v438_v55 = vld [vmem:[#allocation2 + $0xbc8] sm:$0xff]  ;;  %v388_v56 = vld [vmem:[#allocation2 + $0xa38] sm:$0xff] }
  0xa8   :  { %1619 = vmatpush.msra.mxu2 %v355_v57  ;;  %1638 = vmatpush.msra.mxu3 %v372_v58  ;;  %v405_v57 = vld [vmem:[#allocation2 + $0xac0] sm:$0xff]  ;;  %v420_v58 = vld [vmem:[#allocation2 + $0xb38] sm:$0xff] }
  0xa9   :  { %1580 = vmatpush.msra.mxu0 %v322_v59  ;;  %1599 = vmatpush.msra.mxu1 %v339_v60  ;;  %v437_v59 = vld [vmem:[#allocation2 + $0xbc0] sm:$0xff]  ;;  %v387_v60 = vld [vmem:[#allocation2 + $0xa30] sm:$0xff] }
  0xaa   :  { %1620 = vmatpush.msra.mxu2 %v354_v61  ;;  %1639 = vmatpush.msra.mxu3 %v371_v62  ;;  %v404_v61 = vld [vmem:[#allocation2 + $0xab8] sm:$0xff]  ;;  %v419_v62 = vld [vmem:[#allocation2 + $0xb30] sm:$0xff] }
  0xab   :  { %1581 = vmatpush.msra.mxu0 %v321_v63  ;;  %1600 = vmatpush.msra.mxu1 %v338_v0  ;;  %v436_v63 = vld [vmem:[#allocation2 + $0xbb8] sm:$0xff]  ;;  %v386_v0 = vld [vmem:[#allocation2 + $0xa28] sm:$0xff] }
  0xac   :  { %1621 = vmatpush.msra.mxu2 %v353_v1  ;;  %1640 = vmatpush.msra.mxu3 %v370_v2  ;;  %v403_v1 = vld [vmem:[#allocation2 + $0xab0] sm:$0xff]  ;;  %v418_v2 = vld [vmem:[#allocation2 + $0xb28] sm:$0xff] }
  0xad   :  { %1582 = vmatpush.msra.mxu0 %v320_v3  ;;  %1601 = vmatpush.msra.mxu1 %v337_v4  ;;  %v435_v3 = vld [vmem:[#allocation2 + $0xbb0] sm:$0xff]  ;;  %v385_v4 = vld [vmem:[#allocation2 + $0xa20] sm:$0xff] }
  0xae   :  { %1622 = vmatpush.msra.mxu2 %v352_v5  ;;  %1641 = vmatpush.msra.mxu3 %v369_v6  ;;  %v402_v5 = vld [vmem:[#allocation2 + $0xaa8] sm:$0xff]  ;;  %v417_v6 = vld [vmem:[#allocation2 + $0xb20] sm:$0xff] }
  0xaf   :  { %1583 = vmatpush.msra.mxu0 %v319_v7  ;;  %1602 = vmatpush.msra.mxu1 %v336_v8  ;;  %v434_v7 = vld [vmem:[#allocation2 + $0xba8] sm:$0xff]  ;;  %v384_v8 = vld [vmem:[#allocation2 + $0xa18] sm:$0xff] }
  0xb0   :  { %1623 = vmatpush.msra.mxu2 %v351_v9  ;;  %1642 = vmatpush.msra.mxu3 %v368_v10  ;;  %v401_v9 = vld [vmem:[#allocation2 + $0xaa0] sm:$0xff]  ;;  %v416_v10 = vld [vmem:[#allocation2 + $0xb18] sm:$0xff] }
  0xb1   :  { %1584 = vmatpush.msra.mxu0 %v318_v11  ;;  %1603 = vmatpush.msra.mxu1 %v335_v12  ;;  %v433_v11 = vld [vmem:[#allocation2 + $0xba0] sm:$0xff]  ;;  %v383_v12 = vld [vmem:[#allocation2 + $0xa10] sm:$0xff] }
  0xb2   :  { %1624 = vmatpush.msra.mxu2 %v350_v14  ;;  %1643 = vmatpush.msra.mxu3 %v367_v15  ;;  %v415_v14 = vld [vmem:[#allocation2 + $0xb10] sm:$0xff]  ;;  %v432_v15 = vld [vmem:[#allocation2 + $0xb98] sm:$0xff] }
  0xb3   :  { %1585 = vmatpush.msra.mxu0 %v317_v16  ;;  %1604 = vmatpush.msra.mxu1 %v334_v17  ;;  %v382_v16 = vld [vmem:[#allocation2 + $0xa08] sm:$0xff]  ;;  %v399_v17 = vld [vmem:[#allocation2 + $0xa90] sm:$0xff] }
  0xb4   :  { %1625 = vmatpush.msra.mxu2 %v349_v18  ;;  %1644 = vmatpush.msra.mxu3 %v366_v19  ;;  %v51_v18 = vld [vmem:[%s2733_s0 + $0x30] sm:$0xff] }
  0xb5   :  { %1586 = vmatmul.f32.vlgmr.msra.gmra.mxu0 %v1128_v20  ;;  %1626 = vmatmul.f32.vlgmr.msra.gmra.mxu2 %v1130_v21  ;;  %v414_v19 = vld [vmem:[#allocation2 + $0xb08] sm:$0xff]  ;;  %v431_v20 = vld [vmem:[#allocation2 + $0xb90] sm:$0xff]  ;;  %1136 = vst [vmem:[#allocation1] ss:$4 sm:$0xff] %v51_v18  ;;  %v381_v21 = vld [vmem:[#allocation2 + $0xa00] sm:$0xff] }
  0xb6   :  { %1650 = vmatpush.msrb.mxu0 %v396_v22  ;;  %1690 = vmatpush.msrb.mxu2 %v428_v23  ;;  %v398_v22 = vld [vmem:[#allocation2 + $0xa88] sm:$0xff]  ;;  %v413_v23 = vld [vmem:[#allocation2 + $0xb00] sm:$0xff]  ;;  %v464_v18 = vld [vmem:[#allocation2 + $0xc98] sm:$0xff] }
  0xb7   :  { %1605 = vmatpush.msra.mxu1 %v333_v24  ;;  %1645 = vmatpush.msra.mxu3 %v365_v25  ;;  %v430_v24 = vld [vmem:[#allocation2 + $0xb88] sm:$0xff]  ;;  %v1132_v25 = vld.sshfl [vmem:[#allocation1 + $0x20] sm:$0xff pattern:$0x73625140] }
  0xb8   :  { %1606 = vmatmul.f32.vlgmr.msra.gmra.mxu1 %v1129_v26  ;;  %1646 = vmatmul.f32.vlgmr.msra.gmra.mxu3 %v1131_v27  ;;  %v1134_v26 = vld.sshfl [vmem:[#allocation1 + $0x30] sm:$0xff pattern:$0x73625140]  ;;  %v460_v27 = vld [vmem:[#allocation2 + $0xc78] sm:$0xff] }
  0xb9   :  { %1651 = vmatpush.msrb.mxu0 %v395_v28  ;;  %1670 = vmatpush.msrb.mxu1 %v412_v29  ;;  %v492_v28 = vld [vmem:[#allocation2 + $0xd78] sm:$0xff]  ;;  %v397_v29 = vld [vmem:[#allocation2 + $0xa80] sm:$0xff] }
  0xba   :  { %1691 = vmatpush.msrb.mxu2 %v427_v30  ;;  %1710 = vmatpush.msrb.mxu3 %v444_v31  ;;  %v429_v30 = vld [vmem:[#allocation2 + $0xb80] sm:$0xff] }
  0xbb   :  { %1652 = vmatpush.msrb.mxu0 %v394_v32  ;;  %1671 = vmatpush.msrb.mxu1 %v411_v33  ;;  %v1133_v31 = vld.sshfl [vmem:[#allocation1 + $0x28] sm:$0xff pattern:$0x73625140]  ;;  %v1135_v32 = vld.sshfl [vmem:[#allocation1 + $0x38] sm:$0xff pattern:$0x73625140] }
  0xbc   :  { %1692 = vmatpush.msrb.mxu2 %v426_v34  ;;  %1711 = vmatpush.msrb.mxu3 %v443_v35  ;;  %v459_v33 = vld [vmem:[#allocation2 + $0xc70] sm:$0xff]  ;;  %v476_v34 = vld [vmem:[#allocation2 + $0xcf8] sm:$0xff] }
  0xbd   :  { %1653 = vmatpush.msrb.mxu0 %v393_v36  ;;  %1672 = vmatpush.msrb.mxu1 %v410_v37  ;;  %v491_v35 = vld [vmem:[#allocation2 + $0xd70] sm:$0xff]  ;;  %v508_v36 = vld [vmem:[#allocation2 + $0xdf8] sm:$0xff]  ;;  %v458_v37 = vld [vmem:[#allocation2 + $0xc68] sm:$0xff] }
  0xbe   :  { %1693 = vmatpush.msrb.mxu2 %v425_v38  ;;  %1712 = vmatpush.msrb.mxu3 %v442_v39  ;;  %v475_v38 = vld [vmem:[#allocation2 + $0xcf0] sm:$0xff]  ;;  %v490_v39 = vld [vmem:[#allocation2 + $0xd68] sm:$0xff] }
  0xbf   :  { %1654 = vmatpush.msrb.mxu0 %v392_v40  ;;  %1673 = vmatpush.msrb.mxu1 %v409_v41  ;;  %v507_v40 = vld [vmem:[#allocation2 + $0xdf0] sm:$0xff]  ;;  %v457_v41 = vld [vmem:[#allocation2 + $0xc60] sm:$0xff] }
  0xc0   :  { %1694 = vmatpush.msrb.mxu2 %v424_v42  ;;  %1713 = vmatpush.msrb.mxu3 %v441_v43  ;;  %v474_v42 = vld [vmem:[#allocation2 + $0xce8] sm:$0xff]  ;;  %v489_v43 = vld [vmem:[#allocation2 + $0xd60] sm:$0xff] }
  0xc1   :  { %1655 = vmatpush.msrb.mxu0 %v391_v44  ;;  %1674 = vmatpush.msrb.mxu1 %v408_v45  ;;  %v506_v44 = vld [vmem:[#allocation2 + $0xde8] sm:$0xff]  ;;  %v456_v45 = vld [vmem:[#allocation2 + $0xc58] sm:$0xff] }
  0xc2   :  { %1695 = vmatpush.msrb.mxu2 %v423_v46  ;;  %1714 = vmatpush.msrb.mxu3 %v440_v47  ;;  %v473_v46 = vld [vmem:[#allocation2 + $0xce0] sm:$0xff]  ;;  %v488_v47 = vld [vmem:[#allocation2 + $0xd58] sm:$0xff] }
  0xc3   :  { %1656 = vmatpush.msrb.mxu0 %v390_v48  ;;  %1675 = vmatpush.msrb.mxu1 %v407_v49  ;;  %v505_v48 = vld [vmem:[#allocation2 + $0xde0] sm:$0xff]  ;;  %v455_v49 = vld [vmem:[#allocation2 + $0xc50] sm:$0xff] }
  0xc4   :  { %1696 = vmatpush.msrb.mxu2 %v422_v50  ;;  %1715 = vmatpush.msrb.mxu3 %v439_v51  ;;  %v472_v50 = vld [vmem:[#allocation2 + $0xcd8] sm:$0xff]  ;;  %v487_v51 = vld [vmem:[#allocation2 + $0xd50] sm:$0xff] }
  0xc5   :  { %1657 = vmatpush.msrb.mxu0 %v389_v52  ;;  %1676 = vmatpush.msrb.mxu1 %v406_v53  ;;  %v504_v52 = vld [vmem:[#allocation2 + $0xdd8] sm:$0xff]  ;;  %v454_v53 = vld [vmem:[#allocation2 + $0xc48] sm:$0xff] }
  0xc6   :  { %1697 = vmatpush.msrb.mxu2 %v421_v54  ;;  %1716 = vmatpush.msrb.mxu3 %v438_v55  ;;  %v471_v54 = vld [vmem:[#allocation2 + $0xcd0] sm:$0xff]  ;;  %v486_v55 = vld [vmem:[#allocation2 + $0xd48] sm:$0xff] }
  0xc7   :  { %1658 = vmatpush.msrb.mxu0 %v388_v56  ;;  %1677 = vmatpush.msrb.mxu1 %v405_v57  ;;  %v503_v56 = vld [vmem:[#allocation2 + $0xdd0] sm:$0xff]  ;;  %v453_v57 = vld [vmem:[#allocation2 + $0xc40] sm:$0xff] }
  0xc8   :  { %1698 = vmatpush.msrb.mxu2 %v420_v58  ;;  %1717 = vmatpush.msrb.mxu3 %v437_v59  ;;  %v470_v58 = vld [vmem:[#allocation2 + $0xcc8] sm:$0xff]  ;;  %v485_v59 = vld [vmem:[#allocation2 + $0xd40] sm:$0xff] }
  0xc9   :  { %1659 = vmatpush.msrb.mxu0 %v387_v60  ;;  %1678 = vmatpush.msrb.mxu1 %v404_v61  ;;  %v502_v60 = vld [vmem:[#allocation2 + $0xdc8] sm:$0xff]  ;;  %v452_v61 = vld [vmem:[#allocation2 + $0xc38] sm:$0xff] }
  0xca   :  { %1699 = vmatpush.msrb.mxu2 %v419_v62  ;;  %1718 = vmatpush.msrb.mxu3 %v436_v63  ;;  %v469_v62 = vld [vmem:[#allocation2 + $0xcc0] sm:$0xff]  ;;  %v484_v63 = vld [vmem:[#allocation2 + $0xd38] sm:$0xff] }
  0xcb   :  { %1660 = vmatpush.msrb.mxu0 %v386_v0  ;;  %1679 = vmatpush.msrb.mxu1 %v403_v1  ;;  %v501_v0 = vld [vmem:[#allocation2 + $0xdc0] sm:$0xff]  ;;  %v451_v1 = vld [vmem:[#allocation2 + $0xc30] sm:$0xff] }
  0xcc   :  { %1700 = vmatpush.msrb.mxu2 %v418_v2  ;;  %1719 = vmatpush.msrb.mxu3 %v435_v3  ;;  %v468_v2 = vld [vmem:[#allocation2 + $0xcb8] sm:$0xff]  ;;  %v483_v3 = vld [vmem:[#allocation2 + $0xd30] sm:$0xff] }
  0xcd   :  { %1661 = vmatpush.msrb.mxu0 %v385_v4  ;;  %1680 = vmatpush.msrb.mxu1 %v402_v5  ;;  %v500_v4 = vld [vmem:[#allocation2 + $0xdb8] sm:$0xff]  ;;  %v450_v5 = vld [vmem:[#allocation2 + $0xc28] sm:$0xff] }
  0xce   :  { %1701 = vmatpush.msrb.mxu2 %v417_v6  ;;  %1720 = vmatpush.msrb.mxu3 %v434_v7  ;;  %v467_v6 = vld [vmem:[#allocation2 + $0xcb0] sm:$0xff]  ;;  %v482_v7 = vld [vmem:[#allocation2 + $0xd28] sm:$0xff] }
  0xcf   :  { %1662 = vmatpush.msrb.mxu0 %v384_v8  ;;  %1681 = vmatpush.msrb.mxu1 %v401_v9  ;;  %v499_v8 = vld [vmem:[#allocation2 + $0xdb0] sm:$0xff]  ;;  %v449_v9 = vld [vmem:[#allocation2 + $0xc20] sm:$0xff] }
  0xd0   :  { %1702 = vmatpush.msrb.mxu2 %v416_v10  ;;  %1721 = vmatpush.msrb.mxu3 %v433_v11  ;;  %v466_v10 = vld [vmem:[#allocation2 + $0xca8] sm:$0xff]  ;;  %v481_v11 = vld [vmem:[#allocation2 + $0xd20] sm:$0xff] }
  0xd1   :  { %1663 = vmatpush.msrb.mxu0 %v383_v12  ;;  %1682 = vmatpush.msrb.mxu1 %v400_v13  ;;  %v498_v12 = vld [vmem:[#allocation2 + $0xda8] sm:$0xff]  ;;  %v448_v13 = vld [vmem:[#allocation2 + $0xc18] sm:$0xff] }
  0xd2   :  { %1703 = vmatpush.msrb.mxu2 %v415_v14  ;;  %1722 = vmatpush.msrb.mxu3 %v432_v15  ;;  %v465_v14 = vld [vmem:[#allocation2 + $0xca0] sm:$0xff]  ;;  %v480_v15 = vld [vmem:[#allocation2 + $0xd18] sm:$0xff] }
  0xd3   :  { %1664 = vmatpush.msrb.mxu0 %v382_v16  ;;  %1683 = vmatpush.msrb.mxu1 %v399_v17  ;;  %v497_v16 = vld [vmem:[#allocation2 + $0xda0] sm:$0xff]  ;;  %v447_v17 = vld [vmem:[#allocation2 + $0xc10] sm:$0xff] }
  0xd4   :  { %1704 = vmatpush.msrb.mxu2 %v414_v19  ;;  %1723 = vmatpush.msrb.mxu3 %v431_v20  ;;  %v479_v19 = vld [vmem:[#allocation2 + $0xd10] sm:$0xff]  ;;  %v496_v20 = vld [vmem:[#allocation2 + $0xd98] sm:$0xff] }
  0xd5   :  { %1665 = vmatpush.msrb.mxu0 %v381_v21  ;;  %1684 = vmatpush.msrb.mxu1 %v398_v22  ;;  %v446_v21 = vld [vmem:[#allocation2 + $0xc08] sm:$0xff]  ;;  %v463_v22 = vld [vmem:[#allocation2 + $0xc90] sm:$0xff] }
  0xd6   :  { %1705 = vmatpush.msrb.mxu2 %v413_v23  ;;  %1724 = vmatpush.msrb.mxu3 %v430_v24  ;;  %v52_v23 = vld [vmem:[%s2733_s0 + $0x38] sm:$0xff]  ;;  %v478_v24 = vld [vmem:[#allocation2 + $0xd08] sm:$0xff] }
  0xd7   :  { %1666 = vmatmul.f32.vlgmr.msrb.gmra.mxu0 %v1132_v25  ;;  %1706 = vmatmul.f32.vlgmr.msrb.gmra.mxu2 %v1134_v26  ;;  %v495_v25 = vld [vmem:[#allocation2 + $0xd90] sm:$0xff]  ;;  %1137 = vst [vmem:[#allocation1 + $0x20] ss:$4 sm:$0xff] %v52_v23  ;;  %v445_v26 = vld [vmem:[#allocation2 + $0xc00] sm:$0xff]  ;;  %v528_v23 = vld [vmem:[#allocation2 + $0xe98] sm:$0xff] }
  0xd8   :  { %1730 = vmatpush.msra.mxu0 %v460_v27  ;;  %1770 = vmatpush.msra.mxu2 %v492_v28  ;;  %v462_v27 = vld [vmem:[#allocation2 + $0xc88] sm:$0xff]  ;;  %v477_v28 = vld [vmem:[#allocation2 + $0xd00] sm:$0xff] }
  0xd9   :  { %1685 = vmatpush.msrb.mxu1 %v397_v29  ;;  %1725 = vmatpush.msrb.mxu3 %v429_v30  ;;  %v494_v29 = vld [vmem:[#allocation2 + $0xd88] sm:$0xff]  ;;  %v1138_v30 = vld.sshfl [vmem:[#allocation1] sm:$0xff pattern:$0x73625140] }
  0xda   :  { %1686 = vmatmul.f32.vlgmr.msrb.gmra.mxu1 %v1133_v31  ;;  %1726 = vmatmul.f32.vlgmr.msrb.gmra.mxu3 %v1135_v32  ;;  %v1140_v31 = vld.sshfl [vmem:[#allocation1 + $0x10] sm:$0xff pattern:$0x73625140]  ;;  %v524_v32 = vld [vmem:[#allocation2 + $0xe78] sm:$0xff] }
  0xdb   :  { %1731 = vmatpush.msra.mxu0 %v459_v33  ;;  %1750 = vmatpush.msra.mxu1 %v476_v34  ;;  %v556_v33 = vld [vmem:[#allocation2 + $0xf78] sm:$0xff]  ;;  %v461_v34 = vld [vmem:[#allocation2 + $0xc80] sm:$0xff] }
  0xdc   :  { %1771 = vmatpush.msra.mxu2 %v491_v35  ;;  %1790 = vmatpush.msra.mxu3 %v508_v36  ;;  %v493_v35 = vld [vmem:[#allocation2 + $0xd80] sm:$0xff] }
  0xdd   :  { %1732 = vmatpush.msra.mxu0 %v458_v37  ;;  %1751 = vmatpush.msra.mxu1 %v475_v38  ;;  %v1139_v36 = vld.sshfl [vmem:[#allocation1 + $0x8] sm:$0xff pattern:$0x73625140]  ;;  %v1141_v37 = vld.sshfl [vmem:[#allocation1 + $0x18] sm:$0xff pattern:$0x73625140] }
  0xde   :  { %1772 = vmatpush.msra.mxu2 %v490_v39  ;;  %1791 = vmatpush.msra.mxu3 %v507_v40  ;;  %v523_v38 = vld [vmem:[#allocation2 + $0xe70] sm:$0xff]  ;;  %v540_v39 = vld [vmem:[#allocation2 + $0xef8] sm:$0xff] }
  0xdf   :  { %1733 = vmatpush.msra.mxu0 %v457_v41  ;;  %1752 = vmatpush.msra.mxu1 %v474_v42  ;;  %v555_v40 = vld [vmem:[#allocation2 + $0xf70] sm:$0xff]  ;;  %v572_v41 = vld [vmem:[#allocation2 + $0xff8] sm:$0xff]  ;;  %v522_v42 = vld [vmem:[#allocation2 + $0xe68] sm:$0xff] }
  0xe0   :  { %1773 = vmatpush.msra.mxu2 %v489_v43  ;;  %1792 = vmatpush.msra.mxu3 %v506_v44  ;;  %v539_v43 = vld [vmem:[#allocation2 + $0xef0] sm:$0xff]  ;;  %v554_v44 = vld [vmem:[#allocation2 + $0xf68] sm:$0xff] }
  0xe1   :  { %1734 = vmatpush.msra.mxu0 %v456_v45  ;;  %1753 = vmatpush.msra.mxu1 %v473_v46  ;;  %v571_v45 = vld [vmem:[#allocation2 + $0xff0] sm:$0xff]  ;;  %v521_v46 = vld [vmem:[#allocation2 + $0xe60] sm:$0xff] }
  0xe2   :  { %1774 = vmatpush.msra.mxu2 %v488_v47  ;;  %1793 = vmatpush.msra.mxu3 %v505_v48  ;;  %v538_v47 = vld [vmem:[#allocation2 + $0xee8] sm:$0xff]  ;;  %v553_v48 = vld [vmem:[#allocation2 + $0xf60] sm:$0xff] }
  0xe3   :  { %1735 = vmatpush.msra.mxu0 %v455_v49  ;;  %1754 = vmatpush.msra.mxu1 %v472_v50  ;;  %v570_v49 = vld [vmem:[#allocation2 + $0xfe8] sm:$0xff]  ;;  %v520_v50 = vld [vmem:[#allocation2 + $0xe58] sm:$0xff] }
  0xe4   :  { %1775 = vmatpush.msra.mxu2 %v487_v51  ;;  %1794 = vmatpush.msra.mxu3 %v504_v52  ;;  %v537_v51 = vld [vmem:[#allocation2 + $0xee0] sm:$0xff]  ;;  %v552_v52 = vld [vmem:[#allocation2 + $0xf58] sm:$0xff] }
  0xe5   :  { %1736 = vmatpush.msra.mxu0 %v454_v53  ;;  %1755 = vmatpush.msra.mxu1 %v471_v54  ;;  %v569_v53 = vld [vmem:[#allocation2 + $0xfe0] sm:$0xff]  ;;  %v519_v54 = vld [vmem:[#allocation2 + $0xe50] sm:$0xff] }
  0xe6   :  { %1776 = vmatpush.msra.mxu2 %v486_v55  ;;  %1795 = vmatpush.msra.mxu3 %v503_v56  ;;  %v536_v55 = vld [vmem:[#allocation2 + $0xed8] sm:$0xff]  ;;  %v551_v56 = vld [vmem:[#allocation2 + $0xf50] sm:$0xff] }
  0xe7   :  { %1737 = vmatpush.msra.mxu0 %v453_v57  ;;  %1756 = vmatpush.msra.mxu1 %v470_v58  ;;  %v568_v57 = vld [vmem:[#allocation2 + $0xfd8] sm:$0xff]  ;;  %v518_v58 = vld [vmem:[#allocation2 + $0xe48] sm:$0xff] }
  0xe8   :  { %1777 = vmatpush.msra.mxu2 %v485_v59  ;;  %1796 = vmatpush.msra.mxu3 %v502_v60  ;;  %v535_v59 = vld [vmem:[#allocation2 + $0xed0] sm:$0xff]  ;;  %v550_v60 = vld [vmem:[#allocation2 + $0xf48] sm:$0xff] }
  0xe9   :  { %1738 = vmatpush.msra.mxu0 %v452_v61  ;;  %1757 = vmatpush.msra.mxu1 %v469_v62  ;;  %v567_v61 = vld [vmem:[#allocation2 + $0xfd0] sm:$0xff]  ;;  %v517_v62 = vld [vmem:[#allocation2 + $0xe40] sm:$0xff] }
  0xea   :  { %1778 = vmatpush.msra.mxu2 %v484_v63  ;;  %1797 = vmatpush.msra.mxu3 %v501_v0  ;;  %v534_v63 = vld [vmem:[#allocation2 + $0xec8] sm:$0xff]  ;;  %v549_v0 = vld [vmem:[#allocation2 + $0xf40] sm:$0xff] }
  0xeb   :  { %1739 = vmatpush.msra.mxu0 %v451_v1  ;;  %1758 = vmatpush.msra.mxu1 %v468_v2  ;;  %v566_v1 = vld [vmem:[#allocation2 + $0xfc8] sm:$0xff]  ;;  %v516_v2 = vld [vmem:[#allocation2 + $0xe38] sm:$0xff] }
  0xec   :  { %1779 = vmatpush.msra.mxu2 %v483_v3  ;;  %1798 = vmatpush.msra.mxu3 %v500_v4  ;;  %v533_v3 = vld [vmem:[#allocation2 + $0xec0] sm:$0xff]  ;;  %v548_v4 = vld [vmem:[#allocation2 + $0xf38] sm:$0xff] }
  0xed   :  { %1740 = vmatpush.msra.mxu0 %v450_v5  ;;  %1759 = vmatpush.msra.mxu1 %v467_v6  ;;  %v565_v5 = vld [vmem:[#allocation2 + $0xfc0] sm:$0xff]  ;;  %v515_v6 = vld [vmem:[#allocation2 + $0xe30] sm:$0xff] }
  0xee   :  { %1780 = vmatpush.msra.mxu2 %v482_v7  ;;  %1799 = vmatpush.msra.mxu3 %v499_v8  ;;  %v532_v7 = vld [vmem:[#allocation2 + $0xeb8] sm:$0xff]  ;;  %v547_v8 = vld [vmem:[#allocation2 + $0xf30] sm:$0xff] }
  0xef   :  { %1741 = vmatpush.msra.mxu0 %v449_v9  ;;  %1760 = vmatpush.msra.mxu1 %v466_v10  ;;  %v564_v9 = vld [vmem:[#allocation2 + $0xfb8] sm:$0xff]  ;;  %v514_v10 = vld [vmem:[#allocation2 + $0xe28] sm:$0xff] }
  0xf0   :  { %1781 = vmatpush.msra.mxu2 %v481_v11  ;;  %1800 = vmatpush.msra.mxu3 %v498_v12  ;;  %v531_v11 = vld [vmem:[#allocation2 + $0xeb0] sm:$0xff]  ;;  %v546_v12 = vld [vmem:[#allocation2 + $0xf28] sm:$0xff] }
  0xf1   :  { %1742 = vmatpush.msra.mxu0 %v448_v13  ;;  %1761 = vmatpush.msra.mxu1 %v465_v14  ;;  %v563_v13 = vld [vmem:[#allocation2 + $0xfb0] sm:$0xff]  ;;  %v513_v14 = vld [vmem:[#allocation2 + $0xe20] sm:$0xff] }
  0xf2   :  { %1782 = vmatpush.msra.mxu2 %v480_v15  ;;  %1801 = vmatpush.msra.mxu3 %v497_v16  ;;  %v530_v15 = vld [vmem:[#allocation2 + $0xea8] sm:$0xff]  ;;  %v545_v16 = vld [vmem:[#allocation2 + $0xf20] sm:$0xff] }
  0xf3   :  { %1743 = vmatpush.msra.mxu0 %v447_v17  ;;  %1762 = vmatpush.msra.mxu1 %v464_v18  ;;  %v562_v17 = vld [vmem:[#allocation2 + $0xfa8] sm:$0xff]  ;;  %v512_v18 = vld [vmem:[#allocation2 + $0xe18] sm:$0xff] }
  0xf4   :  { %1783 = vmatpush.msra.mxu2 %v479_v19  ;;  %1802 = vmatpush.msra.mxu3 %v496_v20  ;;  %v529_v19 = vld [vmem:[#allocation2 + $0xea0] sm:$0xff]  ;;  %v544_v20 = vld [vmem:[#allocation2 + $0xf18] sm:$0xff] }
  0xf5   :  { %1744 = vmatpush.msra.mxu0 %v446_v21  ;;  %1763 = vmatpush.msra.mxu1 %v463_v22  ;;  %v561_v21 = vld [vmem:[#allocation2 + $0xfa0] sm:$0xff]  ;;  %v511_v22 = vld [vmem:[#allocation2 + $0xe10] sm:$0xff] }
  0xf6   :  { %1784 = vmatpush.msra.mxu2 %v478_v24  ;;  %1803 = vmatpush.msra.mxu3 %v495_v25  ;;  %v543_v24 = vld [vmem:[#allocation2 + $0xf10] sm:$0xff]  ;;  %v560_v25 = vld [vmem:[#allocation2 + $0xf98] sm:$0xff] }
  0xf7   :  { %1745 = vmatpush.msra.mxu0 %v445_v26  ;;  %1764 = vmatpush.msra.mxu1 %v462_v27  ;;  %v510_v26 = vld [vmem:[#allocation2 + $0xe08] sm:$0xff]  ;;  %v527_v27 = vld [vmem:[#allocation2 + $0xe90] sm:$0xff] }
  0xf8   :  { %1785 = vmatpush.msra.mxu2 %v477_v28  ;;  %1804 = vmatpush.msra.mxu3 %v494_v29  ;;  %v53_v28 = vld [vmem:[%s2733_s0 + $0x40] sm:$0xff]  ;;  %v542_v29 = vld [vmem:[#allocation2 + $0xf08] sm:$0xff] }
  0xf9   :  { %1746 = vmatmul.f32.vlgmr.msra.gmra.mxu0 %v1138_v30  ;;  %1786 = vmatmul.f32.vlgmr.msra.gmra.mxu2 %v1140_v31  ;;  %v559_v30 = vld [vmem:[#allocation2 + $0xf90] sm:$0xff]  ;;  %1146 = vst [vmem:[#allocation1] ss:$4 sm:$0xff] %v53_v28  ;;  %v509_v31 = vld [vmem:[#allocation2 + $0xe00] sm:$0xff]  ;;  %v592_v28 = vld [vmem:[#allocation2 + $0x1098] sm:$0xff] }
  0xfa   :  { %1810 = vmatpush.msrb.mxu0 %v524_v32  ;;  %1850 = vmatpush.msrb.mxu2 %v556_v33  ;;  %v526_v32 = vld [vmem:[#allocation2 + $0xe88] sm:$0xff]  ;;  %v541_v33 = vld [vmem:[#allocation2 + $0xf00] sm:$0xff] }
  0xfb   :  { %1765 = vmatpush.msra.mxu1 %v461_v34  ;;  %1805 = vmatpush.msra.mxu3 %v493_v35  ;;  %v558_v34 = vld [vmem:[#allocation2 + $0xf88] sm:$0xff]  ;;  %v1142_v35 = vld.sshfl [vmem:[#allocation1 + $0x20] sm:$0xff pattern:$0x73625140] }
  0xfc   :  { %1766 = vmatmul.f32.vlgmr.msra.gmra.mxu1 %v1139_v36  ;;  %1806 = vmatmul.f32.vlgmr.msra.gmra.mxu3 %v1141_v37  ;;  %v1144_v36 = vld.sshfl [vmem:[#allocation1 + $0x30] sm:$0xff pattern:$0x73625140]  ;;  %v588_v37 = vld [vmem:[#allocation2 + $0x1078] sm:$0xff] }
  0xfd   :  { %1811 = vmatpush.msrb.mxu0 %v523_v38  ;;  %1830 = vmatpush.msrb.mxu1 %v540_v39  ;;  %v620_v38 = vld [vmem:[#allocation2 + $0x1178] sm:$0xff]  ;;  %v525_v39 = vld [vmem:[#allocation2 + $0xe80] sm:$0xff] }
  0xfe   :  { %1851 = vmatpush.msrb.mxu2 %v555_v40  ;;  %1870 = vmatpush.msrb.mxu3 %v572_v41  ;;  %v557_v40 = vld [vmem:[#allocation2 + $0xf80] sm:$0xff] }
  0xff   :  { %1812 = vmatpush.msrb.mxu0 %v522_v42  ;;  %1831 = vmatpush.msrb.mxu1 %v539_v43  ;;  %v1143_v41 = vld.sshfl [vmem:[#allocation1 + $0x28] sm:$0xff pattern:$0x73625140]  ;;  %v1145_v42 = vld.sshfl [vmem:[#allocation1 + $0x38] sm:$0xff pattern:$0x73625140] }
 0x100   :  { %1852 = vmatpush.msrb.mxu2 %v554_v44  ;;  %1871 = vmatpush.msrb.mxu3 %v571_v45  ;;  %v587_v43 = vld [vmem:[#allocation2 + $0x1070] sm:$0xff]  ;;  %v604_v44 = vld [vmem:[#allocation2 + $0x10f8] sm:$0xff] }
 0x101   :  { %1813 = vmatpush.msrb.mxu0 %v521_v46  ;;  %1832 = vmatpush.msrb.mxu1 %v538_v47  ;;  %v619_v45 = vld [vmem:[#allocation2 + $0x1170] sm:$0xff]  ;;  %v636_v46 = vld [vmem:[#allocation2 + $0x11f8] sm:$0xff]  ;;  %v586_v47 = vld [vmem:[#allocation2 + $0x1068] sm:$0xff] }
 0x102   :  { %1853 = vmatpush.msrb.mxu2 %v553_v48  ;;  %1872 = vmatpush.msrb.mxu3 %v570_v49  ;;  %v603_v48 = vld [vmem:[#allocation2 + $0x10f0] sm:$0xff]  ;;  %v618_v49 = vld [vmem:[#allocation2 + $0x1168] sm:$0xff] }
 0x103   :  { %1814 = vmatpush.msrb.mxu0 %v520_v50  ;;  %1833 = vmatpush.msrb.mxu1 %v537_v51  ;;  %v635_v50 = vld [vmem:[#allocation2 + $0x11f0] sm:$0xff]  ;;  %v585_v51 = vld [vmem:[#allocation2 + $0x1060] sm:$0xff] }
 0x104   :  { %1854 = vmatpush.msrb.mxu2 %v552_v52  ;;  %1873 = vmatpush.msrb.mxu3 %v569_v53  ;;  %v602_v52 = vld [vmem:[#allocation2 + $0x10e8] sm:$0xff]  ;;  %v617_v53 = vld [vmem:[#allocation2 + $0x1160] sm:$0xff] }
 0x105   :  { %1815 = vmatpush.msrb.mxu0 %v519_v54  ;;  %1834 = vmatpush.msrb.mxu1 %v536_v55  ;;  %v634_v54 = vld [vmem:[#allocation2 + $0x11e8] sm:$0xff]  ;;  %v584_v55 = vld [vmem:[#allocation2 + $0x1058] sm:$0xff] }
 0x106   :  { %1855 = vmatpush.msrb.mxu2 %v551_v56  ;;  %1874 = vmatpush.msrb.mxu3 %v568_v57  ;;  %v601_v56 = vld [vmem:[#allocation2 + $0x10e0] sm:$0xff]  ;;  %v616_v57 = vld [vmem:[#allocation2 + $0x1158] sm:$0xff] }
 0x107   :  { %1816 = vmatpush.msrb.mxu0 %v518_v58  ;;  %1835 = vmatpush.msrb.mxu1 %v535_v59  ;;  %v633_v58 = vld [vmem:[#allocation2 + $0x11e0] sm:$0xff]  ;;  %v583_v59 = vld [vmem:[#allocation2 + $0x1050] sm:$0xff] }
 0x108   :  { %1856 = vmatpush.msrb.mxu2 %v550_v60  ;;  %1875 = vmatpush.msrb.mxu3 %v567_v61  ;;  %v600_v60 = vld [vmem:[#allocation2 + $0x10d8] sm:$0xff]  ;;  %v615_v61 = vld [vmem:[#allocation2 + $0x1150] sm:$0xff] }
 0x109   :  { %1817 = vmatpush.msrb.mxu0 %v517_v62  ;;  %1836 = vmatpush.msrb.mxu1 %v534_v63  ;;  %v632_v62 = vld [vmem:[#allocation2 + $0x11d8] sm:$0xff]  ;;  %v582_v63 = vld [vmem:[#allocation2 + $0x1048] sm:$0xff] }
 0x10a   :  { %1857 = vmatpush.msrb.mxu2 %v549_v0  ;;  %1876 = vmatpush.msrb.mxu3 %v566_v1  ;;  %v599_v0 = vld [vmem:[#allocation2 + $0x10d0] sm:$0xff]  ;;  %v614_v1 = vld [vmem:[#allocation2 + $0x1148] sm:$0xff] }
 0x10b   :  { %1818 = vmatpush.msrb.mxu0 %v516_v2  ;;  %1837 = vmatpush.msrb.mxu1 %v533_v3  ;;  %v631_v2 = vld [vmem:[#allocation2 + $0x11d0] sm:$0xff]  ;;  %v581_v3 = vld [vmem:[#allocation2 + $0x1040] sm:$0xff] }
 0x10c   :  { %1858 = vmatpush.msrb.mxu2 %v548_v4  ;;  %1877 = vmatpush.msrb.mxu3 %v565_v5  ;;  %v598_v4 = vld [vmem:[#allocation2 + $0x10c8] sm:$0xff]  ;;  %v613_v5 = vld [vmem:[#allocation2 + $0x1140] sm:$0xff] }
 0x10d   :  { %1819 = vmatpush.msrb.mxu0 %v515_v6  ;;  %1838 = vmatpush.msrb.mxu1 %v532_v7  ;;  %v630_v6 = vld [vmem:[#allocation2 + $0x11c8] sm:$0xff]  ;;  %v580_v7 = vld [vmem:[#allocation2 + $0x1038] sm:$0xff] }
 0x10e   :  { %1859 = vmatpush.msrb.mxu2 %v547_v8  ;;  %1878 = vmatpush.msrb.mxu3 %v564_v9  ;;  %v597_v8 = vld [vmem:[#allocation2 + $0x10c0] sm:$0xff]  ;;  %v612_v9 = vld [vmem:[#allocation2 + $0x1138] sm:$0xff] }
 0x10f   :  { %1820 = vmatpush.msrb.mxu0 %v514_v10  ;;  %1839 = vmatpush.msrb.mxu1 %v531_v11  ;;  %v629_v10 = vld [vmem:[#allocation2 + $0x11c0] sm:$0xff]  ;;  %v579_v11 = vld [vmem:[#allocation2 + $0x1030] sm:$0xff] }
 0x110   :  { %1860 = vmatpush.msrb.mxu2 %v546_v12  ;;  %1879 = vmatpush.msrb.mxu3 %v563_v13  ;;  %v596_v12 = vld [vmem:[#allocation2 + $0x10b8] sm:$0xff]  ;;  %v611_v13 = vld [vmem:[#allocation2 + $0x1130] sm:$0xff] }
 0x111   :  { %1821 = vmatpush.msrb.mxu0 %v513_v14  ;;  %1840 = vmatpush.msrb.mxu1 %v530_v15  ;;  %v628_v14 = vld [vmem:[#allocation2 + $0x11b8] sm:$0xff]  ;;  %v578_v15 = vld [vmem:[#allocation2 + $0x1028] sm:$0xff] }
 0x112   :  { %1861 = vmatpush.msrb.mxu2 %v545_v16  ;;  %1880 = vmatpush.msrb.mxu3 %v562_v17  ;;  %v595_v16 = vld [vmem:[#allocation2 + $0x10b0] sm:$0xff]  ;;  %v610_v17 = vld [vmem:[#allocation2 + $0x1128] sm:$0xff] }
 0x113   :  { %1822 = vmatpush.msrb.mxu0 %v512_v18  ;;  %1841 = vmatpush.msrb.mxu1 %v529_v19  ;;  %v627_v18 = vld [vmem:[#allocation2 + $0x11b0] sm:$0xff]  ;;  %v577_v19 = vld [vmem:[#allocation2 + $0x1020] sm:$0xff] }
 0x114   :  { %1862 = vmatpush.msrb.mxu2 %v544_v20  ;;  %1881 = vmatpush.msrb.mxu3 %v561_v21  ;;  %v594_v20 = vld [vmem:[#allocation2 + $0x10a8] sm:$0xff]  ;;  %v609_v21 = vld [vmem:[#allocation2 + $0x1120] sm:$0xff] }
 0x115   :  { %1823 = vmatpush.msrb.mxu0 %v511_v22  ;;  %1842 = vmatpush.msrb.mxu1 %v528_v23  ;;  %v626_v22 = vld [vmem:[#allocation2 + $0x11a8] sm:$0xff]  ;;  %v576_v23 = vld [vmem:[#allocation2 + $0x1018] sm:$0xff] }
 0x116   :  { %1863 = vmatpush.msrb.mxu2 %v543_v24  ;;  %1882 = vmatpush.msrb.mxu3 %v560_v25  ;;  %v593_v24 = vld [vmem:[#allocation2 + $0x10a0] sm:$0xff]  ;;  %v608_v25 = vld [vmem:[#allocation2 + $0x1118] sm:$0xff] }
 0x117   :  { %1824 = vmatpush.msrb.mxu0 %v510_v26  ;;  %1843 = vmatpush.msrb.mxu1 %v527_v27  ;;  %v625_v26 = vld [vmem:[#allocation2 + $0x11a0] sm:$0xff]  ;;  %v575_v27 = vld [vmem:[#allocation2 + $0x1010] sm:$0xff] }
 0x118   :  { %1864 = vmatpush.msrb.mxu2 %v542_v29  ;;  %1883 = vmatpush.msrb.mxu3 %v559_v30  ;;  %v607_v29 = vld [vmem:[#allocation2 + $0x1110] sm:$0xff]  ;;  %v624_v30 = vld [vmem:[#allocation2 + $0x1198] sm:$0xff] }
 0x119   :  { %1825 = vmatpush.msrb.mxu0 %v509_v31  ;;  %1844 = vmatpush.msrb.mxu1 %v526_v32  ;;  %v574_v31 = vld [vmem:[#allocation2 + $0x1008] sm:$0xff]  ;;  %v591_v32 = vld [vmem:[#allocation2 + $0x1090] sm:$0xff] }
 0x11a   :  { %1865 = vmatpush.msrb.mxu2 %v541_v33  ;;  %1884 = vmatpush.msrb.mxu3 %v558_v34  ;;  %v54_v33 = vld [vmem:[%s2733_s0 + $0x48] sm:$0xff]  ;;  %v606_v34 = vld [vmem:[#allocation2 + $0x1108] sm:$0xff] }
 0x11b   :  { %1826 = vmatmul.f32.vlgmr.msrb.gmra.mxu0 %v1142_v35  ;;  %1866 = vmatmul.f32.vlgmr.msrb.gmra.mxu2 %v1144_v36  ;;  %v623_v35 = vld [vmem:[#allocation2 + $0x1190] sm:$0xff]  ;;  %1147 = vst [vmem:[#allocation1 + $0x20] ss:$4 sm:$0xff] %v54_v33  ;;  %v573_v36 = vld [vmem:[#allocation2 + $0x1000] sm:$0xff]  ;;  %v656_v33 = vld [vmem:[#allocation2 + $0x1298] sm:$0xff] }
 0x11c   :  { %1890 = vmatpush.msra.mxu0 %v588_v37  ;;  %1930 = vmatpush.msra.mxu2 %v620_v38  ;;  %v590_v37 = vld [vmem:[#allocation2 + $0x1088] sm:$0xff]  ;;  %v605_v38 = vld [vmem:[#allocation2 + $0x1100] sm:$0xff] }
 0x11d   :  { %1845 = vmatpush.msrb.mxu1 %v525_v39  ;;  %1885 = vmatpush.msrb.mxu3 %v557_v40  ;;  %v622_v39 = vld [vmem:[#allocation2 + $0x1188] sm:$0xff]  ;;  %v1148_v40 = vld.sshfl [vmem:[#allocation1] sm:$0xff pattern:$0x73625140] }
 0x11e   :  { %1846 = vmatmul.f32.vlgmr.msrb.gmra.mxu1 %v1143_v41  ;;  %1886 = vmatmul.f32.vlgmr.msrb.gmra.mxu3 %v1145_v42  ;;  %v1150_v41 = vld.sshfl [vmem:[#allocation1 + $0x10] sm:$0xff pattern:$0x73625140]  ;;  %v652_v42 = vld [vmem:[#allocation2 + $0x1278] sm:$0xff] }
 0x11f   :  { %1891 = vmatpush.msra.mxu0 %v587_v43  ;;  %1910 = vmatpush.msra.mxu1 %v604_v44  ;;  %v684_v43 = vld [vmem:[#allocation2 + $0x1378] sm:$0xff]  ;;  %v589_v44 = vld [vmem:[#allocation2 + $0x1080] sm:$0xff] }
 0x120   :  { %1931 = vmatpush.msra.mxu2 %v619_v45  ;;  %1950 = vmatpush.msra.mxu3 %v636_v46  ;;  %v621_v45 = vld [vmem:[#allocation2 + $0x1180] sm:$0xff] }
 0x121   :  { %1892 = vmatpush.msra.mxu0 %v586_v47  ;;  %1911 = vmatpush.msra.mxu1 %v603_v48  ;;  %v1149_v46 = vld.sshfl [vmem:[#allocation1 + $0x8] sm:$0xff pattern:$0x73625140]  ;;  %v1151_v47 = vld.sshfl [vmem:[#allocation1 + $0x18] sm:$0xff pattern:$0x73625140] }
 0x122   :  { %1932 = vmatpush.msra.mxu2 %v618_v49  ;;  %1951 = vmatpush.msra.mxu3 %v635_v50  ;;  %v651_v48 = vld [vmem:[#allocation2 + $0x1270] sm:$0xff]  ;;  %v668_v49 = vld [vmem:[#allocation2 + $0x12f8] sm:$0xff] }
 0x123   :  { %1893 = vmatpush.msra.mxu0 %v585_v51  ;;  %1912 = vmatpush.msra.mxu1 %v602_v52  ;;  %v683_v50 = vld [vmem:[#allocation2 + $0x1370] sm:$0xff]  ;;  %v700_v51 = vld [vmem:[#allocation2 + $0x13f8] sm:$0xff]  ;;  %v650_v52 = vld [vmem:[#allocation2 + $0x1268] sm:$0xff] }
 0x124   :  { %1933 = vmatpush.msra.mxu2 %v617_v53  ;;  %1952 = vmatpush.msra.mxu3 %v634_v54  ;;  %v667_v53 = vld [vmem:[#allocation2 + $0x12f0] sm:$0xff]  ;;  %v682_v54 = vld [vmem:[#allocation2 + $0x1368] sm:$0xff] }
 0x125   :  { %1894 = vmatpush.msra.mxu0 %v584_v55  ;;  %1913 = vmatpush.msra.mxu1 %v601_v56  ;;  %v699_v55 = vld [vmem:[#allocation2 + $0x13f0] sm:$0xff]  ;;  %v649_v56 = vld [vmem:[#allocation2 + $0x1260] sm:$0xff] }
 0x126   :  { %1934 = vmatpush.msra.mxu2 %v616_v57  ;;  %1953 = vmatpush.msra.mxu3 %v633_v58  ;;  %v666_v57 = vld [vmem:[#allocation2 + $0x12e8] sm:$0xff]  ;;  %v681_v58 = vld [vmem:[#allocation2 + $0x1360] sm:$0xff] }
 0x127   :  { %1895 = vmatpush.msra.mxu0 %v583_v59  ;;  %1914 = vmatpush.msra.mxu1 %v600_v60  ;;  %v698_v59 = vld [vmem:[#allocation2 + $0x13e8] sm:$0xff]  ;;  %v648_v60 = vld [vmem:[#allocation2 + $0x1258] sm:$0xff] }
 0x128   :  { %1935 = vmatpush.msra.mxu2 %v615_v61  ;;  %1954 = vmatpush.msra.mxu3 %v632_v62  ;;  %v665_v61 = vld [vmem:[#allocation2 + $0x12e0] sm:$0xff]  ;;  %v680_v62 = vld [vmem:[#allocation2 + $0x1358] sm:$0xff] }
 0x129   :  { %1896 = vmatpush.msra.mxu0 %v582_v63  ;;  %1915 = vmatpush.msra.mxu1 %v599_v0  ;;  %v697_v63 = vld [vmem:[#allocation2 + $0x13e0] sm:$0xff]  ;;  %v647_v0 = vld [vmem:[#allocation2 + $0x1250] sm:$0xff] }
 0x12a   :  { %1936 = vmatpush.msra.mxu2 %v614_v1  ;;  %1955 = vmatpush.msra.mxu3 %v631_v2  ;;  %v664_v1 = vld [vmem:[#allocation2 + $0x12d8] sm:$0xff]  ;;  %v679_v2 = vld [vmem:[#allocation2 + $0x1350] sm:$0xff] }
 0x12b   :  { %1897 = vmatpush.msra.mxu0 %v581_v3  ;;  %1916 = vmatpush.msra.mxu1 %v598_v4  ;;  %v696_v3 = vld [vmem:[#allocation2 + $0x13d8] sm:$0xff]  ;;  %v646_v4 = vld [vmem:[#allocation2 + $0x1248] sm:$0xff] }
 0x12c   :  { %1937 = vmatpush.msra.mxu2 %v613_v5  ;;  %1956 = vmatpush.msra.mxu3 %v630_v6  ;;  %v663_v5 = vld [vmem:[#allocation2 + $0x12d0] sm:$0xff]  ;;  %v678_v6 = vld [vmem:[#allocation2 + $0x1348] sm:$0xff] }
 0x12d   :  { %1898 = vmatpush.msra.mxu0 %v580_v7  ;;  %1917 = vmatpush.msra.mxu1 %v597_v8  ;;  %v695_v7 = vld [vmem:[#allocation2 + $0x13d0] sm:$0xff]  ;;  %v645_v8 = vld [vmem:[#allocation2 + $0x1240] sm:$0xff] }
 0x12e   :  { %1938 = vmatpush.msra.mxu2 %v612_v9  ;;  %1957 = vmatpush.msra.mxu3 %v629_v10  ;;  %v662_v9 = vld [vmem:[#allocation2 + $0x12c8] sm:$0xff]  ;;  %v677_v10 = vld [vmem:[#allocation2 + $0x1340] sm:$0xff] }
 0x12f   :  { %1899 = vmatpush.msra.mxu0 %v579_v11  ;;  %1918 = vmatpush.msra.mxu1 %v596_v12  ;;  %v694_v11 = vld [vmem:[#allocation2 + $0x13c8] sm:$0xff]  ;;  %v644_v12 = vld [vmem:[#allocation2 + $0x1238] sm:$0xff] }
 0x130   :  { %1939 = vmatpush.msra.mxu2 %v611_v13  ;;  %1958 = vmatpush.msra.mxu3 %v628_v14  ;;  %v661_v13 = vld [vmem:[#allocation2 + $0x12c0] sm:$0xff]  ;;  %v676_v14 = vld [vmem:[#allocation2 + $0x1338] sm:$0xff] }
 0x131   :  { %1900 = vmatpush.msra.mxu0 %v578_v15  ;;  %1919 = vmatpush.msra.mxu1 %v595_v16  ;;  %v693_v15 = vld [vmem:[#allocation2 + $0x13c0] sm:$0xff]  ;;  %v643_v16 = vld [vmem:[#allocation2 + $0x1230] sm:$0xff] }
 0x132   :  { %1940 = vmatpush.msra.mxu2 %v610_v17  ;;  %1959 = vmatpush.msra.mxu3 %v627_v18  ;;  %v660_v17 = vld [vmem:[#allocation2 + $0x12b8] sm:$0xff]  ;;  %v675_v18 = vld [vmem:[#allocation2 + $0x1330] sm:$0xff] }
 0x133   :  { %1901 = vmatpush.msra.mxu0 %v577_v19  ;;  %1920 = vmatpush.msra.mxu1 %v594_v20  ;;  %v692_v19 = vld [vmem:[#allocation2 + $0x13b8] sm:$0xff]  ;;  %v642_v20 = vld [vmem:[#allocation2 + $0x1228] sm:$0xff] }
 0x134   :  { %1941 = vmatpush.msra.mxu2 %v609_v21  ;;  %1960 = vmatpush.msra.mxu3 %v626_v22  ;;  %v659_v21 = vld [vmem:[#allocation2 + $0x12b0] sm:$0xff]  ;;  %v674_v22 = vld [vmem:[#allocation2 + $0x1328] sm:$0xff] }
 0x135   :  { %1902 = vmatpush.msra.mxu0 %v576_v23  ;;  %1921 = vmatpush.msra.mxu1 %v593_v24  ;;  %v691_v23 = vld [vmem:[#allocation2 + $0x13b0] sm:$0xff]  ;;  %v641_v24 = vld [vmem:[#allocation2 + $0x1220] sm:$0xff] }
 0x136   :  { %1942 = vmatpush.msra.mxu2 %v608_v25  ;;  %1961 = vmatpush.msra.mxu3 %v625_v26  ;;  %v658_v25 = vld [vmem:[#allocation2 + $0x12a8] sm:$0xff]  ;;  %v673_v26 = vld [vmem:[#allocation2 + $0x1320] sm:$0xff] }
 0x137   :  { %1903 = vmatpush.msra.mxu0 %v575_v27  ;;  %1922 = vmatpush.msra.mxu1 %v592_v28  ;;  %v690_v27 = vld [vmem:[#allocation2 + $0x13a8] sm:$0xff]  ;;  %v640_v28 = vld [vmem:[#allocation2 + $0x1218] sm:$0xff] }
 0x138   :  { %1943 = vmatpush.msra.mxu2 %v607_v29  ;;  %1962 = vmatpush.msra.mxu3 %v624_v30  ;;  %v657_v29 = vld [vmem:[#allocation2 + $0x12a0] sm:$0xff]  ;;  %v672_v30 = vld [vmem:[#allocation2 + $0x1318] sm:$0xff] }
 0x139   :  { %1904 = vmatpush.msra.mxu0 %v574_v31  ;;  %1923 = vmatpush.msra.mxu1 %v591_v32  ;;  %v689_v31 = vld [vmem:[#allocation2 + $0x13a0] sm:$0xff]  ;;  %v639_v32 = vld [vmem:[#allocation2 + $0x1210] sm:$0xff] }
 0x13a   :  { %1944 = vmatpush.msra.mxu2 %v606_v34  ;;  %1963 = vmatpush.msra.mxu3 %v623_v35  ;;  %v671_v34 = vld [vmem:[#allocation2 + $0x1310] sm:$0xff]  ;;  %v688_v35 = vld [vmem:[#allocation2 + $0x1398] sm:$0xff] }
 0x13b   :  { %1905 = vmatpush.msra.mxu0 %v573_v36  ;;  %1924 = vmatpush.msra.mxu1 %v590_v37  ;;  %v638_v36 = vld [vmem:[#allocation2 + $0x1208] sm:$0xff]  ;;  %v655_v37 = vld [vmem:[#allocation2 + $0x1290] sm:$0xff] }
 0x13c   :  { %1945 = vmatpush.msra.mxu2 %v605_v38  ;;  %1964 = vmatpush.msra.mxu3 %v622_v39  ;;  %v55_v38 = vld [vmem:[%s2733_s0 + $0x50] sm:$0xff] }
 0x13d   :  { %1906 = vmatmul.f32.vlgmr.msra.gmra.mxu0 %v1148_v40  ;;  %1946 = vmatmul.f32.vlgmr.msra.gmra.mxu2 %v1150_v41  ;;  %v670_v39 = vld [vmem:[#allocation2 + $0x1308] sm:$0xff]  ;;  %v687_v40 = vld [vmem:[#allocation2 + $0x1390] sm:$0xff]  ;;  %1156 = vst [vmem:[#allocation1] ss:$4 sm:$0xff] %v55_v38  ;;  %v637_v41 = vld [vmem:[#allocation2 + $0x1200] sm:$0xff] }
 0x13e   :  { %1970 = vmatpush.msrb.mxu0 %v652_v42  ;;  %2010 = vmatpush.msrb.mxu2 %v684_v43  ;;  %v654_v42 = vld [vmem:[#allocation2 + $0x1288] sm:$0xff]  ;;  %v669_v43 = vld [vmem:[#allocation2 + $0x1300] sm:$0xff]  ;;  %v720_v38 = vld [vmem:[#allocation2 + $0x1498] sm:$0xff] }
 0x13f   :  { %1925 = vmatpush.msra.mxu1 %v589_v44  ;;  %1965 = vmatpush.msra.mxu3 %v621_v45  ;;  %v686_v44 = vld [vmem:[#allocation2 + $0x1388] sm:$0xff]  ;;  %v1152_v45 = vld.sshfl [vmem:[#allocation1 + $0x20] sm:$0xff pattern:$0x73625140] }
 0x140   :  { %1926 = vmatmul.f32.vlgmr.msra.gmra.mxu1 %v1149_v46  ;;  %1966 = vmatmul.f32.vlgmr.msra.gmra.mxu3 %v1151_v47  ;;  %v1154_v46 = vld.sshfl [vmem:[#allocation1 + $0x30] sm:$0xff pattern:$0x73625140]  ;;  %v716_v47 = vld [vmem:[#allocation2 + $0x1478] sm:$0xff] }
 0x141   :  { %1971 = vmatpush.msrb.mxu0 %v651_v48  ;;  %1990 = vmatpush.msrb.mxu1 %v668_v49  ;;  %v748_v48 = vld [vmem:[#allocation2 + $0x1578] sm:$0xff]  ;;  %v653_v49 = vld [vmem:[#allocation2 + $0x1280] sm:$0xff] }
 0x142   :  { %2011 = vmatpush.msrb.mxu2 %v683_v50  ;;  %2030 = vmatpush.msrb.mxu3 %v700_v51  ;;  %v685_v50 = vld [vmem:[#allocation2 + $0x1380] sm:$0xff] }
 0x143   :  { %1972 = vmatpush.msrb.mxu0 %v650_v52  ;;  %1991 = vmatpush.msrb.mxu1 %v667_v53  ;;  %v1153_v51 = vld.sshfl [vmem:[#allocation1 + $0x28] sm:$0xff pattern:$0x73625140]  ;;  %v1155_v52 = vld.sshfl [vmem:[#allocation1 + $0x38] sm:$0xff pattern:$0x73625140] }
 0x144   :  { %2012 = vmatpush.msrb.mxu2 %v682_v54  ;;  %2031 = vmatpush.msrb.mxu3 %v699_v55  ;;  %v715_v53 = vld [vmem:[#allocation2 + $0x1470] sm:$0xff]  ;;  %v732_v54 = vld [vmem:[#allocation2 + $0x14f8] sm:$0xff] }
 0x145   :  { %1973 = vmatpush.msrb.mxu0 %v649_v56  ;;  %1992 = vmatpush.msrb.mxu1 %v666_v57  ;;  %v747_v55 = vld [vmem:[#allocation2 + $0x1570] sm:$0xff]  ;;  %v764_v56 = vld [vmem:[#allocation2 + $0x15f8] sm:$0xff]  ;;  %v714_v57 = vld [vmem:[#allocation2 + $0x1468] sm:$0xff] }
 0x146   :  { %2013 = vmatpush.msrb.mxu2 %v681_v58  ;;  %2032 = vmatpush.msrb.mxu3 %v698_v59  ;;  %v731_v58 = vld [vmem:[#allocation2 + $0x14f0] sm:$0xff]  ;;  %v746_v59 = vld [vmem:[#allocation2 + $0x1568] sm:$0xff] }
 0x147   :  { %1974 = vmatpush.msrb.mxu0 %v648_v60  ;;  %1993 = vmatpush.msrb.mxu1 %v665_v61  ;;  %v763_v60 = vld [vmem:[#allocation2 + $0x15f0] sm:$0xff]  ;;  %v713_v61 = vld [vmem:[#allocation2 + $0x1460] sm:$0xff] }
 0x148   :  { %2014 = vmatpush.msrb.mxu2 %v680_v62  ;;  %2033 = vmatpush.msrb.mxu3 %v697_v63  ;;  %v730_v62 = vld [vmem:[#allocation2 + $0x14e8] sm:$0xff]  ;;  %v745_v63 = vld [vmem:[#allocation2 + $0x1560] sm:$0xff] }
 0x149   :  { %1975 = vmatpush.msrb.mxu0 %v647_v0  ;;  %1994 = vmatpush.msrb.mxu1 %v664_v1  ;;  %v762_v0 = vld [vmem:[#allocation2 + $0x15e8] sm:$0xff]  ;;  %v712_v1 = vld [vmem:[#allocation2 + $0x1458] sm:$0xff] }
 0x14a   :  { %2015 = vmatpush.msrb.mxu2 %v679_v2  ;;  %2034 = vmatpush.msrb.mxu3 %v696_v3  ;;  %v729_v2 = vld [vmem:[#allocation2 + $0x14e0] sm:$0xff]  ;;  %v744_v3 = vld [vmem:[#allocation2 + $0x1558] sm:$0xff] }
 0x14b   :  { %1976 = vmatpush.msrb.mxu0 %v646_v4  ;;  %1995 = vmatpush.msrb.mxu1 %v663_v5  ;;  %v761_v4 = vld [vmem:[#allocation2 + $0x15e0] sm:$0xff]  ;;  %v711_v5 = vld [vmem:[#allocation2 + $0x1450] sm:$0xff] }
 0x14c   :  { %2016 = vmatpush.msrb.mxu2 %v678_v6  ;;  %2035 = vmatpush.msrb.mxu3 %v695_v7  ;;  %v728_v6 = vld [vmem:[#allocation2 + $0x14d8] sm:$0xff]  ;;  %v743_v7 = vld [vmem:[#allocation2 + $0x1550] sm:$0xff] }
 0x14d   :  { %1977 = vmatpush.msrb.mxu0 %v645_v8  ;;  %1996 = vmatpush.msrb.mxu1 %v662_v9  ;;  %v760_v8 = vld [vmem:[#allocation2 + $0x15d8] sm:$0xff]  ;;  %v710_v9 = vld [vmem:[#allocation2 + $0x1448] sm:$0xff] }
 0x14e   :  { %2017 = vmatpush.msrb.mxu2 %v677_v10  ;;  %2036 = vmatpush.msrb.mxu3 %v694_v11  ;;  %v727_v10 = vld [vmem:[#allocation2 + $0x14d0] sm:$0xff]  ;;  %v742_v11 = vld [vmem:[#allocation2 + $0x1548] sm:$0xff] }
 0x14f   :  { %1978 = vmatpush.msrb.mxu0 %v644_v12  ;;  %1997 = vmatpush.msrb.mxu1 %v661_v13  ;;  %v759_v12 = vld [vmem:[#allocation2 + $0x15d0] sm:$0xff]  ;;  %v709_v13 = vld [vmem:[#allocation2 + $0x1440] sm:$0xff] }
 0x150   :  { %2018 = vmatpush.msrb.mxu2 %v676_v14  ;;  %2037 = vmatpush.msrb.mxu3 %v693_v15  ;;  %v726_v14 = vld [vmem:[#allocation2 + $0x14c8] sm:$0xff]  ;;  %v741_v15 = vld [vmem:[#allocation2 + $0x1540] sm:$0xff] }
 0x151   :  { %1979 = vmatpush.msrb.mxu0 %v643_v16  ;;  %1998 = vmatpush.msrb.mxu1 %v660_v17  ;;  %v758_v16 = vld [vmem:[#allocation2 + $0x15c8] sm:$0xff]  ;;  %v708_v17 = vld [vmem:[#allocation2 + $0x1438] sm:$0xff] }
 0x152   :  { %2019 = vmatpush.msrb.mxu2 %v675_v18  ;;  %2038 = vmatpush.msrb.mxu3 %v692_v19  ;;  %v725_v18 = vld [vmem:[#allocation2 + $0x14c0] sm:$0xff]  ;;  %v740_v19 = vld [vmem:[#allocation2 + $0x1538] sm:$0xff] }
 0x153   :  { %1980 = vmatpush.msrb.mxu0 %v642_v20  ;;  %1999 = vmatpush.msrb.mxu1 %v659_v21  ;;  %v757_v20 = vld [vmem:[#allocation2 + $0x15c0] sm:$0xff]  ;;  %v707_v21 = vld [vmem:[#allocation2 + $0x1430] sm:$0xff] }
 0x154   :  { %2020 = vmatpush.msrb.mxu2 %v674_v22  ;;  %2039 = vmatpush.msrb.mxu3 %v691_v23  ;;  %v724_v22 = vld [vmem:[#allocation2 + $0x14b8] sm:$0xff]  ;;  %v739_v23 = vld [vmem:[#allocation2 + $0x1530] sm:$0xff] }
 0x155   :  { %1981 = vmatpush.msrb.mxu0 %v641_v24  ;;  %2000 = vmatpush.msrb.mxu1 %v658_v25  ;;  %v756_v24 = vld [vmem:[#allocation2 + $0x15b8] sm:$0xff]  ;;  %v706_v25 = vld [vmem:[#allocation2 + $0x1428] sm:$0xff] }
 0x156   :  { %2021 = vmatpush.msrb.mxu2 %v673_v26  ;;  %2040 = vmatpush.msrb.mxu3 %v690_v27  ;;  %v723_v26 = vld [vmem:[#allocation2 + $0x14b0] sm:$0xff]  ;;  %v738_v27 = vld [vmem:[#allocation2 + $0x1528] sm:$0xff] }
 0x157   :  { %1982 = vmatpush.msrb.mxu0 %v640_v28  ;;  %2001 = vmatpush.msrb.mxu1 %v657_v29  ;;  %v755_v28 = vld [vmem:[#allocation2 + $0x15b0] sm:$0xff]  ;;  %v705_v29 = vld [vmem:[#allocation2 + $0x1420] sm:$0xff] }
 0x158   :  { %2022 = vmatpush.msrb.mxu2 %v672_v30  ;;  %2041 = vmatpush.msrb.mxu3 %v689_v31  ;;  %v722_v30 = vld [vmem:[#allocation2 + $0x14a8] sm:$0xff]  ;;  %v737_v31 = vld [vmem:[#allocation2 + $0x1520] sm:$0xff] }
 0x159   :  { %1983 = vmatpush.msrb.mxu0 %v639_v32  ;;  %2002 = vmatpush.msrb.mxu1 %v656_v33  ;;  %v754_v32 = vld [vmem:[#allocation2 + $0x15a8] sm:$0xff]  ;;  %v704_v33 = vld [vmem:[#allocation2 + $0x1418] sm:$0xff] }
 0x15a   :  { %2023 = vmatpush.msrb.mxu2 %v671_v34  ;;  %2042 = vmatpush.msrb.mxu3 %v688_v35  ;;  %v721_v34 = vld [vmem:[#allocation2 + $0x14a0] sm:$0xff]  ;;  %v736_v35 = vld [vmem:[#allocation2 + $0x1518] sm:$0xff] }
 0x15b   :  { %1984 = vmatpush.msrb.mxu0 %v638_v36  ;;  %2003 = vmatpush.msrb.mxu1 %v655_v37  ;;  %v753_v36 = vld [vmem:[#allocation2 + $0x15a0] sm:$0xff]  ;;  %v703_v37 = vld [vmem:[#allocation2 + $0x1410] sm:$0xff] }
 0x15c   :  { %2024 = vmatpush.msrb.mxu2 %v670_v39  ;;  %2043 = vmatpush.msrb.mxu3 %v687_v40  ;;  %v735_v39 = vld [vmem:[#allocation2 + $0x1510] sm:$0xff]  ;;  %v752_v40 = vld [vmem:[#allocation2 + $0x1598] sm:$0xff] }
 0x15d   :  { %1985 = vmatpush.msrb.mxu0 %v637_v41  ;;  %2004 = vmatpush.msrb.mxu1 %v654_v42  ;;  %v702_v41 = vld [vmem:[#allocation2 + $0x1408] sm:$0xff]  ;;  %v719_v42 = vld [vmem:[#allocation2 + $0x1490] sm:$0xff] }
 0x15e   :  { %2025 = vmatpush.msrb.mxu2 %v669_v43  ;;  %2044 = vmatpush.msrb.mxu3 %v686_v44  ;;  %v56_v43 = vld [vmem:[%s2733_s0 + $0x58] sm:$0xff]  ;;  %v734_v44 = vld [vmem:[#allocation2 + $0x1508] sm:$0xff] }
 0x15f   :  { %1986 = vmatmul.f32.vlgmr.msrb.gmra.mxu0 %v1152_v45  ;;  %2026 = vmatmul.f32.vlgmr.msrb.gmra.mxu2 %v1154_v46  ;;  %v751_v45 = vld [vmem:[#allocation2 + $0x1590] sm:$0xff]  ;;  %1157 = vst [vmem:[#allocation1 + $0x20] ss:$4 sm:$0xff] %v56_v43  ;;  %v701_v46 = vld [vmem:[#allocation2 + $0x1400] sm:$0xff]  ;;  %v784_v43 = vld [vmem:[#allocation2 + $0x1698] sm:$0xff] }
 0x160   :  { %2050 = vmatpush.msra.mxu0 %v716_v47  ;;  %2090 = vmatpush.msra.mxu2 %v748_v48  ;;  %v718_v47 = vld [vmem:[#allocation2 + $0x1488] sm:$0xff]  ;;  %v733_v48 = vld [vmem:[#allocation2 + $0x1500] sm:$0xff] }
 0x161   :  { %2005 = vmatpush.msrb.mxu1 %v653_v49  ;;  %2045 = vmatpush.msrb.mxu3 %v685_v50  ;;  %v750_v49 = vld [vmem:[#allocation2 + $0x1588] sm:$0xff]  ;;  %v1158_v50 = vld.sshfl [vmem:[#allocation1] sm:$0xff pattern:$0x73625140] }
 0x162   :  { %2006 = vmatmul.f32.vlgmr.msrb.gmra.mxu1 %v1153_v51  ;;  %2046 = vmatmul.f32.vlgmr.msrb.gmra.mxu3 %v1155_v52  ;;  %v1160_v51 = vld.sshfl [vmem:[#allocation1 + $0x10] sm:$0xff pattern:$0x73625140]  ;;  %v780_v52 = vld [vmem:[#allocation2 + $0x1678] sm:$0xff] }
 0x163   :  { %2051 = vmatpush.msra.mxu0 %v715_v53  ;;  %2070 = vmatpush.msra.mxu1 %v732_v54  ;;  %v812_v53 = vld [vmem:[#allocation2 + $0x1778] sm:$0xff]  ;;  %v717_v54 = vld [vmem:[#allocation2 + $0x1480] sm:$0xff] }
 0x164   :  { %2091 = vmatpush.msra.mxu2 %v747_v55  ;;  %2110 = vmatpush.msra.mxu3 %v764_v56  ;;  %v749_v55 = vld [vmem:[#allocation2 + $0x1580] sm:$0xff] }
 0x165   :  { %2052 = vmatpush.msra.mxu0 %v714_v57  ;;  %2071 = vmatpush.msra.mxu1 %v731_v58  ;;  %v1159_v56 = vld.sshfl [vmem:[#allocation1 + $0x8] sm:$0xff pattern:$0x73625140]  ;;  %v1161_v57 = vld.sshfl [vmem:[#allocation1 + $0x18] sm:$0xff pattern:$0x73625140] }
 0x166   :  { %2092 = vmatpush.msra.mxu2 %v746_v59  ;;  %2111 = vmatpush.msra.mxu3 %v763_v60  ;;  %v779_v58 = vld [vmem:[#allocation2 + $0x1670] sm:$0xff]  ;;  %v796_v59 = vld [vmem:[#allocation2 + $0x16f8] sm:$0xff] }
 0x167   :  { %2053 = vmatpush.msra.mxu0 %v713_v61  ;;  %2072 = vmatpush.msra.mxu1 %v730_v62  ;;  %v811_v60 = vld [vmem:[#allocation2 + $0x1770] sm:$0xff]  ;;  %v828_v61 = vld [vmem:[#allocation2 + $0x17f8] sm:$0xff]  ;;  %v778_v62 = vld [vmem:[#allocation2 + $0x1668] sm:$0xff] }
 0x168   :  { %2093 = vmatpush.msra.mxu2 %v745_v63  ;;  %2112 = vmatpush.msra.mxu3 %v762_v0  ;;  %v795_v63 = vld [vmem:[#allocation2 + $0x16f0] sm:$0xff]  ;;  %v810_v0 = vld [vmem:[#allocation2 + $0x1768] sm:$0xff] }
 0x169   :  { %2054 = vmatpush.msra.mxu0 %v712_v1  ;;  %2073 = vmatpush.msra.mxu1 %v729_v2  ;;  %v827_v1 = vld [vmem:[#allocation2 + $0x17f0] sm:$0xff]  ;;  %v777_v2 = vld [vmem:[#allocation2 + $0x1660] sm:$0xff] }
 0x16a   :  { %2094 = vmatpush.msra.mxu2 %v744_v3  ;;  %2113 = vmatpush.msra.mxu3 %v761_v4  ;;  %v794_v3 = vld [vmem:[#allocation2 + $0x16e8] sm:$0xff]  ;;  %v809_v4 = vld [vmem:[#allocation2 + $0x1760] sm:$0xff] }
 0x16b   :  { %2055 = vmatpush.msra.mxu0 %v711_v5  ;;  %2074 = vmatpush.msra.mxu1 %v728_v6  ;;  %v826_v5 = vld [vmem:[#allocation2 + $0x17e8] sm:$0xff]  ;;  %v776_v6 = vld [vmem:[#allocation2 + $0x1658] sm:$0xff] }
 0x16c   :  { %2095 = vmatpush.msra.mxu2 %v743_v7  ;;  %2114 = vmatpush.msra.mxu3 %v760_v8  ;;  %v793_v7 = vld [vmem:[#allocation2 + $0x16e0] sm:$0xff]  ;;  %v808_v8 = vld [vmem:[#allocation2 + $0x1758] sm:$0xff] }
 0x16d   :  { %2056 = vmatpush.msra.mxu0 %v710_v9  ;;  %2075 = vmatpush.msra.mxu1 %v727_v10  ;;  %v825_v9 = vld [vmem:[#allocation2 + $0x17e0] sm:$0xff]  ;;  %v775_v10 = vld [vmem:[#allocation2 + $0x1650] sm:$0xff] }
 0x16e   :  { %2096 = vmatpush.msra.mxu2 %v742_v11  ;;  %2115 = vmatpush.msra.mxu3 %v759_v12  ;;  %v792_v11 = vld [vmem:[#allocation2 + $0x16d8] sm:$0xff]  ;;  %v807_v12 = vld [vmem:[#allocation2 + $0x1750] sm:$0xff] }
 0x16f   :  { %2057 = vmatpush.msra.mxu0 %v709_v13  ;;  %2076 = vmatpush.msra.mxu1 %v726_v14  ;;  %v824_v13 = vld [vmem:[#allocation2 + $0x17d8] sm:$0xff]  ;;  %v774_v14 = vld [vmem:[#allocation2 + $0x1648] sm:$0xff] }
 0x170   :  { %2097 = vmatpush.msra.mxu2 %v741_v15  ;;  %2116 = vmatpush.msra.mxu3 %v758_v16  ;;  %v791_v15 = vld [vmem:[#allocation2 + $0x16d0] sm:$0xff]  ;;  %v806_v16 = vld [vmem:[#allocation2 + $0x1748] sm:$0xff] }
 0x171   :  { %2058 = vmatpush.msra.mxu0 %v708_v17  ;;  %2077 = vmatpush.msra.mxu1 %v725_v18  ;;  %v823_v17 = vld [vmem:[#allocation2 + $0x17d0] sm:$0xff]  ;;  %v773_v18 = vld [vmem:[#allocation2 + $0x1640] sm:$0xff] }
 0x172   :  { %2098 = vmatpush.msra.mxu2 %v740_v19  ;;  %2117 = vmatpush.msra.mxu3 %v757_v20  ;;  %v790_v19 = vld [vmem:[#allocation2 + $0x16c8] sm:$0xff]  ;;  %v805_v20 = vld [vmem:[#allocation2 + $0x1740] sm:$0xff] }
 0x173   :  { %2059 = vmatpush.msra.mxu0 %v707_v21  ;;  %2078 = vmatpush.msra.mxu1 %v724_v22  ;;  %v822_v21 = vld [vmem:[#allocation2 + $0x17c8] sm:$0xff]  ;;  %v772_v22 = vld [vmem:[#allocation2 + $0x1638] sm:$0xff] }
 0x174   :  { %2099 = vmatpush.msra.mxu2 %v739_v23  ;;  %2118 = vmatpush.msra.mxu3 %v756_v24  ;;  %v789_v23 = vld [vmem:[#allocation2 + $0x16c0] sm:$0xff]  ;;  %v804_v24 = vld [vmem:[#allocation2 + $0x1738] sm:$0xff] }
 0x175   :  { %2060 = vmatpush.msra.mxu0 %v706_v25  ;;  %2079 = vmatpush.msra.mxu1 %v723_v26  ;;  %v821_v25 = vld [vmem:[#allocation2 + $0x17c0] sm:$0xff]  ;;  %v771_v26 = vld [vmem:[#allocation2 + $0x1630] sm:$0xff] }
 0x176   :  { %2100 = vmatpush.msra.mxu2 %v738_v27  ;;  %2119 = vmatpush.msra.mxu3 %v755_v28  ;;  %v788_v27 = vld [vmem:[#allocation2 + $0x16b8] sm:$0xff]  ;;  %v803_v28 = vld [vmem:[#allocation2 + $0x1730] sm:$0xff] }
 0x177   :  { %2061 = vmatpush.msra.mxu0 %v705_v29  ;;  %2080 = vmatpush.msra.mxu1 %v722_v30  ;;  %v820_v29 = vld [vmem:[#allocation2 + $0x17b8] sm:$0xff]  ;;  %v770_v30 = vld [vmem:[#allocation2 + $0x1628] sm:$0xff] }
 0x178   :  { %2101 = vmatpush.msra.mxu2 %v737_v31  ;;  %2120 = vmatpush.msra.mxu3 %v754_v32  ;;  %v787_v31 = vld [vmem:[#allocation2 + $0x16b0] sm:$0xff]  ;;  %v802_v32 = vld [vmem:[#allocation2 + $0x1728] sm:$0xff] }
 0x179   :  { %2062 = vmatpush.msra.mxu0 %v704_v33  ;;  %2081 = vmatpush.msra.mxu1 %v721_v34  ;;  %v819_v33 = vld [vmem:[#allocation2 + $0x17b0] sm:$0xff]  ;;  %v769_v34 = vld [vmem:[#allocation2 + $0x1620] sm:$0xff] }
 0x17a   :  { %2102 = vmatpush.msra.mxu2 %v736_v35  ;;  %2121 = vmatpush.msra.mxu3 %v753_v36  ;;  %v786_v35 = vld [vmem:[#allocation2 + $0x16a8] sm:$0xff]  ;;  %v801_v36 = vld [vmem:[#allocation2 + $0x1720] sm:$0xff] }
 0x17b   :  { %2063 = vmatpush.msra.mxu0 %v703_v37  ;;  %2082 = vmatpush.msra.mxu1 %v720_v38  ;;  %v818_v37 = vld [vmem:[#allocation2 + $0x17a8] sm:$0xff]  ;;  %v768_v38 = vld [vmem:[#allocation2 + $0x1618] sm:$0xff] }
 0x17c   :  { %2103 = vmatpush.msra.mxu2 %v735_v39  ;;  %2122 = vmatpush.msra.mxu3 %v752_v40  ;;  %v785_v39 = vld [vmem:[#allocation2 + $0x16a0] sm:$0xff]  ;;  %v800_v40 = vld [vmem:[#allocation2 + $0x1718] sm:$0xff] }
 0x17d   :  { %2064 = vmatpush.msra.mxu0 %v702_v41  ;;  %2083 = vmatpush.msra.mxu1 %v719_v42  ;;  %v817_v41 = vld [vmem:[#allocation2 + $0x17a0] sm:$0xff]  ;;  %v767_v42 = vld [vmem:[#allocation2 + $0x1610] sm:$0xff] }
 0x17e   :  { %2104 = vmatpush.msra.mxu2 %v734_v44  ;;  %2123 = vmatpush.msra.mxu3 %v751_v45  ;;  %v799_v44 = vld [vmem:[#allocation2 + $0x1710] sm:$0xff]  ;;  %v816_v45 = vld [vmem:[#allocation2 + $0x1798] sm:$0xff] }
 0x17f   :  { %2065 = vmatpush.msra.mxu0 %v701_v46  ;;  %2084 = vmatpush.msra.mxu1 %v718_v47  ;;  %v766_v46 = vld [vmem:[#allocation2 + $0x1608] sm:$0xff]  ;;  %v783_v47 = vld [vmem:[#allocation2 + $0x1690] sm:$0xff] }
 0x180   :  { %2105 = vmatpush.msra.mxu2 %v733_v48  ;;  %2124 = vmatpush.msra.mxu3 %v750_v49  ;;  %v57_v48 = vld [vmem:[%s2733_s0 + $0x60] sm:$0xff]  ;;  %v798_v49 = vld [vmem:[#allocation2 + $0x1708] sm:$0xff] }
 0x181   :  { %2066 = vmatmul.f32.vlgmr.msra.gmra.mxu0 %v1158_v50  ;;  %2106 = vmatmul.f32.vlgmr.msra.gmra.mxu2 %v1160_v51  ;;  %v815_v50 = vld [vmem:[#allocation2 + $0x1790] sm:$0xff]  ;;  %1166 = vst [vmem:[#allocation1] ss:$4 sm:$0xff] %v57_v48  ;;  %v765_v51 = vld [vmem:[#allocation2 + $0x1600] sm:$0xff]  ;;  %v848_v48 = vld [vmem:[#allocation2 + $0x1898] sm:$0xff] }
 0x182   :  { %2130 = vmatpush.msrb.mxu0 %v780_v52  ;;  %2170 = vmatpush.msrb.mxu2 %v812_v53  ;;  %v782_v52 = vld [vmem:[#allocation2 + $0x1688] sm:$0xff]  ;;  %v797_v53 = vld [vmem:[#allocation2 + $0x1700] sm:$0xff] }
 0x183   :  { %2085 = vmatpush.msra.mxu1 %v717_v54  ;;  %2125 = vmatpush.msra.mxu3 %v749_v55  ;;  %v814_v54 = vld [vmem:[#allocation2 + $0x1788] sm:$0xff]  ;;  %v1162_v55 = vld.sshfl [vmem:[#allocation1 + $0x20] sm:$0xff pattern:$0x73625140] }
 0x184   :  { %2086 = vmatmul.f32.vlgmr.msra.gmra.mxu1 %v1159_v56  ;;  %2126 = vmatmul.f32.vlgmr.msra.gmra.mxu3 %v1161_v57  ;;  %v1164_v56 = vld.sshfl [vmem:[#allocation1 + $0x30] sm:$0xff pattern:$0x73625140]  ;;  %v844_v57 = vld [vmem:[#allocation2 + $0x1878] sm:$0xff] }
 0x185   :  { %2131 = vmatpush.msrb.mxu0 %v779_v58  ;;  %2150 = vmatpush.msrb.mxu1 %v796_v59  ;;  %v876_v58 = vld [vmem:[#allocation2 + $0x1978] sm:$0xff]  ;;  %v781_v59 = vld [vmem:[#allocation2 + $0x1680] sm:$0xff] }
 0x186   :  { %2171 = vmatpush.msrb.mxu2 %v811_v60  ;;  %2190 = vmatpush.msrb.mxu3 %v828_v61  ;;  %v813_v60 = vld [vmem:[#allocation2 + $0x1780] sm:$0xff] }
 0x187   :  { %2132 = vmatpush.msrb.mxu0 %v778_v62  ;;  %2151 = vmatpush.msrb.mxu1 %v795_v63  ;;  %v1163_v61 = vld.sshfl [vmem:[#allocation1 + $0x28] sm:$0xff pattern:$0x73625140]  ;;  %v1165_v62 = vld.sshfl [vmem:[#allocation1 + $0x38] sm:$0xff pattern:$0x73625140] }
 0x188   :  { %2172 = vmatpush.msrb.mxu2 %v810_v0  ;;  %2191 = vmatpush.msrb.mxu3 %v827_v1  ;;  %v843_v63 = vld [vmem:[#allocation2 + $0x1870] sm:$0xff]  ;;  %v860_v0 = vld [vmem:[#allocation2 + $0x18f8] sm:$0xff] }
 0x189   :  { %2133 = vmatpush.msrb.mxu0 %v777_v2  ;;  %2152 = vmatpush.msrb.mxu1 %v794_v3  ;;  %v875_v1 = vld [vmem:[#allocation2 + $0x1970] sm:$0xff]  ;;  %v892_v2 = vld [vmem:[#allocation2 + $0x19f8] sm:$0xff]  ;;  %v842_v3 = vld [vmem:[#allocation2 + $0x1868] sm:$0xff] }
 0x18a   :  { %2173 = vmatpush.msrb.mxu2 %v809_v4  ;;  %2192 = vmatpush.msrb.mxu3 %v826_v5  ;;  %v859_v4 = vld [vmem:[#allocation2 + $0x18f0] sm:$0xff]  ;;  %v874_v5 = vld [vmem:[#allocation2 + $0x1968] sm:$0xff] }
 0x18b   :  { %2134 = vmatpush.msrb.mxu0 %v776_v6  ;;  %2153 = vmatpush.msrb.mxu1 %v793_v7  ;;  %v891_v6 = vld [vmem:[#allocation2 + $0x19f0] sm:$0xff]  ;;  %v841_v7 = vld [vmem:[#allocation2 + $0x1860] sm:$0xff] }
 0x18c   :  { %2174 = vmatpush.msrb.mxu2 %v808_v8  ;;  %2193 = vmatpush.msrb.mxu3 %v825_v9  ;;  %v858_v8 = vld [vmem:[#allocation2 + $0x18e8] sm:$0xff]  ;;  %v873_v9 = vld [vmem:[#allocation2 + $0x1960] sm:$0xff] }
 0x18d   :  { %2135 = vmatpush.msrb.mxu0 %v775_v10  ;;  %2154 = vmatpush.msrb.mxu1 %v792_v11  ;;  %v890_v10 = vld [vmem:[#allocation2 + $0x19e8] sm:$0xff]  ;;  %v840_v11 = vld [vmem:[#allocation2 + $0x1858] sm:$0xff] }
 0x18e   :  { %2175 = vmatpush.msrb.mxu2 %v807_v12  ;;  %2194 = vmatpush.msrb.mxu3 %v824_v13  ;;  %v857_v12 = vld [vmem:[#allocation2 + $0x18e0] sm:$0xff]  ;;  %v872_v13 = vld [vmem:[#allocation2 + $0x1958] sm:$0xff] }
 0x18f   :  { %2136 = vmatpush.msrb.mxu0 %v774_v14  ;;  %2155 = vmatpush.msrb.mxu1 %v791_v15  ;;  %v889_v14 = vld [vmem:[#allocation2 + $0x19e0] sm:$0xff]  ;;  %v839_v15 = vld [vmem:[#allocation2 + $0x1850] sm:$0xff] }
 0x190   :  { %2176 = vmatpush.msrb.mxu2 %v806_v16  ;;  %2195 = vmatpush.msrb.mxu3 %v823_v17  ;;  %v856_v16 = vld [vmem:[#allocation2 + $0x18d8] sm:$0xff]  ;;  %v871_v17 = vld [vmem:[#allocation2 + $0x1950] sm:$0xff] }
 0x191   :  { %2137 = vmatpush.msrb.mxu0 %v773_v18  ;;  %2156 = vmatpush.msrb.mxu1 %v790_v19  ;;  %v888_v18 = vld [vmem:[#allocation2 + $0x19d8] sm:$0xff]  ;;  %v838_v19 = vld [vmem:[#allocation2 + $0x1848] sm:$0xff] }
 0x192   :  { %2177 = vmatpush.msrb.mxu2 %v805_v20  ;;  %2196 = vmatpush.msrb.mxu3 %v822_v21  ;;  %v855_v20 = vld [vmem:[#allocation2 + $0x18d0] sm:$0xff]  ;;  %v870_v21 = vld [vmem:[#allocation2 + $0x1948] sm:$0xff] }
 0x193   :  { %2138 = vmatpush.msrb.mxu0 %v772_v22  ;;  %2157 = vmatpush.msrb.mxu1 %v789_v23  ;;  %v887_v22 = vld [vmem:[#allocation2 + $0x19d0] sm:$0xff]  ;;  %v837_v23 = vld [vmem:[#allocation2 + $0x1840] sm:$0xff] }
 0x194   :  { %2178 = vmatpush.msrb.mxu2 %v804_v24  ;;  %2197 = vmatpush.msrb.mxu3 %v821_v25  ;;  %v854_v24 = vld [vmem:[#allocation2 + $0x18c8] sm:$0xff]  ;;  %v869_v25 = vld [vmem:[#allocation2 + $0x1940] sm:$0xff] }
 0x195   :  { %2139 = vmatpush.msrb.mxu0 %v771_v26  ;;  %2158 = vmatpush.msrb.mxu1 %v788_v27  ;;  %v886_v26 = vld [vmem:[#allocation2 + $0x19c8] sm:$0xff]  ;;  %v836_v27 = vld [vmem:[#allocation2 + $0x1838] sm:$0xff] }
 0x196   :  { %2179 = vmatpush.msrb.mxu2 %v803_v28  ;;  %2198 = vmatpush.msrb.mxu3 %v820_v29  ;;  %v853_v28 = vld [vmem:[#allocation2 + $0x18c0] sm:$0xff]  ;;  %v868_v29 = vld [vmem:[#allocation2 + $0x1938] sm:$0xff] }
 0x197   :  { %2140 = vmatpush.msrb.mxu0 %v770_v30  ;;  %2159 = vmatpush.msrb.mxu1 %v787_v31  ;;  %v885_v30 = vld [vmem:[#allocation2 + $0x19c0] sm:$0xff]  ;;  %v835_v31 = vld [vmem:[#allocation2 + $0x1830] sm:$0xff] }
 0x198   :  { %2180 = vmatpush.msrb.mxu2 %v802_v32  ;;  %2199 = vmatpush.msrb.mxu3 %v819_v33  ;;  %v852_v32 = vld [vmem:[#allocation2 + $0x18b8] sm:$0xff]  ;;  %v867_v33 = vld [vmem:[#allocation2 + $0x1930] sm:$0xff] }
 0x199   :  { %2141 = vmatpush.msrb.mxu0 %v769_v34  ;;  %2160 = vmatpush.msrb.mxu1 %v786_v35  ;;  %v884_v34 = vld [vmem:[#allocation2 + $0x19b8] sm:$0xff]  ;;  %v834_v35 = vld [vmem:[#allocation2 + $0x1828] sm:$0xff] }
 0x19a   :  { %2181 = vmatpush.msrb.mxu2 %v801_v36  ;;  %2200 = vmatpush.msrb.mxu3 %v818_v37  ;;  %v851_v36 = vld [vmem:[#allocation2 + $0x18b0] sm:$0xff]  ;;  %v866_v37 = vld [vmem:[#allocation2 + $0x1928] sm:$0xff] }
 0x19b   :  { %2142 = vmatpush.msrb.mxu0 %v768_v38  ;;  %2161 = vmatpush.msrb.mxu1 %v785_v39  ;;  %v883_v38 = vld [vmem:[#allocation2 + $0x19b0] sm:$0xff]  ;;  %v833_v39 = vld [vmem:[#allocation2 + $0x1820] sm:$0xff] }
 0x19c   :  { %2182 = vmatpush.msrb.mxu2 %v800_v40  ;;  %2201 = vmatpush.msrb.mxu3 %v817_v41  ;;  %v850_v40 = vld [vmem:[#allocation2 + $0x18a8] sm:$0xff]  ;;  %v865_v41 = vld [vmem:[#allocation2 + $0x1920] sm:$0xff] }
 0x19d   :  { %2143 = vmatpush.msrb.mxu0 %v767_v42  ;;  %2162 = vmatpush.msrb.mxu1 %v784_v43  ;;  %v882_v42 = vld [vmem:[#allocation2 + $0x19a8] sm:$0xff]  ;;  %v832_v43 = vld [vmem:[#allocation2 + $0x1818] sm:$0xff] }
 0x19e   :  { %2183 = vmatpush.msrb.mxu2 %v799_v44  ;;  %2202 = vmatpush.msrb.mxu3 %v816_v45  ;;  %v849_v44 = vld [vmem:[#allocation2 + $0x18a0] sm:$0xff]  ;;  %v864_v45 = vld [vmem:[#allocation2 + $0x1918] sm:$0xff] }
 0x19f   :  { %2144 = vmatpush.msrb.mxu0 %v766_v46  ;;  %2163 = vmatpush.msrb.mxu1 %v783_v47  ;;  %v881_v46 = vld [vmem:[#allocation2 + $0x19a0] sm:$0xff]  ;;  %v831_v47 = vld [vmem:[#allocation2 + $0x1810] sm:$0xff] }
 0x1a0   :  { %2184 = vmatpush.msrb.mxu2 %v798_v49  ;;  %2203 = vmatpush.msrb.mxu3 %v815_v50  ;;  %v863_v49 = vld [vmem:[#allocation2 + $0x1910] sm:$0xff]  ;;  %v880_v50 = vld [vmem:[#allocation2 + $0x1998] sm:$0xff] }
 0x1a1   :  { %2145 = vmatpush.msrb.mxu0 %v765_v51  ;;  %2164 = vmatpush.msrb.mxu1 %v782_v52  ;;  %v830_v51 = vld [vmem:[#allocation2 + $0x1808] sm:$0xff]  ;;  %v847_v52 = vld [vmem:[#allocation2 + $0x1890] sm:$0xff] }
 0x1a2   :  { %2185 = vmatpush.msrb.mxu2 %v797_v53  ;;  %2204 = vmatpush.msrb.mxu3 %v814_v54  ;;  %v58_v53 = vld [vmem:[%s2733_s0 + $0x68] sm:$0xff]  ;;  %v862_v54 = vld [vmem:[#allocation2 + $0x1908] sm:$0xff] }
 0x1a3   :  { %2146 = vmatmul.f32.vlgmr.msrb.gmra.mxu0 %v1162_v55  ;;  %2186 = vmatmul.f32.vlgmr.msrb.gmra.mxu2 %v1164_v56  ;;  %v879_v55 = vld [vmem:[#allocation2 + $0x1990] sm:$0xff]  ;;  %1167 = vst [vmem:[#allocation1 + $0x20] ss:$4 sm:$0xff] %v58_v53  ;;  %v829_v56 = vld [vmem:[#allocation2 + $0x1800] sm:$0xff]  ;;  %v912_v53 = vld [vmem:[#allocation2 + $0x1a98] sm:$0xff] }
 0x1a4   :  { %2210 = vmatpush.msra.mxu0 %v844_v57  ;;  %2250 = vmatpush.msra.mxu2 %v876_v58  ;;  %v846_v57 = vld [vmem:[#allocation2 + $0x1888] sm:$0xff]  ;;  %v861_v58 = vld [vmem:[#allocation2 + $0x1900] sm:$0xff] }
 0x1a5   :  { %2165 = vmatpush.msrb.mxu1 %v781_v59  ;;  %2205 = vmatpush.msrb.mxu3 %v813_v60  ;;  %v878_v59 = vld [vmem:[#allocation2 + $0x1988] sm:$0xff]  ;;  %v1168_v60 = vld.sshfl [vmem:[#allocation1] sm:$0xff pattern:$0x73625140] }
 0x1a6   :  { %2166 = vmatmul.f32.vlgmr.msrb.gmra.mxu1 %v1163_v61  ;;  %2206 = vmatmul.f32.vlgmr.msrb.gmra.mxu3 %v1165_v62  ;;  %v1170_v61 = vld.sshfl [vmem:[#allocation1 + $0x10] sm:$0xff pattern:$0x73625140]  ;;  %v908_v62 = vld [vmem:[#allocation2 + $0x1a78] sm:$0xff] }
 0x1a7   :  { %2211 = vmatpush.msra.mxu0 %v843_v63  ;;  %2230 = vmatpush.msra.mxu1 %v860_v0  ;;  %v940_v63 = vld [vmem:[#allocation2 + $0x1b78] sm:$0xff]  ;;  %v845_v0 = vld [vmem:[#allocation2 + $0x1880] sm:$0xff] }
 0x1a8   :  { %2251 = vmatpush.msra.mxu2 %v875_v1  ;;  %2270 = vmatpush.msra.mxu3 %v892_v2  ;;  %v877_v1 = vld [vmem:[#allocation2 + $0x1980] sm:$0xff] }
 0x1a9   :  { %2212 = vmatpush.msra.mxu0 %v842_v3  ;;  %2231 = vmatpush.msra.mxu1 %v859_v4  ;;  %v1169_v2 = vld.sshfl [vmem:[#allocation1 + $0x8] sm:$0xff pattern:$0x73625140]  ;;  %v1171_v3 = vld.sshfl [vmem:[#allocation1 + $0x18] sm:$0xff pattern:$0x73625140] }
 0x1aa   :  { %2252 = vmatpush.msra.mxu2 %v874_v5  ;;  %2271 = vmatpush.msra.mxu3 %v891_v6  ;;  %v907_v4 = vld [vmem:[#allocation2 + $0x1a70] sm:$0xff]  ;;  %v924_v5 = vld [vmem:[#allocation2 + $0x1af8] sm:$0xff] }
 0x1ab   :  { %2213 = vmatpush.msra.mxu0 %v841_v7  ;;  %2232 = vmatpush.msra.mxu1 %v858_v8  ;;  %v939_v6 = vld [vmem:[#allocation2 + $0x1b70] sm:$0xff]  ;;  %v956_v7 = vld [vmem:[#allocation2 + $0x1bf8] sm:$0xff]  ;;  %v906_v8 = vld [vmem:[#allocation2 + $0x1a68] sm:$0xff] }
 0x1ac   :  { %2253 = vmatpush.msra.mxu2 %v873_v9  ;;  %2272 = vmatpush.msra.mxu3 %v890_v10  ;;  %v923_v9 = vld [vmem:[#allocation2 + $0x1af0] sm:$0xff]  ;;  %v938_v10 = vld [vmem:[#allocation2 + $0x1b68] sm:$0xff] }
 0x1ad   :  { %2214 = vmatpush.msra.mxu0 %v840_v11  ;;  %2233 = vmatpush.msra.mxu1 %v857_v12  ;;  %v955_v11 = vld [vmem:[#allocation2 + $0x1bf0] sm:$0xff]  ;;  %v905_v12 = vld [vmem:[#allocation2 + $0x1a60] sm:$0xff] }
 0x1ae   :  { %2254 = vmatpush.msra.mxu2 %v872_v13  ;;  %2273 = vmatpush.msra.mxu3 %v889_v14  ;;  %v922_v13 = vld [vmem:[#allocation2 + $0x1ae8] sm:$0xff]  ;;  %v937_v14 = vld [vmem:[#allocation2 + $0x1b60] sm:$0xff] }
 0x1af   :  { %2215 = vmatpush.msra.mxu0 %v839_v15  ;;  %2234 = vmatpush.msra.mxu1 %v856_v16  ;;  %v954_v15 = vld [vmem:[#allocation2 + $0x1be8] sm:$0xff]  ;;  %v904_v16 = vld [vmem:[#allocation2 + $0x1a58] sm:$0xff] }
 0x1b0   :  { %2255 = vmatpush.msra.mxu2 %v871_v17  ;;  %2274 = vmatpush.msra.mxu3 %v888_v18  ;;  %v921_v17 = vld [vmem:[#allocation2 + $0x1ae0] sm:$0xff]  ;;  %v936_v18 = vld [vmem:[#allocation2 + $0x1b58] sm:$0xff] }
 0x1b1   :  { %2216 = vmatpush.msra.mxu0 %v838_v19  ;;  %2235 = vmatpush.msra.mxu1 %v855_v20  ;;  %v953_v19 = vld [vmem:[#allocation2 + $0x1be0] sm:$0xff]  ;;  %v903_v20 = vld [vmem:[#allocation2 + $0x1a50] sm:$0xff] }
 0x1b2   :  { %2256 = vmatpush.msra.mxu2 %v870_v21  ;;  %2275 = vmatpush.msra.mxu3 %v887_v22  ;;  %v920_v21 = vld [vmem:[#allocation2 + $0x1ad8] sm:$0xff]  ;;  %v935_v22 = vld [vmem:[#allocation2 + $0x1b50] sm:$0xff] }
 0x1b3   :  { %2217 = vmatpush.msra.mxu0 %v837_v23  ;;  %2236 = vmatpush.msra.mxu1 %v854_v24  ;;  %v952_v23 = vld [vmem:[#allocation2 + $0x1bd8] sm:$0xff]  ;;  %v902_v24 = vld [vmem:[#allocation2 + $0x1a48] sm:$0xff] }
 0x1b4   :  { %2257 = vmatpush.msra.mxu2 %v869_v25  ;;  %2276 = vmatpush.msra.mxu3 %v886_v26  ;;  %v919_v25 = vld [vmem:[#allocation2 + $0x1ad0] sm:$0xff]  ;;  %v934_v26 = vld [vmem:[#allocation2 + $0x1b48] sm:$0xff] }
 0x1b5   :  { %2218 = vmatpush.msra.mxu0 %v836_v27  ;;  %2237 = vmatpush.msra.mxu1 %v853_v28  ;;  %v951_v27 = vld [vmem:[#allocation2 + $0x1bd0] sm:$0xff]  ;;  %v901_v28 = vld [vmem:[#allocation2 + $0x1a40] sm:$0xff] }
 0x1b6   :  { %2258 = vmatpush.msra.mxu2 %v868_v29  ;;  %2277 = vmatpush.msra.mxu3 %v885_v30  ;;  %v918_v29 = vld [vmem:[#allocation2 + $0x1ac8] sm:$0xff]  ;;  %v933_v30 = vld [vmem:[#allocation2 + $0x1b40] sm:$0xff] }
 0x1b7   :  { %2219 = vmatpush.msra.mxu0 %v835_v31  ;;  %2238 = vmatpush.msra.mxu1 %v852_v32  ;;  %v950_v31 = vld [vmem:[#allocation2 + $0x1bc8] sm:$0xff]  ;;  %v900_v32 = vld [vmem:[#allocation2 + $0x1a38] sm:$0xff] }
 0x1b8   :  { %2259 = vmatpush.msra.mxu2 %v867_v33  ;;  %2278 = vmatpush.msra.mxu3 %v884_v34  ;;  %v917_v33 = vld [vmem:[#allocation2 + $0x1ac0] sm:$0xff]  ;;  %v932_v34 = vld [vmem:[#allocation2 + $0x1b38] sm:$0xff] }
 0x1b9   :  { %2220 = vmatpush.msra.mxu0 %v834_v35  ;;  %2239 = vmatpush.msra.mxu1 %v851_v36  ;;  %v949_v35 = vld [vmem:[#allocation2 + $0x1bc0] sm:$0xff]  ;;  %v899_v36 = vld [vmem:[#allocation2 + $0x1a30] sm:$0xff] }
 0x1ba   :  { %2260 = vmatpush.msra.mxu2 %v866_v37  ;;  %2279 = vmatpush.msra.mxu3 %v883_v38  ;;  %v916_v37 = vld [vmem:[#allocation2 + $0x1ab8] sm:$0xff]  ;;  %v931_v38 = vld [vmem:[#allocation2 + $0x1b30] sm:$0xff] }
 0x1bb   :  { %2221 = vmatpush.msra.mxu0 %v833_v39  ;;  %2240 = vmatpush.msra.mxu1 %v850_v40  ;;  %v948_v39 = vld [vmem:[#allocation2 + $0x1bb8] sm:$0xff]  ;;  %v898_v40 = vld [vmem:[#allocation2 + $0x1a28] sm:$0xff] }
 0x1bc   :  { %2261 = vmatpush.msra.mxu2 %v865_v41  ;;  %2280 = vmatpush.msra.mxu3 %v882_v42  ;;  %v915_v41 = vld [vmem:[#allocation2 + $0x1ab0] sm:$0xff]  ;;  %v930_v42 = vld [vmem:[#allocation2 + $0x1b28] sm:$0xff] }
 0x1bd   :  { %2222 = vmatpush.msra.mxu0 %v832_v43  ;;  %2241 = vmatpush.msra.mxu1 %v849_v44  ;;  %v947_v43 = vld [vmem:[#allocation2 + $0x1bb0] sm:$0xff]  ;;  %v897_v44 = vld [vmem:[#allocation2 + $0x1a20] sm:$0xff] }
 0x1be   :  { %2262 = vmatpush.msra.mxu2 %v864_v45  ;;  %2281 = vmatpush.msra.mxu3 %v881_v46  ;;  %v914_v45 = vld [vmem:[#allocation2 + $0x1aa8] sm:$0xff]  ;;  %v929_v46 = vld [vmem:[#allocation2 + $0x1b20] sm:$0xff] }
 0x1bf   :  { %2223 = vmatpush.msra.mxu0 %v831_v47  ;;  %2242 = vmatpush.msra.mxu1 %v848_v48  ;;  %v946_v47 = vld [vmem:[#allocation2 + $0x1ba8] sm:$0xff]  ;;  %v896_v48 = vld [vmem:[#allocation2 + $0x1a18] sm:$0xff] }
 0x1c0   :  { %2263 = vmatpush.msra.mxu2 %v863_v49  ;;  %2282 = vmatpush.msra.mxu3 %v880_v50  ;;  %v913_v49 = vld [vmem:[#allocation2 + $0x1aa0] sm:$0xff]  ;;  %v928_v50 = vld [vmem:[#allocation2 + $0x1b18] sm:$0xff] }
 0x1c1   :  { %2224 = vmatpush.msra.mxu0 %v830_v51  ;;  %2243 = vmatpush.msra.mxu1 %v847_v52  ;;  %v945_v51 = vld [vmem:[#allocation2 + $0x1ba0] sm:$0xff]  ;;  %v895_v52 = vld [vmem:[#allocation2 + $0x1a10] sm:$0xff] }
 0x1c2   :  { %2264 = vmatpush.msra.mxu2 %v862_v54  ;;  %2283 = vmatpush.msra.mxu3 %v879_v55  ;;  %v927_v54 = vld [vmem:[#allocation2 + $0x1b10] sm:$0xff]  ;;  %v944_v55 = vld [vmem:[#allocation2 + $0x1b98] sm:$0xff] }
 0x1c3   :  { %2225 = vmatpush.msra.mxu0 %v829_v56  ;;  %2244 = vmatpush.msra.mxu1 %v846_v57  ;;  %v894_v56 = vld [vmem:[#allocation2 + $0x1a08] sm:$0xff]  ;;  %v911_v57 = vld [vmem:[#allocation2 + $0x1a90] sm:$0xff] }
 0x1c4   :  { %2265 = vmatpush.msra.mxu2 %v861_v58  ;;  %2284 = vmatpush.msra.mxu3 %v878_v59  ;;  %v59_v58 = vld [vmem:[%s2733_s0 + $0x70] sm:$0xff] }
 0x1c5   :  { %2226 = vmatmul.f32.vlgmr.msra.gmra.mxu0 %v1168_v60  ;;  %2266 = vmatmul.f32.vlgmr.msra.gmra.mxu2 %v1170_v61  ;;  %v926_v59 = vld [vmem:[#allocation2 + $0x1b08] sm:$0xff]  ;;  %v943_v60 = vld [vmem:[#allocation2 + $0x1b90] sm:$0xff]  ;;  %1176 = vst [vmem:[#allocation1] ss:$4 sm:$0xff] %v59_v58  ;;  %v893_v61 = vld [vmem:[#allocation2 + $0x1a00] sm:$0xff] }
 0x1c6   :  { %2290 = vmatpush.msrb.mxu0 %v908_v62  ;;  %2330 = vmatpush.msrb.mxu2 %v940_v63  ;;  %v910_v62 = vld [vmem:[#allocation2 + $0x1a88] sm:$0xff]  ;;  %v925_v63 = vld [vmem:[#allocation2 + $0x1b00] sm:$0xff] }
 0x1c7   :  { %2245 = vmatpush.msra.mxu1 %v845_v0  ;;  %2285 = vmatpush.msra.mxu3 %v877_v1  ;;  %v942_v0 = vld [vmem:[#allocation2 + $0x1b88] sm:$0xff]  ;;  %v1172_v1 = vld.sshfl [vmem:[#allocation1 + $0x20] sm:$0xff pattern:$0x73625140] }
 0x1c8   :  { %2246 = vmatmul.f32.vlgmr.msra.gmra.mxu1 %v1169_v2  ;;  %2286 = vmatmul.f32.vlgmr.msra.gmra.mxu3 %v1171_v3  ;;  %v1174_v2 = vld.sshfl [vmem:[#allocation1 + $0x30] sm:$0xff pattern:$0x73625140]  ;;  %v972_v3 = vld [vmem:[#allocation2 + $0x1c78] sm:$0xff] }
 0x1c9   :  { %2291 = vmatpush.msrb.mxu0 %v907_v4  ;;  %2310 = vmatpush.msrb.mxu1 %v924_v5  ;;  %v1004_v4 = vld [vmem:[#allocation2 + $0x1d78] sm:$0xff]  ;;  %v909_v5 = vld [vmem:[#allocation2 + $0x1a80] sm:$0xff] }
 0x1ca   :  { %2331 = vmatpush.msrb.mxu2 %v939_v6  ;;  %2350 = vmatpush.msrb.mxu3 %v956_v7  ;;  %v941_v6 = vld [vmem:[#allocation2 + $0x1b80] sm:$0xff] }
 0x1cb   :  { %2292 = vmatpush.msrb.mxu0 %v906_v8  ;;  %2311 = vmatpush.msrb.mxu1 %v923_v9  ;;  %v1173_v7 = vld.sshfl [vmem:[#allocation1 + $0x28] sm:$0xff pattern:$0x73625140]  ;;  %v1175_v8 = vld.sshfl [vmem:[#allocation1 + $0x38] sm:$0xff pattern:$0x73625140] }
 0x1cc   :  { %2332 = vmatpush.msrb.mxu2 %v938_v10  ;;  %2351 = vmatpush.msrb.mxu3 %v955_v11  ;;  %v971_v9 = vld [vmem:[#allocation2 + $0x1c70] sm:$0xff]  ;;  %v988_v10 = vld [vmem:[#allocation2 + $0x1cf8] sm:$0xff] }
 0x1cd   :  { %2293 = vmatpush.msrb.mxu0 %v905_v12  ;;  %2312 = vmatpush.msrb.mxu1 %v922_v13  ;;  %v1003_v11 = vld [vmem:[#allocation2 + $0x1d70] sm:$0xff]  ;;  %v1020_v12 = vld [vmem:[#allocation2 + $0x1df8] sm:$0xff]  ;;  %v970_v13 = vld [vmem:[#allocation2 + $0x1c68] sm:$0xff] }
 0x1ce   :  { %2333 = vmatpush.msrb.mxu2 %v937_v14  ;;  %2352 = vmatpush.msrb.mxu3 %v954_v15  ;;  %v987_v14 = vld [vmem:[#allocation2 + $0x1cf0] sm:$0xff]  ;;  %v2554_v15 = vld [vmem:[#allocation5] ss:$0 sm:$0xff] }
 0x1cf   :  { %2294 = vmatpush.msrb.mxu0 %v904_v16  ;;  %2313 = vmatpush.msrb.mxu1 %v921_v17  ;;  %v1002_v16 = vld [vmem:[#allocation2 + $0x1d68] sm:$0xff]  ;;  %v1019_v17 = vld [vmem:[#allocation2 + $0x1df0] sm:$0xff] }
 0x1d0   :  { %2334 = vmatpush.msrb.mxu2 %v936_v18  ;;  %2353 = vmatpush.msrb.mxu3 %v953_v19  ;;  %v1267_v18 = vpop.f32.mrf.mxu0  ;;  %v969_v19 = vld [vmem:[#allocation2 + $0x1c60] sm:$0xff] }
 0x1d1   :  { %2295 = vmatpush.msrb.mxu0 %v903_v20  ;;  %2314 = vmatpush.msrb.mxu1 %v920_v21  ;;  %v986_v20 = vld [vmem:[#allocation2 + $0x1ce8] sm:$0xff]  ;;  %v1001_v21 = vld [vmem:[#allocation2 + $0x1d60] sm:$0xff] }
 0x1d2   :  { %2335 = vmatpush.msrb.mxu2 %v935_v22  ;;  %2354 = vmatpush.msrb.mxu3 %v952_v23  ;;  %v1018_v22 = vld [vmem:[#allocation2 + $0x1de8] sm:$0xff]  ;;  %v968_v23 = vld [vmem:[#allocation2 + $0x1c58] sm:$0xff] }
 0x1d3   :  { %2296 = vmatpush.msrb.mxu0 %v902_v24  ;;  %2315 = vmatpush.msrb.mxu1 %v919_v25  ;;  %v985_v24 = vld [vmem:[#allocation2 + $0x1ce0] sm:$0xff]  ;;  %v1268_v25 = vadd.f32 %v2554_v15, %v1267_v18 }
 0x1d4   :  { %2336 = vmatpush.msrb.mxu2 %v934_v26  ;;  %2355 = vmatpush.msrb.mxu3 %v951_v27  ;;  %v1000_v26 = vld [vmem:[#allocation2 + $0x1d58] sm:$0xff]  ;;  %v1017_v27 = vld [vmem:[#allocation2 + $0x1de0] sm:$0xff] }
 0x1d5   :  { %2297 = vmatpush.msrb.mxu0 %v901_v28  ;;  %2316 = vmatpush.msrb.mxu1 %v918_v29  ;;  %v1287_v28 = vpop.f32.mrf.mxu1  ;;  %v967_v29 = vld [vmem:[#allocation2 + $0x1c50] sm:$0xff]  ;;  %v989_v18 = vld [vmem:[#allocation2 + $0x1d00] sm:$0xff] }
 0x1d6   :  { %2337 = vmatpush.msrb.mxu2 %v933_v30  ;;  %2356 = vmatpush.msrb.mxu3 %v950_v31  ;;  %v984_v30 = vld [vmem:[#allocation2 + $0x1cd8] sm:$0xff]  ;;  %v999_v31 = vld [vmem:[#allocation2 + $0x1d50] sm:$0xff] }
 0x1d7   :  { %2298 = vmatpush.msrb.mxu0 %v900_v32  ;;  %2317 = vmatpush.msrb.mxu1 %v917_v33  ;;  %v1016_v32 = vld [vmem:[#allocation2 + $0x1dd8] sm:$0xff]  ;;  %v966_v33 = vld [vmem:[#allocation2 + $0x1c48] sm:$0xff] }
 0x1d8   :  { %2338 = vmatpush.msrb.mxu2 %v932_v34  ;;  %2357 = vmatpush.msrb.mxu3 %v949_v35  ;;  %v983_v34 = vld [vmem:[#allocation2 + $0x1cd0] sm:$0xff]  ;;  %v1288_v35 = vadd.f32 %v1287_v28, %v1268_v25  ;;  %v1347_v58 = vpop.f32.mrf.mxu0  ;;  %v1179_v28 = vld.sshfl [vmem:[#allocation1 + $0x8] sm:$0xff pattern:$0x73625140] }
 0x1d9   :  { %2299 = vmatpush.msrb.mxu0 %v899_v36  ;;  %2318 = vmatpush.msrb.mxu1 %v916_v37  ;;  %v998_v36 = vld [vmem:[#allocation2 + $0x1d48] sm:$0xff]  ;;  %v1015_v37 = vld [vmem:[#allocation2 + $0x1dd0] sm:$0xff] }
 0x1da   :  { %2339 = vmatpush.msrb.mxu2 %v931_v38  ;;  %2358 = vmatpush.msrb.mxu3 %v948_v39  ;;  %v1307_v38 = vpop.f32.mrf.mxu2  ;;  %v965_v39 = vld [vmem:[#allocation2 + $0x1c40] sm:$0xff] }
 0x1db   :  { %2300 = vmatpush.msrb.mxu0 %v898_v40  ;;  %2319 = vmatpush.msrb.mxu1 %v915_v41  ;;  %v982_v40 = vld [vmem:[#allocation2 + $0x1cc8] sm:$0xff]  ;;  %v997_v41 = vld [vmem:[#allocation2 + $0x1d40] sm:$0xff] }
 0x1dc   :  { %2340 = vmatpush.msrb.mxu2 %v930_v42  ;;  %2359 = vmatpush.msrb.mxu3 %v947_v43  ;;  %v1014_v42 = vld [vmem:[#allocation2 + $0x1dc8] sm:$0xff]  ;;  %v964_v43 = vld [vmem:[#allocation2 + $0x1c38] sm:$0xff] }
 0x1dd   :  { %2301 = vmatpush.msrb.mxu0 %v897_v44  ;;  %2320 = vmatpush.msrb.mxu1 %v914_v45  ;;  %v981_v44 = vld [vmem:[#allocation2 + $0x1cc0] sm:$0xff]  ;;  %v1308_v45 = vadd.f32 %v1307_v38, %v1288_v35  ;;  %v1084_v35 = vld [vmem:[#allocation2 + $0x1ff8] sm:$0xff] }
 0x1de   :  { %2341 = vmatpush.msrb.mxu2 %v929_v46  ;;  %2360 = vmatpush.msrb.mxu3 %v946_v47  ;;  %v996_v46 = vld [vmem:[#allocation2 + $0x1d38] sm:$0xff]  ;;  %v1013_v47 = vld [vmem:[#allocation2 + $0x1dc0] sm:$0xff] }
 0x1df   :  { %2302 = vmatpush.msrb.mxu0 %v896_v48  ;;  %2321 = vmatpush.msrb.mxu1 %v913_v49  ;;  %v1327_v48 = vpop.f32.mrf.mxu3  ;;  %v963_v49 = vld [vmem:[#allocation2 + $0x1c30] sm:$0xff] }
 0x1e0   :  { %2342 = vmatpush.msrb.mxu2 %v928_v50  ;;  %2361 = vmatpush.msrb.mxu3 %v945_v51  ;;  %v980_v50 = vld [vmem:[#allocation2 + $0x1cb8] sm:$0xff]  ;;  %v995_v51 = vld [vmem:[#allocation2 + $0x1d30] sm:$0xff] }
 0x1e1   :  { %2303 = vmatpush.msrb.mxu0 %v895_v52  ;;  %2322 = vmatpush.msrb.mxu1 %v912_v53  ;;  %v1012_v52 = vld [vmem:[#allocation2 + $0x1db8] sm:$0xff]  ;;  %v962_v53 = vld [vmem:[#allocation2 + $0x1c28] sm:$0xff] }
 0x1e2   :  { %2343 = vmatpush.msrb.mxu2 %v927_v54  ;;  %2362 = vmatpush.msrb.mxu3 %v944_v55  ;;  %v979_v54 = vld [vmem:[#allocation2 + $0x1cb0] sm:$0xff]  ;;  %v1328_v55 = vadd.f32 %v1327_v48, %v1308_v45  ;;  %v1387_v15 = vpop.f32.mrf.mxu2  ;;  %v1082_v45 = vld [vmem:[#allocation2 + $0x1fe8] sm:$0xff]  ;;  %v1049_v48 = vld [vmem:[#allocation2 + $0x1ee0] sm:$0xff] }
 0x1e3   :  { %2304 = vmatpush.msrb.mxu0 %v894_v56  ;;  %2323 = vmatpush.msrb.mxu1 %v911_v57  ;;  %v994_v56 = vld [vmem:[#allocation2 + $0x1d28] sm:$0xff]  ;;  %v1011_v57 = vld [vmem:[#allocation2 + $0x1db0] sm:$0xff] }
 0x1e4   :  { %2344 = vmatpush.msrb.mxu2 %v926_v59  ;;  %2363 = vmatpush.msrb.mxu3 %v943_v60  ;;  %v961_v59 = vld [vmem:[#allocation2 + $0x1c20] sm:$0xff]  ;;  %v978_v60 = vld [vmem:[#allocation2 + $0x1ca8] sm:$0xff] }
 0x1e5   :  { %2305 = vmatpush.msrb.mxu0 %v893_v61  ;;  %2324 = vmatpush.msrb.mxu1 %v910_v62  ;;  %v993_v61 = vld [vmem:[#allocation2 + $0x1d20] sm:$0xff]  ;;  %v1010_v62 = vld [vmem:[#allocation2 + $0x1da8] sm:$0xff] }
 0x1e6   :  { %2345 = vmatpush.msrb.mxu2 %v925_v63  ;;  %2364 = vmatpush.msrb.mxu3 %v942_v0  ;;  %v960_v63 = vld [vmem:[#allocation2 + $0x1c18] sm:$0xff]  ;;  %v977_v0 = vld [vmem:[#allocation2 + $0x1ca0] sm:$0xff] }
 0x1e7   :  { %2306 = vmatmul.f32.vlgmr.msrb.gmra.mxu0 %v1172_v1  ;;  %2346 = vmatmul.f32.vlgmr.msrb.gmra.mxu2 %v1174_v2  ;;  %v1348_v1 = vadd.f32 %v1347_v58, %v1328_v55  ;;  %v992_v2 = vld [vmem:[#allocation2 + $0x1d18] sm:$0xff]  ;;  %v1407_v25 = vpop.f32.mrf.mxu3  ;;  %v1063_v55 = vld [vmem:[#allocation2 + $0x1f50] sm:$0xff]  ;;  %v1030_v58 = vld [vmem:[#allocation2 + $0x1e48] sm:$0xff] }
 0x1e8   :  { %2370 = vmatpush.msra.mxu0 %v972_v3  ;;  %2410 = vmatpush.msra.mxu2 %v1004_v4  ;;  %v1009_v3 = vld [vmem:[#allocation2 + $0x1da0] sm:$0xff]  ;;  %v1367_v4 = vpop.f32.mrf.mxu1 }
 0x1e9   :  { %2325 = vmatpush.msrb.mxu1 %v909_v5  ;;  %2365 = vmatpush.msrb.mxu3 %v941_v6  ;;  %v959_v5 = vld [vmem:[#allocation2 + $0x1c10] sm:$0xff]  ;;  %v976_v6 = vld [vmem:[#allocation2 + $0x1c98] sm:$0xff] }
 0x1ea   :  { %2326 = vmatmul.f32.vlgmr.msrb.gmra.mxu1 %v1173_v7  ;;  %2366 = vmatmul.f32.vlgmr.msrb.gmra.mxu3 %v1175_v8  ;;  %v991_v7 = vld [vmem:[#allocation2 + $0x1d10] sm:$0xff]  ;;  %v1008_v8 = vld [vmem:[#allocation2 + $0x1d98] sm:$0xff] }
 0x1eb   :  { %2371 = vmatpush.msra.mxu0 %v971_v9  ;;  %2390 = vmatpush.msra.mxu1 %v988_v10  ;;  %v958_v9 = vld [vmem:[#allocation2 + $0x1c08] sm:$0xff]  ;;  %v975_v10 = vld [vmem:[#allocation2 + $0x1c90] sm:$0xff] }
 0x1ec   :  { %2411 = vmatpush.msra.mxu2 %v1003_v11  ;;  %2430 = vmatpush.msra.mxu3 %v1020_v12  ;;  %v60_v11 = vld [vmem:[%s2733_s0 + $0x78] sm:$0xff]  ;;  %v1368_v12 = vadd.f32 %v1367_v4, %v1348_v1  ;;  %v1028_v4 = vld [vmem:[#allocation2 + $0x1e38] sm:$0xff]  ;;  %s2637_s0 = smov [#allocation7]  }
 0x1ed   :  { %2372 = vmatpush.msra.mxu0 %v970_v13  ;;  %2391 = vmatpush.msra.mxu1 %v987_v14  ;;  %v990_v13 = vld [vmem:[#allocation2 + $0x1d08] sm:$0xff]  ;;  %v1007_v14 = vld [vmem:[#allocation2 + $0x1d90] sm:$0xff]  ;;  %1177 = vst [vmem:[#allocation1 + $0x20] ss:$4 sm:$0xff] %v60_v11  ;;  %v1044_v11 = vld [vmem:[#allocation2 + $0x1eb8] sm:$0xff]  ;;  %s2536_s25 = sshll.u32 %s2637_s0, 4  ;;  %s2537_s25 = int_to_ptr.vmem [resolvable:$true] %s2536_s25 }
 0x1ee   :  { %2412 = vmatpush.msra.mxu2 %v1002_v16  ;;  %2431 = vmatpush.msra.mxu3 %v1019_v17  ;;  %v957_v16 = vld [vmem:[#allocation2 + $0x1c00] sm:$0xff]  ;;  %v974_v17 = vld [vmem:[#allocation2 + $0x1c88] sm:$0xff] }
 0x1ef   :  { %2373 = vmatpush.msra.mxu0 %v969_v19  ;;  %2392 = vmatpush.msra.mxu1 %v986_v20  ;;  %v1006_v19 = vld [vmem:[#allocation2 + $0x1d88] sm:$0xff]  ;;  %v1178_v20 = vld.sshfl [vmem:[#allocation1] sm:$0xff pattern:$0x73625140] }
 0x1f0   :  { %2413 = vmatpush.msra.mxu2 %v1001_v21  ;;  %2432 = vmatpush.msra.mxu3 %v1018_v22  ;;  %v1180_v21 = vld.sshfl [vmem:[#allocation1 + $0x10] sm:$0xff pattern:$0x73625140]  ;;  %v1388_v22 = vadd.f32 %v1387_v15, %v1368_v12  ;;  %v1059_v12 = vld [vmem:[#allocation2 + $0x1f30] sm:$0xff] }
 0x1f1   :  { %2374 = vmatpush.msra.mxu0 %v968_v23  ;;  %2393 = vmatpush.msra.mxu1 %v985_v24  ;;  %v1036_v23 = vld [vmem:[#allocation2 + $0x1e78] sm:$0xff]  ;;  %v1026_v15 = vld [vmem:[#allocation2 + $0x1e28] sm:$0xff] }
 0x1f2   :  { %2414 = vmatpush.msra.mxu2 %v1000_v26  ;;  %2433 = vmatpush.msra.mxu3 %v1017_v27  ;;  %v1068_v24 = vld [vmem:[#allocation2 + $0x1f78] sm:$0xff]  ;;  %v973_v26 = vld [vmem:[#allocation2 + $0x1c80] sm:$0xff] }
 0x1f3   :  { %2375 = vmatpush.msra.mxu0 %v967_v29  ;;  %2394 = vmatpush.msra.mxu1 %v984_v30  ;;  %v1005_v27 = vld [vmem:[#allocation2 + $0x1d80] sm:$0xff]  ;;  %v1181_v29 = vld.sshfl [vmem:[#allocation1 + $0x18] sm:$0xff pattern:$0x73625140]  ;;  %v1427_v30 = vpop.f32.mrf.mxu0 }
 0x1f4   :  { %2415 = vmatpush.msra.mxu2 %v999_v31  ;;  %2434 = vmatpush.msra.mxu3 %v1016_v32  ;;  %v1035_v31 = vld [vmem:[#allocation2 + $0x1e70] sm:$0xff]  ;;  %v1052_v32 = vld [vmem:[#allocation2 + $0x1ef8] sm:$0xff] }
 0x1f5   :  { %2376 = vmatpush.msra.mxu0 %v966_v33  ;;  %2395 = vmatpush.msra.mxu1 %v983_v34  ;;  %v1408_v33 = vadd.f32 %v1407_v25, %v1388_v22  ;;  %v1067_v34 = vld [vmem:[#allocation2 + $0x1f70] sm:$0xff] }
 0x1f6   :  { %2416 = vmatpush.msra.mxu2 %v998_v36  ;;  %2435 = vmatpush.msra.mxu3 %v1015_v37  ;;  %v1034_v36 = vld [vmem:[#allocation2 + $0x1e68] sm:$0xff]  ;;  %v1051_v37 = vld [vmem:[#allocation2 + $0x1ef0] sm:$0xff] }
 0x1f7   :  { %2377 = vmatpush.msra.mxu0 %v965_v39  ;;  %2396 = vmatpush.msra.mxu1 %v982_v40  ;;  %v1428_v38 = vadd.f32 %v1427_v30, %v1408_v33  ;;  %v1066_v39 = vld [vmem:[#allocation2 + $0x1f68] sm:$0xff]  ;;  %v1083_v40 = vld [vmem:[#allocation2 + $0x1ff0] sm:$0xff] }
 0x1f8   :  { %2417 = vmatpush.msra.mxu2 %v997_v41  ;;  %2436 = vmatpush.msra.mxu3 %v1014_v42  ;;  %v1447_v41 = vpop.f32.mrf.mxu1  ;;  %v1033_v42 = vld [vmem:[#allocation2 + $0x1e60] sm:$0xff] }
 0x1f9   :  { %2378 = vmatpush.msra.mxu0 %v964_v43  ;;  %2397 = vmatpush.msra.mxu1 %v981_v44  ;;  %v1050_v43 = vld [vmem:[#allocation2 + $0x1ee8] sm:$0xff]  ;;  %v1065_v44 = vld [vmem:[#allocation2 + $0x1f60] sm:$0xff] }
 0x1fa   :  { %2418 = vmatpush.msra.mxu2 %v996_v46  ;;  %2437 = vmatpush.msra.mxu3 %v1013_v47  ;;  %v1467_v46 = vpop.f32.mrf.mxu2  ;;  %v1032_v47 = vld [vmem:[#allocation2 + $0x1e58] sm:$0xff] }
 0x1fb   :  { %2379 = vmatpush.msra.mxu0 %v963_v49  ;;  %2398 = vmatpush.msra.mxu1 %v980_v50  ;;  %v1448_v49 = vadd.f32 %v1447_v41, %v1428_v38  ;;  %v1064_v50 = vld [vmem:[#allocation2 + $0x1f58] sm:$0xff] }
 0x1fc   :  { %2419 = vmatpush.msra.mxu2 %v995_v51  ;;  %2438 = vmatpush.msra.mxu3 %v1012_v52  ;;  %v1081_v51 = vld [vmem:[#allocation2 + $0x1fe0] sm:$0xff]  ;;  %v1031_v52 = vld [vmem:[#allocation2 + $0x1e50] sm:$0xff] }
 0x1fd   :  { %2380 = vmatpush.msra.mxu0 %v962_v53  ;;  %2399 = vmatpush.msra.mxu1 %v979_v54  ;;  %v1048_v53 = vld [vmem:[#allocation2 + $0x1ed8] sm:$0xff]  ;;  %v1468_v54 = vadd.f32 %v1467_v46, %v1448_v49 }
 0x1fe   :  { %2420 = vmatpush.msra.mxu2 %v994_v56  ;;  %2439 = vmatpush.msra.mxu3 %v1011_v57  ;;  %v1080_v56 = vld [vmem:[#allocation2 + $0x1fd8] sm:$0xff]  ;;  %v1487_v57 = vpop.f32.mrf.mxu3 }
 0x1ff   :  { %2381 = vmatpush.msra.mxu0 %v961_v59  ;;  %2400 = vmatpush.msra.mxu1 %v978_v60  ;;  %v1047_v59 = vld [vmem:[#allocation2 + $0x1ed0] sm:$0xff]  ;;  %v1062_v60 = vld [vmem:[#allocation2 + $0x1f48] sm:$0xff]  ;;  %v1488_v1 = vadd.f32 %v1487_v57, %v1468_v54 }
 0x200   :  { %2421 = vmatpush.msra.mxu2 %v993_v61  ;;  %2440 = vmatpush.msra.mxu3 %v1010_v62  ;;  %v1079_v61 = vld [vmem:[#allocation2 + $0x1fd0] sm:$0xff]  ;;  %v1507_v62 = vpop.f32.mrf.mxu0 }
 0x201   :  { %2382 = vmatpush.msra.mxu0 %v960_v63  ;;  %2401 = vmatpush.msra.mxu1 %v977_v0  ;;  %v1029_v63 = vld [vmem:[#allocation2 + $0x1e40] sm:$0xff]  ;;  %v1046_v0 = vld [vmem:[#allocation2 + $0x1ec8] sm:$0xff] }
 0x202   :  { %2422 = vmatpush.msra.mxu2 %v992_v2  ;;  %2441 = vmatpush.msra.mxu3 %v1009_v3  ;;  %v1061_v2 = vld [vmem:[#allocation2 + $0x1f40] sm:$0xff]  ;;  %v1078_v3 = vld [vmem:[#allocation2 + $0x1fc8] sm:$0xff] }
 0x203   :  { %2383 = vmatpush.msra.mxu0 %v959_v5  ;;  %2402 = vmatpush.msra.mxu1 %v976_v6  ;;  %v1045_v5 = vld [vmem:[#allocation2 + $0x1ec0] sm:$0xff]  ;;  %v1508_v6 = vadd.f32 %v1507_v62, %v1488_v1 }
 0x204   :  { %2423 = vmatpush.msra.mxu2 %v991_v7  ;;  %2442 = vmatpush.msra.mxu3 %v1008_v8  ;;  %v1060_v7 = vld [vmem:[#allocation2 + $0x1f38] sm:$0xff]  ;;  %v1077_v8 = vld [vmem:[#allocation2 + $0x1fc0] sm:$0xff] }
 0x205   :  { %2384 = vmatpush.msra.mxu0 %v958_v9  ;;  %2403 = vmatpush.msra.mxu1 %v975_v10  ;;  %v1527_v9 = vpop.f32.mrf.mxu1  ;;  %v1027_v10 = vld [vmem:[#allocation2 + $0x1e30] sm:$0xff] }
 0x206   :  { %2424 = vmatpush.msra.mxu2 %v990_v13  ;;  %2443 = vmatpush.msra.mxu3 %v1007_v14  ;;  %v1076_v13 = vld [vmem:[#allocation2 + $0x1fb8] sm:$0xff]  ;;  %v1547_v14 = vpop.f32.mrf.mxu2  ;;  %v1567_v25 = vpop.f32.mrf.mxu3 }
 0x207   :  { %2385 = vmatpush.msra.mxu0 %v957_v16  ;;  %2404 = vmatpush.msra.mxu1 %v974_v17  ;;  %v1043_v16 = vld [vmem:[#allocation2 + $0x1eb0] sm:$0xff]  ;;  %v1528_v17 = vadd.f32 %v1527_v9, %v1508_v6 }
 0x208   :  { %2425 = vmatpush.msra.mxu2 %v989_v18  ;;  %2444 = vmatpush.msra.mxu3 %v1006_v19  ;;  %v1058_v18 = vld [vmem:[#allocation2 + $0x1f28] sm:$0xff]  ;;  %v1075_v19 = vld [vmem:[#allocation2 + $0x1fb0] sm:$0xff]  ;;  %v1587_v30 = vpop.f32.mrf.mxu0 }
 0x209   :  { %2386 = vmatmul.f32.vlgmr.msra.gmra.mxu0 %v1178_v20  ;;  %2426 = vmatmul.f32.vlgmr.msra.gmra.mxu2 %v1180_v21  ;;  %v1025_v20 = vld [vmem:[#allocation2 + $0x1e20] sm:$0xff]  ;;  %v1042_v21 = vld [vmem:[#allocation2 + $0x1ea8] sm:$0xff]  ;;  %v1548_v22 = vadd.f32 %v1547_v14, %v1528_v17 }
 0x20a   :  { %2450 = vmatpush.msrb.mxu0 %v1036_v23  ;;  %2490 = vmatpush.msrb.mxu2 %v1068_v24  ;;  %v1057_v23 = vld [vmem:[#allocation2 + $0x1f20] sm:$0xff]  ;;  %v1074_v24 = vld [vmem:[#allocation2 + $0x1fa8] sm:$0xff] }
 0x20b   :  { %2405 = vmatpush.msra.mxu1 %v973_v26  ;;  %2445 = vmatpush.msra.mxu3 %v1005_v27  ;;  %v1024_v26 = vld [vmem:[#allocation2 + $0x1e18] sm:$0xff]  ;;  %v1041_v27 = vld [vmem:[#allocation2 + $0x1ea0] sm:$0xff]  ;;  %v1568_v33 = vadd.f32 %v1567_v25, %v1548_v22 }
 0x20c   :  { %2406 = vmatmul.f32.vlgmr.msra.gmra.mxu1 %v1179_v28  ;;  %2446 = vmatmul.f32.vlgmr.msra.gmra.mxu3 %v1181_v29  ;;  %v1056_v28 = vld [vmem:[#allocation2 + $0x1f18] sm:$0xff]  ;;  %v1073_v29 = vld [vmem:[#allocation2 + $0x1fa0] sm:$0xff] }
 0x20d   :  { %2451 = vmatpush.msrb.mxu0 %v1035_v31  ;;  %2470 = vmatpush.msrb.mxu1 %v1052_v32  ;;  %v1023_v31 = vld [vmem:[#allocation2 + $0x1e10] sm:$0xff]  ;;  %v1040_v32 = vld [vmem:[#allocation2 + $0x1e98] sm:$0xff]  ;;  %v1588_v38 = vadd.f32 %v1587_v30, %v1568_v33  ;;  %v1607_v41 = vpop.f32.mrf.mxu1 }
 0x20e   :  { %2491 = vmatpush.msrb.mxu2 %v1067_v34  ;;  %2510 = vmatpush.msrb.mxu3 %v1084_v35  ;;  %v1055_v34 = vld [vmem:[#allocation2 + $0x1f10] sm:$0xff]  ;;  %v1072_v35 = vld [vmem:[#allocation2 + $0x1f98] sm:$0xff]  ;;  %v1627_v46 = vpop.f32.mrf.mxu2 }
 0x20f   :  { %2452 = vmatpush.msrb.mxu0 %v1034_v36  ;;  %2471 = vmatpush.msrb.mxu1 %v1051_v37  ;;  %v1022_v36 = vld [vmem:[#allocation2 + $0x1e08] sm:$0xff]  ;;  %v1039_v37 = vld [vmem:[#allocation2 + $0x1e90] sm:$0xff]  ;;  %v1608_v49 = vadd.f32 %v1607_v41, %v1588_v38 }
 0x210   :  { %2492 = vmatpush.msrb.mxu2 %v1066_v39  ;;  %2511 = vmatpush.msrb.mxu3 %v1083_v40  ;;  %v1054_v39 = vld [vmem:[#allocation2 + $0x1f08] sm:$0xff]  ;;  %v1071_v40 = vld [vmem:[#allocation2 + $0x1f90] sm:$0xff] }
 0x211   :  { %2453 = vmatpush.msrb.mxu0 %v1033_v42  ;;  %2472 = vmatpush.msrb.mxu1 %v1050_v43  ;;  %v1021_v42 = vld [vmem:[#allocation2 + $0x1e00] sm:$0xff]  ;;  %v1038_v43 = vld [vmem:[#allocation2 + $0x1e88] sm:$0xff]  ;;  %v1628_v54 = vadd.f32 %v1627_v46, %v1608_v49 }
 0x212   :  { %2493 = vmatpush.msrb.mxu2 %v1065_v44  ;;  %2512 = vmatpush.msrb.mxu3 %v1082_v45  ;;  %v1053_v44 = vld [vmem:[#allocation2 + $0x1f00] sm:$0xff]  ;;  %v1070_v45 = vld [vmem:[#allocation2 + $0x1f88] sm:$0xff] }
 0x213   :  { %2454 = vmatpush.msrb.mxu0 %v1032_v47  ;;  %2473 = vmatpush.msrb.mxu1 %v1049_v48  ;;  %v1182_v47 = vld.sshfl [vmem:[#allocation1 + $0x20] sm:$0xff pattern:$0x73625140]  ;;  %v1184_v48 = vld.sshfl [vmem:[#allocation1 + $0x30] sm:$0xff pattern:$0x73625140] }
 0x214   :  { %2494 = vmatpush.msrb.mxu2 %v1064_v50  ;;  %2513 = vmatpush.msrb.mxu3 %v1081_v51  ;;  %v1037_v50 = vld [vmem:[#allocation2 + $0x1e80] sm:$0xff] }
 0x215   :  { %2455 = vmatpush.msrb.mxu0 %v1031_v52  ;;  %2474 = vmatpush.msrb.mxu1 %v1048_v53  ;;  %v1069_v51 = vld [vmem:[#allocation2 + $0x1f80] sm:$0xff]  ;;  %v1185_v53 = vld.sshfl [vmem:[#allocation1 + $0x38] sm:$0xff pattern:$0x73625140] }
 0x216   :  { %2495 = vmatpush.msrb.mxu2 %v1063_v55  ;;  %2514 = vmatpush.msrb.mxu3 %v1080_v56  ;;  %v1183_v52 = vld.sshfl [vmem:[#allocation1 + $0x28] sm:$0xff pattern:$0x73625140]  ;;  %v1647_v55 = vpop.f32.mrf.mxu3  ;;  %v1667_v56 = vpop.f32.mrf.mxu0 }
 0x217   :  { %2456 = vmatpush.msrb.mxu0 %v1030_v58  ;;  %2475 = vmatpush.msrb.mxu1 %v1047_v59  ;;  %v1648_v57 = vadd.f32 %v1647_v55, %v1628_v54  ;;  %v1687_v59 = vpop.f32.mrf.mxu1 }
 0x218   :  { %2496 = vmatpush.msrb.mxu2 %v1062_v60  ;;  %2515 = vmatpush.msrb.mxu3 %v1079_v61  ;;  %v1707_v60 = vpop.f32.mrf.mxu2 }
 0x219   :  { %2457 = vmatpush.msrb.mxu0 %v1029_v63  ;;  %2476 = vmatpush.msrb.mxu1 %v1046_v0  ;;  %v1668_v58 = vadd.f32 %v1667_v56, %v1648_v57 }
 0x21a   :  { %2497 = vmatpush.msrb.mxu2 %v1061_v2  ;;  %2516 = vmatpush.msrb.mxu3 %v1078_v3 }
 0x21b   :  { %2458 = vmatpush.msrb.mxu0 %v1028_v4  ;;  %2477 = vmatpush.msrb.mxu1 %v1045_v5  ;;  %v1688_v61 = vadd.f32 %v1687_v59, %v1668_v58 }
 0x21c   :  { %2498 = vmatpush.msrb.mxu2 %v1060_v7  ;;  %2517 = vmatpush.msrb.mxu3 %v1077_v8 }
 0x21d   :  { %2459 = vmatpush.msrb.mxu0 %v1027_v10  ;;  %2478 = vmatpush.msrb.mxu1 %v1044_v11  ;;  %v1708_v62 = vadd.f32 %v1707_v60, %v1688_v61 }
 0x21e   :  { %2499 = vmatpush.msrb.mxu2 %v1059_v12  ;;  %2518 = vmatpush.msrb.mxu3 %v1076_v13  ;;  %v1727_v63 = vpop.f32.mrf.mxu3  ;;  %v1747_v0 = vpop.f32.mrf.mxu0 }
 0x21f   :  { %2460 = vmatpush.msrb.mxu0 %v1026_v15  ;;  %2479 = vmatpush.msrb.mxu1 %v1043_v16  ;;  %v1728_v1 = vadd.f32 %v1727_v63, %v1708_v62  ;;  %v1767_v3 = vpop.f32.mrf.mxu1 }
 0x220   :  { %2500 = vmatpush.msrb.mxu2 %v1058_v18  ;;  %2519 = vmatpush.msrb.mxu3 %v1075_v19  ;;  %v1787_v4 = vpop.f32.mrf.mxu2 }
 0x221   :  { %2461 = vmatpush.msrb.mxu0 %v1025_v20  ;;  %2480 = vmatpush.msrb.mxu1 %v1042_v21  ;;  %v1748_v2 = vadd.f32 %v1747_v0, %v1728_v1 }
 0x222   :  { %2501 = vmatpush.msrb.mxu2 %v1057_v23  ;;  %2520 = vmatpush.msrb.mxu3 %v1074_v24 }
 0x223   :  { %2462 = vmatpush.msrb.mxu0 %v1024_v26  ;;  %2481 = vmatpush.msrb.mxu1 %v1041_v27  ;;  %v1768_v5 = vadd.f32 %v1767_v3, %v1748_v2 }
 0x224   :  { %2502 = vmatpush.msrb.mxu2 %v1056_v28  ;;  %2521 = vmatpush.msrb.mxu3 %v1073_v29 }
 0x225   :  { %2463 = vmatpush.msrb.mxu0 %v1023_v31  ;;  %2482 = vmatpush.msrb.mxu1 %v1040_v32  ;;  %v1788_v6 = vadd.f32 %v1787_v4, %v1768_v5 }
 0x226   :  { %2503 = vmatpush.msrb.mxu2 %v1055_v34  ;;  %2522 = vmatpush.msrb.mxu3 %v1072_v35  ;;  %v1807_v7 = vpop.f32.mrf.mxu3  ;;  %v1827_v8 = vpop.f32.mrf.mxu0 }
 0x227   :  { %2464 = vmatpush.msrb.mxu0 %v1022_v36  ;;  %2483 = vmatpush.msrb.mxu1 %v1039_v37  ;;  %v1808_v9 = vadd.f32 %v1807_v7, %v1788_v6  ;;  %v1847_v11 = vpop.f32.mrf.mxu1 }
 0x228   :  { %2504 = vmatpush.msrb.mxu2 %v1054_v39  ;;  %2523 = vmatpush.msrb.mxu3 %v1071_v40  ;;  %v1867_v12 = vpop.f32.mrf.mxu2 }
 0x229   :  { %2465 = vmatpush.msrb.mxu0 %v1021_v42  ;;  %2484 = vmatpush.msrb.mxu1 %v1038_v43  ;;  %v1828_v10 = vadd.f32 %v1827_v8, %v1808_v9 }
 0x22a   :  { %2505 = vmatpush.msrb.mxu2 %v1053_v44  ;;  %2524 = vmatpush.msrb.mxu3 %v1070_v45 }
 0x22b   :  { %2466 = vmatmul.f32.vlgmr.msrb.gmra.mxu0 %v1182_v47  ;;  %2506 = vmatmul.f32.vlgmr.msrb.gmra.mxu2 %v1184_v48  ;;  %v1848_v13 = vadd.f32 %v1847_v11, %v1828_v10 }
 0x22c   :  { %2485 = vmatpush.msrb.mxu1 %v1037_v50  ;;  %2525 = vmatpush.msrb.mxu3 %v1069_v51 }
 0x22d   :  { %2486 = vmatmul.f32.vlgmr.msrb.gmra.mxu1 %v1183_v52  ;;  %2526 = vmatmul.f32.vlgmr.msrb.gmra.mxu3 %v1185_v53  ;;  %v1868_v14 = vadd.f32 %v1867_v12, %v1848_v13 }
 0x22e   :  { %v1887_v15 = vpop.f32.mrf.mxu3  ;;  %v1907_v16 = vpop.f32.mrf.mxu0 }
 0x22f   :  { %v1888_v17 = vadd.f32 %v1887_v15, %v1868_v14  ;;  %v1927_v19 = vpop.f32.mrf.mxu1 }
 0x230   :  { %v1947_v20 = vpop.f32.mrf.mxu2 }
 0x231   :  { %v1908_v18 = vadd.f32 %v1907_v16, %v1888_v17 }
 0x233   :  { %v1928_v21 = vadd.f32 %v1927_v19, %v1908_v18 }
 0x235   :  { %v1948_v22 = vadd.f32 %v1947_v20, %v1928_v21 }
 0x236   :  { %v1967_v23 = vpop.f32.mrf.mxu3  ;;  %v1987_v24 = vpop.f32.mrf.mxu0 }
 0x237   :  { %v1968_v25 = vadd.f32 %v1967_v23, %v1948_v22  ;;  %v2007_v27 = vpop.f32.mrf.mxu1 }
 0x238   :  { %v2027_v28 = vpop.f32.mrf.mxu2 }
 0x239   :  { %v1988_v26 = vadd.f32 %v1987_v24, %v1968_v25 }
 0x23b   :  { %v2008_v29 = vadd.f32 %v2007_v27, %v1988_v26 }
 0x23d   :  { %v2028_v30 = vadd.f32 %v2027_v28, %v2008_v29 }
 0x23e   :  { %v2047_v31 = vpop.f32.mrf.mxu3  ;;  %v2067_v32 = vpop.f32.mrf.mxu0 }
 0x23f   :  { %v2048_v33 = vadd.f32 %v2047_v31, %v2028_v30  ;;  %v2087_v35 = vpop.f32.mrf.mxu1 }
 0x240   :  { %v2107_v36 = vpop.f32.mrf.mxu2 }
 0x241   :  { %v2068_v34 = vadd.f32 %v2067_v32, %v2048_v33 }
 0x243   :  { %v2088_v37 = vadd.f32 %v2087_v35, %v2068_v34 }
 0x245   :  { %v2108_v38 = vadd.f32 %v2107_v36, %v2088_v37 }
 0x246   :  { %v2127_v39 = vpop.f32.mrf.mxu3  ;;  %v2147_v40 = vpop.f32.mrf.mxu0 }
 0x247   :  { %v2128_v41 = vadd.f32 %v2127_v39, %v2108_v38  ;;  %v2167_v43 = vpop.f32.mrf.mxu1 }
 0x248   :  { %v2187_v44 = vpop.f32.mrf.mxu2 }
 0x249   :  { %v2148_v42 = vadd.f32 %v2147_v40, %v2128_v41 }
 0x24b   :  { %v2168_v45 = vadd.f32 %v2167_v43, %v2148_v42 }
 0x24d   :  { %v2188_v46 = vadd.f32 %v2187_v44, %v2168_v45 }
 0x24e   :  { %v2207_v47 = vpop.f32.mrf.mxu3  ;;  %v2227_v48 = vpop.f32.mrf.mxu0 }
 0x24f   :  { %v2208_v49 = vadd.f32 %v2207_v47, %v2188_v46  ;;  %v2247_v51 = vpop.f32.mrf.mxu1 }
 0x250   :  { %v2267_v52 = vpop.f32.mrf.mxu2 }
 0x251   :  { %v2228_v50 = vadd.f32 %v2227_v48, %v2208_v49 }
 0x253   :  { %v2248_v53 = vadd.f32 %v2247_v51, %v2228_v50 }
 0x255   :  { %v2268_v54 = vadd.f32 %v2267_v52, %v2248_v53 }
 0x256   :  { %v2287_v55 = vpop.f32.mrf.mxu3 }
 0x257   :  { %v2288_v57 = vadd.f32 %v2287_v55, %v2268_v54 }
 0x264   :  { %v2307_v56 = vpop.f32.mrf.mxu0 }
 0x265   :  { %v2308_v58 = vadd.f32 %v2307_v56, %v2288_v57 }
 0x267   :  { %v2327_v59 = vpop.f32.mrf.mxu1 }
 0x268   :  { %v2328_v61 = vadd.f32 %v2327_v59, %v2308_v58 }
 0x26a   :  { %v2347_v60 = vpop.f32.mrf.mxu2 }
 0x26b   :  { %v2348_v62 = vadd.f32 %v2347_v60, %v2328_v61 }
 0x26d   :  { %v2367_v63 = vpop.f32.mrf.mxu3 }
 0x26e   :  { %v2368_v1 = vadd.f32 %v2367_v63, %v2348_v62 }
 0x286   :  { %v2387_v0 = vpop.f32.mrf.mxu0 }
 0x287   :  { %v2388_v2 = vadd.f32 %v2387_v0, %v2368_v1 }
 0x289   :  { %v2407_v3 = vpop.f32.mrf.mxu1 }
 0x28a   :  { %v2408_v5 = vadd.f32 %v2407_v3, %v2388_v2 }
 0x28c   :  { %v2427_v4 = vpop.f32.mrf.mxu2 }
 0x28d   :  { %v2428_v6 = vadd.f32 %v2427_v4, %v2408_v5 }
 0x28f   :  { %v2447_v7 = vpop.f32.mrf.mxu3 }
 0x290   :  { %v2448_v8 = vadd.f32 %v2447_v7, %v2428_v6 }
 0x2a8   :  { %v2467_v9 = vpop.f32.mrf.mxu0 }
 0x2a9   :  { %v2468_v10 = vadd.f32 %v2467_v9, %v2448_v8 }
 0x2aa   :  { %v2487_v11 = vpop.f32.mrf.mxu1 }
 0x2ab   :  { %v2488_v12 = vadd.f32 %v2487_v11, %v2468_v10 }
 0x2ae   :  { %v2507_v13 = vpop.f32.mrf.mxu2 }
 0x2af   :  { %v2508_v14 = vadd.f32 %v2507_v13, %v2488_v12 }
 0x2b0   :  { %v2527_v15 = vpop.f32.mrf.mxu3 }
 0x2b1   :  { %v2528_v16 = vadd.f32 %v2527_v15, %v2508_v14 }
 0x2b3   :  { %2530 = vst [vmem:[#allocation7] sm:$0x3] %v2528_v16 }
 0x2b4   :  { %2541 = dma.vmem_to_hbm [thread:$0]  %s2537_s25, 32, %s2539_s28, [#allocation4]  }
 0x2b5   :  { %2631 = dma.done.wait [#allocation4], 32  }
 0x2b6   :  { %2632 = vsyncadd [#allocation4], 4294967264 }
 0x2b7   :  { %2546 = vsyncpa [#allocation3], 1 }
 0x2b8   :  { %2547 = vsyncpa [#allocation6], 1 }
 0x2b9   :  { %2548 = vsyncpa [#allocation4], 1 }

// kernel: solveig_forward.2
= control target key start
LH: loop header
LB: loop body
LE: loop exit
PB: predicated region body
PF: predicated region fallthrough
CT: control target
= control target key end

     0   :  { %12 = vsyncpa [#allocation5], 0  ;;  %s7094_s0 = inlined_call_operand.vmem [shape: f32[2,16,16,128], index: 0, kind: input, shape index: {}]   ;;  %s7095_s1 = inlined_call_operand.hbm [shape: f32[1152,128], index: 1, kind: input, shape index: {}]   ;;  %s7096_s2 = inlined_call_operand.hbm [shape: f32[1,128], index: 2, kind: input, shape index: {}]   ;;  %s7097_s3 = inlined_call_operand.hbm [shape: f32[1152,128], index: 3, kind: input, shape index: {}]   ;;  %s7098_s4 = inlined_call_operand.hbm [shape: f32[1,128], index: 4, kind: input, shape index: {}]   ;;  %s7099_s5 = inlined_call_operand.hbm [shape: f32[1152,128], index: 5, kind: input, shape index: {}]   ;;  %s7100_s6 = inlined_call_operand.hbm [shape: f32[1,128], index: 6, kind: input, shape index: {}]   ;;  %s7101_s7 = inlined_call_operand.vmem [shape: f32[2,64,128], index: 7, kind: output, shape index: {}]  }
   0x1   :  { %13 = vsyncpa [#allocation7], 0 }
   0x2   :  { %14 = vsyncpa [#allocation10], 0 }
   0x3   :  { %15 = vsyncpa [#allocation13], 0  ;;  %s5041_s24 = smov 0  }
   0x4 LB: > { %s230_s27 = sshll.u32 %s7096_s2, 4  ;;  %s5050_s28 = sadd.s32 4294967295, %s4990_s24   ;;  %s4990_s24 = sphi %s5041_s24, %s21_s24   ;;  %s231_s27 = int_to_ptr.hbm [resolvable:$true] %s230_s27 }
   0x5   : > { %p4655_p0 = scmp.ge.s32.totalorder %s4990_s24, 1  ;;  %p204_p1 = scmp.lt.s32.totalorder %s4990_s24, 3 }
   0x6   : > { %p4753_p2 = scmp.eq.s32.totalorder %s5050_s28, 0  ;;  %s4992_s30 = smov [#allocation6]  }
   0x7   : > { %p5055_p3 = pnand %p4655_p0, %p204_p1  ;;  %s232_s8 = sshll.u32 %s4992_s30, 4  ;;  %s233_s8 = int_to_ptr.vmem [resolvable:$true] %s232_s8 }
   0x8   : > { %s256_s11 = sshll.u32 %s7098_s4, 4  ;;  %s215_s14 = sshll.u32 %s7095_s1, 4  ;;  %s257_s11 = int_to_ptr.hbm [resolvable:$true] %s256_s11  ;;  %s216_s14 = int_to_ptr.hbm [resolvable:$true] %s215_s14 }
   0x9   : > { %p4734_p4 = pneg %p5055_p3  ;;  %s4993_s16 = smov [#allocation9]  }
   0xa   : > { %s258_s17 = sshll.u32 %s4993_s16, 4  ;;  %s4994_s18 = smov [#allocation4]   ;;  %s259_s17 = int_to_ptr.vmem [resolvable:$true] %s258_s17 }
   0xb   : > { %p5069_p5 = pnand %p4753_p2, %p4734_p4  ;;  %s217_s19 = sshll.u32 %s4994_s18, 4  ;;  %s218_s19 = int_to_ptr.vmem [resolvable:$true] %s217_s19 }
   0xc   : > { %s4995_s20 = smov 128   ;;  %s4996_s21 = smov 8  }
   0xd   : > { %4740 = dma.hbm_to_vmem [thread:$0]  (!%p5069_p5), %s231_s27, 16, %s233_s8, [#allocation7]  }
   0xe   : > { %4746 = dma.hbm_to_vmem [thread:$0]  (!%p5069_p5), %s257_s11, 16, %s259_s17, [#allocation10]  }
   0xf   : > { %4737 = dma.hbm_to_vmem [thread:$0]  (!%p5069_p5), %s216_s14, 18432, %s218_s19, [#allocation5], %s4995_s20, %s4995_s20, %s4996_s21  }
  0x10   : > { %s241_s25 = sshll.u32 %s7097_s3, 4  ;;  %s4997_s26 = smov [#allocation8]   ;;  %s242_s25 = int_to_ptr.hbm [resolvable:$true] %s241_s25 }
  0x11   : > { %s243_s30 = sshll.u32 %s4997_s26, 4  ;;  %s267_s9 = sshll.u32 %s7099_s5, 4  ;;  %s244_s30 = int_to_ptr.vmem [resolvable:$true] %s243_s30  ;;  %s268_s9 = int_to_ptr.hbm [resolvable:$true] %s267_s9 }
  0x12   : > { %4743 = dma.hbm_to_vmem [thread:$0]  (!%p5069_p5), %s242_s25, 18432, %s244_s30, [#allocation7], %s4995_s20, %s4995_s20, %s4996_s21  }
  0x13   : > { %s4998_s10 = smov [#allocation11]   ;;  %s282_s14 = sshll.u32 %s7100_s6, 4  ;;  %s283_s14 = int_to_ptr.hbm [resolvable:$true] %s282_s14 }
  0x14   : > { %s269_s11 = sshll.u32 %s4998_s10, 4  ;;  %s4999_s16 = smov [#allocation12]   ;;  %s270_s11 = int_to_ptr.vmem [resolvable:$true] %s269_s11 }
  0x15   : > { %4749 = dma.hbm_to_vmem [thread:$0]  (!%p5069_p5), %s268_s9, 18432, %s270_s11, [#allocation10], %s4995_s20, %s4995_s20, %s4996_s21  }
  0x16   : > { %s284_s17 = sshll.u32 %s4999_s16, 4  ;;  %305 = sbr.rel (%p5055_p3) target bundleno = 1517 (0x5ed), region = 48  ;;  %s285_s17 = int_to_ptr.vmem [resolvable:$true] %s284_s17 }
  0x17   : > { %4752 = dma.hbm_to_vmem [thread:$0]  (!%p5069_p5), %s283_s14, 16, %s285_s17, [#allocation13]  }
  0x1b   : > { %4973 = dma.done.wait (%p4753_p2), [#allocation5], 18432  }
  0x1c   : > { %4975 = vsyncadd (%p4753_p2), [#allocation5], 4294948864 }
  0x1d   : > { %4977 = dma.done.wait (%p4753_p2), [#allocation7], 18448  }
  0x1e   : > { %4979 = vsyncadd (%p4753_p2), [#allocation7], 4294948848 }
  0x1f   : > { %4981 = dma.done.wait (%p4753_p2), [#allocation10], 18448  }
  0x20   : > { %4983 = vsyncadd (%p4753_p2), [#allocation10], 4294948848 }
  0x21   : > { %4985 = dma.done.wait (%p4753_p2), [#allocation13], 16  }
  0x22   : > { %4987 = vsyncadd (%p4753_p2), [#allocation13], 4294967280  ;;  %v5000_v0 = vmov 0.0   ;;  %v796_v1 = vld [vmem:[#allocation4 + $0x78] sm:$0xff]  ;;  %v795_v2 = vld [vmem:[#allocation4 + $0x70] sm:$0xff]  ;;  %p363_p6 = scmp.lt.s32.totalorder %s5050_s28, 1 }
  0x23   : > { %373 = vst [vmem:[#allocation2] sm:$0xff] %v5000_v0  ;;  %v812_v3 = vld [vmem:[#allocation4 + $0xf8] sm:$0xff]  ;;  %929 = vmatpush.msra.mxu0 %v796_v1  ;;  %4678 = vmatpush.msra.mxu2 %v796_v1  ;;  %v811_v4 = vld [vmem:[#allocation4 + $0xf0] sm:$0xff]  ;;  %v794_v5 = vld [vmem:[#allocation4 + $0x68] sm:$0xff]  ;;  %vm2202_vm0 = vcmask 1041408   ;;  %vm3247_vm1 = vcmask 1041409  }
  0x24   : > { %374 = vst [vmem:[#allocation2 + $0x8] sm:$0xff] %v5000_v0  ;;  %1042 = vmatpush.msra.mxu1 %v812_v3  ;;  %4694 = vmatpush.msra.mxu3 %v812_v3  ;;  %v810_v6 = vld [vmem:[#allocation4 + $0xe8] sm:$0xff]  ;;  %v793_v7 = vld [vmem:[#allocation4 + $0x60] sm:$0xff]  ;;  %v792_v9 = vld [vmem:[#allocation4 + $0x58] sm:$0xff]  ;;  %s7221_s28 = smov (!%p363_p6, %s5050_s28), 1  ;;  %vm3249_vm2 = vcmask 1042434  }
  0x25   : > { %375 = vst [vmem:[#allocation2 + $0x10] sm:$0x3] %v5000_v0  ;;  %930 = vmatpush.msra.mxu0 %v795_v2  ;;  %4679 = vmatpush.msra.mxu2 %v795_v2  ;;  %v809_v8 = vld [vmem:[#allocation4 + $0xe0] sm:$0xff]  ;;  %v808_v10 = vld [vmem:[#allocation4 + $0xd8] sm:$0xff]  ;;  %v791_v11 = vld [vmem:[#allocation4 + $0x50] sm:$0xff]  ;;  %s4676_s29 = sshll.u32 %s7221_s28, 8 }
  0x26   : > { %376 = vst [vmem:[#allocation2 + $0x18] sm:$0xff] %v5000_v0  ;;  %1043 = vmatpush.msra.mxu1 %v811_v4  ;;  %4695 = vmatpush.msra.mxu3 %v811_v4  ;;  %v807_v12 = vld [vmem:[#allocation4 + $0xd0] sm:$0xff]  ;;  %v790_v13 = vld [vmem:[#allocation4 + $0x48] sm:$0xff]  ;;  %v789_v15 = vld [vmem:[#allocation4 + $0x40] sm:$0xff]  ;;  %s5172_s19 = scalar_lea.vmem %s7094_s0, %s4676_s29  ;;  %vm3251_vm3 = vcmask 1043459   ;;  %vm3253_vm4 = vcmask 1044484  }
  0x27   : > { %377 = vst [vmem:[#allocation2 + $0x20] sm:$0xff] %v5000_v0  ;;  %931 = vmatpush.msra.mxu0 %v794_v5  ;;  %4680 = vmatpush.msra.mxu2 %v794_v5  ;;  %v806_v14 = vld [vmem:[#allocation4 + $0xc8] sm:$0xff]  ;;  %v805_v16 = vld [vmem:[#allocation4 + $0xc0] sm:$0xff]  ;;  %v788_v17 = vld [vmem:[#allocation4 + $0x38] sm:$0xff]  ;;  %vm3255_vm5 = vcmask 1045509   ;;  %vm3257_vm6 = vcmask 1046534  }
  0x28   : > { %378 = vst [vmem:[#allocation2 + $0x28] sm:$0x3] %v5000_v0  ;;  %1044 = vmatpush.msra.mxu1 %v810_v6  ;;  %4696 = vmatpush.msra.mxu3 %v810_v6  ;;  %v804_v18 = vld [vmem:[#allocation4 + $0xb8] sm:$0xff]  ;;  %v787_v19 = vld [vmem:[#allocation4 + $0x30] sm:$0xff]  ;;  %v786_v21 = vld [vmem:[#allocation4 + $0x28] sm:$0xff]  ;;  %vm3259_vm7 = vcmask 1047559  }
  0x29   : > { %379 = vst [vmem:[#allocation2 + $0x30] sm:$0xff] %v5000_v0  ;;  %932 = vmatpush.msra.mxu0 %v793_v7  ;;  %4681 = vmatpush.msra.mxu2 %v793_v7  ;;  %v803_v20 = vld [vmem:[#allocation4 + $0xb0] sm:$0xff]  ;;  %v802_v22 = vld [vmem:[#allocation4 + $0xa8] sm:$0xff]  ;;  %v785_v23 = vld [vmem:[#allocation4 + $0x20] sm:$0xff]  ;;  %s4677_s20 = sshll.u32 %s7221_s28, 6 }
  0x2a   : > { %380 = vst [vmem:[#allocation2 + $0x38] sm:$0xff] %v5000_v0  ;;  %1045 = vmatpush.msra.mxu1 %v809_v8  ;;  %4697 = vmatpush.msra.mxu3 %v809_v8  ;;  %v801_v24 = vld [vmem:[#allocation4 + $0xa0] sm:$0xff]  ;;  %v784_v25 = vld [vmem:[#allocation4 + $0x18] sm:$0xff]  ;;  %v783_v27 = vld [vmem:[#allocation4 + $0x10] sm:$0xff]  ;;  %s7055_s23 = scalar_lea.vmem %s7101_s7, %s4677_s20 }
  0x2b   : > { %381 = vst [vmem:[#allocation2 + $0x40] sm:$0x3] %v5000_v0  ;;  %933 = vmatpush.msra.mxu0 %v792_v9  ;;  %4682 = vmatpush.msra.mxu2 %v792_v9  ;;  %v800_v26 = vld [vmem:[#allocation4 + $0x98] sm:$0xff]  ;;  %v799_v28 = vld [vmem:[#allocation4 + $0x90] sm:$0xff]  ;;  %v782_v29 = vld [vmem:[#allocation4 + $0x8] sm:$0xff] }
  0x2c   : > { %382 = vst [vmem:[#allocation2 + $0x48] sm:$0xff] %v5000_v0  ;;  %1046 = vmatpush.msra.mxu1 %v808_v10  ;;  %4698 = vmatpush.msra.mxu3 %v808_v10  ;;  %v798_v30 = vld [vmem:[#allocation4 + $0x88] sm:$0xff]  ;;  %v781_v31 = vld [vmem:[#allocation4] sm:$0xff]  ;;  %v860_v32 = vld [vmem:[#allocation4 + $0x278] sm:$0xff] }
  0x2d   : > { %383 = vst [vmem:[#allocation2 + $0x50] sm:$0xff] %v5000_v0  ;;  %934 = vmatpush.msra.mxu0 %v791_v11  ;;  %4683 = vmatpush.msra.mxu2 %v791_v11  ;;  %v797_v33 = vld [vmem:[#allocation4 + $0x80] sm:$0xff]  ;;  %v828_v34 = vld [vmem:[#allocation4 + $0x178] sm:$0xff]  ;;  %v827_v36 = vld [vmem:[#allocation4 + $0x170] sm:$0xff] }
  0x2e   : > { %384 = vst [vmem:[#allocation2 + $0x58] sm:$0x3] %v5000_v0  ;;  %1047 = vmatpush.msra.mxu1 %v807_v12  ;;  %4699 = vmatpush.msra.mxu3 %v807_v12  ;;  %v524_v35 = vld [vmem:[#allocation2 + $0x1] sm:$0xff]  ;;  %v5178_v38 = vld [vmem:[%s5172_s19 + $0xd0] sm:$0xff]  ;;  %v826_v39 = vld [vmem:[#allocation4 + $0x168] sm:$0xff] }
  0x2f   : > { %385 = vst [vmem:[#allocation2 + $0x60] sm:$0xff] %v5000_v0  ;;  %935 = vmatpush.msra.mxu0 %v790_v13  ;;  %4684 = vmatpush.msra.mxu2 %v790_v13  ;;  %v844_v37 = vld [vmem:[#allocation4 + $0x1f8] sm:$0xff]  ;;  %v843_v40 = vld [vmem:[#allocation4 + $0x1f0] sm:$0xff]  ;;  %v825_v41 = vld [vmem:[#allocation4 + $0x160] sm:$0xff] }
  0x30   : > { %386 = vst [vmem:[#allocation2 + $0x68] sm:$0xff] %v5000_v0  ;;  %1048 = vmatpush.msra.mxu1 %v806_v14  ;;  %4700 = vmatpush.msra.mxu3 %v806_v14  ;;  %v842_v42 = vld [vmem:[#allocation4 + $0x1e8] sm:$0xff]  ;;  %v824_v43 = vld [vmem:[#allocation4 + $0x158] sm:$0xff]  ;;  %v841_v44 = vld [vmem:[#allocation4 + $0x1e0] sm:$0xff] }
  0x31   : > { %387 = vst [vmem:[#allocation2 + $0x70] sm:$0x3] %v5000_v0  ;;  %936 = vmatpush.msra.mxu0 %v789_v15  ;;  %4685 = vmatpush.msra.mxu2 %v789_v15  ;;  %v525_v45 = vld [vmem:[#allocation2 + $0x9] sm:$0xff]  ;;  %v823_v46 = vld [vmem:[#allocation4 + $0x150] sm:$0xff]  ;;  %v454_v48 = vld [vmem:[%s5172_s19 + $0xd8] sm:$0xff] }
  0x32   : > { %388 = vst [vmem:[#allocation2 + $0x78] sm:$0xff] %v5000_v0  ;;  %1049 = vmatpush.msra.mxu1 %v805_v16  ;;  %4701 = vmatpush.msra.mxu3 %v805_v16  ;;  %v840_v47 = vld [vmem:[#allocation4 + $0x1d8] sm:$0xff]  ;;  %v859_v49 = vld [vmem:[#allocation4 + $0x270] sm:$0xff]  ;;  %v822_v50 = vld [vmem:[#allocation4 + $0x148] sm:$0xff] }
  0x33   : > { %389 = vst [vmem:[#allocation2 + $0x80] sm:$0xff] %v5000_v0  ;;  %937 = vmatpush.msra.mxu0 %v788_v17  ;;  %4686 = vmatpush.msra.mxu2 %v788_v17  ;;  %v839_v51 = vld [vmem:[#allocation4 + $0x1d0] sm:$0xff]  ;;  %v821_v52 = vld [vmem:[#allocation4 + $0x140] sm:$0xff]  ;;  %v838_v53 = vld [vmem:[#allocation4 + $0x1c8] sm:$0xff] }
  0x34   : > { %390 = vst [vmem:[#allocation2 + $0x88] sm:$0x3] %v5000_v0  ;;  %1050 = vmatpush.msra.mxu1 %v804_v18  ;;  %4702 = vmatpush.msra.mxu3 %v804_v18  ;;  %v820_v54 = vld [vmem:[#allocation4 + $0x138] sm:$0xff]  ;;  %v837_v55 = vld [vmem:[#allocation4 + $0x1c0] sm:$0xff]  ;;  %v819_v56 = vld [vmem:[#allocation4 + $0x130] sm:$0xff] }
  0x35   : > { %391 = vst [vmem:[#allocation2 + $0x90] sm:$0xff] %v5000_v0  ;;  %938 = vmatpush.msra.mxu0 %v787_v19  ;;  %4687 = vmatpush.msra.mxu2 %v787_v19  ;;  %v836_v57 = vld [vmem:[#allocation4 + $0x1b8] sm:$0xff]  ;;  %v5199_v58 = vld [vmem:[%s5172_s19] sm:$0xff]  ;;  %v818_v60 = vld [vmem:[#allocation4 + $0x128] sm:$0xff] }
  0x36   : > { %392 = vst [vmem:[#allocation2 + $0x98] sm:$0xff] %v5000_v0  ;;  %1051 = vmatpush.msra.mxu1 %v803_v20  ;;  %4703 = vmatpush.msra.mxu3 %v803_v20  ;;  %v455_v59 = vld [vmem:[%s5172_s19 + $0xe0] sm:$0xff]  ;;  %v817_v62 = vld [vmem:[#allocation4 + $0x120] sm:$0xff]  ;;  %v834_v63 = vld [vmem:[#allocation4 + $0x1a8] sm:$0xff] }
  0x37   : > { %393 = vst [vmem:[#allocation2 + $0xa0] sm:$0x3] %v5000_v0  ;;  %939 = vmatpush.msra.mxu0 %v786_v21  ;;  %4688 = vmatpush.msra.mxu2 %v786_v21  ;;  %v835_v61 = vld [vmem:[#allocation4 + $0x1b0] sm:$0xff]  ;;  %v816_v1 = vld [vmem:[#allocation4 + $0x118] sm:$0xff]  ;;  %v833_v2 = vld [vmem:[#allocation4 + $0x1a0] sm:$0xff] }
  0x38   : > { %394 = vst [vmem:[#allocation2 + $0xa8] sm:$0xff] %v5000_v0  ;;  %1052 = vmatpush.msra.mxu1 %v802_v22  ;;  %4704 = vmatpush.msra.mxu3 %v802_v22  ;;  %v5210_v3 = vld [vmem:[%s5172_s19 + $0x8] sm:$0xff]  ;;  %v815_v4 = vld [vmem:[#allocation4 + $0x110] sm:$0xff]  ;;  %v858_v7 = vld [vmem:[#allocation4 + $0x268] sm:$0xff] }
  0x39   : > { %395 = vst [vmem:[#allocation2 + $0xb0] sm:$0xff] %v5000_v0  ;;  %940 = vmatpush.msra.mxu0 %v785_v23  ;;  %4689 = vmatpush.msra.mxu2 %v785_v23  ;;  %v832_v5 = vld [vmem:[#allocation4 + $0x198] sm:$0xff]  ;;  %v831_v8 = vld [vmem:[#allocation4 + $0x190] sm:$0xff]  ;;  %v5216_v9 = vld [vmem:[%s5172_s19 + $0x10] sm:$0xff] }
  0x3a   : > { %396 = vst [vmem:[#allocation2 + $0xb8] sm:$0x3] %v5000_v0  ;;  %1053 = vmatpush.msra.mxu1 %v801_v24  ;;  %4705 = vmatpush.msra.mxu3 %v801_v24  ;;  %v456_v6 = vld [vmem:[%s5172_s19 + $0xe8] sm:$0xff]  ;;  %v830_v10 = vld [vmem:[#allocation4 + $0x188] sm:$0xff]  ;;  %v813_v11 = vld [vmem:[#allocation4 + $0x100] sm:$0xff] }
  0x3b   : > { %397 = vst [vmem:[#allocation2 + $0xc0] sm:$0xff] %v5000_v0  ;;  %941 = vmatpush.msra.mxu0 %v784_v25  ;;  %4690 = vmatpush.msra.mxu2 %v784_v25  ;;  %v5221_v13 = vld [vmem:[%s5172_s19 + $0x18] sm:$0xff]  ;;  %v829_v14 = vld [vmem:[#allocation4 + $0x180] sm:$0xff]  ;;  %v5226_v18 = vld [vmem:[%s5172_s19 + $0x20] sm:$0xff] }
  0x3c   : > { %398 = vst [vmem:[#allocation2 + $0xc8] sm:$0xff] %v5000_v0  ;;  %1054 = vmatpush.msra.mxu1 %v800_v26  ;;  %4706 = vmatpush.msra.mxu3 %v800_v26  ;;  %v857_v19 = vld [vmem:[#allocation4 + $0x260] sm:$0xff]  ;;  %v5231_v22 = vld [vmem:[%s5172_s19 + $0x28] sm:$0xff] }
  0x3d   : > { %399 = vst [vmem:[#allocation2 + $0xd0] sm:$0x3] %v5000_v0  ;;  %942 = vmatpush.msra.mxu0 %v783_v27  ;;  %4691 = vmatpush.msra.mxu2 %v783_v27  ;;  %v5236_v25 = vld [vmem:[%s5172_s19 + $0x30] sm:$0xff]  ;;  %v856_v26 = vld [vmem:[#allocation4 + $0x258] sm:$0xff] }
  0x3e   : > { %400 = vst [vmem:[#allocation2 + $0xd8] sm:$0xff] %v5000_v0  ;;  %1055 = vmatpush.msra.mxu1 %v799_v28  ;;  %4707 = vmatpush.msra.mxu3 %v799_v28  ;;  %v556_v27 = vld [vmem:[#allocation2 + $0x2] sm:$0xff] }
  0x3f   : > { %401 = vst [vmem:[#allocation2 + $0xe0] sm:$0xff] %v5000_v0  ;;  %943 = vmatpush.msra.mxu0 %v782_v29  ;;  %4692 = vmatpush.msra.mxu2 %v782_v29  ;;  %v434_v29 = vld [vmem:[%s5172_s19 + $0x38] sm:$0xff] }
  0x40   : > { %402 = vst [vmem:[#allocation2 + $0xe8] sm:$0x3] %v5000_v0  ;;  %1056 = vmatpush.msra.mxu1 %v798_v30  ;;  %4708 = vmatpush.msra.mxu3 %v798_v30  ;;  %v855_v30 = vld [vmem:[#allocation4 + $0x250] sm:$0xff] }
  0x41   : > { %403 = vst [vmem:[#allocation2 + $0xf0] sm:$0xff] %v5000_v0  ;;  %944 = vmatpush.msra.mxu0 %v781_v31  ;;  %4693 = vmatpush.msra.mxu2 %v781_v31  ;;  %v557_v31 = vld [vmem:[#allocation2 + $0xa] sm:$0xff] }
  0x42   : > { %404 = vst [vmem:[#allocation2 + $0xf8] sm:$0xff] %v5000_v0  ;;  %945 = vmatmul.f32.vlgmr.msra.gmra.mxu0 %v5000_v0  ;;  %1057 = vmatpush.msra.mxu1 %v797_v33 }
  0x43   : > { %405 = vst [vmem:[#allocation2 + $0x100] sm:$0x3] %v5000_v0  ;;  %1381 = vmatpush.msrb.mxu0 %v860_v32  ;;  %4709 = vmatpush.msra.mxu3 %v797_v33  ;;  %v435_v33 = vld [vmem:[%s5172_s19 + $0x40] sm:$0xff] }
  0x44   : > { %406 = vst [vmem:[#allocation2 + $0x108] sm:$0xff] %v5000_v0  ;;  %1155 = vmatpush.msrb.mxu2 %v828_v34  ;;  %1058 = vmatmul.f32.vlgmr.msra.gmra.mxu1 %v524_v35 }
  0x45   : > { %407 = vst [vmem:[#allocation2 + $0x110] sm:$0xff] %v5000_v0  ;;  %1142 = vmatmul.f32.vlgmr.msra.gmra.mxu3 %v5178_v38  ;;  %1382 = vmatpush.msrb.mxu0 %v859_v49 }
  0x46   : > { %408 = vst [vmem:[#allocation2 + $0x118] sm:$0x3] %v5000_v0  ;;  %1156 = vmatpush.msrb.mxu2 %v827_v36  ;;  %1268 = vmatpush.msrb.mxu3 %v844_v37  ;;  %v436_v36 = vld [vmem:[%s5172_s19 + $0x48] sm:$0xff]  ;;  %v854_v37 = vld [vmem:[#allocation4 + $0x248] sm:$0xff] }
  0x47   : > { %409 = vst [vmem:[#allocation2 + $0x120] sm:$0xff] %v5000_v0  ;;  %1383 = vmatpush.msrb.mxu0 %v858_v7 }
  0x48   : > { %410 = vst [vmem:[#allocation2 + $0x128] sm:$0xff] %v5000_v0  ;;  %1157 = vmatpush.msrb.mxu2 %v826_v39  ;;  %1269 = vmatpush.msrb.mxu3 %v843_v40  ;;  %v437_v40 = vld [vmem:[%s5172_s19 + $0x50] sm:$0xff] }
  0x49   : > { %411 = vst [vmem:[#allocation2 + $0x130] sm:$0x3] %v5000_v0  ;;  %1384 = vmatpush.msrb.mxu0 %v857_v19  ;;  %v849_v19 = vld [vmem:[#allocation4 + $0x220] sm:$0xff] }
  0x4a   : > { %412 = vst [vmem:[#allocation2 + $0x138] sm:$0xff] %v5000_v0  ;;  %948 = vmatmul.f32.gmra.mxu0 %v5000_v0  ;;  %1158 = vmatpush.msrb.mxu2 %v825_v41 }
  0x4b   : > { %413 = vst [vmem:[#allocation2 + $0x140] sm:$0xff] %v5000_v0  ;;  %1270 = vmatpush.msrb.mxu3 %v842_v42  ;;  %1385 = vmatpush.msrb.mxu0 %v856_v26  ;;  %v446_v26 = vld [vmem:[%s5172_s19 + $0x98] sm:$0xff] }
  0x4c   : > { %414 = vst [vmem:[#allocation2 + $0x148] sm:$0x3] %v5000_v0  ;;  %1159 = vmatpush.msrb.mxu2 %v824_v43  ;;  %1061 = vmatmul.f32.gmra.mxu1 %v525_v45  ;;  %v438_v43 = vld [vmem:[%s5172_s19 + $0x58] sm:$0xff] }
  0x4d   : > { %415 = vst [vmem:[#allocation2 + $0x150] sm:$0xff] %v5000_v0  ;;  %1271 = vmatpush.msrb.mxu3 %v841_v44  ;;  %1386 = vmatpush.msrb.mxu0 %v855_v30  ;;  %v853_v44 = vld [vmem:[#allocation4 + $0x240] sm:$0xff] }
  0x4e   : > { %416 = vst [vmem:[#allocation2 + $0x158] sm:$0xff] %v5000_v0  ;;  %1145 = vmatmul.f32.gmra.mxu3 %v454_v48  ;;  %1160 = vmatpush.msrb.mxu2 %v823_v46 }
  0x4f   : > { %417 = vst [vmem:[#allocation2 + $0x160] sm:$0x3] %v5000_v0  ;;  %1272 = vmatpush.msrb.mxu3 %v840_v47  ;;  %1387 = vmatpush.msrb.mxu0 %v854_v37  ;;  %v439_v47 = vld [vmem:[%s5172_s19 + $0x60] sm:$0xff] }
  0x50   : > { %418 = vst [vmem:[#allocation2 + $0x168] sm:$0xff] %v5000_v0  ;;  %1161 = vmatpush.msrb.mxu2 %v822_v50  ;;  %v440_v50 = vld [vmem:[%s5172_s19 + $0x68] sm:$0xff]  ;;  %v447_v37 = vld [vmem:[%s5172_s19 + $0xa0] sm:$0xff] }
  0x51   : > { %419 = vst [vmem:[#allocation2 + $0x170] sm:$0xff] %v5000_v0  ;;  %1273 = vmatpush.msrb.mxu3 %v839_v51  ;;  %1388 = vmatpush.msrb.mxu0 %v853_v44  ;;  %v852_v51 = vld [vmem:[#allocation4 + $0x238] sm:$0xff] }
  0x52   : > { %420 = vst [vmem:[#allocation2 + $0x178] sm:$0x3] %v5000_v0  ;;  %1162 = vmatpush.msrb.mxu2 %v821_v52 }
  0x53   : > { %421 = vst [vmem:[#allocation2 + $0x180] sm:$0xff] %v5000_v0  ;;  %1274 = vmatpush.msrb.mxu3 %v838_v53  ;;  %1389 = vmatpush.msrb.mxu0 %v852_v51  ;;  %v448_v51 = vld [vmem:[%s5172_s19 + $0xa8] sm:$0xff] }
  0x54   : > { %422 = vst [vmem:[#allocation2 + $0x188] sm:$0xff] %v5000_v0  ;;  %1163 = vmatpush.msrb.mxu2 %v820_v54  ;;  %1064 = vmatmul.f32.gmra.mxu1 %v5199_v58  ;;  %v441_v54 = vld [vmem:[%s5172_s19 + $0x70] sm:$0xff] }
  0x55   : > { %423 = vst [vmem:[#allocation2 + $0x190] sm:$0x3] %v5000_v0  ;;  %1275 = vmatpush.msrb.mxu3 %v837_v55  ;;  %v851_v55 = vld [vmem:[#allocation4 + $0x230] sm:$0xff] }
  0x56   : > { %424 = vst [vmem:[#allocation2 + $0x198] sm:$0xff] %v5000_v0  ;;  %1148 = vmatmul.f32.gmra.mxu3 %v455_v59  ;;  %1164 = vmatpush.msrb.mxu2 %v819_v56 }
  0x57   : > { %425 = vst [vmem:[#allocation2 + $0x1a0] sm:$0xff] %v5000_v0  ;;  %1276 = vmatpush.msrb.mxu3 %v836_v57  ;;  %1390 = vmatpush.msrb.mxu0 %v851_v55 }
  0x58   : > { %426 = vst [vmem:[#allocation2 + $0x1a8] sm:$0x3] %v5000_v0  ;;  %1165 = vmatpush.msrb.mxu2 %v818_v60 }
  0x59   : > { %3163 = vst [vmem:[#allocation3] sm:$0xff] %v5000_v0  ;;  %1277 = vmatpush.msrb.mxu3 %v835_v61 }
  0x5a   : > { %3164 = vst [vmem:[#allocation3 + $0x8] sm:$0x3] %v5000_v0  ;;  %1166 = vmatpush.msrb.mxu2 %v817_v62 }
  0x5b   : > { %3165 = vst [vmem:[#allocation3 + $0x10] sm:$0xff] %v5000_v0  ;;  %1278 = vmatpush.msrb.mxu3 %v834_v63 }
  0x5c   : > { %3166 = vst [vmem:[#allocation3 + $0x18] sm:$0x3] %v5000_v0  ;;  %1167 = vmatpush.msrb.mxu2 %v816_v1  ;;  %1067 = vmatmul.f32.gmra.mxu1 %v5210_v3  ;;  %v443_v1 = vld [vmem:[%s5172_s19 + $0x80] sm:$0xff] }
  0x5d   : > { %3167 = vst [vmem:[#allocation3 + $0x20] sm:$0xff] %v5000_v0  ;;  %1279 = vmatpush.msrb.mxu3 %v833_v2 }
  0x5e   : > { %3168 = vst [vmem:[#allocation3 + $0x28] sm:$0x3] %v5000_v0  ;;  %1151 = vmatmul.f32.gmra.mxu3 %v456_v6  ;;  %1168 = vmatpush.msrb.mxu2 %v815_v4 }
  0x5f   : > { %3169 = vst [vmem:[#allocation3 + $0x30] sm:$0xff] %v5000_v0  ;;  %1280 = vmatpush.msrb.mxu3 %v832_v5  ;;  %v850_v5 = vld [vmem:[#allocation4 + $0x228] sm:$0xff] }
  0x60   : > { %3170 = vst [vmem:[#allocation3 + $0x38] sm:$0x3] %v5000_v0  ;;  %1391 = vmatpush.msrb.mxu0 %v850_v5 }
  0x61   : > { %3171 = vst [vmem:[#allocation3 + $0x40] sm:$0xff] %v5000_v0  ;;  %1281 = vmatpush.msrb.mxu3 %v831_v8  ;;  %v444_v8 = vld [vmem:[%s5172_s19 + $0x88] sm:$0xff] }
  0x62   : > { %3172 = vst [vmem:[#allocation3 + $0x48] sm:$0x3] %v5000_v0  ;;  %1392 = vmatpush.msrb.mxu0 %v849_v19 }
  0x63   : > { %3173 = vst [vmem:[#allocation3 + $0x50] sm:$0xff] %v5000_v0  ;;  %1282 = vmatpush.msrb.mxu3 %v830_v10 }
  0x64   : > { %3174 = vst [vmem:[#allocation3 + $0x58] sm:$0x3] %v5000_v0  ;;  %1070 = vmatmul.f32.gmra.mxu1 %v5216_v9 }
  0x65   : > { %3175 = vst [vmem:[#allocation3 + $0x60] sm:$0xff] %v5000_v0  ;;  %1283 = vmatpush.msrb.mxu3 %v829_v14 }
  0x66   : > { %3176 = vst [vmem:[#allocation3 + $0x68] sm:$0x3] %v5000_v0 }
  0x67   : > { %3177 = vst [vmem:[#allocation3 + $0x70] sm:$0xff] %v5000_v0 }
  0x68   : > { %3178 = vst [vmem:[#allocation3 + $0x78] sm:$0x3] %v5000_v0 }
  0x69   : > { %3179 = vst [vmem:[#allocation3 + $0x80] sm:$0xff] %v5000_v0 }
  0x6a   : > { %3180 = vst [vmem:[#allocation3 + $0x88] sm:$0x3] %v5000_v0 }
  0x6b   : > { %3181 = vst [vmem:[#allocation3 + $0x90] sm:$0xff] %v5000_v0 }
  0x6c   : > { %3182 = vst [vmem:[#allocation3 + $0x98] sm:$0x3] %v5000_v0  ;;  %v814_v0 = vld [vmem:[#allocation4 + $0x108] sm:$0xff]  ;;  %1073 = vmatmul.f32.gmra.mxu1 %v5221_v13 }
  0x6d   : > { %486 = vst [vmem:[#allocation2 + $0x151] sm:$0xff] %v5178_v38  ;;  %1169 = vmatpush.msrb.mxu2 %v814_v0 }
  0x6e   : > { %487 = vst [vmem:[#allocation2 + $0x159] sm:$0xff] %v454_v48 }
  0x6f   : > { %460 = vst [vmem:[#allocation2 + $0x19] sm:$0xff] %v5199_v58  ;;  %1170 = vmatpush.msrb.mxu2 %v813_v11 }
  0x70   : > { %488 = vst [vmem:[#allocation2 + $0x169] sm:$0xff] %v455_v59  ;;  %v442_v59 = vld [vmem:[%s5172_s19 + $0x78] sm:$0xff] }
  0x71   : > { %461 = vst [vmem:[#allocation2 + $0x21] sm:$0xff] %v5210_v3 }
  0x72   : > { %489 = vst [vmem:[#allocation2 + $0x171] sm:$0xff] %v456_v6 }
  0x73   : > { %462 = vst [vmem:[#allocation2 + $0x31] sm:$0xff] %v5216_v9 }
  0x74   : > { %v520_v12 = vld [vmem:[#allocation2 + $0x150] sm:$0xff]  ;;  %463 = vst [vmem:[#allocation2 + $0x39] sm:$0xff] %v5221_v13  ;;  %1076 = vmatmul.f32.gmra.mxu1 %v5226_v18 }
  0x75   : > { %1029 = vmatmul.f32.vlgmr.msra.gmra.mxu2 %v520_v12  ;;  %v521_v16 = vld [vmem:[#allocation2 + $0x158] sm:$0xff]  ;;  %464 = vst [vmem:[#allocation2 + $0x49] sm:$0xff] %v5226_v18 }
  0x76   : > { %v494_v15 = vld [vmem:[#allocation2 + $0x18] sm:$0xff]  ;;  %465 = vst [vmem:[#allocation2 + $0x51] sm:$0xff] %v5231_v22 }
  0x77   : > { %951 = vmatmul.f32.gmra.mxu0 %v494_v15  ;;  %1284 = vmatmul.f32.vlgmr.msrb.gmra.mxu3 %v494_v15  ;;  %v522_v20 = vld [vmem:[#allocation2 + $0x168] sm:$0xff]  ;;  %466 = vst [vmem:[#allocation2 + $0x61] sm:$0xff] %v5236_v25 }
  0x78   : > { %v495_v17 = vld [vmem:[#allocation2 + $0x20] sm:$0xff]  ;;  %467 = vst [vmem:[#allocation2 + $0x69] sm:$0xff] %v434_v29 }
  0x79   : > { %v523_v23 = vld [vmem:[#allocation2 + $0x170] sm:$0xff]  ;;  %468 = vst [vmem:[#allocation2 + $0x79] sm:$0xff] %v435_v33  ;;  %v5243_v34 = vld [vmem:[#allocation2 + $0x1a] sm:$0xff]  ;;  %v5247_v38 = vld [vmem:[#allocation2 + $0x22] sm:$0xff] }
  0x7a   : > { %v496_v21 = vld [vmem:[#allocation2 + $0x30] sm:$0xff]  ;;  %469 = vst [vmem:[#allocation2 + $0x81] sm:$0xff] %v436_v36 }
  0x7b   : > { %v497_v24 = vld [vmem:[#allocation2 + $0x38] sm:$0xff]  ;;  %470 = vst [vmem:[#allocation2 + $0x91] sm:$0xff] %v437_v40 }
  0x7c   : > { %1079 = vmatmul.f32.gmra.mxu1 %v5231_v22  ;;  %v498_v28 = vld [vmem:[#allocation2 + $0x48] sm:$0xff]  ;;  %v5251_v41 = vld [vmem:[#allocation2 + $0x32] sm:$0xff]  ;;  %471 = vst [vmem:[#allocation2 + $0x99] sm:$0xff] %v438_v43  ;;  %v5255_v45 = vld [vmem:[#allocation2 + $0x3a] sm:$0xff] }
  0x7d   : > { %1032 = vmatmul.f32.gmra.mxu2 %v521_v16  ;;  %v499_v32 = vld [vmem:[#allocation2 + $0x50] sm:$0xff]  ;;  %472 = vst [vmem:[#allocation2 + $0xa9] sm:$0xff] %v439_v47 }
  0x7e   : > { %v500_v35 = vld [vmem:[#allocation2 + $0x60] sm:$0xff]  ;;  %v5259_v48 = vld [vmem:[#allocation2 + $0x4a] sm:$0xff]  ;;  %473 = vst [vmem:[#allocation2 + $0xb1] sm:$0xff] %v440_v50  ;;  %v5263_v52 = vld [vmem:[#allocation2 + $0x52] sm:$0xff] }
  0x7f   : > { %954 = vmatmul.f32.gmra.mxu0 %v495_v17  ;;  %1287 = vmatmul.f32.gmra.mxu3 %v495_v17  ;;  %v501_v39 = vld [vmem:[#allocation2 + $0x68] sm:$0xff]  ;;  %474 = vst [vmem:[#allocation2 + $0xc1] sm:$0xff] %v441_v54  ;;  %v445_v16 = vld [vmem:[%s5172_s19 + $0x90] sm:$0xff] }
  0x80   : > { %v502_v42 = vld [vmem:[#allocation2 + $0x78] sm:$0xff]  ;;  %v5267_v56 = vld [vmem:[#allocation2 + $0x62] sm:$0xff]  ;;  %475 = vst [vmem:[#allocation2 + $0xc9] sm:$0xff] %v442_v59  ;;  %v5273_v61 = vld [vmem:[#allocation2 + $0x6a] sm:$0xff] }
  0x81   : > { %v503_v46 = vld [vmem:[#allocation2 + $0x80] sm:$0xff]  ;;  %476 = vst [vmem:[#allocation2 + $0xd9] sm:$0xff] %v443_v1 }
  0x82   : > { %v504_v49 = vld [vmem:[#allocation2 + $0x90] sm:$0xff]  ;;  %v5281_v6 = vld [vmem:[#allocation2 + $0x7a] sm:$0xff]  ;;  %477 = vst [vmem:[#allocation2 + $0xe1] sm:$0xff] %v444_v8  ;;  %v5287_v11 = vld [vmem:[#allocation2 + $0x82] sm:$0xff] }
  0x83   : > { %v505_v53 = vld [vmem:[#allocation2 + $0x98] sm:$0xff]  ;;  %478 = vst [vmem:[#allocation2 + $0xf1] sm:$0xff] %v445_v16 }
  0x84   : > { %1082 = vmatmul.f32.gmra.mxu1 %v5236_v25  ;;  %v506_v57 = vld [vmem:[#allocation2 + $0xa8] sm:$0xff]  ;;  %479 = vst [vmem:[#allocation2 + $0xf9] sm:$0xff] %v446_v26 }
  0x85   : > { %1035 = vmatmul.f32.gmra.mxu2 %v522_v20  ;;  %v507_v63 = vld [vmem:[#allocation2 + $0xb0] sm:$0xff]  ;;  %480 = vst [vmem:[#allocation2 + $0x109] sm:$0xff] %v447_v37 }
  0x86   : > { %v508_v0 = vld [vmem:[#allocation2 + $0xc0] sm:$0xff]  ;;  %v5295_v20 = vld [vmem:[#allocation2 + $0x92] sm:$0xff]  ;;  %v5319_v44 = vld [vmem:[#allocation2 + $0xaa] sm:$0xff]  ;;  %481 = vst [vmem:[#allocation2 + $0x111] sm:$0xff] %v448_v51 }
  0x87   : > { %957 = vmatmul.f32.gmra.mxu0 %v496_v21  ;;  %1290 = vmatmul.f32.gmra.mxu3 %v496_v21  ;;  %v509_v15 = vld [vmem:[#allocation2 + $0xc8] sm:$0xff] }
  0x8b   : > { %v513_v5 = vld [vmem:[#allocation2 + $0xf8] sm:$0xff] }
  0x8c   : > { %1085 = vmatmul.f32.gmra.mxu1 %v434_v29 }
  0x8d   : > { %1038 = vmatmul.f32.gmra.mxu2 %v523_v23 }
  0x8f   : > { %960 = vmatmul.f32.gmra.mxu0 %v497_v24  ;;  %1293 = vmatmul.f32.gmra.mxu3 %v497_v24  ;;  %v510_v24 = vld [vmem:[#allocation2 + $0xd8] sm:$0xff] }
  0x94   : > { %1088 = vmatmul.f32.gmra.mxu1 %v435_v33 }
  0x95   : > { %1171 = vmatmul.f32.vlgmr.msrb.gmra.mxu2 %v556_v27 }
  0x97   : > { %963 = vmatmul.f32.gmra.mxu0 %v498_v28  ;;  %1296 = vmatmul.f32.gmra.mxu3 %v498_v28  ;;  %v5303_v28 = vld [vmem:[#allocation6] ss:$0 sm:$0xff] }
  0x9c   : > { %1091 = vmatmul.f32.gmra.mxu1 %v436_v36  ;;  %v511_v36 = vld [vmem:[#allocation2 + $0xe0] sm:$0xff] }
  0x9d   : > { %1174 = vmatmul.f32.gmra.mxu2 %v557_v31  ;;  %v5306_v31 = vld [vmem:[#allocation2 + $0x9a] sm:$0xff] }
  0x9f   : > { %966 = vmatmul.f32.gmra.mxu0 %v499_v32  ;;  %1299 = vmatmul.f32.gmra.mxu3 %v499_v32 }
  0xa4   : > { %1094 = vmatmul.f32.gmra.mxu1 %v437_v40  ;;  %v848_v40 = vld [vmem:[#allocation4 + $0x218] sm:$0xff] }
  0xa5   : > { %1177 = vmatmul.f32.gmra.mxu2 %v5243_v34  ;;  %1393 = vmatpush.msrb.mxu0 %v848_v40  ;;  %v876_v40 = vld [vmem:[#allocation4 + $0x2f8] sm:$0xff] }
  0xa6   : > { %1494 = vmatpush.msrb.mxu1 %v876_v40  ;;  %v5376_v40 = vld [vmem:[#allocation2 + $0xda] sm:$0xff] }
  0xa7   : > { %969 = vmatmul.f32.gmra.mxu0 %v500_v35  ;;  %1302 = vmatmul.f32.gmra.mxu3 %v500_v35 }
  0xac   : > { %1097 = vmatmul.f32.gmra.mxu1 %v438_v43 }
  0xad   : > { %1180 = vmatmul.f32.gmra.mxu2 %v5247_v38 }
  0xaf   : > { %972 = vmatmul.f32.gmra.mxu0 %v501_v39  ;;  %1305 = vmatmul.f32.gmra.mxu3 %v501_v39 }
  0xb4   : > { %1100 = vmatmul.f32.gmra.mxu1 %v439_v47 }
  0xb5   : > { %1183 = vmatmul.f32.gmra.mxu2 %v5251_v41 }
  0xb7   : > { %975 = vmatmul.f32.gmra.mxu0 %v502_v42  ;;  %1308 = vmatmul.f32.gmra.mxu3 %v502_v42 }
  0xbc   : > { %1103 = vmatmul.f32.gmra.mxu1 %v440_v50  ;;  %v512_v50 = vld [vmem:[#allocation2 + $0xf0] sm:$0xff] }
  0xbd   : > { %1186 = vmatmul.f32.gmra.mxu2 %v5255_v45 }
  0xbf   : > { %978 = vmatmul.f32.gmra.mxu0 %v503_v46  ;;  %1311 = vmatmul.f32.gmra.mxu3 %v503_v46  ;;  %v5279_v4 = vpop.f32.mrf.mxu0 }
  0xc1   : > { %v5271_v60 = vpop.f32.mrf.mxu1 }
  0xc4   : > { %1106 = vmatmul.f32.gmra.mxu1 %v441_v54 }
  0xc5   : > { %1189 = vmatmul.f32.gmra.mxu2 %v5259_v48 }
  0xc7   : > { %981 = vmatmul.f32.gmra.mxu0 %v504_v49  ;;  %1314 = vmatmul.f32.gmra.mxu3 %v504_v49  ;;  %v5289_v12 = vpop.f32.mrf.mxu0 }
  0xc8   : > { %v1143_v62 = vpop.f32.mrf.mxu3 }
  0xc9   : > { %v5277_v2 = vpop.f32.mrf.mxu1 }
  0xcc   : > { %1109 = vmatmul.f32.gmra.mxu1 %v442_v59 }
  0xcd   : > { %1192 = vmatmul.f32.gmra.mxu2 %v5263_v52 }
  0xcf   : > { %984 = vmatmul.f32.gmra.mxu0 %v505_v53  ;;  %1317 = vmatmul.f32.gmra.mxu3 %v505_v53 }
  0xd1   : > { %v1146_v7 = vpop.f32.mrf.mxu3  ;;  %v5285_v10 = vpop.f32.mrf.mxu1 }
  0xd4   : > { %1112 = vmatmul.f32.gmra.mxu1 %v443_v1 }
  0xd5   : > { %1195 = vmatmul.f32.gmra.mxu2 %v5267_v56 }
  0xd7   : > { %987 = vmatmul.f32.gmra.mxu0 %v506_v57  ;;  %1320 = vmatmul.f32.gmra.mxu3 %v506_v57  ;;  %v5332_v57 = vld [vmem:[#allocation2 + $0xb2] sm:$0xff] }
  0xd9   : > { %v1149_v14 = vpop.f32.mrf.mxu3  ;;  %v5293_v17 = vpop.f32.mrf.mxu1 }
  0xdc   : > { %1115 = vmatmul.f32.gmra.mxu1 %v444_v8 }
  0xdd   : > { %1198 = vmatmul.f32.gmra.mxu2 %v5273_v61 }
  0xdf   : > { %990 = vmatmul.f32.gmra.mxu0 %v507_v63  ;;  %1323 = vmatmul.f32.gmra.mxu3 %v507_v63  ;;  %v847_v63 = vld [vmem:[#allocation4 + $0x210] sm:$0xff] }
  0xe0   : > { %1394 = vmatpush.msrb.mxu0 %v847_v63 }
  0xe1   : > { %v1152_v21 = vpop.f32.mrf.mxu3  ;;  %v5301_v27 = vpop.f32.mrf.mxu1 }
  0xe4   : > { %1118 = vmatmul.f32.gmra.mxu1 %v445_v16  ;;  %v947_v16 = vadd.f32 %v5303_v28, %v5279_v4 }
  0xe5   : > { %1201 = vmatmul.f32.gmra.mxu2 %v5281_v6 }
  0xe7   : > { %993 = vmatmul.f32.gmra.mxu0 %v508_v0  ;;  %1326 = vmatmul.f32.gmra.mxu3 %v508_v0 }
  0xe9   : > { %v5316_v39 = vpop.f32.mrf.mxu1 }
  0xec   : > { %1121 = vmatmul.f32.gmra.mxu1 %v446_v26 }
  0xed   : > { %1204 = vmatmul.f32.gmra.mxu2 %v5287_v11 }
  0xef   : > { %996 = vmatmul.f32.gmra.mxu0 %v509_v15  ;;  %1329 = vmatmul.f32.gmra.mxu3 %v509_v15  ;;  %v5345_v15 = vld [vmem:[#allocation2 + $0xc2] sm:$0xff] }
  0xf1   : > { %v5329_v53 = vpop.f32.mrf.mxu1 }
  0xf4   : > { %v5297_v23 = vpop.f32.mrf.mxu0  ;;  %1124 = vmatmul.f32.gmra.mxu1 %v447_v37  ;;  %v1060_v37 = vadd.f32 %v5271_v60, %v947_v16 }
  0xf5   : > { %1207 = vmatmul.f32.gmra.mxu2 %v5295_v20 }
  0xf7   : > { %999 = vmatmul.f32.gmra.mxu0 %v510_v24  ;;  %1332 = vmatmul.f32.gmra.mxu3 %v510_v24 }
  0xf8   : > { %v1030_v29 = vpop.f32.mrf.mxu2 }
  0xf9   : > { %v1031_v30 = vadd.f32 %v5303_v28, %v1030_v29  ;;  %v5342_v0 = vpop.f32.mrf.mxu1  ;;  %v514_v29 = vld [vmem:[#allocation2 + $0x108] sm:$0xff] }
  0xfa   : > { %v5310_v33 = vpop.f32.mrf.mxu3 }
  0xfb   : > { %v5308_v32 = vadd.f32 %v1143_v62, %v1031_v30  ;;  %v450_v30 = vld [vmem:[%s5172_s19 + $0xb8] sm:$0xff] }
  0xfc   : > { %v5312_v35 = vpop.f32.mrf.mxu0  ;;  %1127 = vmatmul.f32.gmra.mxu1 %v448_v51  ;;  %483 = vst [vmem:[#allocation2 + $0x129] sm:$0xff] %v450_v30  ;;  %v950_v51 = vadd.f32 %v5303_v28, %v5289_v12 }
  0xfd   : > { %1210 = vmatmul.f32.gmra.mxu2 %v5306_v31 }
  0xfe   : > { %v1063_v12 = vadd.f32 %v5277_v2, %v950_v51  ;;  %v870_v2 = vld [vmem:[#allocation4 + $0x2c8] sm:$0xff] }
  0xff   : > { %1002 = vmatmul.f32.gmra.mxu0 %v511_v36  ;;  %1335 = vmatmul.f32.gmra.mxu3 %v511_v36 }
 0x100   : > { %v1033_v42 = vpop.f32.mrf.mxu2 }
 0x101   : > { %v1034_v43 = vadd.f32 %v5303_v28, %v1033_v42  ;;  %v5357_v36 = vpop.f32.mrf.mxu1 }
 0x102   : > { %v5323_v47 = vpop.f32.mrf.mxu3 }
 0x103   : > { %v5321_v46 = vadd.f32 %v1146_v7, %v1034_v43  ;;  %v449_v7 = vld [vmem:[%s5172_s19 + $0xb0] sm:$0xff]  ;;  %v875_v43 = vld [vmem:[#allocation4 + $0x2f0] sm:$0xff] }
 0x104   : > { %v5325_v49 = vpop.f32.mrf.mxu0  ;;  %482 = vst [vmem:[#allocation2 + $0x121] sm:$0xff] %v449_v7  ;;  %1130 = vmatmul.f32.gmra.mxu1 %v449_v7  ;;  %v451_v7 = vld [vmem:[%s5172_s19 + $0xc0] sm:$0xff] }
 0x105   : > { %7106 = vst [vmem:[#allocation18_spill] sm:$0xff] %v5321_v46  ;;  %1213 = vmatmul.f32.gmra.mxu2 %v5319_v44  ;;  %1495 = vmatpush.msrb.mxu1 %v875_v43 }
 0x106   : > { %484 = vst [vmem:[#allocation2 + $0x139] sm:$0xff] %v451_v7 }
 0x107   : > { %1005 = vmatmul.f32.gmra.mxu0 %v512_v50  ;;  %1338 = vmatmul.f32.gmra.mxu3 %v512_v50  ;;  %v5360_v50 = vld [vmem:[#allocation2 + $0xca] sm:$0xff] }
 0x108   : > { %v1036_v54 = vpop.f32.mrf.mxu2 }
 0x109   : > { %v1037_v55 = vadd.f32 %v5303_v28, %v1036_v54 }
 0x10a   : > { %v5336_v62 = vpop.f32.mrf.mxu3 }
 0x10b   : > { %v5334_v59 = vadd.f32 %v1149_v14, %v1037_v55  ;;  %v874_v55 = vld [vmem:[#allocation4 + $0x2e8] sm:$0xff]  ;;  %v516_v51 = vld [vmem:[#allocation2 + $0x120] sm:$0xff] }
 0x10c   : > { %v5338_v1 = vpop.f32.mrf.mxu0  ;;  %1496 = vmatpush.msrb.mxu1 %v874_v55 }
 0x10d   : > { %7107 = vst [vmem:[#allocation19_spill] sm:$0xff] %v5334_v59  ;;  %1216 = vmatmul.f32.gmra.mxu2 %v5332_v57  ;;  %1133 = vmatmul.f32.gmra.mxu1 %v450_v30  ;;  %v452_v30 = vld [vmem:[%s5172_s19 + $0xc8] sm:$0xff] }
 0x10e   : > { %485 = vst [vmem:[#allocation2 + $0x141] sm:$0xff] %v452_v30 }
 0x10f   : > { %1008 = vmatmul.f32.gmra.mxu0 %v513_v5  ;;  %1341 = vmatmul.f32.gmra.mxu3 %v513_v5  ;;  %v515_v5 = vld [vmem:[#allocation2 + $0x110] sm:$0xff] }
 0x110   : > { %v1039_v8 = vpop.f32.mrf.mxu2 }
 0x111   : > { %v1040_v14 = vadd.f32 %v5303_v28, %v1039_v8  ;;  %v5373_v8 = vpop.f32.mrf.mxu1 }
 0x112   : > { %v5351_v24 = vpop.f32.mrf.mxu3 }
 0x113   : > { %v5349_v19 = vadd.f32 %v1152_v21, %v1040_v14  ;;  %v846_v21 = vld [vmem:[#allocation4 + $0x208] sm:$0xff]  ;;  %v873_v14 = vld [vmem:[#allocation4 + $0x2e0] sm:$0xff] }
 0x114   : > { %v5353_v26 = vpop.f32.mrf.mxu0  ;;  %1395 = vmatpush.msrb.mxu0 %v846_v21  ;;  %1497 = vmatpush.msrb.mxu1 %v873_v14  ;;  %v845_v14 = vld [vmem:[#allocation4 + $0x200] sm:$0xff] }
 0x115   : > { %7108 = vst [vmem:[#allocation20_spill] sm:$0xff] %v5349_v19  ;;  %1219 = vmatmul.f32.gmra.mxu2 %v5345_v15  ;;  %1136 = vmatmul.f32.gmra.mxu1 %v451_v7  ;;  %v517_v7 = vld [vmem:[#allocation2 + $0x128] sm:$0xff]  ;;  %v959_v19 = vadd.f32 %v5303_v28, %v5325_v49 }
 0x116   : > { %1396 = vmatpush.msrb.mxu0 %v845_v14 }
 0x117   : > { %1011 = vmatmul.f32.gmra.mxu0 %v514_v29  ;;  %1344 = vmatmul.f32.gmra.mxu3 %v514_v29  ;;  %v1072_v49 = vadd.f32 %v5301_v27, %v959_v19  ;;  %v519_v27 = vld [vmem:[#allocation2 + $0x140] sm:$0xff] }
 0x118   : > { %v1172_v42 = vpop.f32.mrf.mxu2 }
 0x119   : > { %v1173_v4 = vadd.f32 %v1172_v42, %v1060_v37  ;;  %v871_v37 = vld [vmem:[#allocation4 + $0x2d0] sm:$0xff]  ;;  %v953_v42 = vadd.f32 %v5303_v28, %v5297_v23  ;;  %v5389_v55 = vpop.f32.mrf.mxu1 }
 0x11a   : > { %v5367_v60 = vpop.f32.mrf.mxu3 }
 0x11b   : > { %v5365_v54 = vadd.f32 %v5310_v33, %v1173_v4  ;;  %v872_v33 = vld [vmem:[#allocation4 + $0x2d8] sm:$0xff]  ;;  %v1066_v23 = vadd.f32 %v5285_v10, %v953_v42  ;;  %v866_v42 = vld [vmem:[#allocation4 + $0x2a8] sm:$0xff] }
 0x11c   : > { %v5369_v63 = vpop.f32.mrf.mxu0  ;;  %1498 = vmatpush.msrb.mxu1 %v872_v33  ;;  %v892_v10 = vld [vmem:[#allocation4 + $0x378] sm:$0xff] }
 0x11d   : > { %1222 = vmatmul.f32.gmra.mxu2 %v5360_v50  ;;  %1139 = vmatmul.f32.gmra.mxu1 %v452_v30 }
 0x11e   : > { %1499 = vmatpush.msrb.mxu1 %v871_v37  ;;  %v956_v37 = vadd.f32 %v5303_v28, %v5312_v35  ;;  %1607 = vmatpush.msra.mxu2 %v892_v10  ;;  %v5407_v10 = vld [vmem:[#allocation2 + $0xf2] sm:$0xff] }
 0x11f   : > { %1014 = vmatmul.f32.gmra.mxu0 %v515_v5  ;;  %1347 = vmatmul.f32.gmra.mxu3 %v515_v5  ;;  %v869_v5 = vld [vmem:[#allocation4 + $0x2c0] sm:$0xff] }
 0x120   : > { %v1175_v16 = vpop.f32.mrf.mxu2  ;;  %1500 = vmatpush.msrb.mxu1 %v870_v2  ;;  %v1069_v35 = vadd.f32 %v5293_v17, %v956_v37  ;;  %v862_v17 = vld [vmem:[#allocation4 + $0x288] sm:$0xff] }
 0x121   : > { %v1176_v29 = vadd.f32 %v1175_v16, %v1063_v12  ;;  %v867_v16 = vld [vmem:[#allocation4 + $0x2b0] sm:$0xff] }
 0x122   : > { %v5383_v21 = vpop.f32.mrf.mxu3  ;;  %1501 = vmatpush.msrb.mxu1 %v869_v5 }
 0x123   : > { %v5381_v4 = vadd.f32 %v5323_v47, %v1176_v29  ;;  %v868_v47 = vld [vmem:[#allocation4 + $0x2b8] sm:$0xff] }
 0x124   : > { %v5385_v43 = vpop.f32.mrf.mxu0  ;;  %1502 = vmatpush.msrb.mxu1 %v868_v47  ;;  %v5392_v29 = vld [vmem:[#allocation2 + $0xe2] sm:$0xff]  ;;  %v865_v47 = vld [vmem:[#allocation4 + $0x2a0] sm:$0xff] }
 0x125   : > { %1225 = vmatmul.f32.gmra.mxu2 %v5376_v40 }
 0x126   : > { %1503 = vmatpush.msrb.mxu1 %v867_v16  ;;  %v863_v16 = vld [vmem:[#allocation4 + $0x290] sm:$0xff] }
 0x127   : > { %1017 = vmatmul.f32.gmra.mxu0 %v516_v51  ;;  %1350 = vmatmul.f32.gmra.mxu3 %v516_v51  ;;  %v5404_v51 = vpop.f32.mrf.mxu1 }
 0x128   : > { %v1178_v12 = vpop.f32.mrf.mxu2  ;;  %1504 = vmatpush.msrb.mxu1 %v866_v42 }
 0x129   : > { %v1179_v33 = vadd.f32 %v1178_v12, %v1066_v23  ;;  %v908_v23 = vld [vmem:[#allocation4 + $0x3f8] sm:$0xff] }
 0x12a   : > { %v5399_v14 = vpop.f32.mrf.mxu3  ;;  %1720 = vmatpush.msra.mxu3 %v908_v23  ;;  %1505 = vmatpush.msrb.mxu1 %v865_v47  ;;  %v518_v47 = vld [vmem:[#allocation2 + $0x138] sm:$0xff] }
 0x12b   : > { %v5397_v2 = vadd.f32 %v5336_v62, %v1179_v33  ;;  %v864_v62 = vld [vmem:[#allocation4 + $0x298] sm:$0xff] }
 0x12c   : > { %v5401_v5 = vpop.f32.mrf.mxu0  ;;  %1506 = vmatpush.msrb.mxu1 %v864_v62 }
 0x12d   : > { %1228 = vmatmul.f32.gmra.mxu2 %v5392_v29 }
 0x12e   : > { %1507 = vmatpush.msrb.mxu1 %v863_v16 }
 0x12f   : > { %1020 = vmatmul.f32.gmra.mxu0 %v517_v7  ;;  %1353 = vmatmul.f32.gmra.mxu3 %v517_v7  ;;  %v5419_v30 = vpop.f32.mrf.mxu1  ;;  %v924_v7 = vld [vmem:[#allocation4 + $0x478] sm:$0xff] }
 0x130   : > { %v1181_v12 = vpop.f32.mrf.mxu2  ;;  %1508 = vmatpush.msrb.mxu1 %v862_v17  ;;  %1833 = vmatpush.msra.mxu0 %v924_v7  ;;  %v891_v7 = vld [vmem:[#allocation4 + $0x370] sm:$0xff] }
 0x131   : > { %v1182_v33 = vadd.f32 %v1181_v12, %v1069_v35  ;;  %v861_v35 = vld [vmem:[#allocation4 + $0x280] sm:$0xff]  ;;  %v5423_v12 = vld [vmem:[#allocation2 + $0xfa] sm:$0xff]  ;;  %1608 = vmatpush.msra.mxu2 %v891_v7 }
 0x132   : > { %v5414_v23 = vpop.f32.mrf.mxu3  ;;  %1509 = vmatpush.msrb.mxu1 %v861_v35  ;;  %v5439_v35 = vld [vmem:[#allocation2 + $0x10a] sm:$0xff] }
 0x133   : > { %v5412_v42 = vadd.f32 %v5351_v24, %v1182_v33  ;;  %1510 = vmatmul.f32.vlgmr.msrb.gmra.mxu1 %v5243_v34  ;;  %v962_v33 = vadd.f32 %v5303_v28, %v5338_v1  ;;  %v907_v34 = vld [vmem:[#allocation4 + $0x3f0] sm:$0xff] }
 0x134   : > { %v5416_v37 = vpop.f32.mrf.mxu0  ;;  %1721 = vmatpush.msra.mxu3 %v907_v34 }
 0x135   : > { %1231 = vmatmul.f32.gmra.mxu2 %v5407_v10 }
 0x137   : > { %1023 = vmatmul.f32.gmra.mxu0 %v518_v47  ;;  %1356 = vmatmul.f32.gmra.mxu3 %v518_v47  ;;  %v5435_v19 = vpop.f32.mrf.mxu1  ;;  %v1075_v47 = vadd.f32 %v5316_v39, %v962_v33  ;;  %v923_v33 = vld [vmem:[#allocation4 + $0x470] sm:$0xff] }
 0x138   : > { %v1184_v24 = vpop.f32.mrf.mxu2  ;;  %1834 = vmatpush.msra.mxu0 %v923_v33  ;;  %v890_v33 = vld [vmem:[#allocation4 + $0x368] sm:$0xff] }
 0x139   : > { %v1185_v62 = vadd.f32 %v1184_v24, %v1072_v49  ;;  %v965_v49 = vadd.f32 %v5303_v28, %v5353_v26  ;;  %1609 = vmatpush.msra.mxu2 %v890_v33 }
 0x13a   : > { %v5430_v17 = vpop.f32.mrf.mxu3 }
 0x13b   : > { %v5428_v16 = vadd.f32 %v5367_v60, %v1185_v62  ;;  %1513 = vmatmul.f32.gmra.mxu1 %v5247_v38  ;;  %v1078_v38 = vadd.f32 %v5329_v53, %v965_v49  ;;  %v615_v53 = vld [vmem:[#allocation2 + $0x158] sm:$0xff] }
 0x13c   : > { %v5432_v59 = vpop.f32.mrf.mxu0 }
 0x13d   : > { %1234 = vmatmul.f32.gmra.mxu2 %v5423_v12 }
 0x13f   : > { %1026 = vmatmul.f32.gmra.mxu0 %v519_v27  ;;  %1359 = vmatmul.f32.gmra.mxu3 %v519_v27  ;;  %v5451_v39 = vpop.f32.mrf.mxu1  ;;  %v614_v27 = vld [vmem:[#allocation2 + $0x150] sm:$0xff] }
 0x140   : > { %v1187_v1 = vpop.f32.mrf.mxu2 }
 0x141   : > { %v1188_v60 = vadd.f32 %v1187_v1, %v1075_v47  ;;  %v968_v47 = vadd.f32 %v5303_v28, %v5369_v63 }
 0x142   : > { %v5446_v62 = vpop.f32.mrf.mxu3 }
 0x143   : > { %v5444_v24 = vadd.f32 %v5383_v21, %v1188_v60  ;;  %1516 = vmatmul.f32.gmra.mxu1 %v5251_v41  ;;  %v5456_v21 = vld [vmem:[#allocation2 + $0x112] sm:$0xff]  ;;  %v1081_v49 = vadd.f32 %v5342_v0, %v968_v47  ;;  %v616_v47 = vld [vmem:[#allocation2 + $0x168] sm:$0xff] }
 0x144   : > { %v5448_v7 = vpop.f32.mrf.mxu0  ;;  %v906_v41 = vld [vmem:[#allocation4 + $0x3e8] sm:$0xff] }
 0x145   : > { %1237 = vmatmul.f32.gmra.mxu2 %v5439_v35  ;;  %1722 = vmatpush.msra.mxu3 %v906_v41  ;;  %v922_v0 = vld [vmem:[#allocation4 + $0x468] sm:$0xff] }
 0x146   : > { %1835 = vmatpush.msra.mxu0 %v922_v0  ;;  %v617_v0 = vld [vmem:[#allocation2 + $0x170] sm:$0xff] }
 0x147   : > { %1397 = vmatmul.f32.vlgmr.msrb.gmra.mxu0 %v5199_v58  ;;  %1362 = vmatmul.f32.gmra.mxu3 %v614_v27  ;;  %v5468_v58 = vpop.f32.mrf.mxu1  ;;  %v5473_v27 = vld [vmem:[#allocation2 + $0x122] sm:$0xff] }
 0x148   : > { %v1190_v34 = vpop.f32.mrf.mxu2 }
 0x149   : > { %v1191_v26 = vadd.f32 %v1190_v34, %v1078_v38  ;;  %v971_v38 = vadd.f32 %v5303_v28, %v5385_v43 }
 0x14a   : > { %v5463_v60 = vpop.f32.mrf.mxu3 }
 0x14b   : > { %v5461_v1 = vadd.f32 %v5399_v14, %v1191_v26  ;;  %1519 = vmatmul.f32.gmra.mxu1 %v5255_v45  ;;  %v1084_v45 = vadd.f32 %v5357_v36, %v971_v38  ;;  %v888_v38 = vld [vmem:[#allocation4 + $0x358] sm:$0xff] }
 0x14c   : > { %v5465_v46 = vpop.f32.mrf.mxu0 }
 0x14d   : > { %1240 = vmatmul.f32.gmra.mxu2 %v5456_v21 }
 0x14f   : > { %1400 = vmatmul.f32.gmra.mxu0 %v5210_v3  ;;  %1365 = vmatmul.f32.gmra.mxu3 %v615_v53  ;;  %v5485_v3 = vpop.f32.mrf.mxu1  ;;  %v974_v53 = vadd.f32 %v5303_v28, %v5401_v5 }
 0x150   : > { %v1193_v63 = vpop.f32.mrf.mxu2 }
 0x151   : > { %v1194_v14 = vadd.f32 %v1193_v63, %v1081_v49  ;;  %v1087_v5 = vadd.f32 %v5373_v8, %v974_v53  ;;  %v977_v8 = vadd.f32 %v5303_v28, %v5416_v37  ;;  %v901_v37 = vld [vmem:[#allocation4 + $0x3c0] sm:$0xff] }
 0x152   : > { %v5480_v26 = vpop.f32.mrf.mxu3 }
 0x153   : > { %v5478_v34 = vadd.f32 %v5414_v23, %v1194_v14  ;;  %1522 = vmatmul.f32.gmra.mxu1 %v5259_v48  ;;  %v5490_v23 = vld [vmem:[#allocation2 + $0x12a] sm:$0xff] }
 0x154   : > { %v5482_v33 = vpop.f32.mrf.mxu0  ;;  %v889_v14 = vld [vmem:[#allocation4 + $0x360] sm:$0xff] }
 0x155   : > { %1243 = vmatmul.f32.gmra.mxu2 %v5473_v27  ;;  %v905_v48 = vld [vmem:[#allocation4 + $0x3e0] sm:$0xff] }
 0x156   : > { %1610 = vmatpush.msra.mxu2 %v889_v14  ;;  %1723 = vmatpush.msra.mxu3 %v905_v48  ;;  %v886_v14 = vld [vmem:[#allocation4 + $0x348] sm:$0xff]  ;;  %v903_v48 = vld [vmem:[#allocation4 + $0x3d0] sm:$0xff] }
 0x157   : > { %1403 = vmatmul.f32.gmra.mxu0 %v5216_v9  ;;  %1368 = vmatmul.f32.gmra.mxu3 %v616_v47  ;;  %v5502_v9 = vpop.f32.mrf.mxu1  ;;  %v5505_v47 = vld [vmem:[%s5172_s19 + $0xf0] sm:$0xff] }
 0x158   : > { %v1196_v41 = vpop.f32.mrf.mxu2  ;;  %1611 = vmatpush.msra.mxu2 %v888_v38  ;;  %7110 = vst [vmem:[#allocation22_spill] sm:$0xff] %v5505_v47  ;;  %v5511_v38 = vld [vmem:[#allocation2 + $0x13a] sm:$0xff] }
 0x159   : > { %v1197_v43 = vadd.f32 %v1196_v41, %v1084_v45  ;;  %v904_v45 = vld [vmem:[#allocation4 + $0x3d8] sm:$0xff]  ;;  %490 = vst [vmem:[#allocation2 + $0x181] sm:$0xff] %v5505_v47 }
 0x15a   : > { %v5497_v63 = vpop.f32.mrf.mxu3  ;;  %1724 = vmatpush.msra.mxu3 %v904_v45  ;;  %v921_v45 = vld [vmem:[#allocation4 + $0x460] sm:$0xff]  ;;  %v5532_v47 = vld [vmem:[#allocation2 + $0x142] sm:$0xff] }
 0x15b   : > { %v5495_v49 = vadd.f32 %v5430_v17, %v1197_v43  ;;  %v887_v17 = vld [vmem:[#allocation4 + $0x350] sm:$0xff]  ;;  %1525 = vmatmul.f32.gmra.mxu1 %v5263_v52  ;;  %v902_v52 = vld [vmem:[#allocation4 + $0x3c8] sm:$0xff]  ;;  %1836 = vmatpush.msra.mxu0 %v921_v45 }
 0x15c   : > { %v5499_v36 = vpop.f32.mrf.mxu0  ;;  %1612 = vmatpush.msra.mxu2 %v887_v17  ;;  %1725 = vmatpush.msra.mxu3 %v903_v48  ;;  %v883_v48 = vld [vmem:[#allocation4 + $0x330] sm:$0xff] }
 0x15d   : > { %7109 = vst [vmem:[#allocation21_spill] sm:$0xff] %v5495_v49  ;;  %1246 = vmatmul.f32.gmra.mxu2 %v5490_v23  ;;  %v899_v45 = vld [vmem:[#allocation4 + $0x3b0] sm:$0xff] }
 0x15e   : > { %1613 = vmatpush.msra.mxu2 %v886_v14  ;;  %1726 = vmatpush.msra.mxu3 %v902_v52  ;;  %v1090_v14 = vadd.f32 %v5389_v55, %v977_v8 }
 0x15f   : > { %1406 = vmatmul.f32.gmra.mxu0 %v5221_v13  ;;  %1371 = vmatmul.f32.gmra.mxu3 %v617_v0  ;;  %v885_v0 = vld [vmem:[#allocation4 + $0x340] sm:$0xff]  ;;  %v5523_v17 = vpop.f32.mrf.mxu1 }
 0x160   : > { %v1199_v41 = vpop.f32.mrf.mxu2  ;;  %1614 = vmatpush.msra.mxu2 %v885_v0  ;;  %1727 = vmatpush.msra.mxu3 %v901_v37  ;;  %v882_v0 = vld [vmem:[#allocation4 + $0x328] sm:$0xff] }
 0x161   : > { %v1200_v43 = vadd.f32 %v1199_v41, %v1087_v5  ;;  %v884_v41 = vld [vmem:[#allocation4 + $0x338] sm:$0xff]  ;;  %v898_v37 = vld [vmem:[#allocation4 + $0x3a8] sm:$0xff] }
 0x162   : > { %v5518_v53 = vpop.f32.mrf.mxu3  ;;  %1615 = vmatpush.msra.mxu2 %v884_v41  ;;  %v881_v41 = vld [vmem:[#allocation4 + $0x320] sm:$0xff] }
 0x163   : > { %v5516_v13 = vadd.f32 %v5446_v62, %v1200_v43  ;;  %v618_v62 = vld [vmem:[#allocation2 + $0x180] sm:$0xff]  ;;  %v5526_v43 = vld [vmem:[%s5172_s19 + $0xf8] sm:$0xff]  ;;  %1528 = vmatmul.f32.gmra.mxu1 %v5267_v56 }
 0x164   : > { %v5520_v5 = vpop.f32.mrf.mxu0  ;;  %491 = vst [vmem:[#allocation2 + $0x189] sm:$0xff] %v5526_v43  ;;  %1616 = vmatpush.msra.mxu2 %v883_v48  ;;  %v896_v48 = vld [vmem:[#allocation4 + $0x398] sm:$0xff] }
 0x165   : > { %7111 = vst [vmem:[#allocation23_spill] sm:$0xff] %v5516_v13  ;;  %1249 = vmatmul.f32.gmra.mxu2 %v5511_v38  ;;  %v900_v13 = vld [vmem:[#allocation4 + $0x3b8] sm:$0xff] }
 0x166   : > { %1728 = vmatpush.msra.mxu3 %v900_v13  ;;  %1617 = vmatpush.msra.mxu2 %v882_v0  ;;  %v880_v13 = vld [vmem:[#allocation4 + $0x318] sm:$0xff] }
 0x167   : > { %1409 = vmatmul.f32.gmra.mxu0 %v5226_v18  ;;  %1374 = vmatmul.f32.gmra.mxu3 %v618_v62  ;;  %v980_v18 = vadd.f32 %v5303_v28, %v5432_v59  ;;  %v5544_v56 = vpop.f32.mrf.mxu1  ;;  %v897_v62 = vld [vmem:[#allocation4 + $0x3a0] sm:$0xff] }
 0x168   : > { %v1202_v49 = vpop.f32.mrf.mxu2  ;;  %1729 = vmatpush.msra.mxu3 %v899_v45  ;;  %1618 = vmatpush.msra.mxu2 %v881_v41  ;;  %v878_v45 = vld [vmem:[#allocation4 + $0x308] sm:$0xff] }
 0x169   : > { %v1203_v52 = vadd.f32 %v1202_v49, %v1090_v14  ;;  %v879_v14 = vld [vmem:[#allocation4 + $0x310] sm:$0xff]  ;;  %v5552_v41 = vld [vmem:[#allocation2 + $0x152] sm:$0xff] }
 0x16a   : > { %v5539_v8 = vpop.f32.mrf.mxu3  ;;  %1730 = vmatpush.msra.mxu3 %v898_v37  ;;  %1619 = vmatpush.msra.mxu2 %v880_v13  ;;  %v895_v37 = vld [vmem:[#allocation4 + $0x390] sm:$0xff]  ;;  %v877_v13 = vld [vmem:[#allocation4 + $0x300] sm:$0xff] }
 0x16b   : > { %v5537_v55 = vadd.f32 %v5463_v60, %v1203_v52  ;;  %v5546_v59 = vld [vmem:[#allocation2 + $0x188] sm:$0xff]  ;;  %v1093_v60 = vadd.f32 %v5404_v51, %v980_v18  ;;  %1531 = vmatmul.f32.gmra.mxu1 %v5273_v61  ;;  %v983_v51 = vadd.f32 %v5303_v28, %v5448_v7 }
 0x16c   : > { %v5541_v49 = vpop.f32.mrf.mxu0  ;;  %1731 = vmatpush.msra.mxu3 %v897_v62  ;;  %1620 = vmatpush.msra.mxu2 %v879_v14  ;;  %v894_v62 = vld [vmem:[#allocation4 + $0x388] sm:$0xff]  ;;  %v920_v14 = vld [vmem:[#allocation4 + $0x458] sm:$0xff] }
 0x16d   : > { %7112 = vst [vmem:[#allocation24_spill] sm:$0xff] %v5537_v55  ;;  %1252 = vmatmul.f32.gmra.mxu2 %v5532_v47  ;;  %1837 = vmatpush.msra.mxu0 %v920_v14  ;;  %v1096_v7 = vadd.f32 %v5419_v30, %v983_v51  ;;  %v5580_v30 = vld [vmem:[#allocation2 + $0x69] sm:$0xff]  ;;  %v718_v51 = vld [vmem:[#allocation2 + $0x39] sm:$0xff]  ;;  %v5629_v55 = vld [vmem:[#allocation2 + $0x91] sm:$0xff] }
 0x16e   : > { %1732 = vmatpush.msra.mxu3 %v896_v48  ;;  %1621 = vmatpush.msra.mxu2 %v878_v45  ;;  %v893_v48 = vld [vmem:[#allocation4 + $0x380] sm:$0xff]  ;;  %v5569_v45 = vld [vmem:[#allocation2 + $0x15a] sm:$0xff] }
 0x16f   : > { %1412 = vmatmul.f32.gmra.mxu0 %v5231_v22  ;;  %1377 = vmatmul.f32.gmra.mxu3 %v5546_v59  ;;  %v5564_v61 = vpop.f32.mrf.mxu1 }
 0x170   : > { %v1205_v52 = vpop.f32.mrf.mxu2  ;;  %1733 = vmatpush.msra.mxu3 %v895_v37  ;;  %1622 = vmatpush.msra.mxu2 %v877_v13  ;;  %v986_v37 = vadd.f32 %v5303_v28, %v5465_v46 }
 0x171   : > { %v1206_v0 = vadd.f32 %v1205_v52, %v1093_v60  ;;  %v717_v52 = vld [vmem:[#allocation2 + $0x31] sm:$0xff] }
 0x172   : > { %v5559_v18 = vpop.f32.mrf.mxu3  ;;  %1734 = vmatpush.msra.mxu3 %v894_v62 }
 0x173   : > { %v5557_v22 = vadd.f32 %v5480_v26, %v1206_v0  ;;  %1534 = vmatmul.f32.gmra.mxu1 %v5281_v6  ;;  %v1099_v6 = vadd.f32 %v5435_v19, %v986_v37  ;;  %v919_v37 = vld [vmem:[#allocation4 + $0x450] sm:$0xff] }
 0x174   : > { %v5561_v60 = vpop.f32.mrf.mxu0  ;;  %1735 = vmatpush.msra.mxu3 %v893_v48  ;;  %1838 = vmatpush.msra.mxu0 %v919_v37  ;;  %v5614_v37 = vld [vmem:[#allocation2 + $0x81] sm:$0xff] }
 0x175   : > { %7113 = vst [vmem:[#allocation25_spill] sm:$0xff] %v5557_v22  ;;  %1255 = vmatmul.f32.gmra.mxu2 %v5552_v41 }
 0x177   : > { %1415 = vmatmul.f32.gmra.mxu0 %v5236_v25  ;;  %1736 = vmatmul.f32.vlgmr.msra.gmra.mxu3 %v717_v52  ;;  %v5583_v25 = vpop.f32.mrf.mxu1  ;;  %v989_v52 = vadd.f32 %v5303_v28, %v5482_v33 }
 0x178   : > { %v1208_v26 = vpop.f32.mrf.mxu2 }
 0x179   : > { %v1209_v0 = vadd.f32 %v1208_v26, %v1096_v7 }
 0x17a   : > { %v5576_v13 = vpop.f32.mrf.mxu3 }
 0x17b   : > { %v5574_v62 = vadd.f32 %v5497_v63, %v1209_v0  ;;  %1537 = vmatmul.f32.gmra.mxu1 %v5287_v11  ;;  %v5588_v63 = vld [vmem:[#allocation2 + $0x16a] sm:$0xff]  ;;  %v1102_v11 = vadd.f32 %v5451_v39, %v989_v52 }
 0x17c   : > { %v5578_v14 = vpop.f32.mrf.mxu0  ;;  %v720_v52 = vld [vmem:[#allocation2 + $0x51] sm:$0xff] }
 0x17d   : > { %7114 = vst [vmem:[#allocation26_spill] sm:$0xff] %v5574_v62  ;;  %1258 = vmatmul.f32.gmra.mxu2 %v5569_v45  ;;  %v5597_v62 = vld [vmem:[#allocation2 + $0x79] sm:$0xff] }
 0x17f   : > { %1418 = vmatmul.f32.gmra.mxu0 %v5580_v30  ;;  %1739 = vmatmul.f32.gmra.mxu3 %v718_v51  ;;  %v5600_v19 = vpop.f32.mrf.mxu1  ;;  %v719_v51 = vld [vmem:[#allocation2 + $0x49] sm:$0xff] }
 0x180   : > { %v1211_v48 = vpop.f32.mrf.mxu2 }
 0x181   : > { %v1212_v46 = vadd.f32 %v1211_v48, %v1099_v6  ;;  %v5605_v6 = vld [vmem:[#allocation2 + $0x172] sm:$0xff]  ;;  %v992_v48 = vadd.f32 %v5303_v28, %v5499_v36 }
 0x182   : > { %v1336_v26 = vpop.f32.mrf.mxu3 }
 0x183   : > { %v5593_v7 = vadd.f32 %v5518_v53, %v1212_v46  ;;  %1540 = vmatmul.f32.gmra.mxu1 %v5295_v20  ;;  %v1105_v20 = vadd.f32 %v5468_v58, %v992_v48  ;;  %v918_v48 = vld [vmem:[#allocation4 + $0x448] sm:$0xff] }
 0x184   : > { %v5595_v0 = vpop.f32.mrf.mxu0  ;;  %1839 = vmatpush.msra.mxu0 %v918_v48  ;;  %v5643_v48 = vld [vmem:[#allocation2 + $0x99] sm:$0xff] }
 0x185   : > { %7115 = vst [vmem:[#allocation27_spill] sm:$0xff] %v5593_v7  ;;  %1261 = vmatmul.f32.gmra.mxu2 %v5588_v63 }
 0x187   : > { %1421 = vmatmul.f32.gmra.mxu0 %v5597_v62  ;;  %1742 = vmatmul.f32.gmra.mxu3 %v719_v51  ;;  %v5617_v39 = vpop.f32.mrf.mxu1 }
 0x188   : > { %v1214_v33 = vpop.f32.mrf.mxu2 }
 0x189   : > { %v1215_v53 = vadd.f32 %v1214_v33, %v1102_v11  ;;  %v995_v11 = vadd.f32 %v5303_v28, %v5520_v5 }
 0x18a   : > { %v1339_v7 = vpop.f32.mrf.mxu3 }
 0x18b   : > { %v5610_v46 = vadd.f32 %v5539_v8, %v1215_v53  ;;  %1543 = vmatmul.f32.gmra.mxu1 %v5306_v31  ;;  %v685_v8 = vld [vmem:[#allocation2 + $0x30] sm:$0xff]  ;;  %v1108_v31 = vadd.f32 %v5485_v3, %v995_v11 }
 0x18c   : > { %v5612_v22 = vpop.f32.mrf.mxu0 }
 0x18d   : > { %7116 = vst [vmem:[#allocation28_spill] sm:$0xff] %v5610_v46  ;;  %1264 = vmatmul.f32.gmra.mxu2 %v5605_v6 }
 0x18f   : > { %1424 = vmatmul.f32.gmra.mxu0 %v5614_v37  ;;  %1745 = vmatmul.f32.gmra.mxu3 %v720_v52  ;;  %v5631_v58 = vpop.f32.mrf.mxu1  ;;  %v721_v52 = vld [vmem:[#allocation2 + $0x61] sm:$0xff] }
 0x190   : > { %v1217_v51 = vpop.f32.mrf.mxu2 }
 0x191   : > { %v1218_v36 = vadd.f32 %v1217_v51, %v1105_v20  ;;  %v998_v51 = vadd.f32 %v5303_v28, %v5541_v49  ;;  %v687_v49 = vld [vmem:[#allocation2 + $0x48] sm:$0xff] }
 0x192   : > { %v1342_v53 = vpop.f32.mrf.mxu3 }
 0x193   : > { %v5625_v33 = vadd.f32 %v5559_v18, %v1218_v36  ;;  %1546 = vmatmul.f32.gmra.mxu1 %v5319_v44  ;;  %v686_v18 = vld [vmem:[#allocation2 + $0x38] sm:$0xff]  ;;  %v1111_v11 = vadd.f32 %v5502_v9, %v998_v51  ;;  %v917_v51 = vld [vmem:[#allocation4 + $0x440] sm:$0xff] }
 0x194   : > { %v5627_v46 = vpop.f32.mrf.mxu0  ;;  %1840 = vmatpush.msra.mxu0 %v917_v51  ;;  %v5671_v51 = vld [vmem:[#allocation2 + $0xb1] sm:$0xff] }
 0x195   : > { %7117 = vst [vmem:[#allocation29_spill] sm:$0xff] %v5625_v33  ;;  %1623 = vmatmul.f32.vlgmr.msra.gmra.mxu2 %v685_v8 }
 0x197   : > { %1427 = vmatmul.f32.gmra.mxu0 %v5629_v55  ;;  %1748 = vmatmul.f32.gmra.mxu3 %v721_v52  ;;  %v5645_v3 = vpop.f32.mrf.mxu1 }
 0x198   : > { %v1220_v20 = vpop.f32.mrf.mxu2 }
 0x199   : > { %v1221_v5 = vadd.f32 %v1220_v20, %v1108_v31 }
 0x19a   : > { %v1345_v8 = vpop.f32.mrf.mxu3 }
 0x19b   : > { %v5639_v36 = vadd.f32 %v5576_v13, %v1221_v5  ;;  %1549 = vmatmul.f32.gmra.mxu1 %v5332_v57  ;;  %v1001_v13 = vadd.f32 %v5303_v28, %v5561_v60 }
 0x19c   : > { %v5641_v33 = vpop.f32.mrf.mxu0 }
 0x19d   : > { %1626 = vmatmul.f32.gmra.mxu2 %v686_v18  ;;  %v5657_v18 = vld [vmem:[#allocation2 + $0xa9] sm:$0xff] }
 0x19f   : > { %1430 = vmatmul.f32.gmra.mxu0 %v5643_v48  ;;  %1751 = vmatmul.f32.gmra.mxu3 %v5580_v30  ;;  %v5659_v9 = vpop.f32.mrf.mxu1  ;;  %v1114_v30 = vadd.f32 %v5523_v17, %v1001_v13 }
 0x1a0   : > { %v1223_v44 = vpop.f32.mrf.mxu2 }
 0x1a1   : > { %v1224_v52 = vadd.f32 %v1223_v44, %v1111_v11  ;;  %v1004_v11 = vadd.f32 %v5303_v28, %v5578_v14  ;;  %v689_v14 = vld [vmem:[#allocation2 + $0x60] sm:$0xff] }
 0x1a2   : > { %v1348_v20 = vpop.f32.mrf.mxu3 }
 0x1a3   : > { %v5653_v31 = vadd.f32 %v1336_v26, %v1224_v52  ;;  %1552 = vmatmul.f32.gmra.mxu1 %v5345_v15  ;;  %v688_v26 = vld [vmem:[#allocation2 + $0x50] sm:$0xff]  ;;  %v1117_v13 = vadd.f32 %v5544_v56, %v1004_v11  ;;  %v916_v11 = vld [vmem:[#allocation4 + $0x438] sm:$0xff] }
 0x1a4   : > { %v5655_v5 = vpop.f32.mrf.mxu0  ;;  %1841 = vmatpush.msra.mxu0 %v916_v11  ;;  %v5701_v11 = vld [vmem:[#allocation2 + $0xc9] sm:$0xff] }
 0x1a5   : > { %1629 = vmatmul.f32.gmra.mxu2 %v687_v49 }
 0x1a7   : > { %1433 = vmatmul.f32.gmra.mxu0 %v5657_v18  ;;  %1754 = vmatmul.f32.gmra.mxu3 %v5597_v62  ;;  %v5673_v17 = vpop.f32.mrf.mxu1 }
 0x1a8   : > { %v1226_v57 = vpop.f32.mrf.mxu2 }
 0x1a9   : > { %v1227_v60 = vadd.f32 %v1226_v57, %v1114_v30 }
 0x1aa   : > { %v1351_v52 = vpop.f32.mrf.mxu3 }
 0x1ab   : > { %v5667_v44 = vadd.f32 %v1339_v7, %v1227_v60  ;;  %1555 = vmatmul.f32.gmra.mxu1 %v5360_v50  ;;  %v1007_v7 = vadd.f32 %v5303_v28, %v5595_v0 }
 0x1ac   : > { %v5669_v49 = vpop.f32.mrf.mxu0 }
 0x1ad   : > { %1632 = vmatmul.f32.gmra.mxu2 %v688_v26  ;;  %v5687_v26 = vld [vmem:[#allocation2 + $0xc1] sm:$0xff] }
 0x1af   : > { %1436 = vmatmul.f32.gmra.mxu0 %v5671_v51  ;;  %1757 = vmatmul.f32.gmra.mxu3 %v5614_v37  ;;  %v1120_v37 = vadd.f32 %v5564_v61, %v1007_v7 }
 0x1b0   : > { %v1229_v62 = vpop.f32.mrf.mxu2  ;;  %v1511_v56 = vpop.f32.mrf.mxu1 }
 0x1b1   : > { %v1230_v15 = vadd.f32 %v1229_v62, %v1117_v13  ;;  %v1010_v13 = vadd.f32 %v5303_v28, %v5612_v22  ;;  %v691_v22 = vld [vmem:[#allocation2 + $0x78] sm:$0xff] }
 0x1b2   : > { %v5683_v57 = vpop.f32.mrf.mxu3 }
 0x1b3   : > { %v5681_v30 = vadd.f32 %v1342_v53, %v1230_v15  ;;  %1558 = vmatmul.f32.gmra.mxu1 %v5376_v40  ;;  %v690_v53 = vld [vmem:[#allocation2 + $0x68] sm:$0xff]  ;;  %v1123_v7 = vadd.f32 %v5583_v25, %v1010_v13 }
 0x1b4   : > { %v5685_v60 = vpop.f32.mrf.mxu0 }
 0x1b5   : > { %1635 = vmatmul.f32.gmra.mxu2 %v689_v14 }
 0x1b7   : > { %1439 = vmatmul.f32.gmra.mxu0 %v5687_v26  ;;  %1760 = vmatmul.f32.gmra.mxu3 %v5629_v55 }
 0x1b8   : > { %v1232_v50 = vpop.f32.mrf.mxu2  ;;  %v1514_v61 = vpop.f32.mrf.mxu1 }
 0x1b9   : > { %v1233_v0 = vadd.f32 %v1232_v50, %v1120_v37 }
 0x1ba   : > { %v5697_v15 = vpop.f32.mrf.mxu3 }
 0x1bb   : > { %v5695_v62 = vadd.f32 %v1345_v8, %v1233_v0  ;;  %1561 = vmatmul.f32.gmra.mxu1 %v5392_v29  ;;  %v1013_v8 = vadd.f32 %v5303_v28, %v5627_v46  ;;  %v5711_v0 = vld [vmem:[#allocation2 + $0xd9] sm:$0xff] }
 0x1bc   : > { %v5699_v14 = vpop.f32.mrf.mxu0 }
 0x1bd   : > { %7118 = vst [vmem:[#allocation30_spill] sm:$0xff] %v5695_v62  ;;  %1638 = vmatmul.f32.gmra.mxu2 %v690_v53  ;;  %v915_v62 = vld [vmem:[#allocation4 + $0x430] sm:$0xff] }
 0x1be   : > { %1842 = vmatpush.msra.mxu0 %v915_v62  ;;  %v5726_v62 = vld [vmem:[#allocation2 + $0xe1] sm:$0xff] }
 0x1bf   : > { %1442 = vmatmul.f32.gmra.mxu0 %v5701_v11  ;;  %1763 = vmatmul.f32.gmra.mxu3 %v5643_v48  ;;  %v1126_v48 = vadd.f32 %v5600_v19, %v1013_v8 }
 0x1c0   : > { %v1235_v55 = vpop.f32.mrf.mxu2  ;;  %v1517_v13 = vpop.f32.mrf.mxu1 }
 0x1c1   : > { %v1236_v40 = vadd.f32 %v1235_v55, %v1123_v7  ;;  %v692_v7 = vld [vmem:[#allocation2 + $0x80] sm:$0xff]  ;;  %v1016_v55 = vadd.f32 %v5303_v28, %v5641_v33  ;;  %v693_v33 = vld [vmem:[#allocation2 + $0x90] sm:$0xff] }
 0x1c2   : > { %v5713_v53 = vpop.f32.mrf.mxu3 }
 0x1c3   : > { %v5709_v37 = vadd.f32 %v1348_v20, %v1236_v40  ;;  %1564 = vmatmul.f32.gmra.mxu1 %v5407_v10  ;;  %v1129_v8 = vadd.f32 %v5617_v39, %v1016_v55 }
 0x1c4   : > { %v1398_v50 = vpop.f32.mrf.mxu0 }
 0x1c5   : > { %1641 = vmatmul.f32.gmra.mxu2 %v691_v22  ;;  %v1399_v25 = vadd.f32 %v1398_v50, %v5365_v54 }
 0x1c7   : > { %v5717_v29 = vadd.f32 %v1511_v56, %v1399_v25  ;;  %1445 = vmatmul.f32.gmra.mxu0 %v5711_v0  ;;  %1766 = vmatmul.f32.gmra.mxu3 %v5657_v18 }
 0x1c8   : > { %v1238_v46 = vpop.f32.mrf.mxu2  ;;  %v1520_v56 = vpop.f32.mrf.mxu1 }
 0x1c9   : > { %v1239_v20 = vadd.f32 %v1238_v46, %v1126_v48  ;;  %v5739_v48 = vld [vmem:[#allocation2 + $0xf1] sm:$0xff] }
 0x1ca   : > { %v1363_v22 = vpop.f32.mrf.mxu3  ;;  %v914_v46 = vld [vmem:[#allocation4 + $0x428] sm:$0xff] }
 0x1cb   : > { %v5724_v54 = vadd.f32 %v1351_v52, %v1239_v20  ;;  %1567 = vmatmul.f32.gmra.mxu1 %v5423_v12  ;;  %v4785_v52 = vld [vmem:[#allocation6] ss:$0 sm:$0xff]  ;;  %1843 = vmatpush.msra.mxu0 %v914_v46 }
 0x1cc   : > { %v1401_v40 = vpop.f32.mrf.mxu0  ;;  %v1019_v50 = vadd.f32 %v4785_v52, %v5655_v5  ;;  %v1022_v55 = vadd.f32 %v4785_v52, %v5669_v49  ;;  %v1028_v46 = vadd.f32 %v4785_v52, %v5699_v14  ;;  %v697_v14 = vld [vmem:[#allocation2 + $0xc0] sm:$0xff] }
 0x1cd   : > { %1644 = vmatmul.f32.gmra.mxu2 %v692_v7  ;;  %v1402_v19 = vadd.f32 %v1401_v40, %v5381_v4  ;;  %v694_v7 = vld [vmem:[#allocation2 + $0x98] sm:$0xff] }
 0x1cf   : > { %v5730_v18 = vadd.f32 %v1514_v61, %v1402_v19  ;;  %1448 = vmatmul.f32.gmra.mxu0 %v5726_v62  ;;  %1769 = vmatmul.f32.gmra.mxu3 %v5671_v51  ;;  %v1132_v51 = vadd.f32 %v5631_v58, %v1019_v50  ;;  %v5752_v19 = vld [vmem:[#allocation2 + $0xf9] sm:$0xff]  ;;  %v5765_v50 = vld [vmem:[#allocation2 + $0x109] sm:$0xff] }
 0x1d0   : > { %v1241_v10 = vpop.f32.mrf.mxu2  ;;  %v1523_v61 = vpop.f32.mrf.mxu1 }
 0x1d1   : > { %v1242_v28 = vadd.f32 %v1241_v10, %v1129_v8  ;;  %v1135_v8 = vadd.f32 %v5645_v3, %v1022_v55 }
 0x1d2   : > { %v1366_v5 = vpop.f32.mrf.mxu3 }
 0x1d3   : > { %v5737_v4 = vadd.f32 %v5683_v57, %v1242_v28  ;;  %1570 = vmatmul.f32.gmra.mxu1 %v5439_v35  ;;  %v1025_v28 = vadd.f32 %v4785_v52, %v5685_v60 }
 0x1d4   : > { %v1404_v25 = vpop.f32.mrf.mxu0 }
 0x1d5   : > { %1647 = vmatmul.f32.gmra.mxu2 %v693_v33  ;;  %v1405_v39 = vadd.f32 %v1404_v25, %v5397_v2 }
 0x1d7   : > { %v5743_v20 = vadd.f32 %v1517_v13, %v1405_v39  ;;  %1451 = vmatmul.f32.gmra.mxu0 %v5739_v48  ;;  %1772 = vmatmul.f32.gmra.mxu3 %v5687_v26  ;;  %v695_v26 = vld [vmem:[#allocation2 + $0xa8] sm:$0xff] }
 0x1d8   : > { %v1244_v12 = vpop.f32.mrf.mxu2  ;;  %v1526_v13 = vpop.f32.mrf.mxu1 }
 0x1d9   : > { %v1245_v57 = vadd.f32 %v1244_v12, %v1132_v51  ;;  %v641_v12 = vld [vmem:[#allocation2 + $0x111] sm:$0xff] }
 0x1db   : > { %v5750_v2 = vadd.f32 %v5697_v15, %v1245_v57  ;;  %1573 = vmatmul.f32.gmra.mxu1 %v5456_v21  ;;  %v1369_v15 = vpop.f32.mrf.mxu3 }
 0x1dc   : > { %v1407_v40 = vpop.f32.mrf.mxu0 }
 0x1dd   : > { %1650 = vmatmul.f32.gmra.mxu2 %v694_v7  ;;  %v1408_v58 = vadd.f32 %v1407_v40, %v5412_v42  ;;  %v1141_v7 = vadd.f32 %v5673_v17, %v1028_v46  ;;  %v642_v40 = vld [vmem:[#allocation2 + $0x121] sm:$0xff] }
 0x1df   : > { %v5756_v10 = vadd.f32 %v1520_v56, %v1408_v58  ;;  %1454 = vmatmul.f32.gmra.mxu0 %v5752_v19  ;;  %1775 = vmatmul.f32.gmra.mxu3 %v5701_v11  ;;  %v913_v56 = vld [vmem:[#allocation4 + $0x420] sm:$0xff]  ;;  %v1138_v11 = vadd.f32 %v5659_v9, %v1025_v28  ;;  %v912_v58 = vld [vmem:[#allocation4 + $0x418] sm:$0xff] }
 0x1e0   : > { %v1247_v35 = vpop.f32.mrf.mxu2  ;;  %v1529_v25 = vpop.f32.mrf.mxu1  ;;  %1844 = vmatpush.msra.mxu0 %v913_v56 }
 0x1e1   : > { %v1248_v49 = vadd.f32 %v1247_v35, %v1135_v8 }
 0x1e2   : > { %1845 = vmatpush.msra.mxu0 %v912_v58 }
 0x1e3   : > { %v5763_v33 = vadd.f32 %v5713_v53, %v1248_v49  ;;  %1576 = vmatmul.f32.gmra.mxu1 %v5473_v27  ;;  %v696_v53 = vld [vmem:[#allocation2 + $0xb0] sm:$0xff]  ;;  %v1372_v57 = vpop.f32.mrf.mxu3 }
 0x1e4   : > { %v1410_v42 = vpop.f32.mrf.mxu0 }
 0x1e5   : > { %7119 = vst [vmem:[#allocation31_spill] sm:$0xff] %v5763_v33  ;;  %1653 = vmatmul.f32.gmra.mxu2 %v695_v26  ;;  %v1411_v3 = vadd.f32 %v1410_v42, %v5428_v16 }
 0x1e7   : > { %v5769_v39 = vadd.f32 %v1523_v61, %v1411_v3  ;;  %1457 = vmatmul.f32.gmra.mxu0 %v5765_v50  ;;  %1778 = vmatmul.f32.gmra.mxu3 %v5711_v0 }
 0x1e8   : > { %v1250_v21 = vpop.f32.mrf.mxu2  ;;  %v1532_v61 = vpop.f32.mrf.mxu1 }
 0x1e9   : > { %v1251_v60 = vadd.f32 %v1250_v21, %v1138_v11  ;;  %v644_v11 = vld [vmem:[#allocation2 + $0x139] sm:$0xff] }
 0x1eb   : > { %v5775_v51 = vadd.f32 %v1363_v22, %v1251_v60  ;;  %1579 = vmatmul.f32.gmra.mxu1 %v5490_v23  ;;  %v1375_v8 = vpop.f32.mrf.mxu3 }
 0x1ec   : > { %v1413_v16 = vpop.f32.mrf.mxu0 }
 0x1ed   : > { %7120 = vst [vmem:[#allocation32_spill] sm:$0xff] %v5775_v51  ;;  %1656 = vmatmul.f32.gmra.mxu2 %v696_v53  ;;  %v1414_v9 = vadd.f32 %v1413_v16, %v5444_v24  ;;  %v3445_v51 = vld [vmem:[#allocation8 + $0x168] sm:$0xff] }
 0x1ef   : > { %v5779_v55 = vadd.f32 %v1526_v13, %v1414_v9  ;;  %1460 = vmatmul.f32.gmra.mxu0 %v641_v12  ;;  %1781 = vmatmul.f32.gmra.mxu3 %v5726_v62  ;;  %v698_v62 = vld [vmem:[#allocation2 + $0xc8] sm:$0xff] }
 0x1f0   : > { %v1253_v0 = vpop.f32.mrf.mxu2  ;;  %v5788_v35 = vpop.f32.mrf.mxu1 }
 0x1f1   : > { %v1254_v27 = vadd.f32 %v1253_v0, %v1141_v7  ;;  %v7127_v7 = vld [vmem:[#allocation20_spill] sm:$0xff] }
 0x1f3   : > { %v5783_v22 = vadd.f32 %v1366_v5, %v1254_v27  ;;  %1582 = vmatmul.f32.gmra.mxu1 %v5511_v38  ;;  %v1378_v3 = vpop.f32.mrf.mxu3 }
 0x1f4   : > { %v1416_v52 = vpop.f32.mrf.mxu0 }
 0x1f5   : > { %7121 = vst [vmem:[#allocation33_spill] sm:$0xff] %v5783_v22  ;;  %1659 = vmatmul.f32.gmra.mxu2 %v697_v14  ;;  %v1417_v24 = vadd.f32 %v1416_v52, %v5461_v1  ;;  %v643_v1 = vld [vmem:[#allocation2 + $0x129] sm:$0xff]  ;;  %v646_v52 = vld [vmem:[#allocation2 + $0x151] sm:$0xff]  ;;  %v3429_v22 = vld [vmem:[#allocation8 + $0xe8] sm:$0xff] }
 0x1f7   : > { %v5786_v17 = vadd.f32 %v1529_v25, %v1417_v24  ;;  %1463 = vmatmul.f32.gmra.mxu0 %v642_v40  ;;  %1784 = vmatmul.f32.gmra.mxu3 %v5739_v48  ;;  %v7123_v48 = vld [vmem:[#allocation18_spill] sm:$0xff] }
 0x1f8   : > { %v1256_v13 = vpop.f32.mrf.mxu2  ;;  %v5801_v38 = vpop.f32.mrf.mxu1  ;;  %v910_v24 = vld [vmem:[#allocation4 + $0x408] sm:$0xff] }
 0x1f9   : > { %v1257_v23 = vadd.f32 %v1256_v13, %v5308_v32  ;;  %v699_v32 = vld [vmem:[#allocation2 + $0xd8] sm:$0xff] }
 0x1fb   : > { %v5793_v5 = vadd.f32 %v1369_v15, %v1257_v23  ;;  %1585 = vmatmul.f32.gmra.mxu1 %v5532_v47  ;;  %v700_v47 = vld [vmem:[#allocation2 + $0xe0] sm:$0xff]  ;;  %v1737_v53 = vpop.f32.mrf.mxu3 }
 0x1fc   : > { %v1419_v49 = vpop.f32.mrf.mxu0 }
 0x1fd   : > { %7122 = vst [vmem:[#allocation34_spill] sm:$0xff] %v5793_v5  ;;  %1662 = vmatmul.f32.gmra.mxu2 %v698_v62  ;;  %v1420_v26 = vadd.f32 %v1419_v49, %v5478_v34  ;;  %v911_v34 = vld [vmem:[#allocation4 + $0x410] sm:$0xff] }
 0x1fe   : > { %1846 = vmatpush.msra.mxu0 %v911_v34  ;;  %v647_v62 = vld [vmem:[#allocation2 + $0x159] sm:$0xff] }
 0x1ff   : > { %v5796_v28 = vadd.f32 %v1532_v61, %v1420_v26  ;;  %1466 = vmatmul.f32.gmra.mxu0 %v643_v1  ;;  %1787 = vmatmul.f32.gmra.mxu3 %v5752_v19  ;;  %v7125_v19 = vld [vmem:[#allocation19_spill] sm:$0xff] }
 0x200   : > { %v1259_v42 = vpop.f32.mrf.mxu2  ;;  %v5814_v9 = vpop.f32.mrf.mxu1  ;;  %1847 = vmatpush.msra.mxu0 %v910_v24  ;;  %v7132_v24 = vld [vmem:[#allocation22_spill] sm:$0xff] }
 0x201   : > { %v1260_v56 = vadd.f32 %v1259_v42, %v7123_v48  ;;  %v648_v48 = vld [vmem:[#allocation2 + $0x169] sm:$0xff] }
 0x203   : > { %v5803_v15 = vadd.f32 %v1372_v57, %v1260_v56  ;;  %1588 = vmatmul.f32.gmra.mxu1 %v5552_v41  ;;  %v645_v57 = vld [vmem:[#allocation2 + $0x141] sm:$0xff]  ;;  %v1740_v14 = vpop.f32.mrf.mxu3  ;;  %v909_v56 = vld [vmem:[#allocation4 + $0x400] sm:$0xff] }
 0x204   : > { %v5805_v25 = vpop.f32.mrf.mxu0  ;;  %1848 = vmatpush.msra.mxu0 %v909_v56  ;;  %v707_v56 = vld [vmem:[#allocation2 + $0x138] sm:$0xff] }
 0x205   : > { %7124 = vst [vmem:[#allocation18_spill] sm:$0xff] %v5803_v15  ;;  %1665 = vmatmul.f32.gmra.mxu2 %v699_v32  ;;  %v682_v32 = vld [vmem:[#allocation2 + $0x182] sm:$0xff] }
 0x206   : > { %v5926_v15 = vld [vmem:[#allocation2] sm:$0xff] }
 0x207   : > { %1469 = vmatmul.f32.gmra.mxu0 %v644_v11  ;;  %1790 = vmatmul.f32.gmra.mxu3 %v5765_v50  ;;  %v701_v50 = vld [vmem:[#allocation2 + $0xf0] sm:$0xff]  ;;  %7141 = vst [vmem:[#allocation45_spill] sm:$0xff] %v5926_v15 }
 0x208   : > { %v1262_v21 = vpop.f32.mrf.mxu2  ;;  %v5822_v58 = vpop.f32.mrf.mxu1 }
 0x209   : > { %v1263_v60 = vadd.f32 %v1262_v21, %v7125_v19 }
 0x20b   : > { %v5810_v46 = vadd.f32 %v1375_v8, %v1263_v60  ;;  %1591 = vmatmul.f32.gmra.mxu1 %v5569_v45  ;;  %v702_v45 = vld [vmem:[#allocation2 + $0xf8] sm:$0xff]  ;;  %v1743_v49 = vpop.f32.mrf.mxu3 }
 0x20c   : > { %v5812_v16 = vpop.f32.mrf.mxu0 }
 0x20d   : > { %7126 = vst [vmem:[#allocation19_spill] sm:$0xff] %v5810_v46  ;;  %1668 = vmatmul.f32.gmra.mxu2 %v700_v47  ;;  %v649_v47 = vld [vmem:[#allocation2 + $0x171] sm:$0xff] }
 0x20f   : > { %1472 = vmatmul.f32.gmra.mxu0 %v645_v57  ;;  %1793 = vmatmul.f32.gmra.mxu3 %v641_v12 }
 0x210   : > { %v1265_v61 = vpop.f32.mrf.mxu2  ;;  %v5830_v42 = vpop.f32.mrf.mxu1 }
 0x211   : > { %v1266_v0 = vadd.f32 %v1265_v61, %v7127_v7 }
 0x213   : > { %v5818_v27 = vadd.f32 %v1378_v3, %v1266_v0  ;;  %1594 = vmatmul.f32.gmra.mxu1 %v5588_v63  ;;  %v1746_v21 = vpop.f32.mrf.mxu3 }
 0x214   : > { %v5820_v41 = vpop.f32.mrf.mxu0 }
 0x215   : > { %7128 = vst [vmem:[#allocation20_spill] sm:$0xff] %v5818_v27  ;;  %1671 = vmatmul.f32.gmra.mxu2 %v701_v50 }
 0x217   : > { %1475 = vmatmul.f32.gmra.mxu0 %v646_v52  ;;  %1796 = vmatmul.f32.gmra.mxu3 %v642_v40 }
 0x218   : > { %v1624_v8 = vpop.f32.mrf.mxu2  ;;  %v5839_v19 = vpop.f32.mrf.mxu1 }
 0x219   : > { %v1625_v12 = vadd.f32 %v1624_v8, %v5717_v29  ;;  %v703_v29 = vld [vmem:[#allocation2 + $0x108] sm:$0xff] }
 0x21b   : > { %v5826_v13 = vadd.f32 %v1737_v53, %v1625_v12  ;;  %1597 = vmatmul.f32.gmra.mxu1 %v5605_v6  ;;  %v683_v53 = vld [vmem:[#allocation2 + $0x18a] sm:$0xff]  ;;  %v1749_v0 = vpop.f32.mrf.mxu3 }
 0x21c   : > { %v5828_v23 = vpop.f32.mrf.mxu0 }
 0x21d   : > { %1674 = vmatmul.f32.gmra.mxu2 %v702_v45  ;;  %v706_v45 = vld [vmem:[#allocation2 + $0x128] sm:$0xff] }
 0x21f   : > { %1478 = vmatmul.f32.gmra.mxu0 %v647_v62  ;;  %1799 = vmatmul.f32.gmra.mxu3 %v643_v1 }
 0x220   : > { %v1627_v26 = vpop.f32.mrf.mxu2 }
 0x221   : > { %v1628_v3 = vadd.f32 %v1627_v26, %v5730_v18  ;;  %v704_v18 = vld [vmem:[#allocation2 + $0x110] sm:$0xff] }
 0x223   : > { %v5834_v40 = vadd.f32 %v1740_v14, %v1628_v3  ;;  %1600 = vmatmul.f32.gmra.mxu1 %v682_v32  ;;  %v5850_v14 = vpop.f32.mrf.mxu1 }
 0x224   : > { %v5836_v63 = vpop.f32.mrf.mxu0 }
 0x225   : > { %7129 = vst [vmem:[#allocation35_spill] sm:$0xff] %v5834_v40  ;;  %1677 = vmatmul.f32.gmra.mxu2 %v703_v29  ;;  %v758_v40 = vld [vmem:[#allocation2 + $0x9a] sm:$0xff] }
 0x227   : > { %1481 = vmatmul.f32.gmra.mxu0 %v648_v48  ;;  %1802 = vmatmul.f32.gmra.mxu3 %v644_v11  ;;  %v705_v11 = vld [vmem:[#allocation2 + $0x120] sm:$0xff] }
 0x228   : > { %v1630_v34 = vpop.f32.mrf.mxu2 }
 0x229   : > { %v1631_v1 = vadd.f32 %v1630_v34, %v5743_v20 }
 0x22b   : > { %v5841_v6 = vadd.f32 %v1743_v49, %v1631_v1  ;;  %1603 = vmatmul.f32.gmra.mxu1 %v683_v53  ;;  %v5858_v26 = vpop.f32.mrf.mxu1  ;;  %v708_v53 = vld [vmem:[#allocation2 + $0x140] sm:$0xff] }
 0x22c   : > { %v5843_v60 = vpop.f32.mrf.mxu0 }
 0x22d   : > { %7130 = vst [vmem:[#allocation36_spill] sm:$0xff] %v5841_v6  ;;  %1680 = vmatmul.f32.gmra.mxu2 %v704_v18 }
 0x22f   : > { %1484 = vmatmul.f32.gmra.mxu0 %v649_v47  ;;  %1805 = vmatmul.f32.gmra.mxu3 %v645_v57 }
 0x230   : > { %v1633_v61 = vpop.f32.mrf.mxu2 }
 0x231   : > { %v1634_v7 = vadd.f32 %v1633_v61, %v5756_v10  ;;  %v1752_v10 = vpop.f32.mrf.mxu3 }
 0x233   : > { %v5846_v20 = vadd.f32 %v1746_v21, %v1634_v7  ;;  %v5866_v1 = vpop.f32.mrf.mxu1 }
 0x234   : > { %v5848_v50 = vpop.f32.mrf.mxu0 }
 0x235   : > { %7131 = vst [vmem:[#allocation37_spill] sm:$0xff] %v5846_v20  ;;  %1683 = vmatmul.f32.gmra.mxu2 %v705_v11  ;;  %v756_v20 = vld [vmem:[#allocation2 + $0x82] sm:$0xff] }
 0x237   : > { %1487 = vmatmul.f32.gmra.mxu0 %v7132_v24  ;;  %1808 = vmatmul.f32.gmra.mxu3 %v646_v52  ;;  %v709_v24 = vld [vmem:[#allocation2 + $0x150] sm:$0xff] }
 0x238   : > { %v1636_v8 = vpop.f32.mrf.mxu2 }
 0x239   : > { %v1637_v12 = vadd.f32 %v1636_v8, %v5769_v39  ;;  %v749_v39 = vld [vmem:[#allocation2 + $0x32] sm:$0xff]  ;;  %v1755_v34 = vpop.f32.mrf.mxu3 }
 0x23b   : > { %v5854_v57 = vadd.f32 %v1749_v0, %v1637_v12  ;;  %v5874_v8 = vpop.f32.mrf.mxu1 }
 0x23c   : > { %v5856_v49 = vpop.f32.mrf.mxu0 }
 0x23d   : > { %7133 = vst [vmem:[#allocation22_spill] sm:$0xff] %v5854_v57  ;;  %1686 = vmatmul.f32.gmra.mxu2 %v706_v45  ;;  %v745_v45 = vld [vmem:[#allocation2 + $0x181] sm:$0xff] }
 0x23f   : > { %1490 = vmatmul.f32.gmra.mxu0 %v5526_v43  ;;  %1811 = vmatmul.f32.gmra.mxu3 %v647_v62 }
 0x240   : > { %v1639_v3 = vpop.f32.mrf.mxu2 }
 0x241   : > { %v1640_v29 = vadd.f32 %v1639_v3, %v5779_v55  ;;  %v750_v55 = vld [vmem:[#allocation2 + $0x3a] sm:$0xff]  ;;  %v1758_v11 = vpop.f32.mrf.mxu3 }
 0x242   : > { %v710_v3 = vld [vmem:[#allocation2 + $0x158] sm:$0xff] }
 0x243   : > { %v5862_v32 = vadd.f32 %v1752_v10, %v1640_v29  ;;  %v5882_v29 = vpop.f32.mrf.mxu1 }
 0x244   : > { %v5864_v52 = vpop.f32.mrf.mxu0 }
 0x245   : > { %7134 = vst [vmem:[#allocation38_spill] sm:$0xff] %v5862_v32  ;;  %1689 = vmatmul.f32.gmra.mxu2 %v707_v56  ;;  %v3415_v32 = vld [vmem:[#allocation8 + $0x78] sm:$0xff] }
 0x246   : > { %3548 = vmatpush.msra.mxu1 %v3415_v32 }
 0x247   : > { %1849 = vmatmul.f32.vlgmr.msra.gmra.mxu0 %v749_v39  ;;  %1814 = vmatmul.f32.gmra.mxu3 %v648_v48 }
 0x248   : > { %v1642_v21 = vpop.f32.mrf.mxu2 }
 0x249   : > { %v1643_v18 = vadd.f32 %v1642_v21, %v5786_v17  ;;  %v751_v17 = vld [vmem:[#allocation2 + $0x4a] sm:$0xff]  ;;  %v5886_v56 = vpop.f32.mrf.mxu3 }
 0x24b   : > { %v5869_v61 = vadd.f32 %v1755_v34, %v1643_v18  ;;  %v711_v34 = vld [vmem:[#allocation2 + $0x168] sm:$0xff] }
 0x24c   : > { %v5871_v62 = vpop.f32.mrf.mxu0  ;;  %v753_v18 = vld [vmem:[#allocation2 + $0x62] sm:$0xff] }
 0x24d   : > { %7135 = vst [vmem:[#allocation39_spill] sm:$0xff] %v5869_v61  ;;  %1692 = vmatmul.f32.gmra.mxu2 %v708_v53  ;;  %v747_v53 = vld [vmem:[#allocation2 + $0x199] sm:$0xff] }
 0x24f   : > { %1852 = vmatmul.f32.gmra.mxu0 %v750_v55  ;;  %1817 = vmatmul.f32.gmra.mxu3 %v649_v47  ;;  %v5893_v55 = vpop.f32.mrf.mxu1 }
 0x250   : > { %v1645_v7 = vpop.f32.mrf.mxu2 }
 0x251   : > { %v1646_v0 = vadd.f32 %v1645_v7, %v5796_v28  ;;  %v752_v28 = vld [vmem:[#allocation2 + $0x52] sm:$0xff]  ;;  %v5895_v7 = vpop.f32.mrf.mxu3 }
 0x253   : > { %v5876_v12 = vadd.f32 %v1758_v11, %v1646_v0  ;;  %v712_v0 = vld [vmem:[#allocation2 + $0x170] sm:$0xff] }
 0x254   : > { %v5878_v48 = vpop.f32.mrf.mxu0 }
 0x255   : > { %7136 = vst [vmem:[#allocation40_spill] sm:$0xff] %v5876_v12  ;;  %1695 = vmatmul.f32.gmra.mxu2 %v709_v24  ;;  %v3431_v12 = vld [vmem:[#allocation8 + $0xf8] sm:$0xff] }
 0x256   : > { %3589 = vmatpush.msrb.mxu2 %v3431_v12  ;;  %v3430_v12 = vld [vmem:[#allocation8 + $0xf0] sm:$0xff] }
 0x257   : > { %1855 = vmatmul.f32.gmra.mxu0 %v751_v17  ;;  %1820 = vmatmul.f32.gmra.mxu3 %v745_v45  ;;  %v754_v17 = vld [vmem:[#allocation2 + $0x6a] sm:$0xff] }
 0x258   : > { %v5880_v10 = vpop.f32.mrf.mxu2  ;;  %3590 = vmatpush.msrb.mxu2 %v3430_v12 }
 0x25a   : > { %3591 = vmatpush.msrb.mxu2 %v3429_v22  ;;  %v3444_v22 = vld [vmem:[#allocation8 + $0x160] sm:$0xff] }
 0x25c   : > { %v5884_v47 = vpop.f32.mrf.mxu0 }
 0x25d   : > { %1698 = vmatmul.f32.gmra.mxu2 %v710_v3  ;;  %v5903_v3 = vpop.f32.mrf.mxu1 }
 0x25f   : > { %1858 = vmatmul.f32.gmra.mxu0 %v752_v28  ;;  %1823 = vmatmul.f32.gmra.mxu3 %v5526_v43  ;;  %v748_v43 = vld [vmem:[#allocation2 + $0x1a1] sm:$0xff]  ;;  %v5905_v28 = vpop.f32.mrf.mxu3 }
 0x260   : > { %v5888_v39 = vpop.f32.mrf.mxu2 }
 0x264   : > { %v5891_v21 = vpop.f32.mrf.mxu0 }
 0x265   : > { %1701 = vmatmul.f32.gmra.mxu2 %v711_v34  ;;  %v713_v34 = vld [vmem:[#allocation2 + $0x180] sm:$0xff] }
 0x267   : > { %1861 = vmatmul.f32.gmra.mxu0 %v753_v18  ;;  %1826 = vmatmul.f32.gmra.mxu3 %v747_v53  ;;  %v3447_v18 = vld [vmem:[#allocation8 + $0x178] sm:$0xff]  ;;  %v755_v53 = vld [vmem:[#allocation2 + $0x7a] sm:$0xff]  ;;  %v5913_v57 = vpop.f32.mrf.mxu3 }
 0x268   : > { %v5897_v11 = vpop.f32.mrf.mxu2  ;;  %3630 = vmatpush.msrb.mxu3 %v3447_v18  ;;  %7138 = vst [vmem:[#allocation42_spill] sm:$0xff] %v5913_v57  ;;  %v3446_v18 = vld [vmem:[#allocation8 + $0x170] sm:$0xff] }
 0x26a   : > { %3631 = vmatpush.msrb.mxu3 %v3446_v18 }
 0x26c   : > { %v5899_v24 = vpop.f32.mrf.mxu0  ;;  %3632 = vmatpush.msrb.mxu3 %v3445_v51 }
 0x26d   : > { %1704 = vmatmul.f32.gmra.mxu2 %v712_v0 }
 0x26e   : > { %3633 = vmatpush.msrb.mxu3 %v3444_v22 }
 0x26f   : > { %1864 = vmatmul.f32.gmra.mxu0 %v754_v17  ;;  %1829 = vmatmul.f32.gmra.mxu3 %v748_v43  ;;  %v5911_v17 = vpop.f32.mrf.mxu1  ;;  %v5924_v46 = vpop.f32.mrf.mxu3 }
 0x270   : > { %v5901_v45 = vpop.f32.mrf.mxu2  ;;  %7137 = vst [vmem:[#allocation41_spill] sm:$0xff] %v5911_v17  ;;  %v7168_v17 = vld [vmem:[#allocation28_spill] sm:$0xff] }
 0x271   : > { %7140 = vst [vmem:[#allocation44_spill] sm:$0xff] %v5924_v46 }
 0x274   : > { %v5907_v61 = vpop.f32.mrf.mxu0 }
 0x275   : > { %1707 = vmatmul.f32.gmra.mxu2 %v713_v34  ;;  %v757_v34 = vld [vmem:[#allocation2 + $0x92] sm:$0xff] }
 0x277   : > { %1867 = vmatmul.f32.gmra.mxu0 %v755_v53  ;;  %v5920_v6 = vpop.f32.mrf.mxu1  ;;  %v3414_v53 = vld [vmem:[#allocation8 + $0x70] sm:$0xff]  ;;  %v5936_v12 = vpop.f32.mrf.mxu3 }
 0x278   : > { %v5909_v0 = vpop.f32.mrf.mxu2  ;;  %7139 = vst [vmem:[#allocation43_spill] sm:$0xff] %v5920_v6  ;;  %3549 = vmatpush.msra.mxu1 %v3414_v53  ;;  %v759_v53 = vld [vmem:[#allocation2 + $0xaa] sm:$0xff] }
 0x279   : > { %7144 = vst [vmem:[#allocation48_spill] sm:$0xff] %v5936_v12 }
 0x27c   : > { %v5915_v43 = vpop.f32.mrf.mxu0 }
 0x27d   : > { %1710 = vmatmul.f32.gmra.mxu2 %v5546_v59 }
 0x27f   : > { %1870 = vmatmul.f32.gmra.mxu0 %v756_v20  ;;  %v5934_v5 = vpop.f32.mrf.mxu1 }
 0x280   : > { %v5918_v27 = vpop.f32.mrf.mxu2  ;;  %7143 = vst [vmem:[#allocation47_spill] sm:$0xff] %v5934_v5 }
 0x284   : > { %v5922_v32 = vpop.f32.mrf.mxu0 }
 0x285   : > { %1713 = vmatmul.f32.gmra.mxu2 %v5926_v15 }
 0x287   : > { %1873 = vmatmul.f32.gmra.mxu0 %v757_v34  ;;  %v3413_v34 = vld [vmem:[#allocation8 + $0x68] sm:$0xff]  ;;  %v5942_v6 = vpop.f32.mrf.mxu1 }
 0x288   : > { %v5929_v59 = vpop.f32.mrf.mxu2  ;;  %3550 = vmatpush.msra.mxu1 %v3413_v34  ;;  %7147 = vst [vmem:[#allocation51_spill] sm:$0xff] %v5942_v6  ;;  %v761_v34 = vld [vmem:[#allocation2 + $0xc2] sm:$0xff] }
 0x28c   : > { %v5931_v20 = vpop.f32.mrf.mxu0 }
 0x28d   : > { %7142 = vst [vmem:[#allocation46_spill] sm:$0xff] %v5931_v20  ;;  %1716 = vmatmul.f32.gmra.mxu2 %v5926_v15  ;;  %v5944_v15 = vpop.f32.mrf.mxu3  ;;  %v7165_v20 = vld [vmem:[#allocation25_spill] sm:$0xff] }
 0x28e   : > { %7148 = vst [vmem:[#allocation52_spill] sm:$0xff] %v5944_v15 }
 0x28f   : > { %1876 = vmatmul.f32.gmra.mxu0 %v758_v40  ;;  %v760_v40 = vld [vmem:[#allocation2 + $0xb2] sm:$0xff] }
 0x290   : > { %v5938_v18 = vpop.f32.mrf.mxu2 }
 0x291   : > { %7145 = vst [vmem:[#allocation49_spill] sm:$0xff] %v5938_v18  ;;  %v5950_v18 = vpop.f32.mrf.mxu1 }
 0x292   : > { %7151 = vst [vmem:[#allocation55_spill] sm:$0xff] %v5950_v18 }
 0x294   : > { %v5940_v46 = vpop.f32.mrf.mxu0 }
 0x295   : > { %7146 = vst [vmem:[#allocation50_spill] sm:$0xff] %v5940_v46  ;;  %v5952_v57 = vpop.f32.mrf.mxu3  ;;  %v3428_v46 = vld [vmem:[#allocation8 + $0xe0] sm:$0xff] }
 0x296   : > { %7152 = vst [vmem:[#allocation56_spill] sm:$0xff] %v5952_v57  ;;  %3592 = vmatpush.msrb.mxu2 %v3428_v46 }
 0x297   : > { %1879 = vmatmul.f32.gmra.mxu0 %v759_v53  ;;  %v3412_v53 = vld [vmem:[#allocation8 + $0x60] sm:$0xff] }
 0x298   : > { %v5946_v5 = vpop.f32.mrf.mxu2  ;;  %3551 = vmatpush.msra.mxu1 %v3412_v53  ;;  %v3427_v53 = vld [vmem:[#allocation8 + $0xd8] sm:$0xff] }
 0x299   : > { %7149 = vst [vmem:[#allocation53_spill] sm:$0xff] %v5946_v5  ;;  %v5958_v5 = vpop.f32.mrf.mxu1  ;;  %3593 = vmatpush.msrb.mxu2 %v3427_v53  ;;  %v7167_v53 = vld [vmem:[#allocation27_spill] sm:$0xff] }
 0x29a   : > { %7155 = vst [vmem:[#allocation59_spill] sm:$0xff] %v5958_v5 }
 0x29c   : > { %v5948_v12 = vpop.f32.mrf.mxu0 }
 0x29d   : > { %7150 = vst [vmem:[#allocation54_spill] sm:$0xff] %v5948_v12  ;;  %v5962_v18 = vpop.f32.mrf.mxu3 }
 0x29e   : > { %7157 = vst [vmem:[#allocation61_spill] sm:$0xff] %v5962_v18  ;;  %v7163_v18 = vld [vmem:[#allocation23_spill] sm:$0xff] }
 0x29f   : > { %1882 = vmatmul.f32.gmra.mxu0 %v760_v40  ;;  %v762_v40 = vld [vmem:[#allocation2 + $0xca] sm:$0xff] }
 0x2a0   : > { %v5956_v15 = vpop.f32.mrf.mxu2 }
 0x2a1   : > { %7154 = vst [vmem:[#allocation58_spill] sm:$0xff] %v5956_v15  ;;  %v5968_v46 = vpop.f32.mrf.mxu1  ;;  %v3411_v15 = vld [vmem:[#allocation8 + $0x58] sm:$0xff] }
 0x2a2   : > { %7160 = vst [vmem:[#allocation64_spill] sm:$0xff] %v5968_v46  ;;  %3552 = vmatpush.msra.mxu1 %v3411_v15  ;;  %v1441_v15 = vadd.f32 %v5848_v50, %v7168_v17  ;;  %v1453_v17 = vadd.f32 %v5878_v48, %v5667_v44  ;;  %v1456_v44 = vadd.f32 %v5884_v47, %v5681_v30 }
 0x2a4   : > { %v5954_v51 = vpop.f32.mrf.mxu0 }
 0x2a5   : > { %7153 = vst [vmem:[#allocation57_spill] sm:$0xff] %v5954_v51  ;;  %v763_v51 = vld [vmem:[#allocation2 + $0xda] sm:$0xff]  ;;  %v5970_v22 = vpop.f32.mrf.mxu3 }
 0x2a6   : > { %7161 = vst [vmem:[#allocation65_spill] sm:$0xff] %v5970_v22  ;;  %v7166_v22 = vld [vmem:[#allocation26_spill] sm:$0xff] }
 0x2a7   : > { %1885 = vmatmul.f32.gmra.mxu0 %v761_v34  ;;  %v3443_v34 = vld [vmem:[#allocation8 + $0x158] sm:$0xff]  ;;  %v1435_v33 = vadd.f32 %v5836_v63, %v7166_v22  ;;  %v1450_v63 = vadd.f32 %v5871_v62, %v5653_v31  ;;  %v1465_v62 = vadd.f32 %v5907_v61, %v5724_v54  ;;  %v3426_v61 = vld [vmem:[#allocation8 + $0xd0] sm:$0xff] }
 0x2a8   : > { %v5964_v57 = vpop.f32.mrf.mxu2  ;;  %3634 = vmatpush.msrb.mxu3 %v3443_v34  ;;  %v1438_v34 = vadd.f32 %v5843_v60, %v7167_v53  ;;  %3594 = vmatpush.msrb.mxu2 %v3426_v61 }
 0x2a9   : > { %7158 = vst [vmem:[#allocation62_spill] sm:$0xff] %v5964_v57  ;;  %v7164_v57 = vld [vmem:[#allocation24_spill] sm:$0xff] }
 0x2aa   : > { %v1429_v46 = vadd.f32 %v5820_v41, %v7164_v57 }
 0x2ac   : > { %v5960_v12 = vpop.f32.mrf.mxu0  ;;  %v1542_v60 = vadd.f32 %v5814_v9, %v1429_v46  ;;  %v7177_v46 = vld [vmem:[#allocation48_spill] sm:$0xff] }
 0x2ad   : > { %7156 = vst [vmem:[#allocation60_spill] sm:$0xff] %v5960_v12  ;;  %v7162_v12 = vld [vmem:[#allocation21_spill] sm:$0xff] }
 0x2ae   : > { %v1423_v5 = vadd.f32 %v5805_v25, %v7162_v12  ;;  %v764_v12 = vld [vmem:[#allocation2 + $0xe2] sm:$0xff] }
 0x2af   : > { %1888 = vmatmul.f32.gmra.mxu0 %v762_v40 }
 0x2b0   : > { %v5974_v40 = vpop.f32.mrf.mxu2 }
 0x2b4   : > { %v5966_v6 = vpop.f32.mrf.mxu0 }
 0x2b5   : > { %7159 = vst [vmem:[#allocation63_spill] sm:$0xff] %v5966_v6  ;;  %v1426_v6 = vadd.f32 %v5812_v16, %v7163_v18  ;;  %v1536_v16 = vadd.f32 %v5788_v35, %v1423_v5  ;;  %v7169_v18 = vld [vmem:[#allocation29_spill] sm:$0xff]  ;;  %v1548_v5 = vadd.f32 %v5830_v42, %v1435_v33  ;;  %v1655_v33 = vadd.f32 %v5897_v11, %v1542_v60  ;;  %v7170_v42 = vld [vmem:[#allocation30_spill] sm:$0xff] }
 0x2b6   : > { %v1444_v41 = vadd.f32 %v5856_v49, %v7169_v18  ;;  %v1551_v49 = vadd.f32 %v5839_v19, %v1438_v34  ;;  %v1459_v19 = vadd.f32 %v5891_v21, %v7170_v42  ;;  %v6042_v21 = vadd.f32 %v5893_v55, %v1456_v44  ;;  %v7171_v11 = vld [vmem:[#allocation41_spill] sm:$0xff]  ;;  %v7174_v55 = vld [vmem:[#allocation42_spill] sm:$0xff]  ;;  %v7179_v34 = vld [vmem:[#allocation51_spill] sm:$0xff] }
 0x2b7   : > { %1891 = vmatmul.f32.gmra.mxu0 %v763_v51  ;;  %v1432_v51 = vadd.f32 %v5828_v23, %v7165_v20  ;;  %v1447_v23 = vadd.f32 %v5864_v52, %v5639_v36  ;;  %v1539_v57 = vadd.f32 %v5801_v38, %v1426_v6  ;;  %v1649_v50 = vadd.f32 %v5880_v10, %v1536_v16  ;;  %v6006_v52 = vpop.f32.mrf.mxu1  ;;  %v6013_v6 = vpop.f32.mrf.mxu3  ;;  %v7176_v20 = vld [vmem:[#allocation44_spill] sm:$0xff]  ;;  %v7185_v44 = vld [vmem:[#allocation53_spill] sm:$0xff] }
 0x2b8   : > { %v1554_v36 = vadd.f32 %v5850_v14, %v1441_v15  ;;  %v1557_v31 = vadd.f32 %v5858_v26, %v1444_v41  ;;  %v1462_v14 = vadd.f32 %v5899_v24, %v5709_v37  ;;  %v1664_v48 = vadd.f32 %v5918_v27, %v1551_v49  ;;  %v6036_v47 = vpop.f32.mrf.mxu2 }
 0x2b9   : > { %v1545_v35 = vadd.f32 %v5822_v58, %v1432_v51  ;;  %v1560_v38 = vadd.f32 %v5866_v1, %v1447_v23  ;;  %v1652_v9 = vadd.f32 %v5888_v39, %v1539_v57  ;;  %v1563_v58 = vadd.f32 %v5874_v8, %v1450_v63  ;;  %v7178_v51 = vld [vmem:[#allocation47_spill] sm:$0xff]  ;;  %v3424_v63 = vld [vmem:[#allocation8 + $0xc0] sm:$0xff] }
 0x2ba   : > { %v6022_v26 = vadd.f32 %v5886_v56, %v1649_v50  ;;  %v6025_v1 = vadd.f32 %v5882_v29, %v1453_v17  ;;  %v1661_v8 = vadd.f32 %v5909_v0, %v1548_v5  ;;  %v1468_v10 = vadd.f32 %v5915_v43, %v5737_v4  ;;  %v765_v29 = vld [vmem:[#allocation2 + $0xf2] sm:$0xff]  ;;  %v7182_v50 = vld [vmem:[#allocation55_spill] sm:$0xff] }
 0x2bb   : > { %v1658_v30 = vadd.f32 %v5901_v45, %v1545_v35  ;;  %v1471_v37 = vadd.f32 %v5922_v32, %v5750_v2  ;;  %v6039_v39 = vadd.f32 %v5895_v7, %v1652_v9  ;;  %v1667_v54 = vadd.f32 %v5929_v59, %v1554_v36  ;;  %v7172_v45 = vld [vmem:[#allocation31_spill] sm:$0xff]  ;;  %v7173_v7 = vld [vmem:[#allocation46_spill] sm:$0xff]  ;;  %v7181_v57 = vld [vmem:[#allocation49_spill] sm:$0xff] }
 0x2bc   : > { %v5988_v25 = vpop.f32.mrf.mxu0  ;;  %v6047_v4 = vadd.f32 %v5905_v28, %v1655_v33  ;;  %v6050_v2 = vadd.f32 %v5903_v3, %v1459_v19  ;;  %v6053_v24 = vadd.f32 %v7171_v11, %v1462_v14  ;;  %v1474_v0 = vadd.f32 %v7173_v7, %v7172_v45  ;;  %v7175_v32 = vld [vmem:[#allocation43_spill] sm:$0xff]  ;;  %v7183_v35 = vld [vmem:[#allocation32_spill] sm:$0xff]  ;;  %v7184_v5 = vld [vmem:[#allocation50_spill] sm:$0xff] }
 0x2bd   : > { %v6058_v43 = vadd.f32 %v7174_v55, %v1658_v30  ;;  %v6061_v59 = vadd.f32 %v7175_v32, %v1465_v62  ;;  %v3425_v28 = vld [vmem:[#allocation8 + $0xc8] sm:$0xff]  ;;  %v6064_v3 = vadd.f32 %v7176_v20, %v1661_v8  ;;  %v6067_v22 = vadd.f32 %v7177_v46, %v1664_v48  ;;  %v3423_v62 = vld [vmem:[#allocation8 + $0xb8] sm:$0xff]  ;;  %v3442_v32 = vld [vmem:[#allocation8 + $0x150] sm:$0xff] }
 0x2be   : > { %v6070_v53 = vadd.f32 %v7178_v51, %v1468_v10  ;;  %v6073_v15 = vadd.f32 %v7179_v34, %v1471_v37  ;;  %3595 = vmatpush.msrb.mxu2 %v3425_v28  ;;  %v1670_v60 = vadd.f32 %v7181_v57, %v1557_v31  ;;  %v6080_v17 = vadd.f32 %v7182_v50, %v1474_v0  ;;  %v7186_v31 = vld [vmem:[#allocation33_spill] sm:$0xff]  ;;  %v7187_v8 = vld [vmem:[#allocation54_spill] sm:$0xff]  ;;  %v7191_v0 = vld [vmem:[#allocation35_spill] sm:$0xff] }
 0x2bf   : > { %1894 = vmatmul.f32.gmra.mxu0 %v764_v12  ;;  %v7180_v12 = vld [vmem:[#allocation52_spill] sm:$0xff]  ;;  %v1477_v49 = vadd.f32 %v7184_v5, %v7183_v35  ;;  %v1598_v36 = vpop.f32.mrf.mxu1  ;;  %v1673_v33 = vadd.f32 %v7185_v44, %v1560_v38  ;;  %v1794_v42 = vpop.f32.mrf.mxu3  ;;  %v1480_v48 = vadd.f32 %v7187_v8, %v7186_v31  ;;  %v7189_v38 = vld [vmem:[#allocation34_spill] sm:$0xff]  ;;  %v7190_v11 = vld [vmem:[#allocation57_spill] sm:$0xff]  ;;  %3635 = vmatpush.msrb.mxu3 %v3442_v32 }
 0x2c0   : > { %v6076_v16 = vadd.f32 %v7180_v12, %v1667_v54  ;;  %3596 = vmatpush.msrb.mxu2 %v3424_v63  ;;  %v766_v54 = vld [vmem:[#allocation2 + $0xfa] sm:$0xff]  ;;  %v1483_v45 = vadd.f32 %v7190_v11, %v7189_v38  ;;  %v3422_v28 = vld [vmem:[#allocation8 + $0xb0] sm:$0xff]  ;;  %v6100_v12 = vpop.f32.mrf.mxu2  ;;  %v3420_v38 = vld [vmem:[#allocation8 + $0xa0] sm:$0xff] }
 0x2c1   : > { %v7192_v20 = vld [vmem:[#allocation56_spill] sm:$0xff]  ;;  %v7193_v51 = vld [vmem:[#allocation62_spill] sm:$0xff]  ;;  %v7195_v63 = vld [vmem:[#allocation59_spill] sm:$0xff] }
 0x2c2   : > { %3597 = vmatpush.msrb.mxu2 %v3423_v62  ;;  %v6096_v46 = vadd.f32 %v7192_v20, %v1670_v60  ;;  %v1679_v34 = vadd.f32 %v7193_v51, %v6025_v1  ;;  %v6106_v57 = vadd.f32 %v7195_v63, %v1477_v49  ;;  %v7196_v50 = vld [vmem:[#allocation18_spill] sm:$0xff]  ;;  %v7197_v35 = vld [vmem:[#allocation60_spill] sm:$0xff]  ;;  %v1682_v62 = vadd.f32 %v5974_v40, %v6042_v21  ;;  %v7199_v49 = vld [vmem:[#allocation65_spill] sm:$0xff] }
 0x2c3   : > { %v1486_v5 = vadd.f32 %v7197_v35, %v7196_v50  ;;  %v3441_v44 = vld [vmem:[#allocation8 + $0x148] sm:$0xff]  ;;  %v6119_v8 = vadd.f32 %v6006_v52, %v1483_v45  ;;  %v3439_v32 = vld [vmem:[#allocation8 + $0x138] sm:$0xff] }
 0x2c4   : > { %v1850_v56 = vpop.f32.mrf.mxu0  ;;  %3598 = vmatpush.msrb.mxu2 %v3422_v28  ;;  %v3421_v1 = vld [vmem:[#allocation8 + $0xa8] sm:$0xff]  ;;  %3636 = vmatpush.msrb.mxu3 %v3441_v44  ;;  %v6129_v28 = vadd.f32 %v1794_v42, %v1682_v62  ;;  %v3438_v42 = vld [vmem:[#allocation8 + $0x130] sm:$0xff] }
 0x2c5   : > { %v1851_v27 = vadd.f32 %v1850_v56, %v5826_v13 }
 0x2c6   : > { %3599 = vmatpush.msrb.mxu2 %v3421_v1 }
 0x2c7   : > { %v1946_v13 = vmax.f32 %v1851_v27, 0.0  ;;  %1897 = vmatmul.f32.gmra.mxu0 %v765_v29  ;;  %v7188_v27 = vld [vmem:[#allocation58_spill] sm:$0xff] }
 0x2c8   : > { %v1676_v61 = vadd.f32 %v7188_v27, %v1563_v58  ;;  %v7194_v58 = vld [vmem:[#allocation61_spill] sm:$0xff]  ;;  %3600 = vmatpush.msrb.mxu2 %v3420_v38 }
 0x2c9   : > { %v2010_v18 = vrot.slane %v1946_v13, 2  ;;  %v2011_v41 = vrot.slane %v1946_v13, 4  ;;  %v2012_v23 = vrot.slane %v1946_v13, 6  ;;  %v2203_v9 = vsel %vm2202_vm0, %v1946_v13, -inf  ;;  %v3410_v13 = vld [vmem:[#allocation8 + $0x50] sm:$0xff]  ;;  %v3440_v27 = vld [vmem:[#allocation8 + $0x140] sm:$0xff] }
 0x2ca   : > { %v2204_v19 = vrot.slane %v2203_v9, 4  ;;  %3553 = vmatpush.msra.mxu1 %v3410_v13  ;;  %v6116_v31 = vadd.f32 %v7199_v49, %v1676_v61  ;;  %3637 = vmatpush.msrb.mxu3 %v3440_v27  ;;  %v7202_v61 = vld [vmem:[#allocation63_spill] sm:$0xff]  ;;  %v3419_v13 = vld [vmem:[#allocation8 + $0x98] sm:$0xff]  ;;  %v1690_v27 = vpop.f32.mrf.mxu2 }
 0x2cb   : > { %v2210_v14 = vsel %vm2202_vm0, %v2010_v18, -inf  ;;  %v2217_v30 = vsel %vm2202_vm0, %v2011_v41, -inf  ;;  %v2224_v56 = vsel %vm2202_vm0, %v2012_v23, -inf  ;;  %v6103_v23 = vadd.f32 %v7194_v58, %v1673_v33  ;;  %v1797_v58 = vpop.f32.mrf.mxu3  ;;  %3601 = vmatpush.msrb.mxu2 %v3419_v13  ;;  %v3416_v13 = vld [vmem:[#allocation8 + $0x80] sm:$0xff] }
 0x2cc   : > { %v2211_v10 = vrot.slane %v2210_v14, 4  ;;  %v2218_v37 = vrot.slane %v2217_v30, 4  ;;  %v1853_v29 = vpop.f32.mrf.mxu0  ;;  %v2205_v7 = vmax.f32 %v2203_v9, %v2204_v19  ;;  %v2225_v41 = vrot.slane %v2224_v56, 4  ;;  %v3409_v9 = vld [vmem:[#allocation8 + $0x48] sm:$0xff]  ;;  %v7198_v19 = vld [vmem:[#allocation64_spill] sm:$0xff]  ;;  %3638 = vmatpush.msrb.mxu3 %v3439_v32  ;;  %v3436_v32 = vld [vmem:[#allocation8 + $0x120] sm:$0xff] }
 0x2cd   : > { %v1854_v55 = vadd.f32 %v1853_v29, %v7191_v0  ;;  %3554 = vmatpush.msra.mxu1 %v3409_v9 }
 0x2ce   : > { %v2212_v18 = vmax.f32 %v2210_v14, %v2211_v10  ;;  %v6111_v14 = vadd.f32 %v7198_v19, %v1480_v48  ;;  %v2219_v33 = vmax.f32 %v2217_v30, %v2218_v37  ;;  %v2206_v10 = vrot.slane %v2205_v7, 2  ;;  %v7201_v37 = vld [vmem:[#allocation19_spill] sm:$0xff]  ;;  %3639 = vmatpush.msrb.mxu3 %v3438_v42 }
 0x2cf   : > { %v1947_v60 = vmax.f32 %v1854_v55, 0.0  ;;  %1900 = vmatmul.f32.gmra.mxu0 %v766_v54  ;;  %v3408_v54 = vld [vmem:[#allocation8 + $0x40] sm:$0xff]  ;;  %v6122_v48 = vadd.f32 %v6013_v6, %v1679_v34  ;;  %v2226_v40 = vmax.f32 %v2224_v56, %v2225_v41  ;;  %v6124_v30 = vadd.f32 %v1598_v36, %v1486_v5  ;;  %v3407_v55 = vld [vmem:[#allocation8 + $0x38] sm:$0xff]  ;;  %v1601_v6 = vpop.f32.mrf.mxu1  ;;  %v3406_v5 = vld [vmem:[#allocation8 + $0x30] sm:$0xff] }
 0x2d0   : > { %v2213_v11 = vrot.slane %v2212_v18, 2  ;;  %3555 = vmatpush.msra.mxu1 %v3408_v54  ;;  %v1489_v52 = vadd.f32 %v7202_v61, %v7201_v37  ;;  %v2220_v20 = vrot.slane %v2219_v33, 2  ;;  %v767_v36 = vld [vmem:[#allocation2 + $0x10a] sm:$0xff]  ;;  %v1685_v41 = vadd.f32 %v6036_v47, %v6050_v2  ;;  %v3417_v54 = vld [vmem:[#allocation8 + $0x88] sm:$0xff] }
 0x2d1   : > { %v2013_v29 = vrot.slane %v1947_v60, 2  ;;  %v2014_v21 = vrot.slane %v1947_v60, 4  ;;  %7200 = vst [vmem:[#allocation21_spill] sm:$0xff] %v6124_v30  ;;  %v2015_v45 = vrot.slane %v1947_v60, 6  ;;  %v2231_v0 = vsel %vm2202_vm0, %v1947_v60, -inf  ;;  %v3418_v60 = vld [vmem:[#allocation8 + $0x90] sm:$0xff] }
 0x2d2   : > { %v2232_v56 = vrot.slane %v2231_v0, 4  ;;  %3556 = vmatpush.msra.mxu1 %v3407_v55  ;;  %v2207_v63 = vmax.f32 %v2205_v7, %v2206_v10  ;;  %v2214_v9 = vmax.f32 %v2212_v18, %v2213_v11  ;;  %v2227_v44 = vrot.slane %v2226_v40, 2  ;;  %v7204_v2 = vld [vmem:[#allocation36_spill] sm:$0xff]  ;;  %v3405_v10 = vld [vmem:[#allocation8 + $0x28] sm:$0xff]  ;;  %3602 = vmatpush.msrb.mxu2 %v3418_v60  ;;  %v3404_v55 = vld [vmem:[#allocation8 + $0x20] sm:$0xff] }
 0x2d3   : > { %v2238_v51 = vsel %vm2202_vm0, %v2013_v29, -inf  ;;  %v2245_v35 = vsel %vm2202_vm0, %v2014_v21, -inf  ;;  %v6135_v62 = vadd.f32 %v1601_v6, %v1489_v52  ;;  %v2252_v47 = vsel %vm2202_vm0, %v2015_v45, -inf  ;;  %v3437_v29 = vld [vmem:[#allocation8 + $0x128] sm:$0xff]  ;;  %v7205_v61 = vld [vmem:[#allocation20_spill] sm:$0xff] }
 0x2d4   : > { %v1856_v34 = vpop.f32.mrf.mxu0  ;;  %v2239_v50 = vrot.slane %v2238_v51, 4  ;;  %v2233_v1 = vmax.f32 %v2231_v0, %v2232_v56  ;;  %v2246_v19 = vrot.slane %v2245_v35, 4  ;;  %3557 = vmatpush.msra.mxu1 %v3406_v5  ;;  %v6139_v38 = vmax.f32 %v2219_v33, %v2220_v20  ;;  %3640 = vmatpush.msrb.mxu3 %v3437_v29 }
 0x2d5   : > { %7203 = vst [vmem:[#allocation23_spill] sm:$0xff] %v6135_v62  ;;  %v1857_v7 = vadd.f32 %v1856_v34, %v7204_v2  ;;  %v2253_v21 = vrot.slane %v2252_v47, 4  ;;  %v6141_v37 = vadd.f32 %v1797_v58, %v1685_v41  ;;  %v6145_v52 = vadd.f32 %v5988_v25, %v7205_v61  ;;  %3603 = vmatpush.msrb.mxu2 %v3417_v54  ;;  %v3403_v58 = vld [vmem:[#allocation8 + $0x18] sm:$0xff]  ;;  %v3434_v2 = vld [vmem:[#allocation8 + $0x110] sm:$0xff]  ;;  %v6164_v54 = vpop.f32.mrf.mxu3  ;;  %v3401_v61 = vld [vmem:[#allocation8 + $0x8] sm:$0xff] }
 0x2d6   : > { %v2240_v49 = vmax.f32 %v2238_v51, %v2239_v50  ;;  %v2234_v18 = vrot.slane %v2233_v1, 2  ;;  %v2247_v11 = vmax.f32 %v2245_v35, %v2246_v19  ;;  %3558 = vmatpush.msra.mxu1 %v3405_v10  ;;  %v2208_v45 = vrot.slane %v2207_v63, 1  ;;  %3641 = vmatpush.msrb.mxu3 %v3436_v32  ;;  %v3335_v51 = vld [vmem:[#allocation3 + $0x1] sm:$0xff]  ;;  %v3402_v19 = vld [vmem:[#allocation8 + $0x10] sm:$0xff] }
 0x2d7   : > { %1903 = vmatmul.f32.gmra.mxu0 %v767_v36  ;;  %v1948_v0 = vmax.f32 %v1857_v7, 0.0  ;;  %v6149_v33 = vadd.f32 %v6100_v12, %v6053_v24  ;;  %v2215_v6 = vrot.slane %v2214_v9, 1  ;;  %v2228_v20 = vmax.f32 %v2226_v40, %v2227_v44  ;;  %v3435_v50 = vld [vmem:[#allocation8 + $0x118] sm:$0xff]  ;;  %3604 = vmatpush.msrb.mxu2 %v3416_v13  ;;  %v768_v40 = vld [vmem:[#allocation2 + $0x112] sm:$0xff] }
 0x2d8   : > { %v2241_v56 = vrot.slane %v2240_v49, 2  ;;  %3559 = vmatpush.msra.mxu1 %v3404_v55  ;;  %v6152_v34 = vadd.f32 %v1690_v27, %v6061_v59  ;;  %v2235_v25 = vmax.f32 %v2233_v1, %v2234_v18  ;;  %v2222_v35 = vrot.slane %v6139_v38, 1  ;;  %3642 = vmatpush.msrb.mxu3 %v3435_v50 }
 0x2d9   : > { %v2016_v36 = vrot.slane %v1948_v0, 2  ;;  %v2017_v41 = vrot.slane %v1948_v0, 4  ;;  %v2248_v5 = vrot.slane %v2247_v11, 2  ;;  %v2254_v24 = vmax.f32 %v2252_v47, %v2253_v21  ;;  %3605 = vmatmul.f32.vlgmr.msrb.gmra.mxu2 %v3335_v51 }
 0x2da   : > { %v2018_v12 = vrot.slane %v1948_v0, 6  ;;  %3560 = vmatpush.msra.mxu1 %v3403_v58  ;;  %v6155_v60 = vmax.f32 %v2207_v63, %v2208_v45  ;;  %v2259_v59 = vsel %vm2202_vm0, %v1948_v0, -inf  ;;  %v6160_v7 = vmax.f32 %v2214_v9, %v2215_v6  ;;  %3643 = vmatpush.msrb.mxu3 %v3434_v2  ;;  %v3433_v45 = vld [vmem:[#allocation8 + $0x108] sm:$0xff] }
 0x2db   : > { %v2266_v44 = vsel %vm2202_vm0, %v2016_v36, -inf  ;;  %v2273_v1 = vsel %vm2202_vm0, %v2017_v41, -inf  ;;  %v2229_v10 = vrot.slane %v2228_v20, 1  ;;  %v6162_v47 = vmax.f32 %v2240_v49, %v2241_v56  ;;  %v7206_v56 = vld [vmem:[#allocation37_spill] sm:$0xff] }
 0x2dc   : > { %v1859_v42 = vpop.f32.mrf.mxu0  ;;  %v2260_v29 = vrot.slane %v2259_v59, 4  ;;  %3561 = vmatpush.msra.mxu1 %v3402_v19  ;;  %v2236_v63 = vrot.slane %v2235_v25, 1  ;;  %v2267_v27 = vrot.slane %v2266_v44, 4  ;;  %v2274_v18 = vrot.slane %v2273_v1, 4  ;;  %3644 = vmatpush.msrb.mxu3 %v3433_v45  ;;  %v3400_v36 = vld [vmem:[#allocation8] sm:$0xff] }
 0x2dd   : > { %v2280_v21 = vsel %vm2202_vm0, %v2018_v12, -inf  ;;  %v6167_v0 = vmax.f32 %v2247_v11, %v2248_v5  ;;  %v2255_v9 = vrot.slane %v2254_v24, 2  ;;  %v6170_v49 = vmax.f32 %v6139_v38, %v2222_v35  ;;  %v3432_v41 = vld [vmem:[#allocation8 + $0x100] sm:$0xff] }
 0x2de   : > { %v2261_v55 = vmax.f32 %v2259_v59, %v2260_v29  ;;  %v2281_v32 = vrot.slane %v2280_v21, 4  ;;  %3562 = vmatpush.msra.mxu1 %v3401_v61  ;;  %v2268_v13 = vmax.f32 %v2266_v44, %v2267_v27  ;;  %v2275_v6 = vmax.f32 %v2273_v1, %v2274_v18  ;;  %3645 = vmatpush.msrb.mxu3 %v3432_v41  ;;  %v3343_v12 = vld [vmem:[#allocation3 + $0x2] sm:$0xff] }
 0x2df   : > { %1906 = vmatmul.f32.gmra.mxu0 %v768_v40  ;;  %v1860_v51 = vadd.f32 %v1859_v42, %v7206_v56  ;;  %v6173_v58 = vmax.f32 %v2228_v20, %v2229_v10  ;;  %v2243_v50 = vrot.slane %v6162_v47, 1  ;;  %v6176_v40 = vmax.f32 %v2235_v25, %v2236_v63  ;;  %v7207_v44 = vld [vmem:[#allocation45_spill] sm:$0xff]  ;;  %3646 = vmatmul.f32.vlgmr.msrb.gmra.mxu3 %v3343_v12  ;;  %v769_v10 = vld [vmem:[#allocation2 + $0x122] sm:$0xff] }
 0x2e0   : > { %v2262_v11 = vrot.slane %v2261_v55, 2  ;;  %v2282_v5 = vmax.f32 %v2280_v21, %v2281_v32  ;;  %3563 = vmatpush.msra.mxu1 %v3400_v36  ;;  %v2269_v38 = vrot.slane %v2268_v13, 2  ;;  %v2276_v35 = vrot.slane %v2275_v6, 2 }
 0x2e1   : > { %v1949_v59 = vmax.f32 %v1860_v51, 0.0  ;;  %3564 = vmatmul.f32.vlgmr.msra.gmra.mxu1 %v7207_v44  ;;  %v2250_v20 = vrot.slane %v6167_v0, 1  ;;  %v2256_v42 = vmax.f32 %v2254_v24, %v2255_v9 }
 0x2e2   : > { %v2263_v1 = vmax.f32 %v2261_v55, %v2262_v11  ;;  %v2283_v19 = vrot.slane %v2282_v5, 2  ;;  %v2270_v29 = vmax.f32 %v2268_v13, %v2269_v38  ;;  %v2277_v27 = vmax.f32 %v2275_v6, %v2276_v35  ;;  %v6183_v13 = vpop.f32.mrf.mxu3  ;;  %v6185_v6 = vpop.f32.mrf.mxu2 }
 0x2e3   : > { %v2019_v18 = vrot.slane %v1949_v59, 2  ;;  %v2020_v25 = vrot.slane %v1949_v59, 4  ;;  %v2021_v61 = vrot.slane %v1949_v59, 6  ;;  %v2287_v45 = vsel %vm2202_vm0, %v1949_v59, -inf }
 0x2e4   : > { %v1862_v2 = vpop.f32.mrf.mxu0  ;;  %v2264_v63 = vrot.slane %v2263_v1, 1  ;;  %v2284_v21 = vmax.f32 %v2282_v5, %v2283_v19  ;;  %v2271_v32 = vrot.slane %v2270_v29, 1  ;;  %v2278_v56 = vrot.slane %v2277_v27, 1 }
 0x2e5   : > { %v2288_v51 = vrot.slane %v2287_v45, 4  ;;  %v2294_v36 = vsel %vm2202_vm0, %v2019_v18, -inf  ;;  %v2301_v41 = vsel %vm2202_vm0, %v2020_v25, -inf  ;;  %v6188_v11 = vmax.f32 %v6162_v47, %v2243_v50 }
 0x2e6   : > { %v2265_v24 = vmax.f32 %v2263_v1, %v2264_v63  ;;  %v2285_v9 = vrot.slane %v2284_v21, 1  ;;  %v2295_v55 = vrot.slane %v2294_v36, 4  ;;  %v2272_v5 = vmax.f32 %v2270_v29, %v2271_v32 }
 0x2e7   : > { %1909 = vmatmul.f32.gmra.mxu0 %v769_v10  ;;  %v2279_v12 = vmax.f32 %v2277_v27, %v2278_v56  ;;  %v2289_v38 = vmax.f32 %v2287_v45, %v2288_v51  ;;  %v2302_v19 = vrot.slane %v2301_v41, 4  ;;  %v2257_v1 = vrot.slane %v2256_v42, 1  ;;  %v7208_v56 = vld [vmem:[#allocation22_spill] sm:$0xff] }
 0x2e8   : > { %v2286_v35 = vmax.f32 %v2284_v21, %v2285_v9  ;;  %v3099_v59 = vmax.f32 %v6155_v60, %v2265_v24  ;;  %v2296_v44 = vmax.f32 %v2294_v36, %v2295_v55  ;;  %v3100_v10 = vmax.f32 %v6160_v7, %v2272_v5  ;;  %v770_v21 = vld [vmem:[#allocation2 + $0x12a] sm:$0xff]  ;;  %v7209_v24 = vld [vmem:[#allocation38_spill] sm:$0xff] }
 0x2e9   : > { %v3101_v18 = vmax.f32 %v6170_v49, %v2279_v12  ;;  %v2290_v25 = vrot.slane %v2289_v38, 2  ;;  %v2303_v50 = vmax.f32 %v2301_v41, %v2302_v19  ;;  %v2308_v29 = vsel %vm2202_vm0, %v2021_v61, -inf }
 0x2ea   : > { %v3102_v63 = vmax.f32 %v6173_v58, %v2286_v35  ;;  %v2297_v47 = vrot.slane %v2296_v44, 2  ;;  %v3248_v60 = vsel %vm3247_vm1, %v3100_v10, %v3099_v59  ;;  %v2309_v32 = vrot.slane %v2308_v29, 4 }
 0x2eb   : > { %v2291_v45 = vmax.f32 %v2289_v38, %v2290_v25  ;;  %v1863_v51 = vadd.f32 %v1862_v2, %v7208_v56  ;;  %v3250_v7 = vsel %vm3249_vm2, %v3101_v18, %v3248_v60  ;;  %v2304_v49 = vrot.slane %v2303_v50, 2 }
 0x2ec   : > { %v1865_v27 = vpop.f32.mrf.mxu0  ;;  %v2298_v36 = vmax.f32 %v2296_v44, %v2297_v47  ;;  %v3252_v58 = vsel %vm3251_vm3, %v3102_v63, %v3250_v7  ;;  %v2310_v41 = vmax.f32 %v2308_v29, %v2309_v32  ;;  %v2251_v61 = vmax.f32 %v6167_v0, %v2250_v20  ;;  %v1806_v47 = vpop.f32.mrf.mxu3 }
 0x2ed   : > { %v1866_v9 = vadd.f32 %v1865_v27, %v7209_v24  ;;  %v2292_v55 = vrot.slane %v2291_v45, 1  ;;  %v1950_v5 = vmax.f32 %v1863_v51, 0.0  ;;  %v2258_v12 = vmax.f32 %v2256_v42, %v2257_v1  ;;  %v1696_v27 = vpop.f32.mrf.mxu2 }
 0x2ee   : > { %v2299_v35 = vrot.slane %v2298_v36, 1  ;;  %v2305_v38 = vmax.f32 %v2303_v50, %v2304_v49  ;;  %v2311_v19 = vrot.slane %v2310_v41, 2 }
 0x2ef   : > { %1912 = vmatmul.f32.gmra.mxu0 %v770_v21  ;;  %v2293_v59 = vmax.f32 %v2291_v45, %v2292_v55  ;;  %v2022_v2 = vrot.slane %v1950_v5, 2  ;;  %v2023_v18 = vrot.slane %v1950_v5, 4  ;;  %v1951_v25 = vmax.f32 %v1866_v9, 0.0  ;;  %v771_v45 = vld [vmem:[#allocation2 + $0x13a] sm:$0xff] }
 0x2f0   : > { %v2300_v10 = vmax.f32 %v2298_v36, %v2299_v35  ;;  %v2306_v44 = vrot.slane %v2305_v38, 1  ;;  %v2312_v63 = vmax.f32 %v2310_v41, %v2311_v19  ;;  %v2024_v60 = vrot.slane %v1950_v5, 6  ;;  %v1604_v41 = vpop.f32.mrf.mxu1 }
 0x2f1   : > { %v3103_v29 = vmax.f32 %v6176_v40, %v2293_v59  ;;  %v2315_v21 = vsel %vm2202_vm0, %v1950_v5, -inf  ;;  %v2322_v1 = vsel %vm2202_vm0, %v2022_v2, -inf  ;;  %v2329_v7 = vsel %vm2202_vm0, %v2023_v18, -inf }
 0x2f2   : > { %v2307_v0 = vmax.f32 %v2305_v38, %v2306_v44  ;;  %v3104_v20 = vmax.f32 %v6188_v11, %v2300_v10  ;;  %v2316_v42 = vrot.slane %v2315_v21, 4  ;;  %v2313_v32 = vrot.slane %v2312_v63, 1 }
 0x2f3   : > { %v3254_v56 = vsel %vm3253_vm4, %v3103_v29, %v3252_v58  ;;  %v2323_v51 = vrot.slane %v2322_v1, 4  ;;  %v2330_v24 = vrot.slane %v2329_v7, 4  ;;  %v2336_v11 = vsel %vm2202_vm0, %v2024_v60, -inf }
 0x2f4   : > { %v1868_v50 = vpop.f32.mrf.mxu0  ;;  %v3105_v36 = vmax.f32 %v2251_v61, %v2307_v0  ;;  %v3256_v40 = vsel %vm3255_vm5, %v3104_v20, %v3254_v56  ;;  %v2317_v49 = vmax.f32 %v2315_v21, %v2316_v42  ;;  %v2314_v9 = vmax.f32 %v2312_v63, %v2313_v32 }
 0x2f5   : > { %v2324_v55 = vmax.f32 %v2322_v1, %v2323_v51  ;;  %v2331_v38 = vmax.f32 %v2329_v7, %v2330_v24  ;;  %v2337_v58 = vrot.slane %v2336_v11, 4  ;;  %v1694_v59 = vadd.f32 %v6185_v6, %v6070_v53  ;;  %v1809_v1 = vpop.f32.mrf.mxu3 }
 0x2f6   : > { %v3258_v5 = vsel %vm3257_vm6, %v3105_v36, %v3256_v40  ;;  %v2318_v35 = vrot.slane %v2317_v49, 2  ;;  %v3106_v61 = vmax.f32 %v2258_v12, %v2314_v9  ;;  %v2025_v19 = vrot.slane %v1951_v25, 2  ;;  %v7213_v9 = vld [vmem:[#allocation39_spill] sm:$0xff] }
 0x2f7   : > { %1915 = vmatmul.f32.gmra.mxu0 %v771_v45  ;;  %v2026_v2 = vrot.slane %v1951_v25, 4  ;;  %v2325_v44 = vrot.slane %v2324_v55, 2  ;;  %v2338_v18 = vmax.f32 %v2336_v11, %v2337_v58  ;;  %v2027_v63 = vrot.slane %v1951_v25, 6  ;;  %v1699_v45 = vpop.f32.mrf.mxu2 }
 0x2f8   : > { %v2319_v10 = vmax.f32 %v2317_v49, %v2318_v35  ;;  %v6213_v29 = vadd.f32 %v1604_v41, %v6145_v52  ;;  %v3260_v60 = vsel %vm3259_vm7, %v3106_v61, %v3258_v5  ;;  %v2332_v21 = vrot.slane %v2331_v38, 2  ;;  %v772_v52 = vld [vmem:[#allocation2 + $0x142] sm:$0xff] }
 0x2f9   : > { %v2343_v0 = vsel %vm2202_vm0, %v1951_v25, -inf  ;;  %v6219_v20 = vadd.f32 %v6164_v54, %v6149_v33  ;;  %v6223_v53 = vadd.f32 %v6183_v13, %v6152_v34  ;;  %v1697_v6 = vadd.f32 %v1696_v27, %v6073_v15  ;;  %3319 = vst [vmem:[#allocation3 + $0x11] sm:$0xff] %v3260_v60  ;;  %3608 = vmatmul.f32.gmra.mxu2 %v3260_v60 }
 0x2fa   : > { %7210 = vst [vmem:[#allocation24_spill] sm:$0xff] %v6213_v29  ;;  %v2344_v12 = vrot.slane %v2343_v0, 4  ;;  %v2339_v32 = vrot.slane %v2338_v18, 2  ;;  %v2350_v25 = vsel %vm2202_vm0, %v2025_v19, -inf  ;;  %v2357_v56 = vsel %vm2202_vm0, %v2026_v2, -inf }
 0x2fb   : > { %v2364_v33 = vsel %vm2202_vm0, %v2027_v63, -inf  ;;  %v6229_v54 = vadd.f32 %v1806_v47, %v1694_v59  ;;  %v2320_v34 = vrot.slane %v2319_v10, 1  ;;  %v2326_v13 = vmax.f32 %v2324_v55, %v2325_v44 }
 0x2fc   : > { %v1871_v42 = vpop.f32.mrf.mxu0  ;;  %v2345_v51 = vmax.f32 %v2343_v0, %v2344_v12  ;;  %v2333_v15 = vmax.f32 %v2331_v38, %v2332_v21  ;;  %v2351_v27 = vrot.slane %v2350_v25, 4  ;;  %v2358_v7 = vrot.slane %v2357_v56, 4 }
 0x2fd   : > { %7211 = vst [vmem:[#allocation25_spill] sm:$0xff] %v6229_v54  ;;  %v2365_v36 = vrot.slane %v2364_v33, 4  ;;  %v6231_v40 = vadd.f32 %v1809_v1, %v1697_v6  ;;  %v6234_v49 = vadd.f32 %v1699_v45, %v6080_v17  ;;  %v1869_v11 = vadd.f32 %v1868_v50, %v7213_v9  ;;  %v7214_v6 = vld [vmem:[#allocation40_spill] sm:$0xff] }
 0x2fe   : > { %v2346_v24 = vrot.slane %v2345_v51, 2  ;;  %v2340_v41 = vmax.f32 %v2338_v18, %v2339_v32  ;;  %v2352_v5 = vmax.f32 %v2350_v25, %v2351_v27  ;;  %v2359_v47 = vmax.f32 %v2357_v56, %v2358_v7 }
 0x2ff   : > { %1918 = vmatmul.f32.gmra.mxu0 %v772_v52  ;;  %7212 = vst [vmem:[#allocation26_spill] sm:$0xff] %v6231_v40  ;;  %v2366_v35 = vmax.f32 %v2364_v33, %v2365_v36  ;;  %v6237_v58 = vmax.f32 %v2319_v10, %v2320_v34  ;;  %v2327_v55 = vrot.slane %v2326_v13, 1  ;;  %v1952_v59 = vmax.f32 %v1869_v11, 0.0  ;;  %v773_v10 = vld [vmem:[#allocation2 + $0x152] sm:$0xff] }
 0x300   : > { %v2347_v38 = vmax.f32 %v2345_v51, %v2346_v24  ;;  %v2334_v61 = vrot.slane %v2333_v15, 1  ;;  %v2353_v19 = vrot.slane %v2352_v5, 2  ;;  %v2360_v2 = vrot.slane %v2359_v47, 2  ;;  %v3328_v63 = vld [vmem:[#allocation3 + $0x10] sm:$0xff] }
 0x301   : > { %v2367_v44 = vrot.slane %v2366_v35, 2  ;;  %v3344_v60 = vld [vmem:[#allocation3 + $0x12] sm:$0xff]  ;;  %v2028_v17 = vrot.slane %v1952_v59, 2  ;;  %v2029_v21 = vrot.slane %v1952_v59, 4  ;;  %v2030_v0 = vrot.slane %v1952_v59, 6  ;;  %3567 = vmatmul.f32.gmra.mxu1 %v3328_v63 }
 0x302   : > { %v1872_v50 = vadd.f32 %v1871_v42, %v7214_v6  ;;  %3649 = vmatmul.f32.gmra.mxu3 %v3344_v60  ;;  %v2341_v12 = vrot.slane %v2340_v41, 1  ;;  %v2348_v52 = vrot.slane %v2347_v38, 1  ;;  %v2354_v1 = vmax.f32 %v2352_v5, %v2353_v19 }
 0x303   : > { %v2371_v45 = vsel %vm2202_vm0, %v1952_v59, -inf  ;;  %v6243_v32 = vmax.f32 %v2359_v47, %v2360_v2  ;;  %v2378_v56 = vsel %vm2202_vm0, %v2028_v17, -inf  ;;  %v2385_v33 = vsel %vm2202_vm0, %v2029_v21, -inf }
 0x304   : > { %v6240_v18 = vpop.f32.mrf.mxu0  ;;  %v2372_v25 = vrot.slane %v2371_v45, 4  ;;  %v6247_v34 = vmax.f32 %v2326_v13, %v2327_v55  ;;  %v6249_v42 = vmax.f32 %v2333_v15, %v2334_v61  ;;  %v6251_v51 = vmax.f32 %v2366_v35, %v2367_v44 }
 0x305   : > { %v2379_v27 = vrot.slane %v2378_v56, 4  ;;  %v2386_v36 = vrot.slane %v2385_v33, 4  ;;  %v2392_v24 = vsel %vm2202_vm0, %v2030_v0, -inf  ;;  %v1953_v9 = vmax.f32 %v1872_v50, 0.0  ;;  %v774_v0 = vld [vmem:[#allocation2 + $0x15a] sm:$0xff] }
 0x306   : > { %v2373_v7 = vmax.f32 %v2371_v45, %v2372_v25  ;;  %v6254_v11 = vmax.f32 %v2340_v41, %v2341_v12  ;;  %v6256_v5 = vmax.f32 %v2347_v38, %v2348_v52  ;;  %v2355_v47 = vrot.slane %v2354_v1, 1 }
 0x307   : > { %1921 = vmatmul.f32.gmra.mxu0 %v773_v10  ;;  %v2380_v59 = vmax.f32 %v2378_v56, %v2379_v27  ;;  %v2362_v13 = vrot.slane %v6243_v32, 1  ;;  %v2387_v15 = vmax.f32 %v2385_v33, %v2386_v36  ;;  %v2393_v61 = vrot.slane %v2392_v24, 4 }
 0x308   : > { %v2374_v55 = vrot.slane %v2373_v7, 2  ;;  %v2031_v19 = vrot.slane %v1953_v9, 2  ;;  %v2032_v2 = vrot.slane %v1953_v9, 4  ;;  %v2033_v44 = vrot.slane %v1953_v9, 6 }
 0x309   : > { %v2381_v35 = vrot.slane %v2380_v59, 2  ;;  %v2369_v63 = vrot.slane %v6251_v51, 1  ;;  %v2388_v17 = vrot.slane %v2387_v15, 2  ;;  %v2394_v21 = vmax.f32 %v2392_v24, %v2393_v61 }
 0x30a   : > { %v2375_v60 = vmax.f32 %v2373_v7, %v2374_v55  ;;  %v2399_v6 = vsel %vm2202_vm0, %v1953_v9, -inf  ;;  %v2406_v50 = vsel %vm2202_vm0, %v2031_v19, -inf  ;;  %v2413_v10 = vsel %vm2202_vm0, %v2032_v2, -inf }
 0x30b   : > { %v2382_v38 = vmax.f32 %v2380_v59, %v2381_v35  ;;  %v2389_v52 = vmax.f32 %v2387_v15, %v2388_v17  ;;  %v2395_v45 = vrot.slane %v2394_v21, 2  ;;  %v2400_v25 = vrot.slane %v2399_v6, 4 }
 0x30c   : > { %v1877_v41 = vpop.f32.mrf.mxu0  ;;  %v2376_v12 = vrot.slane %v2375_v60, 1  ;;  %v2407_v33 = vrot.slane %v2406_v50, 4  ;;  %v2414_v27 = vrot.slane %v2413_v10, 4  ;;  %v2420_v7 = vsel %vm2202_vm0, %v2033_v44, -inf }
 0x30d   : > { %v2383_v56 = vrot.slane %v2382_v38, 1  ;;  %v2390_v24 = vrot.slane %v2389_v52, 1  ;;  %v2396_v55 = vmax.f32 %v2394_v21, %v2395_v45  ;;  %v2401_v59 = vmax.f32 %v2399_v6, %v2400_v25 }
 0x30e   : > { %v2377_v36 = vmax.f32 %v2375_v60, %v2376_v12  ;;  %v2408_v9 = vmax.f32 %v2406_v50, %v2407_v33  ;;  %v2415_v35 = vmax.f32 %v2413_v10, %v2414_v27  ;;  %v2421_v19 = vrot.slane %v2420_v7, 4 }
 0x30f   : > { %1924 = vmatmul.f32.gmra.mxu0 %v774_v0  ;;  %v2384_v61 = vmax.f32 %v2382_v38, %v2383_v56  ;;  %v2391_v29 = vmax.f32 %v2389_v52, %v2390_v24  ;;  %v2397_v2 = vrot.slane %v2396_v55, 1  ;;  %v2402_v17 = vrot.slane %v2401_v59, 2  ;;  %v775_v38 = vld [vmem:[#allocation2 + $0x16a] sm:$0xff] }
 0x310   : > { %v3107_v15 = vmax.f32 %v6237_v58, %v2377_v36  ;;  %v2409_v40 = vrot.slane %v2408_v9, 2  ;;  %v2416_v54 = vrot.slane %v2415_v35, 2  ;;  %v2422_v30 = vmax.f32 %v2420_v7, %v2421_v19 }
 0x311   : > { %v3108_v62 = vmax.f32 %v6247_v34, %v2384_v61  ;;  %v2356_v44 = vmax.f32 %v2354_v1, %v2355_v47  ;;  %v2398_v0 = vmax.f32 %v2396_v55, %v2397_v2  ;;  %v3109_v60 = vmax.f32 %v6249_v42, %v2391_v29 }
 0x312   : > { %v2403_v21 = vmax.f32 %v2401_v59, %v2402_v17  ;;  %v2410_v10 = vmax.f32 %v2408_v9, %v2409_v40  ;;  %v2417_v12 = vmax.f32 %v2415_v35, %v2416_v54  ;;  %v2423_v52 = vrot.slane %v2422_v30, 2  ;;  %v776_v9 = vld [vmem:[#allocation2 + $0x172] sm:$0xff] }
 0x313   : > { %v3261_v50 = vsel %vm3247_vm1, %v3108_v62, %v3107_v15  ;;  %v2363_v58 = vmax.f32 %v6243_v32, %v2362_v13  ;;  %v3110_v45 = vmax.f32 %v6254_v11, %v2398_v0  ;;  %v1875_v29 = vadd.f32 %v6240_v18, %v6022_v26 }
 0x314   : > { %v1880_v6 = vpop.f32.mrf.mxu0  ;;  %v3262_v34 = vsel %vm3249_vm2, %v3109_v60, %v3261_v50  ;;  %v2404_v25 = vrot.slane %v2403_v21, 1  ;;  %v2411_v56 = vrot.slane %v2410_v10, 1  ;;  %v2418_v1 = vrot.slane %v2417_v12, 1 }
 0x315   : > { %v2424_v47 = vmax.f32 %v2422_v30, %v2423_v52  ;;  %v3263_v42 = vsel %vm3251_vm3, %v3110_v45, %v3262_v34  ;;  %v1878_v54 = vadd.f32 %v1877_v41, %v6039_v39  ;;  %v1881_v40 = vadd.f32 %v1880_v6, %v6047_v4 }
 0x316   : > { %v2405_v62 = vmax.f32 %v2403_v21, %v2404_v25  ;;  %v2412_v32 = vmax.f32 %v2410_v10, %v2411_v56  ;;  %v2419_v13 = vmax.f32 %v2417_v12, %v2418_v1  ;;  %v1954_v33 = vmax.f32 %v1875_v29, 0.0 }
 0x317   : > { %1927 = vmatmul.f32.gmra.mxu0 %v775_v38  ;;  %v2425_v11 = vrot.slane %v2424_v47, 1  ;;  %v2370_v27 = vmax.f32 %v6251_v51, %v2369_v63  ;;  %v1955_v30 = vmax.f32 %v1878_v54, 0.0  ;;  %v6278_v36 = vmax.f32 %v1881_v40, 0.0  ;;  %v1702_v54 = vpop.f32.mrf.mxu2 }
 0x318   : > { %v3111_v7 = vmax.f32 %v6256_v5, %v2405_v62  ;;  %v3112_v18 = vmax.f32 %v2356_v44, %v2412_v32  ;;  %v3113_v24 = vmax.f32 %v2363_v58, %v2419_v13  ;;  %v2034_v55 = vrot.slane %v1954_v33, 2 }
 0x319   : > { %v2426_v26 = vmax.f32 %v2424_v47, %v2425_v11  ;;  %v2035_v39 = vrot.slane %v1954_v33, 4  ;;  %v2036_v41 = vrot.slane %v1954_v33, 6  ;;  %v2427_v4 = vsel %vm2202_vm0, %v1954_v33, -inf }
 0x31a   : > { %v3264_v59 = vsel %vm3253_vm4, %v3111_v7, %v3263_v42  ;;  %v2428_v5 = vrot.slane %v2427_v4, 4  ;;  %v2434_v63 = vsel %vm2202_vm0, %v2034_v55, -inf  ;;  %v2037_v38 = vrot.slane %v1955_v30, 2 }
 0x31b   : > { %v3114_v35 = vmax.f32 %v2370_v27, %v2426_v26  ;;  %v3265_v51 = vsel %vm3255_vm5, %v3112_v18, %v3264_v59  ;;  %v2435_v2 = vrot.slane %v2434_v63, 4  ;;  %v2441_v15 = vsel %vm2202_vm0, %v2035_v39, -inf  ;;  %v777_v27 = vld [vmem:[#allocation2 + $0x182] sm:$0xff] }
 0x31c   : > { %v6282_v61 = vpop.f32.mrf.mxu0  ;;  %v3266_v19 = vsel %vm3257_vm6, %v3113_v24, %v3265_v51  ;;  %v2448_v17 = vsel %vm2202_vm0, %v2036_v41, -inf  ;;  %v2429_v0 = vmax.f32 %v2427_v4, %v2428_v5  ;;  %v2442_v60 = vrot.slane %v2441_v15, 4 }
 0x31d   : > { %v3267_v44 = vsel %vm3259_vm7, %v3114_v35, %v3266_v19  ;;  %v2449_v21 = vrot.slane %v2448_v17, 4  ;;  %v2436_v6 = vmax.f32 %v2434_v63, %v2435_v2  ;;  %v2038_v50 = vrot.slane %v1955_v30, 4 }
 0x31e   : > { %3320 = vst [vmem:[#allocation3 + $0x21] sm:$0xff] %v3267_v44  ;;  %v2039_v10 = vrot.slane %v1955_v30, 6  ;;  %3611 = vmatmul.f32.gmra.mxu2 %v3267_v44  ;;  %v2430_v12 = vrot.slane %v2429_v0, 2  ;;  %v2443_v52 = vmax.f32 %v2441_v15, %v2442_v60  ;;  %v2455_v45 = vsel %vm2202_vm0, %v1955_v30, -inf }
 0x31f   : > { %1930 = vmatmul.f32.gmra.mxu0 %v776_v9  ;;  %v2450_v58 = vmax.f32 %v2448_v17, %v2449_v21  ;;  %v2437_v34 = vrot.slane %v2436_v6, 2  ;;  %v2456_v25 = vrot.slane %v2455_v45, 4  ;;  %v2462_v56 = vsel %vm2202_vm0, %v2037_v38, -inf }
 0x320   : > { %v2469_v1 = vsel %vm2202_vm0, %v2038_v50, -inf  ;;  %v2431_v47 = vmax.f32 %v2429_v0, %v2430_v12  ;;  %v2444_v29 = vrot.slane %v2443_v52, 2  ;;  %v2463_v62 = vrot.slane %v2462_v56, 4 }
 0x321   : > { %v2451_v42 = vrot.slane %v2450_v58, 2  ;;  %v2438_v40 = vmax.f32 %v2436_v6, %v2437_v34  ;;  %v2457_v32 = vmax.f32 %v2455_v45, %v2456_v25  ;;  %v2470_v13 = vrot.slane %v2469_v1, 4 }
 0x322   : > { %v2476_v11 = vsel %vm2202_vm0, %v2039_v10, -inf  ;;  %v2432_v7 = vrot.slane %v2431_v47, 1  ;;  %v2445_v30 = vmax.f32 %v2443_v52, %v2444_v29  ;;  %v2464_v18 = vmax.f32 %v2462_v56, %v2463_v62 }
 0x323   : > { %v2452_v26 = vmax.f32 %v2450_v58, %v2451_v42  ;;  %v2439_v24 = vrot.slane %v2438_v40, 1  ;;  %v2458_v55 = vrot.slane %v2457_v32, 2  ;;  %v2471_v59 = vmax.f32 %v2469_v1, %v2470_v13  ;;  %v778_v1 = vld [vmem:[#allocation2 + $0x18a] sm:$0xff] }
 0x324   : > { %v1886_v33 = vpop.f32.mrf.mxu0  ;;  %v2477_v39 = vrot.slane %v2476_v11, 4  ;;  %v6295_v41 = vadd.f32 %v1702_v54, %v6106_v57  ;;  %v6297_v4 = vmax.f32 %v2431_v47, %v2432_v7  ;;  %v2446_v9 = vrot.slane %v2445_v30, 1 }
 0x325   : > { %v2465_v35 = vrot.slane %v2464_v18, 2  ;;  %v3329_v51 = vld [vmem:[#allocation3 + $0x20] sm:$0xff]  ;;  %v2453_v63 = vrot.slane %v2452_v26, 1  ;;  %v2459_v19 = vmax.f32 %v2457_v32, %v2458_v55  ;;  %v2472_v2 = vrot.slane %v2471_v59, 2 }
 0x326   : > { %v3345_v5 = vld [vmem:[#allocation3 + $0x22] sm:$0xff]  ;;  %v2478_v15 = vmax.f32 %v2476_v11, %v2477_v39  ;;  %3570 = vmatmul.f32.gmra.mxu1 %v3329_v51  ;;  %v6299_v17 = vmax.f32 %v2438_v40, %v2439_v24  ;;  %v6301_v44 = vmax.f32 %v2445_v30, %v2446_v9  ;;  %v2040_v57 = vrot.slane %v6278_v36, 2 }
 0x327   : > { %1933 = vmatmul.f32.gmra.mxu0 %v777_v27  ;;  %3652 = vmatmul.f32.gmra.mxu3 %v3345_v5  ;;  %v2466_v0 = vmax.f32 %v2464_v18, %v2465_v35  ;;  %v2460_v60 = vrot.slane %v2459_v19, 1  ;;  %v2473_v21 = vmax.f32 %v2471_v59, %v2472_v2  ;;  %v2041_v38 = vrot.slane %v6278_v36, 4 }
 0x328   : > { %v2479_v6 = vrot.slane %v2478_v15, 2  ;;  %v2042_v10 = vrot.slane %v6278_v36, 6  ;;  %v2483_v12 = vsel %vm2202_vm0, %v6278_v36, -inf  ;;  %v2490_v52 = vsel %vm2202_vm0, %v2040_v57, -inf  ;;  %v779_v57 = vld [vmem:[#allocation2 + $0x19a] sm:$0xff] }
 0x329   : > { %v2467_v50 = vrot.slane %v2466_v0, 1  ;;  %v6309_v58 = vmax.f32 %v2452_v26, %v2453_v63  ;;  %v2474_v45 = vrot.slane %v2473_v21, 1  ;;  %v2484_v25 = vrot.slane %v2483_v12, 4 }
 0x32a   : > { %v2480_v34 = vmax.f32 %v2478_v15, %v2479_v6  ;;  %v6311_v47 = vmax.f32 %v2459_v19, %v2460_v60  ;;  %v2491_v29 = vrot.slane %v2490_v52, 4  ;;  %v2497_v42 = vsel %vm2202_vm0, %v2041_v38, -inf }
 0x32b   : > { %v2504_v62 = vsel %vm2202_vm0, %v2042_v10, -inf  ;;  %v6315_v54 = vmax.f32 %v2466_v0, %v2467_v50  ;;  %v2485_v36 = vmax.f32 %v2483_v12, %v2484_v25  ;;  %v2498_v32 = vrot.slane %v2497_v42, 4 }
 0x32c   : > { %v1889_v56 = vpop.f32.mrf.mxu0  ;;  %v2481_v40 = vrot.slane %v2480_v34, 1  ;;  %v2492_v13 = vmax.f32 %v2490_v52, %v2491_v29  ;;  %v2505_v11 = vrot.slane %v2504_v62, 4  ;;  %v1884_v27 = vadd.f32 %v6282_v61, %v6058_v43 }
 0x32d   : > { %v1887_v7 = vadd.f32 %v1886_v33, %v6064_v3  ;;  %v6320_v30 = vmax.f32 %v2473_v21, %v2474_v45  ;;  %v2486_v26 = vrot.slane %v2485_v36, 2  ;;  %v2499_v18 = vmax.f32 %v2497_v42, %v2498_v32 }
 0x32e   : > { %v1890_v24 = vadd.f32 %v1889_v56, %v6067_v22  ;;  %v6323_v55 = vmax.f32 %v2480_v34, %v2481_v40  ;;  %v2493_v59 = vrot.slane %v2492_v13, 2  ;;  %v2506_v39 = vmax.f32 %v2504_v62, %v2505_v11 }
 0x32f   : > { %1936 = vmatmul.f32.gmra.mxu0 %v778_v1  ;;  %v1957_v9 = vmax.f32 %v1884_v27, 0.0  ;;  %v2487_v35 = vmax.f32 %v2485_v36, %v2486_v26  ;;  %v2500_v51 = vrot.slane %v2499_v18, 2  ;;  %v6325_v5 = vmax.f32 %v1887_v7, 0.0 }
 0x330   : > { %v6327_v63 = vmax.f32 %v1890_v24, 0.0  ;;  %v2494_v43 = vmax.f32 %v2492_v13, %v2493_v59  ;;  %v2507_v3 = vrot.slane %v2506_v39, 2 }
 0x331   : > { %v2043_v61 = vrot.slane %v1957_v9, 2  ;;  %v2044_v33 = vrot.slane %v1957_v9, 4  ;;  %v2488_v19 = vrot.slane %v2487_v35, 1  ;;  %v2501_v2 = vmax.f32 %v2499_v18, %v2500_v51 }
 0x332   : > { %v2045_v15 = vrot.slane %v1957_v9, 6  ;;  %v2511_v22 = vsel %vm2202_vm0, %v1957_v9, -inf  ;;  %v2495_v60 = vrot.slane %v2494_v43, 1  ;;  %v2508_v21 = vmax.f32 %v2506_v39, %v2507_v3 }
 0x333   : > { %v2512_v6 = vrot.slane %v2511_v22, 4  ;;  %v2518_v38 = vsel %vm2202_vm0, %v2043_v61, -inf  ;;  %v2489_v50 = vmax.f32 %v2487_v35, %v2488_v19  ;;  %v2502_v10 = vrot.slane %v2501_v2, 1 }
 0x334   : > { %v6330_v0 = vpop.f32.mrf.mxu0  ;;  %v2519_v12 = vrot.slane %v2518_v38, 4  ;;  %v2525_v52 = vsel %vm2202_vm0, %v2044_v33, -inf  ;;  %v2496_v45 = vmax.f32 %v2494_v43, %v2495_v60  ;;  %v2509_v34 = vrot.slane %v2508_v21, 1  ;;  %v780_v43 = vld [vmem:[#allocation2 + $0x1a2] sm:$0xff] }
 0x335   : > { %v2513_v25 = vmax.f32 %v2511_v22, %v2512_v6  ;;  %v2526_v56 = vrot.slane %v2525_v52, 4  ;;  %v2503_v1 = vmax.f32 %v2501_v2, %v2502_v10  ;;  %v3115_v29 = vmax.f32 %v6297_v4, %v2489_v50 }
 0x336   : > { %v2520_v42 = vmax.f32 %v2518_v38, %v2519_v12  ;;  %v2532_v62 = vsel %vm2202_vm0, %v2045_v15, -inf  ;;  %v2510_v40 = vmax.f32 %v2508_v21, %v2509_v34  ;;  %v3116_v36 = vmax.f32 %v6299_v17, %v2496_v45 }
 0x337   : > { %1939 = vmatmul.f32.gmra.mxu0 %v779_v57  ;;  %v2514_v32 = vrot.slane %v2513_v25, 2  ;;  %v2527_v13 = vmax.f32 %v2525_v52, %v2526_v56  ;;  %v3117_v11 = vmax.f32 %v6301_v44, %v2503_v1  ;;  %v2533_v7 = vrot.slane %v2532_v62, 4 }
 0x338   : > { %v2521_v27 = vrot.slane %v2520_v42, 2  ;;  %v2046_v26 = vrot.slane %v6325_v5, 2  ;;  %v3118_v18 = vmax.f32 %v6309_v58, %v2510_v40  ;;  %v3268_v24 = vsel %vm3247_vm1, %v3116_v36, %v3115_v29 }
 0x339   : > { %v2515_v59 = vmax.f32 %v2513_v25, %v2514_v32  ;;  %v2528_v4 = vrot.slane %v2527_v13, 2  ;;  %v3269_v39 = vsel %vm3249_vm2, %v3117_v11, %v3268_v24  ;;  %v2534_v35 = vmax.f32 %v2532_v62, %v2533_v7 }
 0x33a   : > { %v2522_v9 = vmax.f32 %v2520_v42, %v2521_v27  ;;  %v2047_v17 = vrot.slane %v6325_v5, 4  ;;  %v3270_v44 = vsel %vm3251_vm3, %v3118_v18, %v3269_v39  ;;  %v2048_v33 = vrot.slane %v6325_v5, 6 }
 0x33b   : > { %v2516_v3 = vrot.slane %v2515_v59, 1  ;;  %v2529_v61 = vmax.f32 %v2527_v13, %v2528_v4  ;;  %v2535_v19 = vrot.slane %v2534_v35, 2  ;;  %v2539_v2 = vsel %vm2202_vm0, %v6325_v5, -inf }
 0x33c   : > { %v6343_v51 = vpop.f32.mrf.mxu0  ;;  %v2523_v58 = vrot.slane %v2522_v9, 1  ;;  %v2546_v15 = vsel %vm2202_vm0, %v2046_v26, -inf  ;;  %v2540_v60 = vrot.slane %v2539_v2, 4  ;;  %v2553_v50 = vsel %vm2202_vm0, %v2047_v17, -inf }
 0x33d   : > { %v2517_v22 = vmax.f32 %v2515_v59, %v2516_v3  ;;  %v2530_v57 = vrot.slane %v2529_v61, 1  ;;  %v2547_v21 = vrot.slane %v2546_v15, 4  ;;  %v2536_v38 = vmax.f32 %v2534_v35, %v2535_v19 }
 0x33e   : > { %v2524_v6 = vmax.f32 %v2522_v9, %v2523_v58  ;;  %v2560_v10 = vsel %vm2202_vm0, %v2048_v33, -inf  ;;  %v2541_v45 = vmax.f32 %v2539_v2, %v2540_v60  ;;  %v2554_v56 = vrot.slane %v2553_v50, 4 }
 0x33f   : > { %1942 = vmatmul.f32.gmra.mxu0 %v780_v43  ;;  %v2531_v12 = vmax.f32 %v2529_v61, %v2530_v57  ;;  %v3119_v52 = vmax.f32 %v6311_v47, %v2517_v22  ;;  %v2548_v34 = vmax.f32 %v2546_v15, %v2547_v21  ;;  %v2537_v25 = vrot.slane %v2536_v38, 1 }
 0x340   : > { %v3120_v5 = vmax.f32 %v6315_v54, %v2524_v6  ;;  %v2561_v1 = vrot.slane %v2560_v10, 4  ;;  %v2542_v62 = vrot.slane %v2541_v45, 2  ;;  %v2555_v13 = vmax.f32 %v2553_v50, %v2554_v56 }
 0x341   : > { %v3121_v29 = vmax.f32 %v6320_v30, %v2531_v12  ;;  %v3271_v42 = vsel %vm3253_vm4, %v3119_v52, %v3270_v44  ;;  %v2549_v40 = vrot.slane %v2548_v34, 2  ;;  %v2538_v36 = vmax.f32 %v2536_v38, %v2537_v25 }
 0x342   : > { %v3272_v32 = vsel %vm3255_vm5, %v3120_v5, %v3271_v42  ;;  %v2562_v11 = vmax.f32 %v2560_v10, %v2561_v1  ;;  %v2543_v7 = vmax.f32 %v2541_v45, %v2542_v62  ;;  %v2049_v54 = vrot.slane %v6327_v63, 2 }
 0x343   : > { %v3273_v47 = vsel %vm3257_vm6, %v3121_v29, %v3272_v32  ;;  %v2550_v26 = vmax.f32 %v2548_v34, %v2549_v40  ;;  %v3122_v18 = vmax.f32 %v6323_v55, %v2538_v36  ;;  %v2556_v24 = vrot.slane %v2555_v13, 2 }
 0x344   : > { %v1898_v27 = vpop.f32.mrf.mxu0  ;;  %v2563_v30 = vrot.slane %v2562_v11, 2  ;;  %v2050_v59 = vrot.slane %v6327_v63, 4  ;;  %v2544_v4 = vrot.slane %v2543_v7, 1  ;;  %v2051_v9 = vrot.slane %v6327_v63, 6 }
 0x345   : > { %v2551_v39 = vrot.slane %v2550_v26, 1  ;;  %v2567_v35 = vsel %vm2202_vm0, %v6327_v63, -inf  ;;  %v3274_v17 = vsel %vm3259_vm7, %v3122_v18, %v3273_v47  ;;  %v2557_v43 = vmax.f32 %v2555_v13, %v2556_v24 }
 0x346   : > { %v2564_v44 = vmax.f32 %v2562_v11, %v2563_v30  ;;  %v2568_v3 = vrot.slane %v2567_v35, 4  ;;  %3321 = vst [vmem:[#allocation3 + $0x31] sm:$0xff] %v3274_v17  ;;  %v6365_v61 = vmax.f32 %v2543_v7, %v2544_v4  ;;  %v2574_v33 = vsel %vm2202_vm0, %v2049_v54, -inf  ;;  %3614 = vmatmul.f32.gmra.mxu2 %v3274_v17 }
 0x347   : > { %v6367_v55 = vmax.f32 %v2550_v26, %v2551_v39  ;;  %v2581_v58 = vsel %vm2202_vm0, %v2050_v59, -inf  ;;  %v2558_v19 = vrot.slane %v2557_v43, 1  ;;  %v2575_v22 = vrot.slane %v2574_v33, 4 }
 0x348   : > { %v2565_v2 = vrot.slane %v2564_v44, 1  ;;  %v2569_v15 = vmax.f32 %v2567_v35, %v2568_v3  ;;  %v2582_v63 = vrot.slane %v2581_v58, 4  ;;  %v2588_v57 = vsel %vm2202_vm0, %v2051_v9, -inf }
 0x349   : > { %v1893_v60 = vadd.f32 %v6330_v0, %v6076_v16  ;;  %v1896_v21 = vadd.f32 %v6343_v51, %v6096_v46  ;;  %v6376_v6 = vmax.f32 %v2557_v43, %v2558_v19  ;;  %v2576_v10 = vmax.f32 %v2574_v33, %v2575_v22 }
 0x34a   : > { %v6378_v38 = vmax.f32 %v2564_v44, %v2565_v2  ;;  %v2570_v50 = vrot.slane %v2569_v15, 2  ;;  %v2583_v52 = vmax.f32 %v2581_v58, %v2582_v63  ;;  %v2589_v45 = vrot.slane %v2588_v57, 4 }
 0x34b   : > { %v1960_v34 = vmax.f32 %v1893_v60, 0.0  ;;  %v1961_v25 = vmax.f32 %v1896_v21, 0.0  ;;  %v2577_v56 = vrot.slane %v2576_v10, 2  ;;  %v6381_v1 = vadd.f32 %v1898_v27, %v6103_v23 }
 0x34c   : > { %v1901_v12 = vpop.f32.mrf.mxu0  ;;  %v2571_v5 = vmax.f32 %v2569_v15, %v2570_v50  ;;  %v2584_v46 = vrot.slane %v2583_v52, 2  ;;  %v2590_v0 = vmax.f32 %v2588_v57, %v2589_v45 }
 0x34d   : > { %v6384_v16 = vadd.f32 %v1901_v12, %v6116_v31  ;;  %v2052_v51 = vrot.slane %v1960_v34, 2  ;;  %v2053_v29 = vrot.slane %v1960_v34, 4  ;;  %v2578_v62 = vmax.f32 %v2576_v10, %v2577_v56  ;;  %v3330_v32 = vld [vmem:[#allocation3 + $0x30] sm:$0xff] }
 0x34e   : > { %v2572_v42 = vrot.slane %v2571_v5, 1  ;;  %v2054_v40 = vrot.slane %v1960_v34, 6  ;;  %v2595_v36 = vsel %vm2202_vm0, %v1960_v34, -inf  ;;  %v3346_v13 = vld [vmem:[#allocation3 + $0x32] sm:$0xff]  ;;  %v2585_v11 = vmax.f32 %v2583_v52, %v2584_v46  ;;  %3573 = vmatmul.f32.gmra.mxu1 %v3330_v32 }
 0x34f   : > { %v2591_v47 = vrot.slane %v2590_v0, 2  ;;  %v2596_v7 = vrot.slane %v2595_v36, 4  ;;  %v2602_v23 = vsel %vm2202_vm0, %v2052_v51, -inf  ;;  %3655 = vmatmul.f32.gmra.mxu3 %v3346_v13  ;;  %v2579_v27 = vrot.slane %v2578_v62, 1 }
 0x350   : > { %v6388_v31 = vmax.f32 %v2571_v5, %v2572_v42  ;;  %v2603_v26 = vrot.slane %v2602_v23, 4  ;;  %v2609_v54 = vsel %vm2202_vm0, %v2053_v29, -inf  ;;  %v2586_v18 = vrot.slane %v2585_v11, 1 }
 0x351   : > { %v2592_v24 = vmax.f32 %v2590_v0, %v2591_v47  ;;  %v2597_v30 = vmax.f32 %v2595_v36, %v2596_v7  ;;  %v2610_v59 = vrot.slane %v2609_v54, 4  ;;  %v6391_v4 = vmax.f32 %v2578_v62, %v2579_v27 }
 0x352   : > { %v2604_v39 = vmax.f32 %v2602_v23, %v2603_v26  ;;  %v2616_v9 = vsel %vm2202_vm0, %v2054_v40, -inf  ;;  %v2055_v35 = vrot.slane %v1961_v25, 2  ;;  %v6394_v17 = vmax.f32 %v2585_v11, %v2586_v18 }
 0x353   : > { %v2593_v43 = vrot.slane %v2592_v24, 1  ;;  %v2598_v44 = vrot.slane %v2597_v30, 2  ;;  %v2611_v3 = vmax.f32 %v2609_v54, %v2610_v59  ;;  %v2617_v58 = vrot.slane %v2616_v9, 4 }
 0x354   : > { %v2605_v33 = vrot.slane %v2604_v39, 2  ;;  %v2056_v19 = vrot.slane %v1961_v25, 4  ;;  %v2057_v2 = vrot.slane %v1961_v25, 6  ;;  %v2623_v57 = vsel %vm2202_vm0, %v1961_v25, -inf  ;;  %v1904_v23 = vpop.f32.mrf.mxu0 }
 0x355   : > { %v6396_v15 = vmax.f32 %v2592_v24, %v2593_v43  ;;  %v2599_v22 = vmax.f32 %v2597_v30, %v2598_v44  ;;  %v2612_v63 = vrot.slane %v2611_v3, 2  ;;  %v2618_v21 = vmax.f32 %v2616_v9, %v2617_v58 }
 0x356   : > { %v2606_v60 = vmax.f32 %v2604_v39, %v2605_v33  ;;  %v2624_v50 = vrot.slane %v2623_v57, 4  ;;  %v2630_v10 = vsel %vm2202_vm0, %v2055_v35, -inf  ;;  %v2637_v34 = vsel %vm2202_vm0, %v2056_v19, -inf }
 0x357   : > { %v2600_v12 = vrot.slane %v2599_v22, 1  ;;  %v2613_v52 = vmax.f32 %v2611_v3, %v2612_v63  ;;  %v2631_v45 = vrot.slane %v2630_v10, 4  ;;  %v2619_v56 = vrot.slane %v2618_v21, 2 }
 0x358   : > { %v2607_v5 = vrot.slane %v2606_v60, 1  ;;  %v2625_v46 = vmax.f32 %v2623_v57, %v2624_v50  ;;  %v2638_v0 = vrot.slane %v2637_v34, 4  ;;  %v2644_v62 = vsel %vm2202_vm0, %v2057_v2, -inf }
 0x359   : > { %v2601_v51 = vmax.f32 %v2599_v22, %v2600_v12  ;;  %v2614_v29 = vrot.slane %v2613_v52, 1  ;;  %v2632_v42 = vmax.f32 %v2630_v10, %v2631_v45  ;;  %v2620_v40 = vmax.f32 %v2618_v21, %v2619_v56 }
 0x35a   : > { %v2608_v25 = vmax.f32 %v2606_v60, %v2607_v5  ;;  %v2626_v36 = vrot.slane %v2625_v46, 2  ;;  %v2639_v32 = vmax.f32 %v2637_v34, %v2638_v0  ;;  %v2645_v7 = vrot.slane %v2644_v62, 4 }
 0x35b   : > { %v2615_v13 = vmax.f32 %v2613_v52, %v2614_v29  ;;  %v3123_v11 = vmax.f32 %v6365_v61, %v2601_v51  ;;  %v2633_v47 = vrot.slane %v2632_v42, 2  ;;  %v2621_v27 = vrot.slane %v2620_v40, 1 }
 0x35c   : > { %v3124_v26 = vmax.f32 %v6367_v55, %v2608_v25  ;;  %v2627_v54 = vmax.f32 %v2625_v46, %v2626_v36  ;;  %v2640_v18 = vrot.slane %v2639_v32, 2  ;;  %v2646_v59 = vmax.f32 %v2644_v62, %v2645_v7 }
 0x35d   : > { %v3125_v24 = vmax.f32 %v6376_v6, %v2615_v13  ;;  %v2634_v30 = vmax.f32 %v2632_v42, %v2633_v47  ;;  %v1962_v39 = vmax.f32 %v6381_v1, 0.0  ;;  %v2622_v9 = vmax.f32 %v2620_v40, %v2621_v27  ;;  %v1907_v42 = vpop.f32.mrf.mxu0 }
 0x35e   : > { %v3275_v35 = vsel %vm3247_vm1, %v3124_v26, %v3123_v11  ;;  %v2628_v43 = vrot.slane %v2627_v54, 1  ;;  %v2641_v44 = vmax.f32 %v2639_v32, %v2640_v18  ;;  %v2647_v33 = vrot.slane %v2646_v59, 2 }
 0x35f   : > { %v3276_v61 = vsel %vm3249_vm2, %v3125_v24, %v3275_v35  ;;  %v2635_v3 = vrot.slane %v2634_v30, 1  ;;  %v2058_v58 = vrot.slane %v1962_v39, 2  ;;  %v3126_v55 = vmax.f32 %v6378_v38, %v2622_v9 }
 0x360   : > { %v2629_v19 = vmax.f32 %v2627_v54, %v2628_v43  ;;  %v2642_v2 = vrot.slane %v2641_v44, 1  ;;  %v2059_v22 = vrot.slane %v1962_v39, 4  ;;  %v2648_v63 = vmax.f32 %v2646_v59, %v2647_v33 }
 0x361   : > { %v2636_v6 = vmax.f32 %v2634_v30, %v2635_v3  ;;  %v2060_v57 = vrot.slane %v1962_v39, 6  ;;  %v2651_v1 = vsel %vm2202_vm0, %v1962_v39, -inf  ;;  %v3277_v60 = vsel %vm3251_vm3, %v3126_v55, %v3276_v61 }
 0x362   : > { %v2643_v21 = vmax.f32 %v2641_v44, %v2642_v2  ;;  %v3127_v50 = vmax.f32 %v6388_v31, %v2629_v19  ;;  %v2652_v10 = vrot.slane %v2651_v1, 4  ;;  %v2649_v12 = vrot.slane %v2648_v63, 1 }
 0x363   : > { %v3128_v52 = vmax.f32 %v6391_v4, %v2636_v6  ;;  %v2658_v45 = vsel %vm2202_vm0, %v2058_v58, -inf  ;;  %v2665_v38 = vsel %vm2202_vm0, %v2059_v22, -inf  ;;  %v2672_v31 = vsel %vm2202_vm0, %v2060_v57, -inf }
 0x364   : > { %v3129_v34 = vmax.f32 %v6394_v17, %v2643_v21  ;;  %v3278_v5 = vsel %vm3253_vm4, %v3127_v50, %v3277_v60  ;;  %v2653_v56 = vmax.f32 %v2651_v1, %v2652_v10  ;;  %v2659_v46 = vrot.slane %v2658_v45, 4 }
 0x365   : > { %v2650_v0 = vmax.f32 %v2648_v63, %v2649_v12  ;;  %v3279_v51 = vsel %vm3255_vm5, %v3128_v52, %v3278_v5  ;;  %v2666_v29 = vrot.slane %v2665_v38, 4  ;;  %v2673_v40 = vrot.slane %v2672_v31, 4 }
 0x366   : > { %v3280_v62 = vsel %vm3257_vm6, %v3129_v34, %v3279_v51  ;;  %v2654_v4 = vrot.slane %v2653_v56, 2  ;;  %v2660_v25 = vmax.f32 %v2658_v45, %v2659_v46  ;;  %v1963_v17 = vmax.f32 %v6384_v16, 0.0 }
 0x367   : > { %v3130_v36 = vmax.f32 %v6396_v15, %v2650_v0  ;;  %v2667_v32 = vmax.f32 %v2665_v38, %v2666_v29  ;;  %v1905_v13 = vadd.f32 %v1904_v23, %v6122_v48  ;;  %v2674_v7 = vmax.f32 %v2672_v31, %v2673_v40 }
 0x368   : > { %v2655_v11 = vmax.f32 %v2653_v56, %v2654_v4  ;;  %v2661_v47 = vrot.slane %v2660_v25, 2  ;;  %v1908_v27 = vadd.f32 %v1907_v42, %v6129_v28  ;;  %v2061_v18 = vrot.slane %v1963_v17, 2  ;;  %v6437_v56 = vpop.f32.mrf.mxu0 }
 0x369   : > { %v3281_v26 = vsel %vm3259_vm7, %v3130_v36, %v3280_v62  ;;  %v2668_v54 = vrot.slane %v2667_v32, 2  ;;  %v2062_v24 = vrot.slane %v1963_v17, 4  ;;  %v2675_v39 = vrot.slane %v2674_v7, 2 }
 0x36a   : > { %3322 = vst [vmem:[#allocation3 + $0x41] sm:$0xff] %v3281_v26  ;;  %v2656_v30 = vrot.slane %v2655_v11, 1  ;;  %v2662_v59 = vmax.f32 %v2660_v25, %v2661_v47  ;;  %v2063_v15 = vrot.slane %v1963_v17, 6  ;;  %3617 = vmatmul.f32.gmra.mxu2 %v3281_v26  ;;  %v2679_v16 = vsel %vm2202_vm0, %v1963_v17, -inf  ;;  %v6441_v25 = vpop.f32.mrf.mxu3 }
 0x36b   : > { %v2669_v9 = vmax.f32 %v2667_v32, %v2668_v54  ;;  %v2686_v48 = vsel %vm2202_vm0, %v2061_v18, -inf  ;;  %v2693_v23 = vsel %vm2202_vm0, %v2062_v24, -inf  ;;  %v2676_v43 = vmax.f32 %v2674_v7, %v2675_v39 }
 0x36c   : > { %v6428_v35 = vmax.f32 %v2655_v11, %v2656_v30  ;;  %v2663_v28 = vrot.slane %v2662_v59, 1  ;;  %v2680_v44 = vrot.slane %v2679_v16, 4  ;;  %v2687_v3 = vrot.slane %v2686_v48, 4 }
 0x36d   : > { %v2670_v61 = vrot.slane %v2669_v9, 1  ;;  %v2694_v33 = vrot.slane %v2693_v23, 4  ;;  %v2700_v58 = vsel %vm2202_vm0, %v2063_v15, -inf  ;;  %v2677_v19 = vrot.slane %v2676_v43, 1 }
 0x36e   : > { %v6431_v55 = vmax.f32 %v2662_v59, %v2663_v28  ;;  %v2681_v2 = vmax.f32 %v2679_v16, %v2680_v44  ;;  %v2701_v22 = vrot.slane %v2700_v58, 4  ;;  %v2688_v63 = vmax.f32 %v2686_v48, %v2687_v3 }
 0x36f   : > { %v6433_v6 = vmax.f32 %v2669_v9, %v2670_v61  ;;  %v2695_v57 = vmax.f32 %v2693_v23, %v2694_v33  ;;  %v1964_v1 = vmax.f32 %v1905_v13, 0.0  ;;  %v6435_v60 = vmax.f32 %v2676_v43, %v2677_v19 }
 0x370   : > { %v2682_v21 = vrot.slane %v2681_v2, 2  ;;  %v2702_v50 = vmax.f32 %v2700_v58, %v2701_v22  ;;  %v1965_v10 = vmax.f32 %v1908_v27, 0.0  ;;  %v2689_v12 = vrot.slane %v2688_v63, 2 }
 0x371   : > { %v2696_v52 = vrot.slane %v2695_v57, 2  ;;  %v2064_v45 = vrot.slane %v1964_v1, 2  ;;  %v2065_v38 = vrot.slane %v1964_v1, 4  ;;  %v3331_v34 = vld [vmem:[#allocation3 + $0x40] sm:$0xff]  ;;  %v2066_v51 = vrot.slane %v1964_v1, 6 }
 0x372   : > { %v3347_v5 = vld [vmem:[#allocation3 + $0x42] sm:$0xff]  ;;  %v2683_v46 = vmax.f32 %v2681_v2, %v2682_v21  ;;  %v2703_v0 = vrot.slane %v2702_v50, 2  ;;  %v2707_v29 = vsel %vm2202_vm0, %v1964_v1, -inf  ;;  %3576 = vmatmul.f32.gmra.mxu1 %v3331_v34  ;;  %v2690_v31 = vmax.f32 %v2688_v63, %v2689_v12 }
 0x373   : > { %3658 = vmatmul.f32.gmra.mxu3 %v3347_v5  ;;  %v2697_v42 = vmax.f32 %v2695_v57, %v2696_v52  ;;  %v2708_v62 = vrot.slane %v2707_v29, 4  ;;  %v2714_v4 = vsel %vm2202_vm0, %v2064_v45, -inf  ;;  %v2721_v17 = vsel %vm2202_vm0, %v2065_v38, -inf  ;;  %v1913_v57 = vpop.f32.mrf.mxu0  ;;  %v6457_v5 = vpop.f32.mrf.mxu3 }
 0x374   : > { %v2684_v40 = vrot.slane %v2683_v46, 1  ;;  %v2704_v36 = vmax.f32 %v2702_v50, %v2703_v0  ;;  %v2715_v32 = vrot.slane %v2714_v4, 4  ;;  %v2691_v13 = vrot.slane %v2690_v31, 1 }
 0x375   : > { %v2698_v11 = vrot.slane %v2697_v42, 1  ;;  %v2709_v47 = vmax.f32 %v2707_v29, %v2708_v62  ;;  %v2722_v7 = vrot.slane %v2721_v17, 4  ;;  %v2728_v18 = vsel %vm2202_vm0, %v2066_v51, -inf }
 0x376   : > { %v6444_v27 = vmax.f32 %v2683_v46, %v2684_v40  ;;  %v2705_v26 = vrot.slane %v2704_v36, 1  ;;  %v2716_v54 = vmax.f32 %v2714_v4, %v2715_v32  ;;  %v6447_v24 = vmax.f32 %v2690_v31, %v2691_v13  ;;  %v6460_v4 = vpop.f32.mrf.mxu2 }
 0x377   : > { %v6449_v30 = vmax.f32 %v2697_v42, %v2698_v11  ;;  %v2710_v59 = vrot.slane %v2709_v47, 2  ;;  %v2723_v39 = vmax.f32 %v2721_v17, %v2722_v7  ;;  %v2729_v16 = vrot.slane %v2728_v18, 4 }
 0x378   : > { %v6451_v15 = vmax.f32 %v2704_v36, %v2705_v26  ;;  %v2717_v9 = vrot.slane %v2716_v54, 2  ;;  %v2067_v48 = vrot.slane %v1965_v10, 2  ;;  %v2068_v43 = vrot.slane %v1965_v10, 4 }
 0x379   : > { %v2711_v23 = vmax.f32 %v2709_v47, %v2710_v59  ;;  %v2724_v28 = vrot.slane %v2723_v39, 2  ;;  %v2069_v44 = vrot.slane %v1965_v10, 6  ;;  %v2730_v3 = vmax.f32 %v2728_v18, %v2729_v16 }
 0x37a   : > { %v2718_v61 = vmax.f32 %v2716_v54, %v2717_v9  ;;  %v2735_v33 = vsel %vm2202_vm0, %v1965_v10, -inf  ;;  %v2742_v58 = vsel %vm2202_vm0, %v2067_v48, -inf  ;;  %v2749_v50 = vsel %vm2202_vm0, %v2068_v43, -inf }
 0x37b   : > { %v2712_v19 = vrot.slane %v2711_v23, 1  ;;  %v2725_v2 = vmax.f32 %v2723_v39, %v2724_v28  ;;  %v2736_v22 = vrot.slane %v2735_v33, 4  ;;  %v2743_v63 = vrot.slane %v2742_v58, 4 }
 0x37c   : > { %v2719_v1 = vrot.slane %v2718_v61, 1  ;;  %v2731_v21 = vrot.slane %v2730_v3, 2  ;;  %v2756_v12 = vsel %vm2202_vm0, %v2069_v44, -inf  ;;  %v2750_v0 = vrot.slane %v2749_v50, 4 }
 0x37d   : > { %v2713_v52 = vmax.f32 %v2711_v23, %v2712_v19  ;;  %v2726_v45 = vrot.slane %v2725_v2, 1  ;;  %v2737_v38 = vmax.f32 %v2735_v33, %v2736_v22  ;;  %v2744_v34 = vmax.f32 %v2742_v58, %v2743_v63 }
 0x37e   : > { %v2720_v10 = vmax.f32 %v2718_v61, %v2719_v1  ;;  %v2732_v46 = vmax.f32 %v2730_v3, %v2731_v21  ;;  %v2757_v51 = vrot.slane %v2756_v12, 4  ;;  %v2751_v32 = vmax.f32 %v2749_v50, %v2750_v0 }
 0x37f   : > { %v2727_v29 = vmax.f32 %v2725_v2, %v2726_v45  ;;  %v3131_v31 = vmax.f32 %v6428_v35, %v2713_v52  ;;  %v2738_v42 = vrot.slane %v2737_v38, 2  ;;  %v2745_v62 = vrot.slane %v2744_v34, 2 }
 0x380   : > { %v2733_v40 = vrot.slane %v2732_v46, 1  ;;  %v3132_v36 = vmax.f32 %v6431_v55, %v2720_v10  ;;  %v2758_v17 = vmax.f32 %v2756_v12, %v2757_v51  ;;  %v1911_v7 = vadd.f32 %v6437_v56, %v6141_v37  ;;  %v6470_v56 = vpop.f32.mrf.mxu0 }
 0x381   : > { %v3133_v13 = vmax.f32 %v6433_v6, %v2727_v29  ;;  %v2739_v11 = vmax.f32 %v2737_v38, %v2738_v42  ;;  %v2746_v47 = vmax.f32 %v2744_v34, %v2745_v62  ;;  %v2752_v35 = vrot.slane %v2751_v32, 2  ;;  %v1708_v38 = vpop.f32.mrf.mxu2 }
 0x382   : > { %v2734_v26 = vmax.f32 %v2732_v46, %v2733_v40  ;;  %v3282_v54 = vsel %vm3247_vm1, %v3132_v36, %v3131_v31  ;;  %v2759_v18 = vrot.slane %v2758_v17, 2  ;;  %v1966_v16 = vmax.f32 %v1911_v7, 0.0 }
 0x383   : > { %v3283_v59 = vsel %vm3249_vm2, %v3133_v13, %v3282_v54  ;;  %v2740_v39 = vrot.slane %v2739_v11, 1  ;;  %v2747_v9 = vrot.slane %v2746_v47, 1  ;;  %v2753_v48 = vmax.f32 %v2751_v32, %v2752_v35 }
 0x384   : > { %v3134_v55 = vmax.f32 %v6435_v60, %v2734_v26  ;;  %v2760_v23 = vmax.f32 %v2758_v17, %v2759_v18  ;;  %v1914_v6 = vadd.f32 %v1913_v57, %v6219_v20  ;;  %v2070_v44 = vrot.slane %v1966_v16, 2  ;;  %v1818_v20 = vpop.f32.mrf.mxu3 }
 0x385   : > { %v2741_v28 = vmax.f32 %v2739_v11, %v2740_v39  ;;  %v2748_v43 = vmax.f32 %v2746_v47, %v2747_v9  ;;  %v2071_v37 = vrot.slane %v1966_v16, 4  ;;  %v2754_v3 = vrot.slane %v2753_v48, 1 }
 0x386   : > { %v3284_v61 = vsel %vm3251_vm3, %v3134_v55, %v3283_v59  ;;  %v2761_v33 = vrot.slane %v2760_v23, 1  ;;  %v2072_v58 = vrot.slane %v1966_v16, 6  ;;  %v2763_v60 = vsel %vm2202_vm0, %v1966_v16, -inf }
 0x387   : > { %v3135_v19 = vmax.f32 %v6444_v27, %v2741_v28  ;;  %v3136_v2 = vmax.f32 %v6447_v24, %v2748_v43  ;;  %v2770_v22 = vsel %vm2202_vm0, %v2070_v44, -inf  ;;  %v2755_v63 = vmax.f32 %v2753_v48, %v2754_v3 }
 0x388   : > { %v2762_v57 = vmax.f32 %v2760_v23, %v2761_v33  ;;  %v2764_v1 = vrot.slane %v2763_v60, 4  ;;  %v2771_v21 = vrot.slane %v2770_v22, 4  ;;  %v2777_v12 = vsel %vm2202_vm0, %v2071_v37, -inf  ;;  %v1919_v18 = vpop.f32.mrf.mxu0 }
 0x389   : > { %v3285_v50 = vsel %vm3253_vm4, %v3135_v19, %v3284_v61  ;;  %v2784_v52 = vsel %vm2202_vm0, %v2072_v58, -inf  ;;  %v1967_v45 = vmax.f32 %v1914_v6, 0.0  ;;  %v3137_v27 = vmax.f32 %v6449_v30, %v2755_v63  ;;  %v1711_v58 = vpop.f32.mrf.mxu2 }
 0x38a   : > { %v3138_v24 = vmax.f32 %v6451_v15, %v2762_v57  ;;  %v3286_v34 = vsel %vm3255_vm5, %v3136_v2, %v3285_v50  ;;  %v2765_v10 = vmax.f32 %v2763_v60, %v2764_v1  ;;  %v2772_v46 = vmax.f32 %v2770_v22, %v2771_v21 }
 0x38b   : > { %v2778_v0 = vrot.slane %v2777_v12, 4  ;;  %v2785_v51 = vrot.slane %v2784_v52, 4  ;;  %v2073_v29 = vrot.slane %v1967_v45, 2  ;;  %v3287_v31 = vsel %vm3257_vm6, %v3137_v27, %v3286_v34 }
 0x38c   : > { %v2766_v42 = vrot.slane %v2765_v10, 2  ;;  %v2074_v62 = vrot.slane %v1967_v45, 4  ;;  %v2075_v40 = vrot.slane %v1967_v45, 6  ;;  %v3288_v36 = vsel %vm3259_vm7, %v3138_v24, %v3287_v31  ;;  %v1821_v28 = vpop.f32.mrf.mxu3 }
 0x38d   : > { %v2773_v32 = vrot.slane %v2772_v46, 2  ;;  %v2779_v17 = vmax.f32 %v2777_v12, %v2778_v0  ;;  %v2786_v13 = vmax.f32 %v2784_v52, %v2785_v51  ;;  %3323 = vst [vmem:[#allocation3 + $0x51] sm:$0xff] %v3288_v36  ;;  %v2791_v15 = vsel %vm2202_vm0, %v1967_v45, -inf  ;;  %3620 = vmatmul.f32.gmra.mxu2 %v3288_v36  ;;  %v7215_v12 = vld [vmem:[#allocation21_spill] sm:$0xff] }
 0x38e   : > { %v2767_v30 = vmax.f32 %v2765_v10, %v2766_v42  ;;  %v2798_v11 = vsel %vm2202_vm0, %v2073_v29, -inf  ;;  %v2805_v47 = vsel %vm2202_vm0, %v2074_v62, -inf  ;;  %v2792_v35 = vrot.slane %v2791_v15, 4 }
 0x38f   : > { %v2774_v7 = vmax.f32 %v2772_v46, %v2773_v32  ;;  %v2780_v26 = vrot.slane %v2779_v17, 2  ;;  %v2787_v54 = vrot.slane %v2786_v13, 2  ;;  %v6490_v59 = vadd.f32 %v6441_v25, %v6234_v49 }
 0x390   : > { %v2799_v39 = vrot.slane %v2798_v11, 4  ;;  %v2806_v9 = vrot.slane %v2805_v47, 4  ;;  %v2812_v16 = vsel %vm2202_vm0, %v2075_v40, -inf  ;;  %v1706_v55 = vadd.f32 %v6460_v4, %v6111_v14  ;;  %v1922_v29 = vpop.f32.mrf.mxu0 }
 0x391   : > { %v1709_v48 = vadd.f32 %v1708_v38, %v6119_v8  ;;  %v2781_v23 = vmax.f32 %v2779_v17, %v2780_v26  ;;  %v2793_v6 = vmax.f32 %v2791_v15, %v2792_v35  ;;  %v2788_v43 = vmax.f32 %v2786_v13, %v2787_v54  ;;  %v3495_v15 = vld [vmem:[#allocation8 + $0x2f8] sm:$0xff]  ;;  %v3478_v35 = vld [vmem:[#allocation8 + $0x270] sm:$0xff] }
 0x392   : > { %v2800_v44 = vmax.f32 %v2798_v11, %v2799_v39  ;;  %v2807_v37 = vmax.f32 %v2805_v47, %v2806_v9  ;;  %v2813_v61 = vrot.slane %v2812_v16, 4  ;;  %v6498_v49 = vadd.f32 %v6457_v5, %v6295_v41  ;;  %3753 = vmatpush.msra.mxu3 %v3495_v15  ;;  %v3463_v54 = vld [vmem:[#allocation8 + $0x1f8] sm:$0xff]  ;;  %v3461_v15 = vld [vmem:[#allocation8 + $0x1e8] sm:$0xff] }
 0x393   : > { %v2768_v25 = vrot.slane %v2767_v30, 1  ;;  %v2775_v3 = vrot.slane %v2774_v7, 1  ;;  %v2794_v33 = vrot.slane %v2793_v6, 2  ;;  %v2782_v19 = vrot.slane %v2781_v23, 1  ;;  %3671 = vmatpush.msrb.mxu1 %v3463_v54 }
 0x394   : > { %v2801_v2 = vrot.slane %v2800_v44, 2  ;;  %v2808_v14 = vrot.slane %v2807_v37, 2  ;;  %v2814_v4 = vmax.f32 %v2812_v16, %v2813_v61  ;;  %v6500_v8 = vadd.f32 %v1818_v20, %v1706_v55  ;;  %v3332_v57 = vld [vmem:[#allocation3 + $0x50] sm:$0xff]  ;;  %v7217_v55 = vld [vmem:[#allocation26_spill] sm:$0xff] }
 0x395   : > { %v6502_v60 = vadd.f32 %v1821_v28, %v1709_v48  ;;  %v2795_v22 = vmax.f32 %v2793_v6, %v2794_v33  ;;  %v1917_v63 = vadd.f32 %v6470_v56, %v6223_v53  ;;  %v3348_v1 = vld [vmem:[#allocation3 + $0x52] sm:$0xff]  ;;  %v2789_v41 = vrot.slane %v2788_v43, 1  ;;  %3579 = vmatmul.f32.gmra.mxu1 %v3332_v57  ;;  %v7216_v56 = vld [vmem:[#allocation25_spill] sm:$0xff] }
 0x396   : > { %v2802_v5 = vmax.f32 %v2800_v44, %v2801_v2  ;;  %v2809_v21 = vmax.f32 %v2807_v37, %v2808_v14  ;;  %v2815_v50 = vrot.slane %v2814_v4, 2  ;;  %3661 = vmatmul.f32.gmra.mxu3 %v3348_v1  ;;  %v6507_v52 = vadd.f32 %v1711_v58, %v7215_v12 }
 0x397   : > { %v6509_v45 = vmax.f32 %v2767_v30, %v2768_v25  ;;  %v2796_v20 = vrot.slane %v2795_v22, 1  ;;  %v1968_v38 = vmax.f32 %v1917_v63, 0.0  ;;  %v6511_v27 = vmax.f32 %v2774_v7, %v2775_v3  ;;  %v3479_v30 = vld [vmem:[#allocation8 + $0x278] sm:$0xff] }
 0x398   : > { %v6513_v24 = vmax.f32 %v2781_v23, %v2782_v19  ;;  %v2803_v53 = vrot.slane %v2802_v5, 1  ;;  %v1920_v34 = vadd.f32 %v1919_v18, %v7216_v56  ;;  %v2810_v10 = vrot.slane %v2809_v21, 1  ;;  %3712 = vmatpush.msra.mxu2 %v3479_v30  ;;  %v3494_v18 = vld [vmem:[#allocation8 + $0x2f0] sm:$0xff] }
 0x399   : > { %v2076_v46 = vrot.slane %v1968_v38, 2  ;;  %v2077_v0 = vrot.slane %v1968_v38, 4  ;;  %v2078_v51 = vrot.slane %v1968_v38, 6  ;;  %v6516_v31 = vmax.f32 %v2788_v43, %v2789_v41  ;;  %3754 = vmatpush.msra.mxu3 %v3494_v18 }
 0x39a   : > { %v6518_v42 = vmax.f32 %v2795_v22, %v2796_v20  ;;  %v6520_v62 = vmax.f32 %v2814_v4, %v2815_v50  ;;  %v2819_v40 = vsel %vm2202_vm0, %v1968_v38, -inf  ;;  %v6526_v11 = vmax.f32 %v2802_v5, %v2803_v53  ;;  %3713 = vmatpush.msra.mxu2 %v3478_v35  ;;  %v1925_v20 = vpop.f32.mrf.mxu0 }
 0x39b   : > { %v2820_v36 = vrot.slane %v2819_v40, 4  ;;  %v2826_v32 = vsel %vm2202_vm0, %v2076_v46, -inf  ;;  %v2833_v17 = vsel %vm2202_vm0, %v2077_v0, -inf  ;;  %v2840_v13 = vsel %vm2202_vm0, %v2078_v51, -inf }
 0x39c   : > { %v2827_v47 = vrot.slane %v2826_v32, 4  ;;  %v2834_v7 = vrot.slane %v2833_v17, 4  ;;  %v2841_v26 = vrot.slane %v2840_v13, 4  ;;  %v6528_v39 = vmax.f32 %v2809_v21, %v2810_v10 }
 0x39d   : > { %v2821_v9 = vmax.f32 %v2819_v40, %v2820_v36  ;;  %v1969_v16 = vmax.f32 %v1920_v34, 0.0  ;;  %v6531_v48 = vadd.f32 %v1922_v29, %v7217_v55  ;;  %v2817_v23 = vrot.slane %v6520_v62, 1  ;;  %v3462_v29 = vld [vmem:[#allocation8 + $0x1f0] sm:$0xff]  ;;  %v3477_v40 = vld [vmem:[#allocation8 + $0x268] sm:$0xff] }
 0x39e   : > { %v2828_v6 = vmax.f32 %v2826_v32, %v2827_v47  ;;  %v2835_v28 = vmax.f32 %v2833_v17, %v2834_v7  ;;  %v2842_v43 = vmax.f32 %v2840_v13, %v2841_v26  ;;  %v3493_v36 = vld [vmem:[#allocation8 + $0x2e8] sm:$0xff]  ;;  %3672 = vmatpush.msrb.mxu1 %v3462_v29  ;;  %3714 = vmatpush.msra.mxu2 %v3477_v40  ;;  %v3476_v47 = vld [vmem:[#allocation8 + $0x260] sm:$0xff]  ;;  %v3491_v40 = vld [vmem:[#allocation8 + $0x2d8] sm:$0xff] }
 0x39f   : > { %v2822_v44 = vrot.slane %v2821_v9, 2  ;;  %v2079_v37 = vrot.slane %v1969_v16, 2  ;;  %v2080_v61 = vrot.slane %v1969_v16, 4  ;;  %v2081_v25 = vrot.slane %v1969_v16, 6  ;;  %v3492_v7 = vld [vmem:[#allocation8 + $0x2e0] sm:$0xff]  ;;  %3755 = vmatpush.msra.mxu3 %v3493_v36  ;;  %v3459_v36 = vld [vmem:[#allocation8 + $0x1d8] sm:$0xff] }
 0x3a0   : > { %v2829_v3 = vrot.slane %v2828_v6, 2  ;;  %v2836_v33 = vrot.slane %v2835_v28, 2  ;;  %v2843_v58 = vrot.slane %v2842_v43, 2  ;;  %v2847_v19 = vsel %vm2202_vm0, %v1969_v16, -inf  ;;  %3673 = vmatpush.msrb.mxu1 %v3461_v15  ;;  %3715 = vmatpush.msra.mxu2 %v3476_v47  ;;  %v3460_v29 = vld [vmem:[#allocation8 + $0x1e0] sm:$0xff]  ;;  %v3490_v15 = vld [vmem:[#allocation8 + $0x2d0] sm:$0xff] }
 0x3a1   : > { %v2823_v2 = vmax.f32 %v2821_v9, %v2822_v44  ;;  %v2848_v14 = vrot.slane %v2847_v19, 4  ;;  %v2854_v4 = vsel %vm2202_vm0, %v2079_v37, -inf  ;;  %v2861_v22 = vsel %vm2202_vm0, %v2080_v61, -inf  ;;  %3756 = vmatpush.msra.mxu3 %v3492_v7  ;;  %v3473_v47 = vld [vmem:[#allocation8 + $0x248] sm:$0xff] }
 0x3a2   : > { %v2830_v63 = vmax.f32 %v2828_v6, %v2829_v3  ;;  %v2837_v57 = vmax.f32 %v2835_v28, %v2836_v33  ;;  %v2844_v1 = vmax.f32 %v2842_v43, %v2843_v58  ;;  %v2855_v41 = vrot.slane %v2854_v4, 4  ;;  %v6547_v58 = vpop.f32.mrf.mxu3  ;;  %3674 = vmatpush.msrb.mxu1 %v3460_v29 }
 0x3a3   : > { %v2824_v5 = vrot.slane %v2823_v2, 1  ;;  %v2849_v21 = vmax.f32 %v2847_v19, %v2848_v14  ;;  %v2862_v50 = vrot.slane %v2861_v22, 4  ;;  %v2868_v12 = vsel %vm2202_vm0, %v2081_v25, -inf  ;;  %3757 = vmatpush.msra.mxu3 %v3491_v40 }
 0x3a4   : > { %v2831_v38 = vrot.slane %v2830_v63, 1  ;;  %v2838_v53 = vrot.slane %v2837_v57, 1  ;;  %v2845_v56 = vrot.slane %v2844_v1, 1  ;;  %v2856_v34 = vmax.f32 %v2854_v4, %v2855_v41  ;;  %3675 = vmatpush.msrb.mxu1 %v3459_v36 }
 0x3a5   : > { %v2825_v10 = vmax.f32 %v2823_v2, %v2824_v5  ;;  %v2850_v46 = vrot.slane %v2849_v21, 2  ;;  %v2863_v0 = vmax.f32 %v2861_v22, %v2862_v50  ;;  %v2869_v51 = vrot.slane %v2868_v12, 4  ;;  %3758 = vmatpush.msra.mxu3 %v3490_v15 }
 0x3a6   : > { %v2832_v32 = vmax.f32 %v2830_v63, %v2831_v38  ;;  %v2839_v17 = vmax.f32 %v2837_v57, %v2838_v53  ;;  %v2846_v13 = vmax.f32 %v2844_v1, %v2845_v56  ;;  %v2857_v30 = vrot.slane %v2856_v34, 2  ;;  %v1928_v57 = vpop.f32.mrf.mxu0  ;;  %v3474_v53 = vld [vmem:[#allocation8 + $0x250] sm:$0xff] }
 0x3a7   : > { %v3139_v26 = vmax.f32 %v6509_v45, %v2825_v10  ;;  %v2851_v54 = vmax.f32 %v2849_v21, %v2850_v46  ;;  %v2864_v35 = vrot.slane %v2863_v0, 2  ;;  %v2870_v18 = vmax.f32 %v2868_v12, %v2869_v51 }
 0x3a8   : > { %v3140_v9 = vmax.f32 %v6511_v27, %v2832_v32  ;;  %v3141_v16 = vmax.f32 %v6513_v24, %v2839_v17  ;;  %v3142_v55 = vmax.f32 %v6516_v31, %v2846_v13  ;;  %v2858_v6 = vmax.f32 %v2856_v34, %v2857_v30 }
 0x3a9   : > { %v2818_v28 = vmax.f32 %v6520_v62, %v2817_v23  ;;  %v2852_v43 = vrot.slane %v2851_v54, 1  ;;  %v2865_v44 = vmax.f32 %v2863_v0, %v2864_v35  ;;  %v2871_v37 = vrot.slane %v2870_v18, 2  ;;  %v1714_v62 = vpop.f32.mrf.mxu2 }
 0x3aa   : > { %v3289_v45 = vsel %vm3247_vm1, %v3140_v9, %v3139_v26  ;;  %v2859_v61 = vrot.slane %v2858_v6, 1  ;;  %v1970_v25 = vmax.f32 %v6531_v48, 0.0  ;;  %v1926_v27 = vadd.f32 %v1925_v20, %v6490_v59  ;;  %v3475_v59 = vld [vmem:[#allocation8 + $0x258] sm:$0xff] }
 0x3ab   : > { %v3290_v24 = vsel %vm3249_vm2, %v3141_v16, %v3289_v45  ;;  %v2853_v3 = vmax.f32 %v2851_v54, %v2852_v43  ;;  %v2866_v31 = vrot.slane %v2865_v44, 1  ;;  %v2872_v33 = vmax.f32 %v2870_v18, %v2871_v37  ;;  %3716 = vmatpush.msra.mxu2 %v3475_v59  ;;  %v1827_v37 = vpop.f32.mrf.mxu3 }
 0x3ac   : > { %v3291_v23 = vsel %vm3251_vm3, %v3142_v55, %v3290_v24  ;;  %v2860_v19 = vmax.f32 %v2858_v6, %v2859_v61  ;;  %v2082_v2 = vrot.slane %v1970_v25, 2  ;;  %v2083_v14 = vrot.slane %v1970_v25, 4 }
 0x3ad   : > { %v2867_v4 = vmax.f32 %v2865_v44, %v2866_v31  ;;  %v2873_v22 = vrot.slane %v2872_v33, 1  ;;  %v3143_v63 = vmax.f32 %v6518_v42, %v2853_v3  ;;  %v2084_v48 = vrot.slane %v1970_v25, 6  ;;  %3717 = vmatpush.msra.mxu2 %v3474_v53 }
 0x3ae   : > { %v3144_v1 = vmax.f32 %v6526_v11, %v2860_v19  ;;  %v2875_v41 = vsel %vm2202_vm0, %v1970_v25, -inf  ;;  %v2882_v5 = vsel %vm2202_vm0, %v2082_v2, -inf  ;;  %v2889_v21 = vsel %vm2202_vm0, %v2083_v14, -inf  ;;  %v3472_v19 = vld [vmem:[#allocation8 + $0x240] sm:$0xff] }
 0x3af   : > { %v2874_v50 = vmax.f32 %v2872_v33, %v2873_v22  ;;  %v3145_v12 = vmax.f32 %v6528_v39, %v2867_v4  ;;  %v3292_v20 = vsel %vm3253_vm4, %v3143_v63, %v3291_v23  ;;  %v2876_v38 = vrot.slane %v2875_v41, 4  ;;  %v7218_v39 = vld [vmem:[#allocation23_spill] sm:$0xff]  ;;  %3718 = vmatpush.msra.mxu2 %v3473_v47 }
 0x3b0   : > { %v3293_v42 = vsel %vm3255_vm5, %v3144_v1, %v3292_v20  ;;  %v2883_v56 = vrot.slane %v2882_v5, 4  ;;  %v2890_v34 = vrot.slane %v2889_v21, 4  ;;  %v2896_v11 = vsel %vm2202_vm0, %v2084_v48, -inf  ;;  %v3458_v23 = vld [vmem:[#allocation8 + $0x1d0] sm:$0xff]  ;;  %v3471_v20 = vld [vmem:[#allocation8 + $0x238] sm:$0xff] }
 0x3b1   : > { %v3146_v10 = vmax.f32 %v2818_v28, %v2874_v50  ;;  %v3294_v46 = vsel %vm3257_vm6, %v3145_v12, %v3293_v42  ;;  %v2877_v0 = vmax.f32 %v2875_v41, %v2876_v38  ;;  %v2897_v51 = vrot.slane %v2896_v11, 4  ;;  %v1717_v45 = vpop.f32.mrf.mxu2  ;;  %3676 = vmatpush.msrb.mxu1 %v3458_v23  ;;  %3719 = vmatpush.msra.mxu2 %v3472_v19  ;;  %v7219_v48 = vld [vmem:[#allocation24_spill] sm:$0xff]  ;;  %v3489_v41 = vld [vmem:[#allocation8 + $0x2c8] sm:$0xff] }
 0x3b2   : > { %v1715_v32 = vadd.f32 %v1714_v62, %v7218_v39  ;;  %v2884_v17 = vmax.f32 %v2882_v5, %v2883_v56  ;;  %v2891_v13 = vmax.f32 %v2889_v21, %v2890_v34  ;;  %v1971_v30 = vmax.f32 %v1926_v27, 0.0  ;;  %v1931_v62 = vpop.f32.mrf.mxu0  ;;  %v3457_v5 = vld [vmem:[#allocation8 + $0x1c8] sm:$0xff]  ;;  %3759 = vmatpush.msra.mxu3 %v3489_v41 }
 0x3b3   : > { %v3295_v7 = vsel %vm3259_vm7, %v3146_v10, %v3294_v46  ;;  %v2878_v26 = vrot.slane %v2877_v0, 2  ;;  %v2898_v54 = vmax.f32 %v2896_v11, %v2897_v51  ;;  %v1929_v35 = vadd.f32 %v1928_v57, %v6498_v49  ;;  %3677 = vmatpush.msrb.mxu1 %v3457_v5  ;;  %3720 = vmatpush.msra.mxu2 %v3471_v20  ;;  %v3470_v10 = vld [vmem:[#allocation8 + $0x230] sm:$0xff]  ;;  %v3465_v20 = vld [vmem:[#allocation8 + $0x208] sm:$0xff] }
 0x3b4   : > { %3324 = vst [vmem:[#allocation3 + $0x61] sm:$0xff] %v3295_v7  ;;  %v2885_v18 = vrot.slane %v2884_v17, 2  ;;  %v2892_v9 = vrot.slane %v2891_v13, 2  ;;  %v2085_v16 = vrot.slane %v1971_v30, 2  ;;  %v2086_v55 = vrot.slane %v1971_v30, 4  ;;  %3623 = vmatmul.f32.gmra.mxu2 %v3295_v7 }
 0x3b5   : > { %v2879_v6 = vmax.f32 %v2877_v0, %v2878_v26  ;;  %v2899_v28 = vrot.slane %v2898_v54, 2  ;;  %v2087_v43 = vrot.slane %v1971_v30, 6  ;;  %v2903_v44 = vsel %vm2202_vm0, %v1971_v30, -inf  ;;  %3721 = vmatpush.msra.mxu2 %v3470_v10 }
 0x3b6   : > { %v2886_v61 = vmax.f32 %v2884_v17, %v2885_v18  ;;  %v2893_v25 = vmax.f32 %v2891_v13, %v2892_v9  ;;  %v2904_v27 = vrot.slane %v2903_v44, 4  ;;  %v2910_v49 = vsel %vm2202_vm0, %v2085_v16, -inf  ;;  %v3469_v17 = vld [vmem:[#allocation8 + $0x228] sm:$0xff]  ;;  %v3468_v18 = vld [vmem:[#allocation8 + $0x220] sm:$0xff] }
 0x3b7   : > { %v2880_v24 = vrot.slane %v2879_v6, 1  ;;  %v2900_v3 = vmax.f32 %v2898_v54, %v2899_v28  ;;  %v2911_v31 = vrot.slane %v2910_v49, 4  ;;  %v2917_v33 = vsel %vm2202_vm0, %v2086_v55, -inf  ;;  %3722 = vmatpush.msra.mxu2 %v3469_v17 }
 0x3b8   : > { %v6568_v2 = vadd.f32 %v6547_v58, %v6507_v52  ;;  %v2887_v14 = vrot.slane %v2886_v61, 1  ;;  %v2905_v4 = vmax.f32 %v2903_v44, %v2904_v27  ;;  %v2918_v22 = vrot.slane %v2917_v33, 4  ;;  %v3488_v58 = vld [vmem:[#allocation8 + $0x2c0] sm:$0xff]  ;;  %v3455_v27 = vld [vmem:[#allocation8 + $0x1b8] sm:$0xff] }
 0x3b9   : > { %v6570_v63 = vadd.f32 %v1827_v37, %v1715_v32  ;;  %v6573_v57 = vadd.f32 %v1717_v45, %v7219_v48  ;;  %v2912_v59 = vmax.f32 %v2910_v49, %v2911_v31  ;;  %v2924_v1 = vsel %vm2202_vm0, %v2087_v43, -inf  ;;  %3760 = vmatpush.msra.mxu3 %v3488_v58  ;;  %3723 = vmatpush.msra.mxu2 %v3468_v18  ;;  %v3467_v49 = vld [vmem:[#allocation8 + $0x218] sm:$0xff]  ;;  %v3453_v58 = vld [vmem:[#allocation8 + $0x1a8] sm:$0xff] }
 0x3ba   : > { %v2894_v21 = vrot.slane %v2893_v25, 1  ;;  %v2901_v50 = vrot.slane %v2900_v3, 1  ;;  %v2906_v12 = vrot.slane %v2905_v4, 2  ;;  %v2919_v52 = vmax.f32 %v2917_v33, %v2918_v22  ;;  %v6596_v45 = vpop.f32.mrf.mxu0  ;;  %v3486_v33 = vld [vmem:[#allocation8 + $0x2b0] sm:$0xff] }
 0x3bb   : > { %v6576_v38 = vmax.f32 %v2879_v6, %v2880_v24  ;;  %v2913_v53 = vrot.slane %v2912_v59, 2  ;;  %v2925_v42 = vrot.slane %v2924_v1, 4  ;;  %v1972_v56 = vmax.f32 %v1929_v35, 0.0  ;;  %v6578_v34 = vld [vmem:[#allocation3 + $0x60] sm:$0xff]  ;;  %3724 = vmatpush.msra.mxu2 %v3467_v49  ;;  %v3466_v22 = vld [vmem:[#allocation8 + $0x210] sm:$0xff] }
 0x3bc   : > { %v6580_v11 = vld [vmem:[#allocation3 + $0x62] sm:$0xff]  ;;  %v6582_v46 = vmax.f32 %v2886_v61, %v2887_v14  ;;  %v2907_v0 = vmax.f32 %v2905_v4, %v2906_v12  ;;  %v2920_v51 = vrot.slane %v2919_v52, 2  ;;  %v1932_v29 = vadd.f32 %v1931_v62, %v6500_v8  ;;  %3582 = vmatmul.f32.gmra.mxu1 %v6578_v34  ;;  %v3487_v61 = vld [vmem:[#allocation8 + $0x2b8] sm:$0xff]  ;;  %v3454_v4 = vld [vmem:[#allocation8 + $0x1b0] sm:$0xff] }
 0x3bd   : > { %3664 = vmatmul.f32.gmra.mxu3 %v6580_v11  ;;  %v2914_v40 = vmax.f32 %v2912_v59, %v2913_v53  ;;  %v2926_v36 = vmax.f32 %v2924_v1, %v2925_v42  ;;  %v2088_v39 = vrot.slane %v1972_v56, 2  ;;  %v2089_v32 = vrot.slane %v1972_v56, 4  ;;  %v3456_v35 = vld [vmem:[#allocation8 + $0x1c0] sm:$0xff]  ;;  %3725 = vmatpush.msra.mxu2 %v3466_v22  ;;  %v3482_v49 = vld [vmem:[#allocation8 + $0x290] sm:$0xff] }
 0x3be   : > { %v2908_v13 = vrot.slane %v2907_v0, 1  ;;  %v2921_v30 = vmax.f32 %v2919_v52, %v2920_v51  ;;  %v2090_v15 = vrot.slane %v1972_v56, 6  ;;  %v2931_v47 = vsel %vm2202_vm0, %v1972_v56, -inf  ;;  %3678 = vmatpush.msrb.mxu1 %v3456_v35  ;;  %3761 = vmatpush.msra.mxu3 %v3487_v61  ;;  %v3485_v52 = vld [vmem:[#allocation8 + $0x2a8] sm:$0xff] }
 0x3bf   : > { %v2915_v7 = vrot.slane %v2914_v40, 1  ;;  %v2927_v26 = vrot.slane %v2926_v36, 2  ;;  %v2932_v54 = vrot.slane %v2931_v47, 4  ;;  %v2938_v8 = vsel %vm2202_vm0, %v2088_v39, -inf  ;;  %v3452_v39 = vld [vmem:[#allocation8 + $0x1a0] sm:$0xff]  ;;  %3726 = vmatpush.msra.mxu2 %v3465_v20 }
 0x3c0   : > { %v6589_v9 = vmax.f32 %v2893_v25, %v2894_v21  ;;  %v6591_v16 = vmax.f32 %v2900_v3, %v2901_v50  ;;  %v2939_v55 = vrot.slane %v2938_v8, 4  ;;  %v2945_v6 = vsel %vm2202_vm0, %v2089_v32, -inf  ;;  %3679 = vmatpush.msrb.mxu1 %v3455_v27  ;;  %3762 = vmatpush.msra.mxu3 %v3486_v33 }
 0x3c1   : > { %v6594_v28 = vmax.f32 %v2907_v0, %v2908_v13  ;;  %v2922_v43 = vrot.slane %v2921_v30, 1  ;;  %v2933_v44 = vmax.f32 %v2931_v47, %v2932_v54  ;;  %v2946_v37 = vrot.slane %v2945_v6, 4  ;;  %v3483_v54 = vld [vmem:[#allocation8 + $0x298] sm:$0xff] }
 0x3c2   : > { %v6598_v24 = vmax.f32 %v2914_v40, %v2915_v7  ;;  %v2940_v25 = vmax.f32 %v2938_v8, %v2939_v55  ;;  %v2952_v3 = vsel %vm2202_vm0, %v2090_v15, -inf  ;;  %v1973_v31 = vmax.f32 %v1932_v29, 0.0  ;;  %3680 = vmatpush.msrb.mxu1 %v3454_v4  ;;  %3763 = vmatpush.msra.mxu3 %v3485_v52  ;;  %v3451_v8 = vld [vmem:[#allocation8 + $0x198] sm:$0xff]  ;;  %v1937_v27 = vpop.f32.mrf.mxu0 }
 0x3c3   : > { %v6601_v62 = vmax.f32 %v2926_v36, %v2927_v26  ;;  %v2934_v23 = vrot.slane %v2933_v44, 2  ;;  %v2947_v19 = vmax.f32 %v2945_v6, %v2946_v37  ;;  %v2953_v14 = vrot.slane %v2952_v3, 4  ;;  %v3484_v36 = vld [vmem:[#allocation8 + $0x2a0] sm:$0xff] }
 0x3c4   : > { %v2941_v48 = vrot.slane %v2940_v25, 2  ;;  %v2091_v59 = vrot.slane %v1973_v31, 2  ;;  %v2092_v1 = vrot.slane %v1973_v31, 4  ;;  %v2093_v41 = vrot.slane %v1973_v31, 6  ;;  %3681 = vmatpush.msrb.mxu1 %v3453_v58  ;;  %3764 = vmatpush.msra.mxu3 %v3484_v36 }
 0x3c5   : > { %v6603_v5 = vmax.f32 %v2921_v30, %v2922_v43  ;;  %v2935_v21 = vmax.f32 %v2933_v44, %v2934_v23  ;;  %v2948_v50 = vrot.slane %v2947_v19, 2  ;;  %v2954_v12 = vmax.f32 %v2952_v3, %v2953_v14 }
 0x3c6   : > { %v2942_v53 = vmax.f32 %v2940_v25, %v2941_v48  ;;  %v2959_v42 = vsel %vm2202_vm0, %v1973_v31, -inf  ;;  %v2966_v56 = vsel %vm2202_vm0, %v2091_v59, -inf  ;;  %v2973_v10 = vsel %vm2202_vm0, %v2092_v1, -inf  ;;  %3682 = vmatpush.msrb.mxu1 %v3452_v39  ;;  %3765 = vmatpush.msra.mxu3 %v3483_v54  ;;  %v3450_v25 = vld [vmem:[#allocation8 + $0x190] sm:$0xff]  ;;  %v3481_v48 = vld [vmem:[#allocation8 + $0x288] sm:$0xff] }
 0x3c7   : > { %v2936_v0 = vrot.slane %v2935_v21, 1  ;;  %v2949_v51 = vmax.f32 %v2947_v19, %v2948_v50  ;;  %v2955_v29 = vrot.slane %v2954_v12, 2  ;;  %v2960_v40 = vrot.slane %v2959_v42, 4 }
 0x3c8   : > { %v2943_v32 = vrot.slane %v2942_v53, 1  ;;  %v2967_v17 = vrot.slane %v2966_v56, 4  ;;  %v2974_v13 = vrot.slane %v2973_v10, 4  ;;  %v2980_v30 = vsel %vm2202_vm0, %v2093_v41, -inf  ;;  %3683 = vmatpush.msrb.mxu1 %v3451_v8  ;;  %3766 = vmatpush.msra.mxu3 %v3482_v49 }
 0x3c9   : > { %v2937_v15 = vmax.f32 %v2935_v21, %v2936_v0  ;;  %v2950_v47 = vrot.slane %v2949_v51, 1  ;;  %v2956_v7 = vmax.f32 %v2954_v12, %v2955_v29  ;;  %v2961_v26 = vmax.f32 %v2959_v42, %v2960_v40  ;;  %v3464_v0 = vld [vmem:[#allocation8 + $0x200] sm:$0xff] }
 0x3ca   : > { %v2944_v35 = vmax.f32 %v2942_v53, %v2943_v32  ;;  %v2968_v18 = vmax.f32 %v2966_v56, %v2967_v17  ;;  %v2975_v55 = vmax.f32 %v2973_v10, %v2974_v13  ;;  %v2981_v6 = vrot.slane %v2980_v30, 4  ;;  %3684 = vmatpush.msrb.mxu1 %v3450_v25  ;;  %3767 = vmatpush.msra.mxu3 %v3481_v48 }
 0x3cb   : > { %v2951_v43 = vmax.f32 %v2949_v51, %v2950_v47  ;;  %v2957_v44 = vrot.slane %v2956_v7, 1  ;;  %v3147_v37 = vmax.f32 %v6576_v38, %v2937_v15  ;;  %v2962_v61 = vrot.slane %v2961_v26, 2  ;;  %3727 = vmatpush.msra.mxu2 %v3464_v0 }
 0x3cc   : > { %v3148_v3 = vmax.f32 %v6582_v46, %v2944_v35  ;;  %v2969_v31 = vrot.slane %v2968_v18, 2  ;;  %v2976_v33 = vrot.slane %v2975_v55, 2  ;;  %v2982_v23 = vmax.f32 %v2980_v30, %v2981_v6 }
 0x3cd   : > { %v2929_v19 = vrot.slane %v6601_v62, 1  ;;  %v2958_v14 = vmax.f32 %v2956_v7, %v2957_v44  ;;  %v3149_v4 = vmax.f32 %v6589_v9, %v2951_v43  ;;  %v2963_v22 = vmax.f32 %v2961_v26, %v2962_v61  ;;  %v1940_v7 = vpop.f32.mrf.mxu0 }
 0x3ce   : > { %v3296_v38 = vsel %vm3247_vm1, %v3148_v3, %v3147_v37  ;;  %v2970_v59 = vmax.f32 %v2968_v18, %v2969_v31  ;;  %v2977_v1 = vmax.f32 %v2975_v55, %v2976_v33  ;;  %v2983_v41 = vrot.slane %v2982_v23, 2  ;;  %v3449_v55 = vld [vmem:[#allocation8 + $0x188] sm:$0xff]  ;;  %v3480_v3 = vld [vmem:[#allocation8 + $0x280] sm:$0xff] }
 0x3cf   : > { %v3150_v46 = vmax.f32 %v6591_v16, %v2958_v14  ;;  %v3297_v21 = vsel %vm3249_vm2, %v3149_v4, %v3296_v38  ;;  %v2964_v50 = vrot.slane %v2963_v22, 1  ;;  %v1935_v12 = vadd.f32 %v6596_v45, %v6502_v60  ;;  %3685 = vmatpush.msrb.mxu1 %v3449_v55  ;;  %3768 = vmatpush.msra.mxu3 %v3480_v3  ;;  %v3448_v14 = vld [vmem:[#allocation8 + $0x180] sm:$0xff] }
 0x3d0   : > { %v2971_v52 = vrot.slane %v2970_v59, 1  ;;  %v2978_v58 = vrot.slane %v2977_v1, 1  ;;  %v2984_v20 = vmax.f32 %v2982_v23, %v2983_v41  ;;  %v1938_v9 = vadd.f32 %v1937_v27, %v6568_v2 }
 0x3d1   : > { %v2930_v53 = vmax.f32 %v6601_v62, %v2929_v19  ;;  %v3298_v42 = vsel %vm3251_vm3, %v3150_v46, %v3297_v21  ;;  %v2965_v56 = vmax.f32 %v2963_v22, %v2964_v50  ;;  %v1974_v10 = vmax.f32 %v1935_v12, 0.0  ;;  %3686 = vmatpush.msrb.mxu1 %v3448_v14  ;;  %v3539_v14 = vld [vmem:[#allocation8 + $0x458] sm:$0xff] }
 0x3d2   : > { %v2972_v51 = vmax.f32 %v2970_v59, %v2971_v52  ;;  %v2979_v16 = vmax.f32 %v2977_v1, %v2978_v58  ;;  %v2985_v29 = vrot.slane %v2984_v20, 1  ;;  %v1975_v40 = vmax.f32 %v1938_v9, 0.0  ;;  %v1830_v59 = vpop.f32.mrf.mxu3 }
 0x3d3   : > { %v3151_v36 = vmax.f32 %v6594_v28, %v2965_v56  ;;  %v2094_v60 = vrot.slane %v1974_v10, 2  ;;  %v2095_v45 = vrot.slane %v1974_v10, 4  ;;  %v2096_v39 = vrot.slane %v1974_v10, 6  ;;  %v3543_v56 = vld [vmem:[#allocation8 + $0x478] sm:$0xff] }
 0x3d4   : > { %v2986_v32 = vmax.f32 %v2984_v20, %v2985_v29  ;;  %v3152_v2 = vmax.f32 %v6598_v24, %v2972_v51  ;;  %v3153_v62 = vmax.f32 %v6603_v5, %v2979_v16  ;;  %v2987_v17 = vsel %vm2202_vm0, %v1974_v10, -inf  ;;  %v3511_v10 = vld [vmem:[#allocation8 + $0x378] sm:$0xff]  ;;  %3876 = vmatpush.msrb.mxu3 %v3543_v56  ;;  %v3538_v56 = vld [vmem:[#allocation8 + $0x450] sm:$0xff] }
 0x3d5   : > { %v3299_v13 = vsel %vm3253_vm4, %v3151_v36, %v3298_v42  ;;  %v2988_v30 = vrot.slane %v2987_v17, 4  ;;  %v2994_v15 = vsel %vm2202_vm0, %v2094_v60, -inf  ;;  %v3001_v47 = vsel %vm2202_vm0, %v2095_v45, -inf  ;;  %v3527_v42 = vld [vmem:[#allocation8 + $0x3f8] sm:$0xff]  ;;  %v3359_v36 = vld [vmem:[#allocation3 + $0x11] sm:$0xff]  ;;  %3794 = vmatpush.msra.mxu1 %v3511_v10 }
 0x3d6   : > { %v3154_v26 = vmax.f32 %v2930_v53, %v2986_v32  ;;  %v3300_v28 = vsel %vm3255_vm5, %v3152_v2, %v3299_v13  ;;  %v2995_v54 = vrot.slane %v2994_v15, 4  ;;  %v3002_v8 = vrot.slane %v3001_v47, 4  ;;  %3835 = vmatpush.msrb.mxu2 %v3527_v42  ;;  %v3526_v60 = vld [vmem:[#allocation8 + $0x3f0] sm:$0xff]  ;;  %v3523_v42 = vld [vmem:[#allocation8 + $0x3d8] sm:$0xff] }
 0x3d7   : > { %v3301_v35 = vsel %vm3257_vm6, %v3153_v62, %v3300_v28  ;;  %v2989_v24 = vmax.f32 %v2987_v17, %v2988_v30  ;;  %v3008_v5 = vsel %vm2202_vm0, %v2096_v39, -inf  ;;  %v2097_v18 = vrot.slane %v1975_v40, 2  ;;  %v3542_v45 = vld [vmem:[#allocation8 + $0x470] sm:$0xff] }
 0x3d8   : > { %v6632_v6 = vsel %vm3259_vm7, %v3154_v26, %v3301_v35  ;;  %v2996_v43 = vmax.f32 %v2994_v15, %v2995_v54  ;;  %v3003_v44 = vmax.f32 %v3001_v47, %v3002_v8  ;;  %v3009_v37 = vrot.slane %v3008_v5, 4  ;;  %v3510_v13 = vld [vmem:[#allocation8 + $0x370] sm:$0xff]  ;;  %v3541_v26 = vld [vmem:[#allocation8 + $0x468] sm:$0xff]  ;;  %3877 = vmatpush.msrb.mxu3 %v3542_v45  ;;  %3836 = vmatpush.msrb.mxu2 %v3526_v60 }
 0x3d9   : > { %3325 = vst [vmem:[#allocation3 + $0x71] sm:$0xff] %v6632_v6  ;;  %v2990_v61 = vrot.slane %v2989_v24, 2  ;;  %v2098_v27 = vrot.slane %v1975_v40, 4  ;;  %v2099_v49 = vrot.slane %v1975_v40, 6  ;;  %v3015_v25 = vsel %vm2202_vm0, %v1975_v40, -inf  ;;  %3626 = vmatmul.f32.gmra.mxu2 %v6632_v6  ;;  %v1943_v40 = vpop.f32.mrf.mxu0  ;;  %v3525_v35 = vld [vmem:[#allocation8 + $0x3e8] sm:$0xff]  ;;  %3795 = vmatpush.msra.mxu1 %v3510_v13 }
 0x3da   : > { %v2997_v31 = vrot.slane %v2996_v43, 2  ;;  %v3004_v33 = vrot.slane %v3003_v44, 2  ;;  %v3010_v23 = vmax.f32 %v3008_v5, %v3009_v37  ;;  %v3016_v19 = vrot.slane %v3015_v25, 4  ;;  %3878 = vmatpush.msrb.mxu3 %v3541_v26  ;;  %3837 = vmatpush.msrb.mxu2 %v3525_v35 }
 0x3db   : > { %v2991_v4 = vmax.f32 %v2989_v24, %v2990_v61  ;;  %v3022_v22 = vsel %vm2202_vm0, %v2097_v18, -inf  ;;  %v3029_v48 = vsel %vm2202_vm0, %v2098_v27, -inf  ;;  %v3036_v38 = vsel %vm2202_vm0, %v2099_v49, -inf  ;;  %v3509_v24 = vld [vmem:[#allocation8 + $0x368] sm:$0xff] }
 0x3dc   : > { %v2998_v1 = vmax.f32 %v2996_v43, %v2997_v31  ;;  %v3005_v41 = vmax.f32 %v3003_v44, %v3004_v33  ;;  %v3011_v46 = vrot.slane %v3010_v23, 2  ;;  %v3017_v21 = vmax.f32 %v3015_v25, %v3016_v19  ;;  %v3540_v44 = vld [vmem:[#allocation8 + $0x460] sm:$0xff]  ;;  %3796 = vmatpush.msra.mxu1 %v3509_v24 }
 0x3dd   : > { %v3023_v50 = vrot.slane %v3022_v22, 4  ;;  %v3030_v12 = vrot.slane %v3029_v48, 4  ;;  %v3037_v52 = vrot.slane %v3036_v38, 4  ;;  %v1941_v58 = vadd.f32 %v1940_v7, %v6570_v63  ;;  %v4068_v7 = vld [vmem:[#allocation11 + $0x1f8] sm:$0xff]  ;;  %3879 = vmatpush.msrb.mxu3 %v3540_v44 }
 0x3de   : > { %v2992_v20 = vrot.slane %v2991_v4, 1  ;;  %v3012_v9 = vmax.f32 %v3010_v23, %v3011_v46  ;;  %v3018_v53 = vrot.slane %v3017_v21, 2  ;;  %v1831_v0 = vadd.f32 %v1830_v59, %v6573_v57  ;;  %4276 = vmatpush.msrb.mxu0 %v4068_v7  ;;  %v3524_v25 = vld [vmem:[#allocation8 + $0x3e0] sm:$0xff]  ;;  %v3351_v59 = vld [vmem:[#allocation3 + $0x10] sm:$0xff] }
 0x3df   : > { %v3024_v51 = vmax.f32 %v3022_v22, %v3023_v50  ;;  %v3031_v16 = vmax.f32 %v3029_v48, %v3030_v12  ;;  %v3038_v29 = vmax.f32 %v3036_v38, %v3037_v52  ;;  %v2999_v39 = vrot.slane %v2998_v1, 1  ;;  %v3508_v19 = vld [vmem:[#allocation8 + $0x360] sm:$0xff]  ;;  %v3367_v50 = vld [vmem:[#allocation3 + $0x12] sm:$0xff]  ;;  %3838 = vmatpush.msrb.mxu2 %v3524_v25  ;;  %v3507_v52 = vld [vmem:[#allocation8 + $0x358] sm:$0xff]  ;;  %3880 = vmatpush.msrb.mxu3 %v3539_v14 }
 0x3e0   : > { %v3006_v32 = vrot.slane %v3005_v41, 1  ;;  %v3013_v2 = vrot.slane %v3012_v9, 1  ;;  %v3019_v63 = vmax.f32 %v3017_v21, %v3018_v53  ;;  %v6642_v62 = vld [vmem:[#allocation3 + $0x70] sm:$0xff]  ;;  %v1976_v47 = vmax.f32 %v1941_v58, 0.0  ;;  %v6671_v12 = vld [vmem:[#allocation3 + $0x21] sm:$0xff]  ;;  %3797 = vmatpush.msra.mxu1 %v3508_v19 }
 0x3e1   : > { %v6644_v17 = vld [vmem:[#allocation3 + $0x72] sm:$0xff]  ;;  %v3025_v57 = vrot.slane %v3024_v51, 2  ;;  %v3032_v30 = vrot.slane %v3031_v16, 2  ;;  %v3039_v15 = vrot.slane %v3038_v29, 2  ;;  %3585 = vmatmul.f32.gmra.mxu1 %v6642_v62  ;;  %v6648_v28 = vmax.f32 %v2991_v4, %v2992_v20  ;;  %3728 = vmatmul.f32.vlgmr.msra.gmra.mxu2 %v3359_v36 }
 0x3e2   : > { %3667 = vmatmul.f32.gmra.mxu3 %v6644_v17  ;;  %v3020_v54 = vrot.slane %v3019_v63, 1  ;;  %v1944_v8 = vadd.f32 %v1943_v40, %v1831_v0  ;;  %v2100_v43 = vrot.slane %v1976_v47, 2  ;;  %v6656_v37 = vmax.f32 %v2998_v1, %v2999_v39  ;;  %v4067_v40 = vld [vmem:[#allocation11 + $0x1f0] sm:$0xff]  ;;  %3798 = vmatpush.msra.mxu1 %v3507_v52 }
 0x3e3   : > { %v6650_v5 = vmax.f32 %v3024_v51, %v3025_v57  ;;  %v6652_v18 = vmax.f32 %v3031_v16, %v3032_v30  ;;  %v6654_v55 = vmax.f32 %v3038_v29, %v3039_v15  ;;  %v2101_v61 = vrot.slane %v1976_v47, 4  ;;  %v3506_v29 = vld [vmem:[#allocation8 + $0x350] sm:$0xff]  ;;  %3839 = vmatpush.msrb.mxu2 %v3523_v42  ;;  %3881 = vmatpush.msrb.mxu3 %v3538_v56  ;;  %v3505_v15 = vld [vmem:[#allocation8 + $0x348] sm:$0xff] }
 0x3e4   : > { %v2102_v27 = vrot.slane %v1976_v47, 6  ;;  %v3043_v49 = vsel %vm2202_vm0, %v1976_v47, -inf  ;;  %v6659_v3 = vmax.f32 %v3005_v41, %v3006_v32  ;;  %v6661_v31 = vmax.f32 %v3012_v9, %v3013_v2  ;;  %v3522_v32 = vld [vmem:[#allocation8 + $0x3d0] sm:$0xff]  ;;  %v3537_v2 = vld [vmem:[#allocation8 + $0x448] sm:$0xff]  ;;  %3799 = vmatpush.msra.mxu1 %v3506_v29  ;;  %4277 = vmatpush.msrb.mxu0 %v4067_v40 }
 0x3e5   : > { %v6663_v33 = vmax.f32 %v3019_v63, %v3020_v54  ;;  %v3044_v23 = vrot.slane %v3043_v49, 4  ;;  %v3050_v4 = vsel %vm2202_vm0, %v2100_v43, -inf  ;;  %v3057_v22 = vsel %vm2202_vm0, %v2101_v61, -inf  ;;  %3840 = vmatpush.msrb.mxu2 %v3522_v32  ;;  %3882 = vmatpush.msrb.mxu3 %v3537_v2  ;;  %v3536_v61 = vld [vmem:[#allocation8 + $0x440] sm:$0xff] }
 0x3e6   : > { %v3064_v48 = vsel %vm2202_vm0, %v2102_v27, -inf  ;;  %v1977_v38 = vmax.f32 %v1944_v8, 0.0  ;;  %v3027_v1 = vrot.slane %v6650_v5, 1  ;;  %v3034_v41 = vrot.slane %v6652_v18, 1  ;;  %v3521_v8 = vld [vmem:[#allocation8 + $0x3c8] sm:$0xff]  ;;  %v3504_v27 = vld [vmem:[#allocation8 + $0x340] sm:$0xff]  ;;  %3800 = vmatpush.msra.mxu1 %v3505_v15 }
 0x3e7   : > { %v3041_v46 = vrot.slane %v6654_v55, 1  ;;  %v3045_v21 = vmax.f32 %v3043_v49, %v3044_v23  ;;  %v3051_v58 = vrot.slane %v3050_v4, 4  ;;  %v3058_v20 = vrot.slane %v3057_v22, 4  ;;  %3841 = vmatpush.msrb.mxu2 %v3521_v8  ;;  %3883 = vmatpush.msrb.mxu3 %v3536_v61  ;;  %v3533_v8 = vld [vmem:[#allocation8 + $0x428] sm:$0xff] }
 0x3e8   : > { %v3065_v9 = vrot.slane %v3064_v48, 4  ;;  %v2103_v53 = vrot.slane %v1977_v38, 2  ;;  %v2104_v0 = vrot.slane %v1977_v38, 4  ;;  %v2105_v51 = vrot.slane %v1977_v38, 6  ;;  %3801 = vmatpush.msra.mxu1 %v3504_v27  ;;  %v6704_v61 = vld [vmem:[#allocation3 + $0x30] sm:$0xff] }
 0x3e9   : > { %v3046_v10 = vrot.slane %v3045_v21, 2  ;;  %v3071_v16 = vsel %vm2202_vm0, %v1977_v38, -inf  ;;  %3687 = vmatmul.f32.vlgmr.msrb.gmra.mxu1 %v3351_v59  ;;  %v3052_v36 = vmax.f32 %v3050_v4, %v3051_v58  ;;  %v3059_v60 = vmax.f32 %v3057_v22, %v3058_v20  ;;  %3731 = vmatmul.f32.gmra.mxu2 %v6671_v12  ;;  %v3535_v38 = vld [vmem:[#allocation8 + $0x438] sm:$0xff]  ;;  %v6680_v20 = vld [vmem:[#allocation3 + $0x22] sm:$0xff]  ;;  %v3517_v27 = vld [vmem:[#allocation8 + $0x3a8] sm:$0xff] }
 0x3ea   : > { %3769 = vmatmul.f32.vlgmr.msra.gmra.mxu3 %v3367_v50  ;;  %v3066_v45 = vmax.f32 %v3064_v48, %v3065_v9  ;;  %v3072_v39 = vrot.slane %v3071_v16, 4  ;;  %v3078_v13 = vsel %vm2202_vm0, %v2103_v53, -inf  ;;  %v3085_v57 = vsel %vm2202_vm0, %v2104_v0, -inf  ;;  %v6678_v58 = vld [vmem:[#allocation3 + $0x20] sm:$0xff]  ;;  %v6685_v0 = vld [vmem:[#allocation3 + $0x31] sm:$0xff] }
 0x3eb   : > { %v3047_v63 = vmax.f32 %v3045_v21, %v3046_v10  ;;  %v3092_v30 = vsel %vm2202_vm0, %v2105_v51, -inf  ;;  %v3053_v47 = vrot.slane %v3052_v36, 2  ;;  %v3060_v7 = vrot.slane %v3059_v60, 2  ;;  %v3520_v9 = vld [vmem:[#allocation8 + $0x3c0] sm:$0xff]  ;;  %v3503_v51 = vld [vmem:[#allocation8 + $0x338] sm:$0xff]  ;;  %3884 = vmatpush.msrb.mxu3 %v3535_v38 }
 0x3ec   : > { %v3067_v26 = vrot.slane %v3066_v45, 2  ;;  %v3073_v54 = vmax.f32 %v3071_v16, %v3072_v39  ;;  %v3079_v24 = vrot.slane %v3078_v13, 4  ;;  %v3086_v43 = vrot.slane %v3085_v57, 4  ;;  %3842 = vmatpush.msrb.mxu2 %v3520_v9  ;;  %3802 = vmatpush.msra.mxu1 %v3503_v51  ;;  %v3499_v38 = vld [vmem:[#allocation8 + $0x318] sm:$0xff]  ;;  %v3514_v9 = vld [vmem:[#allocation8 + $0x390] sm:$0xff]  ;;  %v3513_v51 = vld [vmem:[#allocation8 + $0x388] sm:$0xff] }
 0x3ed   : > { %v3048_v35 = vrot.slane %v3047_v63, 1  ;;  %v3093_v44 = vrot.slane %v3092_v30, 4  ;;  %v3054_v49 = vmax.f32 %v3052_v36, %v3053_v47  ;;  %v3061_v25 = vmax.f32 %v3059_v60, %v3060_v7  ;;  %v3519_v60 = vld [vmem:[#allocation8 + $0x3b8] sm:$0xff]  ;;  %v3518_v7 = vld [vmem:[#allocation8 + $0x3b0] sm:$0xff] }
 0x3ee   : > { %v3068_v23 = vmax.f32 %v3066_v45, %v3067_v26  ;;  %v3074_v19 = vrot.slane %v3073_v54, 2  ;;  %v3080_v4 = vmax.f32 %v3078_v13, %v3079_v24  ;;  %v3087_v22 = vmax.f32 %v3085_v57, %v3086_v43  ;;  %v3534_v45 = vld [vmem:[#allocation8 + $0x430] sm:$0xff]  ;;  %3843 = vmatpush.msrb.mxu2 %v3519_v60  ;;  %v3528_v60 = vld [vmem:[#allocation8 + $0x400] sm:$0xff] }
 0x3ef   : > { %v3049_v14 = vmax.f32 %v3047_v63, %v3048_v35  ;;  %v3094_v48 = vmax.f32 %v3092_v30, %v3093_v44  ;;  %v3055_v59 = vrot.slane %v3054_v49, 1  ;;  %v3062_v21 = vrot.slane %v3061_v25, 1  ;;  %v3502_v63 = vld [vmem:[#allocation8 + $0x330] sm:$0xff]  ;;  %3885 = vmatpush.msrb.mxu3 %v3534_v45  ;;  %v3501_v35 = vld [vmem:[#allocation8 + $0x328] sm:$0xff]  ;;  %v3496_v45 = vld [vmem:[#allocation8 + $0x300] sm:$0xff] }
 0x3f0   : > { %v3069_v50 = vrot.slane %v3068_v23, 1  ;;  %v3075_v52 = vmax.f32 %v3073_v54, %v3074_v19  ;;  %v3081_v42 = vrot.slane %v3080_v4, 2  ;;  %v3088_v56 = vrot.slane %v3087_v22, 2  ;;  %v4066_v13 = vld [vmem:[#allocation11 + $0x1e8] sm:$0xff]  ;;  %3803 = vmatpush.msra.mxu1 %v3502_v63  ;;  %3844 = vmatpush.msrb.mxu2 %v3518_v7  ;;  %v6710_v19 = vld [vmem:[#allocation3 + $0x41] sm:$0xff] }
 0x3f1   : > { %v3155_v53 = vmax.f32 %v6648_v28, %v3049_v14  ;;  %v3095_v10 = vrot.slane %v3094_v48, 2  ;;  %3690 = vmatmul.f32.gmra.mxu1 %v6678_v58  ;;  %v3056_v16 = vmax.f32 %v3054_v49, %v3055_v59  ;;  %v3063_v29 = vmax.f32 %v3061_v25, %v3062_v21  ;;  %3734 = vmatmul.f32.gmra.mxu2 %v6685_v0  ;;  %v3516_v14 = vld [vmem:[#allocation8 + $0x3a0] sm:$0xff]  ;;  %v3515_v21 = vld [vmem:[#allocation8 + $0x398] sm:$0xff] }
 0x3f2   : > { %3772 = vmatmul.f32.gmra.mxu3 %v6680_v20  ;;  %v3070_v40 = vmax.f32 %v3068_v23, %v3069_v50  ;;  %v3076_v36 = vrot.slane %v3075_v52, 1  ;;  %v3028_v28 = vmax.f32 %v6650_v5, %v3027_v1  ;;  %v3082_v39 = vmax.f32 %v3080_v4, %v3081_v42  ;;  %4278 = vmatpush.msrb.mxu0 %v4066_v13  ;;  %v6708_v23 = vld [vmem:[#allocation3 + $0x32] sm:$0xff]  ;;  %v3500_v4 = vld [vmem:[#allocation8 + $0x320] sm:$0xff] }
 0x3f3   : > { %v3089_v32 = vmax.f32 %v3087_v22, %v3088_v56  ;;  %v3096_v2 = vmax.f32 %v3094_v48, %v3095_v10  ;;  %v3156_v57 = vmax.f32 %v6656_v37, %v3056_v16  ;;  %v3157_v30 = vmax.f32 %v6659_v3, %v3063_v29  ;;  %3886 = vmatpush.msrb.mxu3 %v3533_v8  ;;  %v3531_v22 = vld [vmem:[#allocation8 + $0x418] sm:$0xff]  ;;  %v3530_v50 = vld [vmem:[#allocation8 + $0x410] sm:$0xff]  ;;  %v3370_v42 = vld [vmem:[#allocation3 + $0x42] sm:$0xff] }
 0x3f4   : > { %v3158_v15 = vmax.f32 %v6661_v31, %v3070_v40  ;;  %v3077_v47 = vmax.f32 %v3075_v52, %v3076_v36  ;;  %v3035_v26 = vmax.f32 %v6652_v18, %v3034_v41  ;;  %v3083_v5 = vrot.slane %v3082_v39, 1  ;;  %3804 = vmatpush.msra.mxu1 %v3501_v35  ;;  %3845 = vmatpush.msrb.mxu2 %v3517_v27  ;;  %v3363_v56 = vld [vmem:[#allocation3 + $0x51] sm:$0xff]  ;;  %v4065_v16 = vld [vmem:[#allocation11 + $0x1e0] sm:$0xff] }
 0x3f5   : > { %v3090_v1 = vrot.slane %v3089_v32, 1  ;;  %v3097_v54 = vrot.slane %v3096_v2, 1  ;;  %v3042_v37 = vmax.f32 %v6654_v55, %v3041_v46  ;;  %v3303_v3 = vsel %vm3247_vm1, %v3156_v57, %v3155_v53  ;;  %v3532_v55 = vld [vmem:[#allocation8 + $0x420] sm:$0xff]  ;;  %v3498_v10 = vld [vmem:[#allocation8 + $0x310] sm:$0xff]  ;;  %v3529_v29 = vld [vmem:[#allocation8 + $0x408] sm:$0xff]  ;;  %4279 = vmatpush.msrb.mxu0 %v4065_v16  ;;  %v6726_v57 = vpop.f32.mrf.mxu2 }
 0x3f6   : > { %v3159_v31 = vmax.f32 %v6663_v33, %v3077_v47  ;;  %v3304_v24 = vsel %vm3249_vm2, %v3157_v30, %v3303_v3  ;;  %v3084_v18 = vmax.f32 %v3082_v39, %v3083_v5  ;;  %3887 = vmatpush.msrb.mxu3 %v3532_v55  ;;  %3805 = vmatpush.msra.mxu1 %v3500_v4  ;;  %v3354_v53 = vld [vmem:[#allocation3 + $0x40] sm:$0xff]  ;;  %v3497_v40 = vld [vmem:[#allocation8 + $0x308] sm:$0xff]  ;;  %v3371_v39 = vld [vmem:[#allocation3 + $0x52] sm:$0xff]  ;;  %v6732_v47 = vpop.f32.mrf.mxu3 }
 0x3f7   : > { %v3091_v41 = vmax.f32 %v3089_v32, %v3090_v1  ;;  %v3098_v43 = vmax.f32 %v3096_v2, %v3097_v54  ;;  %v3305_v44 = vsel %vm3251_vm3, %v3158_v15, %v3304_v24  ;;  %3846 = vmatpush.msrb.mxu2 %v3516_v14  ;;  %v3512_v36 = vld [vmem:[#allocation8 + $0x380] sm:$0xff]  ;;  %v4063_v30 = vld [vmem:[#allocation11 + $0x1d0] sm:$0xff]  ;;  %v6729_v15 = vpop.f32.mrf.mxu1  ;;  %v4018_v27 = vld [vmem:[#allocation11 + $0x68] sm:$0xff] }
 0x3f8   : > { %v3160_v46 = vmax.f32 %v3028_v28, %v3084_v18  ;;  %v3306_v33 = vsel %vm3253_vm4, %v3159_v31, %v3305_v44  ;;  %3888 = vmatpush.msrb.mxu3 %v3531_v22  ;;  %3806 = vmatpush.msra.mxu1 %v3499_v38  ;;  %v3355_v28 = vld [vmem:[#allocation3 + $0x50] sm:$0xff]  ;;  %v3364_v32 = vld [vmem:[#allocation3 + $0x61] sm:$0xff] }
 0x3f9   : > { %v3161_v49 = vmax.f32 %v3035_v26, %v3091_v41  ;;  %v3162_v25 = vmax.f32 %v3042_v37, %v3098_v43  ;;  %3693 = vmatmul.f32.gmra.mxu1 %v6704_v61  ;;  %3737 = vmatmul.f32.gmra.mxu2 %v6710_v19  ;;  %v4064_v2 = vld [vmem:[#allocation11 + $0x1d8] sm:$0xff]  ;;  %v4061_v8 = vld [vmem:[#allocation11 + $0x1c0] sm:$0xff]  ;;  %v3391_v44 = vld [vmem:[#allocation3 + $0x91] sm:$0xff] }
 0x3fa   : > { %3775 = vmatmul.f32.gmra.mxu3 %v6708_v23  ;;  %v3307_v48 = vsel %vm3255_vm5, %v3160_v46, %v3306_v33  ;;  %3847 = vmatpush.msrb.mxu2 %v3515_v21  ;;  %v4060_v41 = vld [vmem:[#allocation11 + $0x1b8] sm:$0xff]  ;;  %v3399_v46 = vld [vmem:[#allocation3 + $0x92] sm:$0xff] }
 0x3fb   : > { %v3308_v59 = vsel %vm3257_vm6, %v3161_v49, %v3307_v48  ;;  %3889 = vmatpush.msrb.mxu3 %v3530_v50  ;;  %3807 = vmatpush.msra.mxu1 %v3498_v10  ;;  %v4020_v43 = vld [vmem:[#allocation11 + $0x78] sm:$0xff]  ;;  %v4017_v49 = vld [vmem:[#allocation11 + $0x60] sm:$0xff]  ;;  %v4015_v22 = vld [vmem:[#allocation11 + $0x50] sm:$0xff] }
 0x3fc   : > { %v6717_v52 = vsel %vm3259_vm7, %v3162_v25, %v3308_v59  ;;  %3848 = vmatpush.msrb.mxu2 %v3514_v9  ;;  %4280 = vmatpush.msrb.mxu0 %v4064_v2  ;;  %v4059_v25 = vld [vmem:[#allocation11 + $0x1b0] sm:$0xff]  ;;  %v4016_v33 = vld [vmem:[#allocation11 + $0x58] sm:$0xff]  ;;  %v4014_v48 = vld [vmem:[#allocation11 + $0x48] sm:$0xff] }
 0x3fd   : > { %3326 = vst [vmem:[#allocation3 + $0x81] sm:$0xff] %v6717_v52  ;;  %3890 = vmatpush.msrb.mxu3 %v3529_v29  ;;  %3808 = vmatpush.msra.mxu1 %v3497_v40  ;;  %v6736_v7 = vpop.f32.mrf.mxu2  ;;  %v4013_v50 = vld [vmem:[#allocation11 + $0x40] sm:$0xff]  ;;  %v4058_v9 = vld [vmem:[#allocation11 + $0x1a8] sm:$0xff]  ;;  %v4051_v40 = vld [vmem:[#allocation11 + $0x170] sm:$0xff] }
 0x3fe   : > { %3849 = vmatpush.msrb.mxu2 %v3513_v51  ;;  %4281 = vmatpush.msrb.mxu0 %v4063_v30  ;;  %v6743_v5 = vpop.f32.mrf.mxu3  ;;  %v4034_v29 = vld [vmem:[#allocation11 + $0xe8] sm:$0xff]  ;;  %v4031_v2 = vld [vmem:[#allocation11 + $0xd0] sm:$0xff] }
 0x3ff   : > { %3891 = vmatpush.msrb.mxu3 %v3528_v60  ;;  %3809 = vmatpush.msra.mxu1 %v3496_v45  ;;  %v6738_v26 = vpop.f32.mrf.mxu1  ;;  %v4050_v60 = vld [vmem:[#allocation11 + $0x168] sm:$0xff]  ;;  %v4011_v45 = vld [vmem:[#allocation11 + $0x30] sm:$0xff] }
 0x400   : > { %3850 = vmatpush.msrb.mxu2 %v3512_v36  ;;  %v4033_v36 = vld [vmem:[#allocation11 + $0xe0] sm:$0xff] }
 0x401   : > { %3696 = vmatmul.f32.gmra.mxu1 %v3354_v53  ;;  %3740 = vmatmul.f32.gmra.mxu2 %v3363_v56 }
 0x402   : > { %3778 = vmatmul.f32.gmra.mxu3 %v3370_v42  ;;  %4153 = vmatpush.msrb.mxu1 %v4020_v43  ;;  %v4029_v43 = vld [vmem:[#allocation11 + $0xc0] sm:$0xff] }
 0x404   : > { %v3358_v63 = vld [vmem:[#allocation3 + $0x80] sm:$0xff] }
 0x405   : > { %v3374_v13 = vld [vmem:[#allocation3 + $0x82] sm:$0xff] }
 0x407   : > { %v6747_v1 = vpop.f32.mrf.mxu1 }
 0x409   : > { %3699 = vmatmul.f32.gmra.mxu1 %v3355_v28  ;;  %3743 = vmatmul.f32.gmra.mxu2 %v3364_v32 }
 0x40a   : > { %3781 = vmatmul.f32.gmra.mxu3 %v3371_v39 }
 0x40f   : > { %v6753_v54 = vpop.f32.mrf.mxu1 }
 0x411   : > { %3702 = vmatmul.f32.gmra.mxu1 %v6578_v34  ;;  %3746 = vmatmul.f32.gmra.mxu2 %v6632_v6 }
 0x412   : > { %3784 = vmatmul.f32.gmra.mxu3 %v6580_v11 }
 0x417   : > { %v6759_v3 = vpop.f32.mrf.mxu1 }
 0x419   : > { %3705 = vmatmul.f32.gmra.mxu1 %v6642_v62  ;;  %3749 = vmatmul.f32.gmra.mxu2 %v6717_v52 }
 0x41a   : > { %3787 = vmatmul.f32.gmra.mxu3 %v6644_v17 }
 0x41f   : > { %v6768_v18 = vpop.f32.mrf.mxu1 }
 0x421   : > { %3708 = vmatmul.f32.gmra.mxu1 %v3358_v63  ;;  %3851 = vmatmul.f32.vlgmr.msrb.gmra.mxu2 %v6671_v12  ;;  %v4062_v12 = vld [vmem:[#allocation11 + $0x1c8] sm:$0xff] }
 0x422   : > { %3790 = vmatmul.f32.gmra.mxu3 %v3374_v13  ;;  %4282 = vmatpush.msrb.mxu0 %v4062_v12 }
 0x424   : > { %4283 = vmatpush.msrb.mxu0 %v4061_v8  ;;  %v4030_v8 = vld [vmem:[#allocation11 + $0xc8] sm:$0xff] }
 0x426   : > { %4284 = vmatpush.msrb.mxu0 %v4060_v41  ;;  %v4047_v41 = vld [vmem:[#allocation11 + $0x150] sm:$0xff] }
 0x428   : > { %4285 = vmatpush.msrb.mxu0 %v4059_v25  ;;  %v4008_v25 = vld [vmem:[#allocation11 + $0x18] sm:$0xff] }
 0x429   : > { %3810 = vmatmul.f32.vlgmr.msra.gmra.mxu1 %v6678_v58  ;;  %3854 = vmatmul.f32.gmra.mxu2 %v6685_v0  ;;  %v6745_v58 = vpop.f32.mrf.mxu2 }
 0x42a   : > { %3892 = vmatmul.f32.vlgmr.msrb.gmra.mxu3 %v6680_v20  ;;  %v6749_v20 = vpop.f32.mrf.mxu3  ;;  %4286 = vmatpush.msrb.mxu0 %v4058_v9  ;;  %v4026_v9 = vld [vmem:[#allocation11 + $0xa8] sm:$0xff] }
 0x431   : > { %3813 = vmatmul.f32.gmra.mxu1 %v6704_v61  ;;  %3857 = vmatmul.f32.gmra.mxu2 %v6710_v19  ;;  %v6751_v0 = vpop.f32.mrf.mxu2  ;;  %v4019_v61 = vld [vmem:[#allocation11 + $0x70] sm:$0xff] }
 0x432   : > { %3895 = vmatmul.f32.gmra.mxu3 %v6708_v23  ;;  %v6755_v35 = vpop.f32.mrf.mxu3  ;;  %4154 = vmatpush.msrb.mxu1 %v4019_v61  ;;  %v6785_v23 = vld [vmem:[#allocation2] sm:$0xff]  ;;  %v4009_v61 = vld [vmem:[#allocation11 + $0x20] sm:$0xff] }
 0x434   : > { %4155 = vmatpush.msrb.mxu1 %v4018_v27  ;;  %v4028_v27 = vld [vmem:[#allocation11 + $0xb8] sm:$0xff] }
 0x436   : > { %4156 = vmatpush.msrb.mxu1 %v4017_v49  ;;  %v4057_v49 = vld [vmem:[#allocation11 + $0x1a0] sm:$0xff] }
 0x437   : > { %4287 = vmatpush.msrb.mxu0 %v4057_v49  ;;  %v4056_v49 = vld [vmem:[#allocation11 + $0x198] sm:$0xff] }
 0x438   : > { %4157 = vmatpush.msrb.mxu1 %v4016_v33  ;;  %v4027_v33 = vld [vmem:[#allocation11 + $0xb0] sm:$0xff] }
 0x439   : > { %3816 = vmatmul.f32.gmra.mxu1 %v3354_v53  ;;  %3860 = vmatmul.f32.gmra.mxu2 %v3363_v56  ;;  %v6757_v37 = vpop.f32.mrf.mxu2  ;;  %v4035_v53 = vld [vmem:[#allocation11 + $0xf0] sm:$0xff]  ;;  %v4012_v56 = vld [vmem:[#allocation11 + $0x38] sm:$0xff] }
 0x43a   : > { %3898 = vmatmul.f32.gmra.mxu3 %v3370_v42  ;;  %v6764_v31 = vpop.f32.mrf.mxu3  ;;  %4158 = vmatpush.msrb.mxu1 %v4015_v22  ;;  %v4052_v42 = vld [vmem:[#allocation11 + $0x178] sm:$0xff] }
 0x43b   : > { %4235 = vmatpush.msra.mxu3 %v4052_v42  ;;  %v4044_v22 = vld [vmem:[#allocation11 + $0x138] sm:$0xff]  ;;  %v4025_v42 = vld [vmem:[#allocation11 + $0xa0] sm:$0xff]  ;;  %4288 = vmatpush.msrb.mxu0 %v4056_v49 }
 0x43c   : > { %4159 = vmatpush.msrb.mxu1 %v4014_v48 }
 0x43d   : > { %4236 = vmatpush.msra.mxu3 %v4051_v40  ;;  %v4024_v40 = vld [vmem:[#allocation11 + $0x98] sm:$0xff] }
 0x43e   : > { %4160 = vmatpush.msrb.mxu1 %v4013_v50 }
 0x43f   : > { %4237 = vmatpush.msra.mxu3 %v4050_v60  ;;  %v4006_v60 = vld [vmem:[#allocation11 + $0x8] sm:$0xff] }
 0x440   : > { %4161 = vmatpush.msrb.mxu1 %v4012_v56  ;;  %v4042_v56 = vld [vmem:[#allocation11 + $0x128] sm:$0xff] }
 0x441   : > { %3819 = vmatmul.f32.gmra.mxu1 %v3355_v28  ;;  %3863 = vmatmul.f32.gmra.mxu2 %v3364_v32  ;;  %v6766_v24 = vpop.f32.mrf.mxu2  ;;  %v4032_v28 = vld [vmem:[#allocation11 + $0xd8] sm:$0xff]  ;;  %v4010_v32 = vld [vmem:[#allocation11 + $0x28] sm:$0xff] }
 0x442   : > { %3901 = vmatmul.f32.gmra.mxu3 %v3371_v39  ;;  %4162 = vmatpush.msrb.mxu1 %v4011_v45  ;;  %v4049_v39 = vld [vmem:[#allocation11 + $0x160] sm:$0xff]  ;;  %v4023_v45 = vld [vmem:[#allocation11 + $0x90] sm:$0xff] }
 0x443   : > { %4238 = vmatpush.msra.mxu3 %v4049_v39 }
 0x444   : > { %4163 = vmatpush.msrb.mxu1 %v4010_v32 }
 0x446   : > { %4164 = vmatpush.msrb.mxu1 %v4009_v61  ;;  %v3941_v61 = vld [vmem:[#allocation3 + $0x1] sm:$0xff] }
 0x448   : > { %4165 = vmatpush.msrb.mxu1 %v4008_v25 }
 0x449   : > { %3822 = vmatmul.f32.gmra.mxu1 %v6578_v34  ;;  %3866 = vmatmul.f32.gmra.mxu2 %v6632_v6  ;;  %v6773_v34 = vpop.f32.mrf.mxu3  ;;  %v6777_v6 = vpop.f32.mrf.mxu1 }
 0x44a   : > { %3904 = vmatmul.f32.gmra.mxu3 %v6580_v11  ;;  %v6775_v11 = vpop.f32.mrf.mxu2 }
 0x451   : > { %3825 = vmatmul.f32.gmra.mxu1 %v6642_v62  ;;  %3869 = vmatmul.f32.gmra.mxu2 %v6717_v52  ;;  %v6779_v55 = vpop.f32.mrf.mxu3  ;;  %v4036_v52 = vld [vmem:[#allocation11 + $0xf8] sm:$0xff] }
 0x452   : > { %3907 = vmatmul.f32.gmra.mxu3 %v6644_v17  ;;  %4194 = vmatpush.msra.mxu2 %v4036_v52 }
 0x454   : > { %4195 = vmatpush.msra.mxu2 %v4035_v53  ;;  %v4043_v53 = vld [vmem:[#allocation11 + $0x130] sm:$0xff] }
 0x456   : > { %4196 = vmatpush.msra.mxu2 %v4034_v29  ;;  %v4007_v29 = vld [vmem:[#allocation11 + $0x10] sm:$0xff] }
 0x457   : > { %4166 = vmatpush.msrb.mxu1 %v4007_v29  ;;  %v4055_v29 = vld [vmem:[#allocation11 + $0x190] sm:$0xff] }
 0x458   : > { %4197 = vmatpush.msra.mxu2 %v4033_v36  ;;  %v4041_v36 = vld [vmem:[#allocation11 + $0x120] sm:$0xff]  ;;  %4289 = vmatpush.msrb.mxu0 %v4055_v29  ;;  %v4079_v29 = vld [vmem:[#allocation11 + $0x250] sm:$0xff] }
 0x459   : > { %3828 = vmatmul.f32.gmra.mxu1 %v3358_v63  ;;  %3872 = vmatmul.f32.gmra.mxu2 %v3391_v44  ;;  %v4048_v63 = vld [vmem:[#allocation11 + $0x158] sm:$0xff]  ;;  %v4046_v44 = vld [vmem:[#allocation11 + $0x148] sm:$0xff] }
 0x45a   : > { %3910 = vmatmul.f32.gmra.mxu3 %v3374_v13  ;;  %4198 = vmatpush.msra.mxu2 %v4032_v28  ;;  %v4040_v28 = vld [vmem:[#allocation11 + $0x118] sm:$0xff] }
 0x45b   : > { %4239 = vmatpush.msra.mxu3 %v4048_v63  ;;  %4167 = vmatpush.msrb.mxu1 %v4006_v60  ;;  %v4022_v63 = vld [vmem:[#allocation11 + $0x88] sm:$0xff] }
 0x45c   : > { %v6781_v62 = vpop.f32.mrf.mxu2  ;;  %4199 = vmatpush.msra.mxu2 %v4031_v2  ;;  %v4082_v60 = vld [vmem:[#allocation11 + $0x268] sm:$0xff] }
 0x45d   : > { %4240 = vmatpush.msra.mxu3 %v4047_v41  ;;  %v4021_v41 = vld [vmem:[#allocation11 + $0x80] sm:$0xff] }
 0x45e   : > { %v6783_v17 = vpop.f32.mrf.mxu1  ;;  %4200 = vmatpush.msra.mxu2 %v4030_v8  ;;  %v4039_v8 = vld [vmem:[#allocation11 + $0x110] sm:$0xff] }
 0x45f   : > { %4241 = vmatpush.msra.mxu3 %v4046_v44  ;;  %v4005_v44 = vld [vmem:[#allocation11] sm:$0xff] }
 0x460   : > { %4201 = vmatpush.msra.mxu2 %v4029_v43  ;;  %v4038_v43 = vld [vmem:[#allocation11 + $0x108] sm:$0xff]  ;;  %4168 = vmatpush.msrb.mxu1 %v4005_v44  ;;  %v4080_v44 = vld [vmem:[#allocation11 + $0x258] sm:$0xff] }
 0x461   : > { %3831 = vmatmul.f32.gmra.mxu1 %v6785_v23 }
 0x462   : > { %3913 = vmatmul.f32.gmra.mxu3 %v3399_v46  ;;  %v4045_v46 = vld [vmem:[#allocation11 + $0x140] sm:$0xff]  ;;  %4202 = vmatpush.msra.mxu2 %v4028_v27  ;;  %v6824_v27 = vld [vmem:[#allocation9] ss:$0 sm:$0xff] }
 0x463   : > { %4242 = vmatpush.msra.mxu3 %v4045_v46  ;;  %v4037_v46 = vld [vmem:[#allocation11 + $0x100] sm:$0xff] }
 0x464   : > { %v6790_v14 = vpop.f32.mrf.mxu2  ;;  %4203 = vmatpush.msra.mxu2 %v4027_v33 }
 0x465   : > { %v6788_v19 = vpop.f32.mrf.mxu3  ;;  %4243 = vmatpush.msra.mxu3 %v4044_v22  ;;  %v3949_v22 = vld [vmem:[#allocation3 + $0x2] sm:$0xff] }
 0x466   : > { %v6792_v4 = vpop.f32.mrf.mxu1  ;;  %4204 = vmatpush.msra.mxu2 %v4026_v9  ;;  %v4084_v9 = vld [vmem:[#allocation11 + $0x278] sm:$0xff] }
 0x467   : > { %4244 = vmatpush.msra.mxu3 %v4043_v53  ;;  %v3566_v53 = vadd.f32 %v6824_v27, %v6729_v15  ;;  %4317 = vmatpush.msra.mxu1 %v4084_v9 }
 0x468   : > { %4205 = vmatpush.msra.mxu2 %v4025_v42 }
 0x469   : > { %4245 = vmatpush.msra.mxu3 %v4042_v56  ;;  %4169 = vmatmul.f32.vlgmr.msrb.gmra.mxu1 %v6785_v23  ;;  %v3607_v56 = vadd.f32 %v6726_v57, %v3566_v53  ;;  %v3569_v57 = vadd.f32 %v6824_v27, %v6738_v26  ;;  %v3572_v26 = vadd.f32 %v6824_v27, %v6747_v1 }
 0x46a   : > { %4206 = vmatpush.msra.mxu2 %v4024_v40  ;;  %v4083_v40 = vld [vmem:[#allocation11 + $0x270] sm:$0xff] }
 0x46b   : > { %4246 = vmatpush.msra.mxu3 %v4041_v36  ;;  %v4054_v36 = vld [vmem:[#allocation11 + $0x188] sm:$0xff]  ;;  %4318 = vmatpush.msra.mxu1 %v4083_v40 }
 0x46c   : > { %v6796_v59 = vpop.f32.mrf.mxu2  ;;  %4207 = vmatpush.msra.mxu2 %v4023_v45  ;;  %v4053_v45 = vld [vmem:[#allocation11 + $0x180] sm:$0xff]  ;;  %4290 = vmatpush.msrb.mxu0 %v4054_v36 }
 0x46d   : > { %v6794_v38 = vpop.f32.mrf.mxu3  ;;  %4247 = vmatpush.msra.mxu3 %v4040_v28  ;;  %4319 = vmatpush.msra.mxu1 %v4082_v60 }
 0x46e   : > { %v6798_v21 = vpop.f32.mrf.mxu1  ;;  %4208 = vmatpush.msra.mxu2 %v4022_v63  ;;  %v3648_v63 = vadd.f32 %v6732_v47, %v3607_v56  ;;  %4291 = vmatpush.msrb.mxu0 %v4053_v45 }
 0x46f   : > { %4248 = vmatpush.msra.mxu3 %v4039_v8 }
 0x470   : > { %4209 = vmatpush.msra.mxu2 %v4021_v41  ;;  %v3689_v41 = vadd.f32 %v6792_v4, %v3648_v63 }
 0x471   : > { %4249 = vmatpush.msra.mxu3 %v4038_v43  ;;  %4210 = vmatmul.f32.vlgmr.msra.gmra.mxu2 %v3941_v61  ;;  %v4081_v43 = vld [vmem:[#allocation11 + $0x260] sm:$0xff]  ;;  %v3610_v61 = vadd.f32 %v6736_v7, %v3569_v57  ;;  %v4078_v7 = vld [vmem:[#allocation11 + $0x248] sm:$0xff] }
 0x472   : > { %4320 = vmatpush.msra.mxu1 %v4081_v43  ;;  %v4076_v43 = vld [vmem:[#allocation11 + $0x238] sm:$0xff] }
 0x473   : > { %4250 = vmatpush.msra.mxu3 %v4037_v46  ;;  %v3730_v46 = vadd.f32 %v6790_v14, %v3689_v41  ;;  %v3651_v47 = vadd.f32 %v6743_v5, %v3610_v61  ;;  %v3613_v14 = vadd.f32 %v6745_v58, %v3572_v26 }
 0x474   : > { %v6802_v51 = vpop.f32.mrf.mxu2  ;;  %4251 = vmatmul.f32.vlgmr.msra.gmra.mxu3 %v3949_v22  ;;  %4321 = vmatpush.msra.mxu1 %v4080_v44 }
 0x475   : > { %v6800_v10 = vpop.f32.mrf.mxu3  ;;  %v3771_v9 = vadd.f32 %v6794_v38, %v3730_v46  ;;  %v3692_v4 = vadd.f32 %v6798_v21, %v3651_v47  ;;  %v3654_v5 = vadd.f32 %v6749_v20, %v3613_v14  ;;  %v3575_v21 = vadd.f32 %v6824_v27, %v6753_v54 }
 0x476   : > { %v6804_v16 = vpop.f32.mrf.mxu1  ;;  %4322 = vmatpush.msra.mxu1 %v4079_v29  ;;  %v4075_v29 = vld [vmem:[#allocation11 + $0x230] sm:$0xff] }
 0x477   : > { %v3733_v40 = vadd.f32 %v6796_v59, %v3692_v4  ;;  %v3695_v57 = vadd.f32 %v6804_v16, %v3654_v5  ;;  %v4077_v59 = vld [vmem:[#allocation11 + $0x240] sm:$0xff]  ;;  %v3616_v20 = vadd.f32 %v6751_v0, %v3575_v21  ;;  %v4074_v5 = vld [vmem:[#allocation11 + $0x228] sm:$0xff] }
 0x478   : > { %4323 = vmatpush.msra.mxu1 %v4078_v7 }
 0x479   : > { %v3774_v38 = vadd.f32 %v6800_v10, %v3733_v40  ;;  %v3736_v10 = vadd.f32 %v6802_v51, %v3695_v57  ;;  %v3657_v54 = vadd.f32 %v6755_v35, %v3616_v20  ;;  %v4100_v35 = vld [vmem:[#allocation11 + $0x2f8] sm:$0xff] }
 0x47a   : > { %4324 = vmatpush.msra.mxu1 %v4077_v59  ;;  %4358 = vmatpush.msrb.mxu2 %v4100_v35  ;;  %v4097_v59 = vld [vmem:[#allocation11 + $0x2e0] sm:$0xff]  ;;  %v4112_v20 = vld [vmem:[#allocation11 + $0x358] sm:$0xff] }
 0x47c   : > { %v6808_v30 = vpop.f32.mrf.mxu2  ;;  %4325 = vmatpush.msra.mxu1 %v4076_v43 }
 0x47d   : > { %v6806_v13 = vpop.f32.mrf.mxu3 }
 0x47e   : > { %v6810_v12 = vpop.f32.mrf.mxu1  ;;  %v3777_v16 = vadd.f32 %v6806_v13, %v3736_v10  ;;  %v4116_v13 = vld [vmem:[#allocation11 + $0x378] sm:$0xff]  ;;  %4326 = vmatpush.msra.mxu1 %v4075_v29 }
 0x47f   : > { %4399 = vmatpush.msrb.mxu3 %v4116_v13  ;;  %v3584_v13 = vadd.f32 %v6824_v27, %v6777_v6  ;;  %v4129_v6 = vld [vmem:[#allocation11 + $0x3e0] sm:$0xff] }
 0x480   : > { %4327 = vmatpush.msra.mxu1 %v4074_v5  ;;  %v4128_v5 = vld [vmem:[#allocation11 + $0x3d8] sm:$0xff] }
 0x484   : > { %v6814_v50 = vpop.f32.mrf.mxu2 }
 0x485   : > { %v6812_v48 = vpop.f32.mrf.mxu3 }
 0x486   : > { %v6816_v52 = vpop.f32.mrf.mxu1 }
 0x48c   : > { %v6820_v32 = vpop.f32.mrf.mxu2 }
 0x48d   : > { %v6818_v39 = vpop.f32.mrf.mxu3 }
 0x48e   : > { %v6822_v2 = vpop.f32.mrf.mxu1 }
 0x494   : > { %v6828_v33 = vpop.f32.mrf.mxu2 }
 0x495   : > { %v6826_v25 = vpop.f32.mrf.mxu3 }
 0x496   : > { %v6832_v42 = vpop.f32.mrf.mxu1 }
 0x49c   : > { %v6838_v15 = vpop.f32.mrf.mxu2 }
 0x49d   : > { %v6836_v28 = vpop.f32.mrf.mxu3 }
 0x49e   : > { %v6841_v8 = vpop.f32.mrf.mxu1 }
 0x4a4   : > { %v3852_v22 = vpop.f32.mrf.mxu2 }
 0x4a5   : > { %v6848_v49 = vpop.f32.mrf.mxu3 }
 0x4a6   : > { %v3811_v53 = vpop.f32.mrf.mxu1 }
 0x4a7   : > { %v3812_v56 = vadd.f32 %v3811_v53, %v3771_v9  ;;  %v3578_v9 = vadd.f32 %v6824_v27, %v6759_v3  ;;  %v3698_v53 = vadd.f32 %v6810_v12, %v3657_v54  ;;  %v4115_v3 = vld [vmem:[#allocation11 + $0x370] sm:$0xff]  ;;  %v4073_v54 = vld [vmem:[#allocation11 + $0x220] sm:$0xff] }
 0x4a8   : > { %4400 = vmatpush.msrb.mxu3 %v4115_v3  ;;  %4328 = vmatpush.msra.mxu1 %v4073_v54 }
 0x4a9   : > { %v3853_v36 = vadd.f32 %v3852_v22, %v3812_v56  ;;  %v4099_v56 = vld [vmem:[#allocation11 + $0x2f0] sm:$0xff]  ;;  %v3619_v12 = vadd.f32 %v6757_v37, %v3578_v9  ;;  %v3739_v7 = vadd.f32 %v6808_v30, %v3698_v53  ;;  %v3581_v37 = vadd.f32 %v6824_v27, %v6768_v18  ;;  %v4132_v18 = vld [vmem:[#allocation11 + $0x3f8] sm:$0xff] }
 0x4aa   : > { %4359 = vmatpush.msrb.mxu2 %v4099_v56  ;;  %4440 = vmatpush.msra.mxu0 %v4132_v18  ;;  %v4111_v9 = vld [vmem:[#allocation11 + $0x350] sm:$0xff]  ;;  %v3587_v18 = vadd.f32 %v6824_v27, %v6783_v17  ;;  %v4126_v17 = vld [vmem:[#allocation11 + $0x3c8] sm:$0xff] }
 0x4ab   : > { %v3622_v10 = vadd.f32 %v6766_v24, %v3581_v37  ;;  %v4130_v24 = vld [vmem:[#allocation11 + $0x3e8] sm:$0xff] }
 0x4ac   : > { %v3855_v45 = vpop.f32.mrf.mxu2  ;;  %v4090_v27 = vld [vmem:[#allocation11 + $0x2a8] sm:$0xff]  ;;  %v3628_v54 = vadd.f32 %v6781_v62, %v3587_v18  ;;  %v4124_v62 = vld [vmem:[#allocation11 + $0x3b8] sm:$0xff] }
 0x4ad   : > { %v3893_v60 = vpop.f32.mrf.mxu3  ;;  %v3663_v53 = vadd.f32 %v6773_v34, %v3622_v10  ;;  %v4094_v34 = vld [vmem:[#allocation11 + $0x2c8] sm:$0xff] }
 0x4ae   : > { %v3894_v63 = vadd.f32 %v3893_v60, %v3853_v36  ;;  %v3814_v1 = vpop.f32.mrf.mxu1  ;;  %v4098_v60 = vld [vmem:[#allocation11 + $0x2e8] sm:$0xff] }
 0x4af   : > { %v3815_v58 = vadd.f32 %v3814_v1, %v3774_v38  ;;  %v3660_v38 = vadd.f32 %v6764_v31, %v3619_v12  ;;  %4360 = vmatpush.msrb.mxu2 %v4098_v60  ;;  %v3704_v56 = vadd.f32 %v6822_v2, %v3663_v53  ;;  %v4093_v2 = vld [vmem:[#allocation11 + $0x2c0] sm:$0xff] }
 0x4b0   : > { %v6862_v41 = vmax.f32 %v3894_v63, 0.0  ;;  %v3780_v63 = vadd.f32 %v6812_v48, %v3739_v7  ;;  %v4113_v48 = vld [vmem:[#allocation11 + $0x360] sm:$0xff]  ;;  %v4110_v7 = vld [vmem:[#allocation11 + $0x348] sm:$0xff] }
 0x4b1   : > { %v3856_v44 = vadd.f32 %v3855_v45, %v3815_v58  ;;  %v4114_v45 = vld [vmem:[#allocation11 + $0x368] sm:$0xff]  ;;  %v3701_v30 = vadd.f32 %v6816_v52, %v3660_v38  ;;  %v4096_v52 = vld [vmem:[#allocation11 + $0x2d8] sm:$0xff]  ;;  %4361 = vmatpush.msrb.mxu2 %v4097_v59  ;;  %v3745_v60 = vadd.f32 %v6820_v32, %v3704_v56 }
 0x4b2   : > { %3925 = vst [vmem:[#allocation3 + $0x11] sm:$0xff] %v6862_v41  ;;  %4213 = vmatmul.f32.gmra.mxu2 %v6862_v41  ;;  %4401 = vmatpush.msrb.mxu3 %v4114_v45 }
 0x4b3   : > { %4362 = vmatpush.msrb.mxu2 %v4096_v52 }
 0x4b4   : > { %v3858_v46 = vpop.f32.mrf.mxu2  ;;  %4402 = vmatpush.msrb.mxu3 %v4113_v48  ;;  %v4069_v48 = vld [vmem:[#allocation11 + $0x200] sm:$0xff] }
 0x4b5   : > { %v3896_v61 = vpop.f32.mrf.mxu3 }
 0x4b6   : > { %v3897_v22 = vadd.f32 %v3896_v61, %v3856_v44  ;;  %v3817_v47 = vpop.f32.mrf.mxu1  ;;  %v3742_v44 = vadd.f32 %v6814_v50, %v3701_v30  ;;  %4403 = vmatpush.msrb.mxu3 %v4112_v20  ;;  %v4072_v50 = vld [vmem:[#allocation11 + $0x218] sm:$0xff]  ;;  %v3786_v30 = vadd.f32 %v6826_v25, %v3745_v60 }
 0x4b7   : > { %v3818_v0 = vadd.f32 %v3817_v47, %v3777_v16  ;;  %v4095_v47 = vld [vmem:[#allocation11 + $0x2d0] sm:$0xff]  ;;  %4329 = vmatpush.msra.mxu1 %v4072_v50 }
 0x4b8   : > { %v6873_v26 = vmax.f32 %v3897_v22, 0.0  ;;  %4363 = vmatpush.msrb.mxu2 %v4095_v47  ;;  %4404 = vmatpush.msrb.mxu3 %v4111_v9  ;;  %v4125_v47 = vld [vmem:[#allocation11 + $0x3c0] sm:$0xff]  ;;  %v4147_v9 = vld [vmem:[#allocation11 + $0x470] sm:$0xff] }
 0x4b9   : > { %v3934_v4 = vld [vmem:[#allocation3 + $0x10] sm:$0xff]  ;;  %v3859_v14 = vadd.f32 %v3858_v46, %v3818_v0  ;;  %v3783_v0 = vadd.f32 %v6818_v39, %v3742_v44 }
 0x4ba   : > { %v6875_v51 = vld [vmem:[#allocation3 + $0x12] sm:$0xff]  ;;  %3926 = vst [vmem:[#allocation3 + $0x21] sm:$0xff] %v6873_v26  ;;  %4172 = vmatmul.f32.gmra.mxu1 %v3934_v4  ;;  %4292 = vmatmul.f32.vlgmr.msrb.gmra.mxu0 %v3934_v4 }
 0x4bb   : > { %4254 = vmatmul.f32.gmra.mxu3 %v6875_v51  ;;  %4216 = vmatmul.f32.gmra.mxu2 %v6873_v26  ;;  %v4131_v46 = vld [vmem:[#allocation11 + $0x3f0] sm:$0xff] }
 0x4bc   : > { %v3861_v36 = vpop.f32.mrf.mxu2  ;;  %4441 = vmatpush.msra.mxu0 %v4131_v46  ;;  %4364 = vmatpush.msrb.mxu2 %v4094_v34  ;;  %v4148_v46 = vld [vmem:[#allocation11 + $0x478] sm:$0xff] }
 0x4bd   : > { %v3899_v40 = vpop.f32.mrf.mxu3  ;;  %4405 = vmatpush.msrb.mxu3 %v4110_v7  ;;  %v4088_v34 = vld [vmem:[#allocation11 + $0x298] sm:$0xff] }
 0x4be   : > { %v3900_v1 = vadd.f32 %v3899_v40, %v3859_v14  ;;  %v3820_v21 = vpop.f32.mrf.mxu1  ;;  %4442 = vmatpush.msra.mxu0 %v4130_v24  ;;  %v4109_v14 = vld [vmem:[#allocation11 + $0x340] sm:$0xff]  ;;  %v4071_v40 = vld [vmem:[#allocation11 + $0x210] sm:$0xff]  ;;  %4365 = vmatpush.msrb.mxu2 %v4093_v2 }
 0x4bf   : > { %v3821_v58 = vadd.f32 %v3820_v21, %v3780_v63  ;;  %v4092_v63 = vld [vmem:[#allocation11 + $0x2b8] sm:$0xff]  ;;  %4330 = vmatpush.msra.mxu1 %v4071_v40  ;;  %v4070_v21 = vld [vmem:[#allocation11 + $0x208] sm:$0xff]  ;;  %4406 = vmatpush.msrb.mxu3 %v4109_v14  ;;  %v4087_v2 = vld [vmem:[#allocation11 + $0x290] sm:$0xff] }
 0x4c0   : > { %v6887_v57 = vmax.f32 %v3900_v1, 0.0  ;;  %4443 = vmatpush.msra.mxu0 %v4129_v6  ;;  %v4108_v1 = vld [vmem:[#allocation11 + $0x338] sm:$0xff]  ;;  %4366 = vmatpush.msrb.mxu2 %v4092_v63  ;;  %v4103_v14 = vld [vmem:[#allocation11 + $0x310] sm:$0xff]  ;;  %v4146_v40 = vld [vmem:[#allocation11 + $0x468] sm:$0xff] }
 0x4c1   : > { %v6889_v43 = vld [vmem:[#allocation3 + $0x20] sm:$0xff]  ;;  %v3862_v61 = vadd.f32 %v3861_v36, %v3821_v58  ;;  %v3625_v36 = vadd.f32 %v6775_v11, %v3584_v13  ;;  %v4127_v11 = vld [vmem:[#allocation11 + $0x3d0] sm:$0xff]  ;;  %4331 = vmatpush.msra.mxu1 %v4070_v21  ;;  %4407 = vmatpush.msrb.mxu3 %v4108_v1  ;;  %v4086_v63 = vld [vmem:[#allocation11 + $0x288] sm:$0xff] }
 0x4c2   : > { %v6891_v31 = vld [vmem:[#allocation3 + $0x22] sm:$0xff]  ;;  %3927 = vst [vmem:[#allocation3 + $0x31] sm:$0xff] %v6887_v57  ;;  %4175 = vmatmul.f32.gmra.mxu1 %v6889_v43  ;;  %4295 = vmatmul.f32.gmra.mxu0 %v6889_v43  ;;  %v4102_v1 = vld [vmem:[#allocation11 + $0x308] sm:$0xff] }
 0x4c3   : > { %4257 = vmatmul.f32.gmra.mxu3 %v6891_v31  ;;  %4219 = vmatmul.f32.gmra.mxu2 %v6887_v57  ;;  %v3666_v37 = vadd.f32 %v6779_v55, %v3625_v36  ;;  %v4091_v55 = vld [vmem:[#allocation11 + $0x2b0] sm:$0xff]  ;;  %v4104_v6 = vld [vmem:[#allocation11 + $0x318] sm:$0xff] }
 0x4c4   : > { %v3864_v22 = vpop.f32.mrf.mxu2  ;;  %4444 = vmatpush.msra.mxu0 %v4128_v5  ;;  %4332 = vmatpush.msra.mxu1 %v4069_v48  ;;  %v4145_v5 = vld [vmem:[#allocation11 + $0x460] sm:$0xff] }
 0x4c5   : > { %v3902_v16 = vpop.f32.mrf.mxu3  ;;  %v3707_v52 = vadd.f32 %v6832_v42, %v3666_v37  ;;  %v4106_v42 = vld [vmem:[#allocation11 + $0x328] sm:$0xff]  ;;  %4367 = vmatpush.msrb.mxu2 %v4091_v55 }
 0x4c6   : > { %v3903_v4 = vadd.f32 %v3902_v16, %v3862_v61  ;;  %v3823_v35 = vpop.f32.mrf.mxu1  ;;  %v4107_v61 = vld [vmem:[#allocation11 + $0x330] sm:$0xff]  ;;  %4445 = vmatpush.msra.mxu0 %v4127_v11  ;;  %4481 = vmatpush.msrb.mxu1 %v4148_v46  ;;  %v4085_v11 = vld [vmem:[#allocation11 + $0x280] sm:$0xff]  ;;  %v4118_v46 = vld [vmem:[#allocation11 + $0x388] sm:$0xff] }
 0x4c7   : > { %v3824_v29 = vadd.f32 %v3823_v35, %v3783_v0  ;;  %v3748_v16 = vadd.f32 %v6828_v33, %v3707_v52  ;;  %4408 = vmatpush.msrb.mxu3 %v4107_v61  ;;  %v4089_v0 = vld [vmem:[#allocation11 + $0x2a0] sm:$0xff]  ;;  %v3669_v35 = vadd.f32 %v6788_v19, %v3628_v54  ;;  %4368 = vmatpush.msrb.mxu2 %v4090_v27  ;;  %v4119_v61 = vld [vmem:[#allocation11 + $0x390] sm:$0xff] }
 0x4c8   : > { %v6905_v3 = vmax.f32 %v3903_v4, 0.0  ;;  %4446 = vmatpush.msra.mxu0 %v4126_v17  ;;  %v4105_v4 = vld [vmem:[#allocation11 + $0x320] sm:$0xff]  ;;  %4482 = vmatpush.msrb.mxu1 %v4147_v9  ;;  %v4143_v17 = vld [vmem:[#allocation11 + $0x450] sm:$0xff]  ;;  %v4142_v9 = vld [vmem:[#allocation11 + $0x448] sm:$0xff] }
 0x4c9   : > { %v6907_v39 = vld [vmem:[#allocation3 + $0x30] sm:$0xff]  ;;  %v3865_v45 = vadd.f32 %v3864_v22, %v3824_v29  ;;  %v3789_v24 = vadd.f32 %v6836_v28, %v3748_v16  ;;  %4409 = vmatpush.msrb.mxu3 %v4106_v42  ;;  %v3710_v33 = vadd.f32 %v6841_v8, %v3669_v35  ;;  %4369 = vmatpush.msrb.mxu2 %v4089_v0  ;;  %v4101_v52 = vld [vmem:[#allocation11 + $0x300] sm:$0xff] }
 0x4ca   : > { %v6909_v12 = vld [vmem:[#allocation3 + $0x32] sm:$0xff]  ;;  %3928 = vst [vmem:[#allocation3 + $0x41] sm:$0xff] %v6905_v3  ;;  %4178 = vmatmul.f32.gmra.mxu1 %v6907_v39  ;;  %4298 = vmatmul.f32.gmra.mxu0 %v6907_v39 }
 0x4cb   : > { %4260 = vmatmul.f32.gmra.mxu3 %v6909_v12  ;;  %4222 = vmatmul.f32.gmra.mxu2 %v6905_v3  ;;  %v4123_v8 = vld [vmem:[#allocation11 + $0x3b0] sm:$0xff]  ;;  %v3751_v36 = vadd.f32 %v6838_v15, %v3710_v33 }
 0x4cc   : > { %v3867_v32 = vpop.f32.mrf.mxu2  ;;  %4447 = vmatpush.msra.mxu0 %v4125_v47  ;;  %4410 = vmatpush.msrb.mxu3 %v4105_v4  ;;  %v4117_v47 = vld [vmem:[#allocation11 + $0x380] sm:$0xff]  ;;  %v4140_v4 = vld [vmem:[#allocation11 + $0x438] sm:$0xff]  ;;  %v4139_v35 = vld [vmem:[#allocation11 + $0x430] sm:$0xff] }
 0x4cd   : > { %v3905_v38 = vpop.f32.mrf.mxu3  ;;  %4370 = vmatpush.msrb.mxu2 %v4088_v34  ;;  %4483 = vmatpush.msrb.mxu1 %v4146_v40  ;;  %v3792_v21 = vadd.f32 %v6848_v49, %v3751_v36  ;;  %v4120_v49 = vld [vmem:[#allocation11 + $0x398] sm:$0xff] }
 0x4ce   : > { %v3906_v58 = vadd.f32 %v3905_v38, %v3865_v45  ;;  %v3826_v59 = vpop.f32.mrf.mxu1  ;;  %4448 = vmatpush.msra.mxu0 %v4124_v62  ;;  %4411 = vmatpush.msrb.mxu3 %v4104_v6  ;;  %v4122_v45 = vld [vmem:[#allocation11 + $0x3a8] sm:$0xff] }
 0x4cf   : > { %v3827_v10 = vadd.f32 %v3826_v59, %v3786_v30  ;;  %4371 = vmatpush.msrb.mxu2 %v4087_v2  ;;  %4484 = vmatpush.msrb.mxu1 %v4145_v5 }
 0x4d0   : > { %v6923_v20 = vmax.f32 %v3906_v58, 0.0  ;;  %4449 = vmatpush.msra.mxu0 %v4123_v8  ;;  %4412 = vmatpush.msrb.mxu3 %v4103_v14  ;;  %v4121_v58 = vld [vmem:[#allocation11 + $0x3a0] sm:$0xff]  ;;  %v4004_v14 = vld [vmem:[#allocation3 + $0x92] sm:$0xff] }
 0x4d1   : > { %v6925_v25 = vld [vmem:[#allocation3 + $0x40] sm:$0xff]  ;;  %v3868_v22 = vadd.f32 %v3867_v32, %v3827_v10  ;;  %4372 = vmatpush.msrb.mxu2 %v4086_v63 }
 0x4d2   : > { %v6927_v44 = vld [vmem:[#allocation3 + $0x42] sm:$0xff]  ;;  %3929 = vst [vmem:[#allocation3 + $0x51] sm:$0xff] %v6923_v20  ;;  %4181 = vmatmul.f32.gmra.mxu1 %v6925_v25  ;;  %4301 = vmatmul.f32.gmra.mxu0 %v6925_v25 }
 0x4d3   : > { %4263 = vmatmul.f32.gmra.mxu3 %v6927_v44  ;;  %4225 = vmatmul.f32.gmra.mxu2 %v6923_v20  ;;  %v4144_v10 = vld [vmem:[#allocation11 + $0x458] sm:$0xff] }
 0x4d4   : > { %v3870_v28 = vpop.f32.mrf.mxu2  ;;  %4450 = vmatpush.msra.mxu0 %v4122_v45  ;;  %4413 = vmatpush.msrb.mxu3 %v4102_v1 }
 0x4d5   : > { %v3908_v53 = vpop.f32.mrf.mxu3  ;;  %4373 = vmatpush.msrb.mxu2 %v4085_v11  ;;  %4485 = vmatpush.msrb.mxu1 %v4144_v10 }
 0x4d6   : > { %v3909_v50 = vadd.f32 %v3908_v53, %v3868_v22  ;;  %v3829_v13 = vpop.f32.mrf.mxu1  ;;  %4451 = vmatpush.msra.mxu0 %v4121_v58  ;;  %4414 = vmatpush.msrb.mxu3 %v4101_v52  ;;  %v4141_v53 = vld [vmem:[#allocation11 + $0x440] sm:$0xff] }
 0x4d7   : > { %v3830_v29 = vadd.f32 %v3829_v13, %v3789_v24  ;;  %4486 = vmatpush.msrb.mxu1 %v4143_v17  ;;  %v4137_v24 = vld [vmem:[#allocation11 + $0x420] sm:$0xff] }
 0x4d8   : > { %v6939_v56 = vmax.f32 %v3909_v50, 0.0  ;;  %4452 = vmatpush.msra.mxu0 %v4120_v49  ;;  %v7038_v52 = vld [vmem:[#allocation12] ss:$0 sm:$0xff] }
 0x4d9   : > { %v6941_v7 = vld [vmem:[#allocation3 + $0x50] sm:$0xff]  ;;  %v3871_v60 = vadd.f32 %v3870_v28, %v3830_v29  ;;  %4487 = vmatpush.msrb.mxu1 %v4142_v9 }
 0x4da   : > { %v6943_v19 = vld [vmem:[#allocation3 + $0x52] sm:$0xff]  ;;  %3930 = vst [vmem:[#allocation3 + $0x61] sm:$0xff] %v6939_v56  ;;  %4184 = vmatmul.f32.gmra.mxu1 %v6941_v7  ;;  %4304 = vmatmul.f32.gmra.mxu0 %v6941_v7 }
 0x4db   : > { %4266 = vmatmul.f32.gmra.mxu3 %v6943_v19  ;;  %4228 = vmatmul.f32.gmra.mxu2 %v6939_v56 }
 0x4dc   : > { %v3873_v18 = vpop.f32.mrf.mxu2  ;;  %4453 = vmatpush.msra.mxu0 %v4119_v61  ;;  %4488 = vmatpush.msrb.mxu1 %v4141_v53 }
 0x4dd   : > { %v3911_v38 = vpop.f32.mrf.mxu3 }
 0x4de   : > { %v3912_v37 = vadd.f32 %v3911_v38, %v3871_v60  ;;  %v3832_v30 = vpop.f32.mrf.mxu1  ;;  %4454 = vmatpush.msra.mxu0 %v4118_v46  ;;  %4489 = vmatpush.msrb.mxu1 %v4140_v4 }
 0x4df   : > { %v3833_v59 = vadd.f32 %v3832_v30, %v3792_v21 }
 0x4e0   : > { %v6952_v15 = vmax.f32 %v3912_v37, 0.0  ;;  %4455 = vmatpush.msra.mxu0 %v4117_v47  ;;  %4490 = vmatpush.msrb.mxu1 %v4139_v35 }
 0x4e1   : > { %v6954_v32 = vld [vmem:[#allocation3 + $0x60] sm:$0xff]  ;;  %v3874_v55 = vadd.f32 %v3873_v18, %v3833_v59 }
 0x4e2   : > { %v6956_v48 = vld [vmem:[#allocation3 + $0x62] sm:$0xff]  ;;  %3931 = vst [vmem:[#allocation3 + $0x71] sm:$0xff] %v6952_v15  ;;  %4187 = vmatmul.f32.gmra.mxu1 %v6954_v32  ;;  %4307 = vmatmul.f32.gmra.mxu0 %v6954_v32 }
 0x4e3   : > { %4269 = vmatmul.f32.gmra.mxu3 %v6956_v48  ;;  %4231 = vmatmul.f32.gmra.mxu2 %v6952_v15 }
 0x4e5   : > { %v3914_v27 = vpop.f32.mrf.mxu3 }
 0x4e6   : > { %v3915_v42 = vadd.f32 %v3914_v27, %v3874_v55 }
 0x4e8   : > { %v3924_v54 = vmax.f32 %v3915_v42, 0.0 }
 0x4e9   : > { %v3940_v16 = vld [vmem:[#allocation3 + $0x70] sm:$0xff] }
 0x4ea   : > { %v6963_v22 = vld [vmem:[#allocation3 + $0x72] sm:$0xff]  ;;  %3932 = vst [vmem:[#allocation3 + $0x81] sm:$0xff] %v3924_v54  ;;  %4190 = vmatmul.f32.gmra.mxu1 %v3940_v16  ;;  %4310 = vmatmul.f32.gmra.mxu0 %v3940_v16 }
 0x4eb   : > { %4272 = vmatmul.f32.gmra.mxu3 %v6963_v22  ;;  %4374 = vmatmul.f32.vlgmr.msrb.gmra.mxu2 %v6875_v51  ;;  %v4138_v51 = vld [vmem:[#allocation11 + $0x428] sm:$0xff] }
 0x4ec   : > { %4491 = vmatpush.msrb.mxu1 %v4138_v51 }
 0x4ee   : > { %4492 = vmatpush.msrb.mxu1 %v4137_v24 }
 0x4f1   : > { %v3964_v0 = vld [vmem:[#allocation3 + $0x80] sm:$0xff] }
 0x4f2   : > { %4333 = vmatmul.f32.vlgmr.msra.gmra.mxu1 %v6862_v41  ;;  %4313 = vmatmul.f32.gmra.mxu0 %v3964_v0  ;;  %v4136_v41 = vld [vmem:[#allocation11 + $0x418] sm:$0xff] }
 0x4f3   : > { %4415 = vmatmul.f32.vlgmr.msrb.gmra.mxu3 %v6889_v43  ;;  %4377 = vmatmul.f32.gmra.mxu2 %v6891_v31  ;;  %v4135_v43 = vld [vmem:[#allocation11 + $0x410] sm:$0xff] }
 0x4f4   : > { %4493 = vmatpush.msrb.mxu1 %v4136_v41  ;;  %v4211_v62 = vpop.f32.mrf.mxu2 }
 0x4f6   : > { %4494 = vmatpush.msrb.mxu1 %v4135_v43 }
 0x4f7   : > { %v4252_v33 = vpop.f32.mrf.mxu3 }
 0x4fa   : > { %4336 = vmatmul.f32.gmra.mxu1 %v6873_v26  ;;  %4456 = vmatmul.f32.vlgmr.msra.gmra.mxu0 %v6873_v26  ;;  %v4134_v26 = vld [vmem:[#allocation11 + $0x408] sm:$0xff] }
 0x4fb   : > { %4418 = vmatmul.f32.gmra.mxu3 %v6907_v39  ;;  %4380 = vmatmul.f32.gmra.mxu2 %v6909_v12  ;;  %v4133_v39 = vld [vmem:[#allocation11 + $0x400] sm:$0xff] }
 0x4fc   : > { %4495 = vmatpush.msrb.mxu1 %v4134_v26 }
 0x4fe   : > { %4496 = vmatpush.msrb.mxu1 %v4133_v39 }
 0x502   : > { %4339 = vmatmul.f32.gmra.mxu1 %v6887_v57  ;;  %4459 = vmatmul.f32.gmra.mxu0 %v6887_v57  ;;  %v3980_v57 = vld [vmem:[#allocation3 + $0x82] sm:$0xff] }
 0x503   : > { %4421 = vmatmul.f32.gmra.mxu3 %v6925_v25  ;;  %4383 = vmatmul.f32.gmra.mxu2 %v6927_v44 }
 0x50a   : > { %4342 = vmatmul.f32.gmra.mxu1 %v6905_v3  ;;  %4462 = vmatmul.f32.gmra.mxu0 %v6905_v3  ;;  %v4170_v3 = vpop.f32.mrf.mxu1 }
 0x50b   : > { %4424 = vmatmul.f32.gmra.mxu3 %v6941_v7  ;;  %4386 = vmatmul.f32.gmra.mxu2 %v6943_v19  ;;  %v4171_v10 = vadd.f32 %v7038_v52, %v4170_v3 }
 0x50d   : > { %v4212_v17 = vadd.f32 %v4211_v62, %v4171_v10 }
 0x50f   : > { %v4253_v46 = vadd.f32 %v4252_v33, %v4212_v17 }
 0x512   : > { %4345 = vmatmul.f32.gmra.mxu1 %v6923_v20  ;;  %4465 = vmatmul.f32.gmra.mxu0 %v6923_v20  ;;  %v3996_v20 = vld [vmem:[#allocation3 + $0x91] sm:$0xff] }
 0x513   : > { %4427 = vmatmul.f32.gmra.mxu3 %v6954_v32  ;;  %4389 = vmatmul.f32.gmra.mxu2 %v6956_v48 }
 0x51a   : > { %4348 = vmatmul.f32.gmra.mxu1 %v6939_v56  ;;  %4468 = vmatmul.f32.gmra.mxu0 %v6939_v56 }
 0x51b   : > { %4430 = vmatmul.f32.gmra.mxu3 %v3940_v16  ;;  %4392 = vmatmul.f32.gmra.mxu2 %v6963_v22 }
 0x522   : > { %4351 = vmatmul.f32.gmra.mxu1 %v6952_v15  ;;  %4471 = vmatmul.f32.gmra.mxu0 %v6952_v15 }
 0x523   : > { %4433 = vmatmul.f32.gmra.mxu3 %v3964_v0  ;;  %4395 = vmatmul.f32.gmra.mxu2 %v3980_v57 }
 0x52a   : > { %4354 = vmatmul.f32.gmra.mxu1 %v3924_v54  ;;  %4474 = vmatmul.f32.gmra.mxu0 %v3924_v54 }
 0x52b   : > { %4436 = vmatmul.f32.gmra.mxu3 %v6785_v23 }
 0x532   : > { %4497 = vmatmul.f32.vlgmr.msrb.gmra.mxu1 %v6891_v31  ;;  %4477 = vmatmul.f32.gmra.mxu0 %v3996_v20 }
 0x535   : > { %v4214_v29 = vpop.f32.mrf.mxu2 }
 0x537   : > { %v4173_v25 = vpop.f32.mrf.mxu1  ;;  %v4293_v56 = vpop.f32.mrf.mxu0 }
 0x538   : > { %v4174_v54 = vadd.f32 %v7038_v52, %v4173_v25  ;;  %v4294_v16 = vadd.f32 %v4293_v56, %v4253_v46 }
 0x53a   : > { %4500 = vmatmul.f32.gmra.mxu1 %v6909_v12  ;;  %v4215_v9 = vadd.f32 %v4214_v29, %v4174_v54 }
 0x53e   : > { %v4255_v31 = vpop.f32.mrf.mxu3  ;;  %v4217_v12 = vpop.f32.mrf.mxu2 }
 0x53f   : > { %v4176_v50 = vpop.f32.mrf.mxu1  ;;  %v4296_v34 = vpop.f32.mrf.mxu0  ;;  %v4256_v0 = vadd.f32 %v4255_v31, %v4215_v9 }
 0x540   : > { %v4177_v51 = vadd.f32 %v7038_v52, %v4176_v50 }
 0x541   : > { %v4297_v41 = vadd.f32 %v4296_v34, %v4256_v0 }
 0x542   : > { %4503 = vmatmul.f32.gmra.mxu1 %v6927_v44  ;;  %v4218_v26 = vadd.f32 %v4217_v12, %v4177_v51 }
 0x546   : > { %v4258_v44 = vpop.f32.mrf.mxu3 }
 0x547   : > { %v6995_v13 = vpop.f32.mrf.mxu1  ;;  %v4299_v6 = vpop.f32.mrf.mxu0  ;;  %v4259_v20 = vadd.f32 %v4258_v44, %v4218_v26 }
 0x548   : > { %v4180_v33 = vadd.f32 %v7038_v52, %v6995_v13 }
 0x549   : > { %v4300_v50 = vadd.f32 %v4299_v6, %v4259_v20 }
 0x54a   : > { %4506 = vmatmul.f32.gmra.mxu1 %v6943_v19  ;;  %v4220_v19 = vpop.f32.mrf.mxu2 }
 0x54e   : > { %v7006_v8 = vpop.f32.mrf.mxu3 }
 0x54f   : > { %v6998_v23 = vpop.f32.mrf.mxu1  ;;  %v7010_v40 = vpop.f32.mrf.mxu0 }
 0x552   : > { %4509 = vmatmul.f32.gmra.mxu1 %v6956_v48  ;;  %v7012_v60 = vpop.f32.mrf.mxu2 }
 0x556   : > { %v7014_v45 = vpop.f32.mrf.mxu3 }
 0x557   : > { %v7001_v7 = vpop.f32.mrf.mxu1  ;;  %v7016_v5 = vpop.f32.mrf.mxu0 }
 0x558   : > { %v4186_v9 = vadd.f32 %v7038_v52, %v7001_v7 }
 0x55a   : > { %4512 = vmatmul.f32.gmra.mxu1 %v6963_v22  ;;  %v7018_v63 = vpop.f32.mrf.mxu2 }
 0x55e   : > { %v7020_v1 = vpop.f32.mrf.mxu3 }
 0x55f   : > { %v7004_v28 = vpop.f32.mrf.mxu1  ;;  %v7022_v21 = vpop.f32.mrf.mxu0 }
 0x560   : > { %v4189_v7 = vadd.f32 %v7038_v52, %v7004_v28 }
 0x562   : > { %4515 = vmatmul.f32.gmra.mxu1 %v3980_v57  ;;  %v7024_v30 = vpop.f32.mrf.mxu2 }
 0x566   : > { %v7026_v58 = vpop.f32.mrf.mxu3 }
 0x567   : > { %v7008_v2 = vpop.f32.mrf.mxu1  ;;  %v7028_v59 = vpop.f32.mrf.mxu0 }
 0x568   : > { %v4192_v28 = vadd.f32 %v7038_v52, %v7008_v2 }
 0x56a   : > { %4518 = vmatmul.f32.gmra.mxu1 %v4004_v14  ;;  %v7030_v11 = vpop.f32.mrf.mxu2  ;;  %v4221_v14 = vadd.f32 %v4220_v19, %v4180_v33 }
 0x56e   : > { %v7032_v32 = vpop.f32.mrf.mxu3 }
 0x56f   : > { %v4334_v36 = vpop.f32.mrf.mxu1  ;;  %v7036_v18 = vpop.f32.mrf.mxu0 }
 0x570   : > { %v4335_v53 = vadd.f32 %v4334_v36, %v4294_v16  ;;  %v4262_v36 = vadd.f32 %v7006_v8, %v4221_v14 }
 0x572   : > { %v4375_v55 = vpop.f32.mrf.mxu2  ;;  %v4303_v46 = vadd.f32 %v7010_v40, %v4262_v36 }
 0x573   : > { %v4376_v24 = vadd.f32 %v4375_v55, %v4335_v53 }
 0x576   : > { %v4416_v61 = vpop.f32.mrf.mxu3 }
 0x577   : > { %v4337_v38 = vpop.f32.mrf.mxu1  ;;  %v4457_v27 = vpop.f32.mrf.mxu0  ;;  %v4417_v43 = vadd.f32 %v4416_v61, %v4376_v24  ;;  %v4183_v61 = vadd.f32 %v7038_v52, %v6998_v23 }
 0x578   : > { %v4338_v39 = vadd.f32 %v4337_v38, %v4297_v41 }
 0x579   : > { %v4458_v25 = vadd.f32 %v4457_v27, %v4417_v43  ;;  %v4224_v19 = vadd.f32 %v7012_v60, %v4183_v61  ;;  %v4227_v60 = vadd.f32 %v7018_v63, %v4186_v9 }
 0x57a   : > { %v4378_v22 = vpop.f32.mrf.mxu2 }
 0x57b   : > { %v4379_v56 = vadd.f32 %v4378_v22, %v4338_v39  ;;  %v4265_v8 = vadd.f32 %v7014_v45, %v4224_v19  ;;  %v4268_v41 = vadd.f32 %v7020_v1, %v4227_v60 }
 0x57d   : > { %v4306_v40 = vadd.f32 %v7016_v5, %v4265_v8  ;;  %v4309_v5 = vadd.f32 %v7022_v21, %v4268_v41 }
 0x57e   : > { %v4419_v47 = vpop.f32.mrf.mxu3 }
 0x57f   : > { %v4340_v37 = vpop.f32.mrf.mxu1  ;;  %v4460_v4 = vpop.f32.mrf.mxu0  ;;  %v4420_v34 = vadd.f32 %v4419_v47, %v4379_v56 }
 0x580   : > { %v4341_v44 = vadd.f32 %v4340_v37, %v4300_v50 }
 0x581   : > { %v4461_v38 = vadd.f32 %v4460_v4, %v4420_v34 }
 0x582   : > { %v4381_v57 = vpop.f32.mrf.mxu2 }
 0x583   : > { %v4382_v17 = vadd.f32 %v4381_v57, %v4341_v44 }
 0x586   : > { %v4422_v3 = vpop.f32.mrf.mxu3 }
 0x587   : > { %v4343_v15 = vpop.f32.mrf.mxu1  ;;  %v4463_v31 = vpop.f32.mrf.mxu0  ;;  %v4423_v6 = vadd.f32 %v4422_v3, %v4382_v17 }
 0x588   : > { %v4344_v37 = vadd.f32 %v4343_v15, %v4303_v46 }
 0x589   : > { %v4464_v22 = vadd.f32 %v4463_v31, %v4423_v6 }
 0x58a   : > { %v4384_v13 = vpop.f32.mrf.mxu2 }
 0x58b   : > { %v4385_v23 = vadd.f32 %v4384_v13, %v4344_v37 }
 0x58e   : > { %v4425_v10 = vpop.f32.mrf.mxu3 }
 0x58f   : > { %v7034_v48 = vpop.f32.mrf.mxu1  ;;  %v4466_v16 = vpop.f32.mrf.mxu0  ;;  %v4426_v51 = vadd.f32 %v4425_v10, %v4385_v23 }
 0x590   : > { %v4347_v15 = vadd.f32 %v7034_v48, %v4306_v40  ;;  %v4230_v48 = vadd.f32 %v7024_v30, %v4189_v7  ;;  %v4233_v30 = vadd.f32 %v7030_v11, %v4192_v28 }
 0x591   : > { %v4467_v43 = vadd.f32 %v4466_v16, %v4426_v51 }
 0x592   : > { %v4387_v53 = vpop.f32.mrf.mxu2  ;;  %v4271_v1 = vadd.f32 %v7026_v58, %v4230_v48  ;;  %v4274_v44 = vadd.f32 %v7032_v32, %v4233_v30 }
 0x593   : > { %v4388_v39 = vadd.f32 %v4387_v53, %v4347_v15 }
 0x594   : > { %v4312_v50 = vadd.f32 %v7028_v59, %v4271_v1  ;;  %v4315_v59 = vadd.f32 %v7036_v18, %v4274_v44 }
 0x596   : > { %v4428_v4 = vpop.f32.mrf.mxu3 }
 0x597   : > { %v7040_v49 = vpop.f32.mrf.mxu1  ;;  %v4469_v45 = vpop.f32.mrf.mxu0  ;;  %v4429_v3 = vadd.f32 %v4428_v4, %v4388_v39 }
 0x599   : > { %v4470_v33 = vadd.f32 %v4469_v45, %v4429_v3 }
 0x59a   : > { %v4390_v20 = vpop.f32.mrf.mxu2 }
 0x59e   : > { %v4431_v63 = vpop.f32.mrf.mxu3 }
 0x59f   : > { %v7043_v42 = vpop.f32.mrf.mxu1  ;;  %v4472_v56 = vpop.f32.mrf.mxu0 }
 0x5a2   : > { %v4393_v14 = vpop.f32.mrf.mxu2 }
 0x5a6   : > { %v4434_v58 = vpop.f32.mrf.mxu3 }
 0x5a7   : > { %v7046_v35 = vpop.f32.mrf.mxu1  ;;  %v4475_v52 = vpop.f32.mrf.mxu0 }
 0x5a8   : > { %v4356_v61 = vadd.f32 %v7046_v35, %v4315_v59 }
 0x5ae   : > { %v4437_v17 = vpop.f32.mrf.mxu3 }
 0x5af   : > { %v4498_v62 = vpop.f32.mrf.mxu1  ;;  %v4478_v16 = vpop.f32.mrf.mxu0 }
 0x5b0   : > { %v4499_v29 = vadd.f32 %v4498_v62, %v4458_v25  ;;  %v4350_v62 = vadd.f32 %v7040_v49, %v4309_v5  ;;  %v4353_v49 = vadd.f32 %v7043_v42, %v4312_v50  ;;  %v4396_v42 = vpop.f32.mrf.mxu2 }
 0x5b1   : > { %v4397_v46 = vadd.f32 %v4396_v42, %v4356_v61 }
 0x5b2   : > { %v4522_v12 = vmax.f32 %v4499_v29, 0.0  ;;  %v4391_v31 = vadd.f32 %v4390_v20, %v4350_v62  ;;  %v4394_v13 = vadd.f32 %v4393_v14, %v4353_v49 }
 0x5b3   : > { %v4438_v6 = vadd.f32 %v4437_v17, %v4397_v46 }
 0x5b4   : > { %4530 = vst [vmem:[%s7055_s23] sm:$0xff] %v4522_v12  ;;  %v4432_v34 = vadd.f32 %v4431_v63, %v4391_v31  ;;  %v4435_v10 = vadd.f32 %v4434_v58, %v4394_v13 }
 0x5b5   : > { %v4479_v19 = vadd.f32 %v4478_v16, %v4438_v6 }
 0x5b6   : > { %v4473_v36 = vadd.f32 %v4472_v56, %v4432_v34  ;;  %v4476_v11 = vadd.f32 %v4475_v52, %v4435_v10 }
 0x5b7   : > { %v4501_v55 = vpop.f32.mrf.mxu1 }
 0x5b8   : > { %v4502_v27 = vadd.f32 %v4501_v55, %v4461_v38 }
 0x5ba   : > { %v4523_v54 = vmax.f32 %v4502_v27, 0.0 }
 0x5bc   : > { %4531 = vst [vmem:[%s7055_s23 + $0x8] sm:$0xff] %v4523_v54 }
 0x5bf   : > { %v4504_v47 = vpop.f32.mrf.mxu1 }
 0x5c0   : > { %v4505_v0 = vadd.f32 %v4504_v47, %v4464_v22 }
 0x5c2   : > { %v4524_v24 = vmax.f32 %v4505_v0, 0.0 }
 0x5c4   : > { %4532 = vst [vmem:[%s7055_s23 + $0x10] sm:$0xff] %v4524_v24 }
 0x5c7   : > { %v4507_v26 = vpop.f32.mrf.mxu1 }
 0x5c8   : > { %v4508_v57 = vadd.f32 %v4507_v26, %v4467_v43 }
 0x5ca   : > { %v4525_v25 = vmax.f32 %v4508_v57, 0.0 }
 0x5cc   : > { %4533 = vst [vmem:[%s7055_s23 + $0x18] sm:$0xff] %v4525_v25 }
 0x5cf   : > { %v4510_v29 = vpop.f32.mrf.mxu1 }
 0x5d0   : > { %v4511_v21 = vadd.f32 %v4510_v29, %v4470_v33 }
 0x5d2   : > { %v4526_v12 = vmax.f32 %v4511_v21, 0.0 }
 0x5d4   : > { %4534 = vst [vmem:[%s7055_s23 + $0x20] sm:$0xff] %v4526_v12 }
 0x5d7   : > { %v4513_v38 = vpop.f32.mrf.mxu1 }
 0x5d8   : > { %v4514_v2 = vadd.f32 %v4513_v38, %v4473_v36 }
 0x5da   : > { %v4527_v55 = vmax.f32 %v4514_v2, 0.0 }
 0x5dc   : > { %4535 = vst [vmem:[%s7055_s23 + $0x28] sm:$0xff] %v4527_v55 }
 0x5df   : > { %v4516_v27 = vpop.f32.mrf.mxu1 }
 0x5e0   : > { %v4517_v32 = vadd.f32 %v4516_v27, %v4476_v11 }
 0x5e2   : > { %v4528_v54 = vmax.f32 %v4517_v32, 0.0 }
 0x5e4   : > { %4536 = vst [vmem:[%s7055_s23 + $0x30] sm:$0xff] %v4528_v54 }
 0x5e7   : > { %v4519_v37 = vpop.f32.mrf.mxu1 }
 0x5e8   : > { %v4520_v8 = vadd.f32 %v4519_v37, %v4479_v19 }
 0x5ea   : > { %v4529_v18 = vmax.f32 %v4520_v8, 0.0 }
 0x5ec   : > { %4537 = vst [vmem:[%s7055_s23 + $0x38] sm:$0xff] %v4529_v18 }
 0x5ed PF: > { %s21_s24 = sadd.s32 1, %s4990_s24  }
 0x5ee   : > { %p18_p7 = scmp.ge.s32.totalorder %s21_s24, 4  }
 0x5f0   :  { %20 = sbr.rel (!%p18_p7) target bundleno = 4 (0x4), region = 107 }
 0x5f5   :  { %4559 = vsyncpa [#allocation5], 1 }
 0x5f6   :  { %4561 = vsyncpa [#allocation5 + $0x1], 1 }
 0x5f7   :  { %4562 = vsyncpa [#allocation7], 1 }
 0x5f8   :  { %4563 = vsyncpa [#allocation10], 1 }
 0x5f9   :  { %4564 = vsyncpa [#allocation13], 1 }

</bundles_post_ra>
